<compile_context>
chip_gen: v5e
topology: v5e:2x2
jax: 0.10.0
libtpu: 0.0.40
codegen_flags: <defaults>
</compile_context>

<pallas_src>
import math
from functools import partial

import jax
import jax.numpy as jnp
from jax.experimental import pallas as pl

# ----------------------------- config ---------------------------------------
N_TOKENS = 128
D_MODEL = 32          # d_rep == d_model in Seq2SeqLSTM
N_ENC_LAYERS = 2
PAD_ID = 0
B = 8                 # batch (sublane friendly)
L_SRC = 8             # src sequence length
T_TGT = 8             # tgt sequence length


# ----------------------------- in-kernel helpers -----------------------------
def _lstm_scan(gates_x, whh, h0, c0, lens, T, Bq, H, reverse):
    """Unrolled masked LSTM recurrence on precomputed input projections.

    gates_x : [T*Bq, 4H]  x_t @ W_ih + (b_ih + b_hh), time-major rows (t*Bq + b)
    whh     : [H, 4H]     recurrent weights (pre-transposed, PyTorch gate order i,f,g,o)
    h0, c0  : [Bq, H]     initial state
    lens    : [Bq, 1] i32 packed-sequence lengths (steps >= len are masked no-ops)
    returns (outs: list of T arrays [Bq, H] indexed by real time t, h_final [Bq, H])
    """
    h, c = h0, c0
    outs = [None] * T
    steps = range(T - 1, -1, -1) if reverse else range(T)
    for t in steps:
        gx = gates_x[t * Bq:(t + 1) * Bq, :]                       # static slice
        gates = gx + jnp.dot(h, whh, preferred_element_type=jnp.float32)   # [Bq, 4H]
        # Two full-vreg EUP passes instead of four quarter-vreg ones.
        sig = jax.nn.sigmoid(gates)
        tnh = jnp.tanh(gates)
        i_g = sig[:, 0 * H:1 * H]
        f_g = sig[:, 1 * H:2 * H]
        g_g = tnh[:, 2 * H:3 * H]
        o_g = sig[:, 3 * H:4 * H]
        c_new = f_g * c + i_g * g_g
        h_new = o_g * jnp.tanh(c_new)
        # packed-sequence semantics: padded steps do not advance the state.
        m = (lens > t).astype(jnp.float32)                         # [Bq, 1]
        h = m * h_new + (1.0 - m) * h
        c = m * c_new + (1.0 - m) * c
        outs[t] = m * h_new                                        # zero on padded steps
    return outs, h


def _seq2seq_kernel(src_ids_ref, tgt_ids_ref, src_len_ref, tgt_len_ref,
                    emb_ref, emb_t_ref,
                    wih0_ref, whh0f_ref, whh0b_ref, b0_ref,
                    wih1_ref, whh1f_ref, whh1b_ref, b1_ref,
                    pw1_ref, pb1_ref, pw2_ref, pb2_ref,
                    dwih_ref, dwhh_ref, db_ref, dc0_ref,
                    out_ref, *, n_tokens, d_model, L, T, Bq):
    V, D, H = n_tokens, d_model, d_model
    scale = math.sqrt(d_model)
    E = emb_ref[...]                                               # [V, D]

    def embed(ids_tm, steps):
        """Embedding(ids) * sqrt(D) via one-hot matmul. ids_tm: [steps, Bq] int32."""
        iota_v = jax.lax.broadcasted_iota(jnp.int32, (steps, Bq, V), 2)
        oh = (iota_v == ids_tm[:, :, None]).astype(jnp.float32).reshape(steps * Bq, V)
        return jnp.dot(oh, E, preferred_element_type=jnp.float32) * scale   # [steps*Bq, D]

    src_len = src_len_ref[...]                                     # [Bq, 1] int32
    tgt_len = tgt_len_ref[...]                                     # [Bq, 1] int32
    zeros_bh = jnp.zeros((Bq, H), jnp.float32)

    # ----------------- encoder (CodeEncoderLSTM, project='hidden') -----------
    x0 = embed(src_ids_ref[...], L)                                # [L*Bq, D]

    # layer 0: hoisted input projection for fwd||bwd in one MXU pass
    gx0 = jnp.dot(x0, wih0_ref[...], preferred_element_type=jnp.float32) + b0_ref[...]   # [L*Bq, 8H]
    out0f, hf0f = _lstm_scan(gx0[:, :4 * H], whh0f_ref[...], zeros_bh, zeros_bh,
                             src_len, L, Bq, H, reverse=False)
    out0b, hf0b = _lstm_scan(gx0[:, 4 * H:], whh0b_ref[...], zeros_bh, zeros_bh,
                             src_len, L, Bq, H, reverse=True)

    # layer 1 input = concat(fwd, bwd) per timestep (time-major flat [L*Bq, 2D])
    x1 = jnp.concatenate([jnp.concatenate([out0f[t], out0b[t]], axis=1)
                          for t in range(L)], axis=0)
    gx1 = jnp.dot(x1, wih1_ref[...], preferred_element_type=jnp.float32) + b1_ref[...]   # [L*Bq, 8H]
    _, hf1f = _lstm_scan(gx1[:, :4 * H], whh1f_ref[...], zeros_bh, zeros_bh,
                         src_len, L, Bq, H, reverse=False)
    _, hf1b = _lstm_scan(gx1[:, 4 * H:], whh1b_ref[...], zeros_bh, zeros_bh,
                         src_len, L, Bq, H, reverse=True)
    # TODO(synk): inter-layer dropout skipped (eval-mode semantics).

    # PyTorch h_n layout [l0_fwd, l0_bwd, l1_fwd, l1_bwd] -> Linear -> ReLU -> Linear
    h_cat = jnp.concatenate([hf0f, hf0b, hf1f, hf1b], axis=1)      # [Bq, 4D]
    hid = jnp.dot(h_cat, pw1_ref[...], preferred_element_type=jnp.float32) + pb1_ref[...]
    hid = jnp.maximum(hid, 0.0)
    oh_0 = jnp.dot(hid, pw2_ref[...], preferred_element_type=jnp.float32) + pb2_ref[...]  # [Bq, D]

    # ----------------- decoder ------------------------------------------------
    xt = embed(tgt_ids_ref[...], T)                                # [T*Bq, D]
    gxd = jnp.dot(xt, dwih_ref[...], preferred_element_type=jnp.float32) + db_ref[...]    # [T*Bq, 4H]
    c0 = jnp.broadcast_to(dc0_ref[...], (Bq, H))                   # decoder_c_0.expand
    outs_d, _ = _lstm_scan(gxd, dwhh_ref[...], oh_0, c0, tgt_len - 1, T, Bq, H,
                           reverse=False)

    # ----------------- logits = output @ embedding.weight.T -------------------
    out_bt = jnp.stack(outs_d, axis=1).reshape(Bq * T, H)          # rows b*T + t
    logits = jnp.dot(out_bt, emb_t_ref[...], preferred_element_type=jnp.float32)   # [Bq*T, V]
    out_ref[...] = logits.reshape(Bq, T, V)                        # lane-dense (V=128) write


# ----------------------------- wrapper ----------------------------------------
def seq2seq_lstm_forward(params, src_tok_ids, tgt_tok_ids, src_lengths, tgt_lengths):
    E = params["embedding"]                                        # [V, D]
    V, D = E.shape
    Bq, L = src_tok_ids.shape
    _, T = tgt_tok_ids.shape

    # tiny XLA glue: time-major ids, column-vector lengths, fwd||bwd weight concat
    src_tm = jnp.transpose(src_tok_ids).astype(jnp.int32)          # [L, B]
    tgt_tm = jnp.transpose(tgt_tok_ids).astype(jnp.int32)          # [T, B]
    src_len = src_lengths.astype(jnp.int32).reshape(Bq, 1)
    tgt_len = tgt_lengths.astype(jnp.int32).reshape(Bq, 1)
    E_t = jnp.transpose(E)                                         # [D, V]

    (wih0f, whh0f, b0f), (wih0b, whh0b, b0b) = params["enc"][0]
    (wih1f, whh1f, b1f), (wih1b, whh1b, b1b) = params["enc"][1]
    wih0 = jnp.concatenate([wih0f, wih0b], axis=1)                 # [D, 8H]
    b0 = jnp.concatenate([b0f, b0b], axis=1)                       # [1, 8H]
    wih1 = jnp.concatenate([wih1f, wih1b], axis=1)                 # [2D, 8H]
    b1 = jnp.concatenate([b1f, b1b], axis=1)
    dc0 = params["dec_c0"].reshape(1, D)

    kernel = partial(_seq2seq_kernel, n_tokens=V, d_model=D, L=L, T=T, Bq=Bq)

    # Single fused kernel: no grid, every operand is a whole-array VMEM block (~100 KB total).
    return pl.pallas_call(
        kernel,
        out_shape=jax.ShapeDtypeStruct((Bq, T, V), jnp.float32),
    )(src_tm, tgt_tm, src_len, tgt_len, E, E_t,
      wih0, whh0f, whh0b, b0,
      wih1, whh1f, whh1b, b1,
      params["proj_w1"], params["proj_b1"], params["proj_w2"], params["proj_b2"],
      params["dec_wih"], params["dec_whh"], params["dec_b"], dc0)


# ----------------------------- parameter init --------------------------------
def init_params(key):
    D = D_MODEL
    H = D_MODEL
    keys = iter(jax.random.split(key, 32))

    def nrm(shape, s=0.08):
        return jax.random.normal(next(keys), shape, jnp.float32) * s

    params = {}
    emb = nrm((N_TOKENS, D), 1.0)
    emb = emb.at[PAD_ID].set(0.0)                 # nn.Embedding(padding_idx=pad_id)
    params["embedding"] = emb

    enc = []
    for l in range(N_ENC_LAYERS):
        din = D if l == 0 else 2 * D
        layer = []
        for _ in range(2):                        # fwd, bwd
            layer.append((nrm((din, 4 * H)),      # W_ih^T
                          nrm((H, 4 * H)),        # W_hh^T
                          nrm((1, 4 * H))))       # b_ih + b_hh
        enc.append(layer)
    params["enc"] = enc

    params["proj_w1"] = nrm((2 * N_ENC_LAYERS * D, D))
    params["proj_b1"] = nrm((1, D))
    params["proj_w2"] = nrm((D, D))
    params["proj_b2"] = nrm((1, D))

    params["dec_wih"] = nrm((D, 4 * H))
    params["dec_whh"] = nrm((H, 4 * H))
    params["dec_b"] = nrm((1, 4 * H))
    params["dec_c0"] = jnp.zeros((1, 1, D), jnp.float32)   # decoder_c_0 (zeros Param)
    return params


# ----------------------------- main -------------------------------------------
if __name__ == "__main__":
    key = jax.random.PRNGKey(0)
    k_par, k_src, k_tgt = jax.random.split(key, 3)

    params = init_params(k_par)

    src_lengths = jnp.array([8, 6, 7, 5, 8, 4, 3, 8], dtype=jnp.int32)
    tgt_lengths = jnp.array([8, 7, 6, 5, 4, 3, 2, 8], dtype=jnp.int32)

    src_tok_ids = jax.random.randint(k_src, (B, L_SRC), 1, N_TOKENS, dtype=jnp.int32)
    tgt_tok_ids = jax.random.randint(k_tgt, (B, T_TGT), 1, N_TOKENS, dtype=jnp.int32)
    # set padded positions to pad_id
    src_pad = jnp.arange(L_SRC)[None, :] >= src_lengths[:, None]
    tgt_pad = jnp.arange(T_TGT)[None, :] >= tgt_lengths[:, None]
    src_tok_ids = jnp.where(src_pad, PAD_ID, src_tok_ids)
    tgt_tok_ids = jnp.where(tgt_pad, PAD_ID, tgt_tok_ids)

    fwd = jax.jit(seq2seq_lstm_forward)
    logits = fwd(params, src_tok_ids, tgt_tok_ids, src_lengths, tgt_lengths)
    logits = jax.block_until_ready(logits)

    assert logits.shape == (B, T_TGT, N_TOKENS), logits.shape
    assert bool(jnp.all(jnp.isfinite(logits)))
    print("KERNEL_OK")
</pallas_src>

<mosaic_0001>
module attributes {stable_mosaic.version = 11 : i64} {
  func.func @_seq2seq_kernel(%arg0: memref<8x8xi32, #tpu.memory_space<vmem>>, %arg1: memref<8x8xi32, #tpu.memory_space<vmem>>, %arg2: memref<8x1xi32, #tpu.memory_space<vmem>>, %arg3: memref<8x1xi32, #tpu.memory_space<vmem>>, %arg4: memref<128x32xf32, #tpu.memory_space<vmem>>, %arg5: memref<32x128xf32, #tpu.memory_space<vmem>>, %arg6: memref<32x256xf32, #tpu.memory_space<vmem>>, %arg7: memref<32x128xf32, #tpu.memory_space<vmem>>, %arg8: memref<32x128xf32, #tpu.memory_space<vmem>>, %arg9: memref<1x256xf32, #tpu.memory_space<vmem>>, %arg10: memref<64x256xf32, #tpu.memory_space<vmem>>, %arg11: memref<32x128xf32, #tpu.memory_space<vmem>>, %arg12: memref<32x128xf32, #tpu.memory_space<vmem>>, %arg13: memref<1x256xf32, #tpu.memory_space<vmem>>, %arg14: memref<128x32xf32, #tpu.memory_space<vmem>>, %arg15: memref<1x32xf32, #tpu.memory_space<vmem>>, %arg16: memref<32x32xf32, #tpu.memory_space<vmem>>, %arg17: memref<1x32xf32, #tpu.memory_space<vmem>>, %arg18: memref<32x128xf32, #tpu.memory_space<vmem>>, %arg19: memref<32x128xf32, #tpu.memory_space<vmem>>, %arg20: memref<1x128xf32, #tpu.memory_space<vmem>>, %arg21: memref<1x32xf32, #tpu.memory_space<vmem>>, %arg22: memref<8x8x128xf32, #tpu.memory_space<vmem>>) attributes {dimension_semantics = [], scalar_prefetch = 0 : i64, scratch_operands = 0 : i64, tpu.core_type = #tpu.core_type<tc>} {
    %c0 = arith.constant 0 : index
    %c0_0 = arith.constant 0 : index
    %0 = vector.load %arg4[%c0, %c0_0] : memref<128x32xf32, #tpu.memory_space<vmem>>, vector<128x32xf32>
    %c0_1 = arith.constant 0 : index
    %c0_2 = arith.constant 0 : index
    %1 = vector.load %arg2[%c0_1, %c0_2] : memref<8x1xi32, #tpu.memory_space<vmem>>, vector<8x1xi32>
    %c0_3 = arith.constant 0 : index
    %c0_4 = arith.constant 0 : index
    %2 = vector.load %arg3[%c0_3, %c0_4] : memref<8x1xi32, #tpu.memory_space<vmem>>, vector<8x1xi32>
    %cst = arith.constant 0.000000e+00 : f32
    %3 = vector.broadcast %cst : f32 to vector<8x32xf32>
    %c0_5 = arith.constant 0 : index
    %c0_6 = arith.constant 0 : index
    %4 = vector.load %arg0[%c0_5, %c0_6] : memref<8x8xi32, #tpu.memory_space<vmem>>, vector<8x8xi32>
    %5 = tpu.iota {dimensions = array<i32: 2>} : vector<8x8x128xi32>
    %6 = vector.shape_cast %4 : vector<8x8xi32> to vector<8x8x1xi32>
    %7 = vector.broadcast %6 : vector<8x8x1xi32> to vector<8x8x128xi32>
    %8 = arith.cmpi eq, %5, %7 : vector<8x8x128xi32>
    %9 = arith.extui %8 : vector<8x8x128xi1> to vector<8x8x128xi32>
    %10 = arith.sitofp %9 : vector<8x8x128xi32> to vector<8x8x128xf32>
    %11 = vector.shape_cast %10 : vector<8x8x128xf32> to vector<64x128xf32>
    %cst_7 = arith.constant dense<0.000000e+00> : vector<64x32xf32>
    %12 = tpu.matmul %11, %0, %cst_7 {dimension_numbers = #tpu.dot_dimension_numbers<[1], [0], [0], [1], [0, 0, 1, 1], [], []>} : vector<64x128xf32>, vector<128x32xf32>, vector<64x32xf32> -> vector<64x32xf32>
    %cst_8 = arith.constant 5.65685415 : f32
    %13 = vector.broadcast %cst_8 : f32 to vector<64x32xf32>
    %14 = arith.mulf %12, %13 : vector<64x32xf32>
    %c0_9 = arith.constant 0 : index
    %c0_10 = arith.constant 0 : index
    %15 = vector.load %arg6[%c0_9, %c0_10] : memref<32x256xf32, #tpu.memory_space<vmem>>, vector<32x256xf32>
    %cst_11 = arith.constant dense<0.000000e+00> : vector<64x256xf32>
    %16 = tpu.matmul %14, %15, %cst_11 {dimension_numbers = #tpu.dot_dimension_numbers<[1], [0], [0], [1], [0, 0, 1, 1], [], []>} : vector<64x32xf32>, vector<32x256xf32>, vector<64x256xf32> -> vector<64x256xf32>
    %c0_12 = arith.constant 0 : index
    %c0_13 = arith.constant 0 : index
    %17 = vector.load %arg9[%c0_12, %c0_13] : memref<1x256xf32, #tpu.memory_space<vmem>>, vector<1x256xf32>
    %18 = vector.broadcast %17 : vector<1x256xf32> to vector<64x256xf32>
    %19 = arith.addf %16, %18 : vector<64x256xf32>
    %20 = vector.extract_strided_slice %19 {offsets = [0, 0], sizes = [64, 128], strides = [1, 1]} : vector<64x256xf32> to vector<64x128xf32>
    %c0_14 = arith.constant 0 : index
    %c0_15 = arith.constant 0 : index
    %21 = vector.load %arg7[%c0_14, %c0_15] : memref<32x128xf32, #tpu.memory_space<vmem>>, vector<32x128xf32>
    %22 = vector.extract_strided_slice %20 {offsets = [0, 0], sizes = [8, 128], strides = [1, 1]} : vector<64x128xf32> to vector<8x128xf32>
    %cst_16 = arith.constant dense<0.000000e+00> : vector<8x128xf32>
    %23 = tpu.matmul %3, %21, %cst_16 {dimension_numbers = #tpu.dot_dimension_numbers<[1], [0], [0], [1], [0, 0, 1, 1], [], []>} : vector<8x32xf32>, vector<32x128xf32>, vector<8x128xf32> -> vector<8x128xf32>
    %24 = arith.addf %22, %23 : vector<8x128xf32>
    %25 = arith.negf %24 : vector<8x128xf32>
    %26 = math.exp %25 : vector<8x128xf32>
    %cst_17 = arith.constant 1.000000e+00 : f32
    %27 = vector.broadcast %cst_17 : f32 to vector<8x128xf32>
    %28 = arith.addf %27, %26 : vector<8x128xf32>
    %29 = arith.divf %27, %28 : vector<8x128xf32>
    %30 = math.tanh %24 : vector<8x128xf32>
    %31 = vector.extract_strided_slice %29 {offsets = [0, 0], sizes = [8, 32], strides = [1, 1]} : vector<8x128xf32> to vector<8x32xf32>
    %32 = vector.extract_strided_slice %29 {offsets = [0, 32], sizes = [8, 32], strides = [1, 1]} : vector<8x128xf32> to vector<8x32xf32>
    %33 = vector.extract_strided_slice %30 {offsets = [0, 64], sizes = [8, 32], strides = [1, 1]} : vector<8x128xf32> to vector<8x32xf32>
    %34 = vector.extract_strided_slice %29 {offsets = [0, 96], sizes = [8, 32], strides = [1, 1]} : vector<8x128xf32> to vector<8x32xf32>
    %35 = arith.mulf %32, %3 : vector<8x32xf32>
    %36 = arith.mulf %31, %33 : vector<8x32xf32>
    %37 = arith.addf %35, %36 : vector<8x32xf32>
    %38 = math.tanh %37 : vector<8x32xf32>
    %39 = arith.mulf %34, %38 : vector<8x32xf32>
    %c0_i32 = arith.constant 0 : i32
    %40 = vector.broadcast %c0_i32 : i32 to vector<8x1xi32>
    %41 = arith.cmpi sgt, %1, %40 : vector<8x1xi32>
    %42 = arith.extui %41 : vector<8x1xi1> to vector<8x1xi32>
    %43 = arith.sitofp %42 : vector<8x1xi32> to vector<8x1xf32>
    %44 = vector.broadcast %43 : vector<8x1xf32> to vector<8x32xf32>
    %45 = arith.mulf %44, %39 : vector<8x32xf32>
    %cst_18 = arith.constant 1.000000e+00 : f32
    %46 = vector.broadcast %cst_18 : f32 to vector<8x1xf32>
    %47 = arith.subf %46, %43 : vector<8x1xf32>
    %48 = vector.broadcast %47 : vector<8x1xf32> to vector<8x32xf32>
    %49 = arith.mulf %48, %3 : vector<8x32xf32>
    %50 = arith.addf %45, %49 : vector<8x32xf32>
    %51 = vector.broadcast %43 : vector<8x1xf32> to vector<8x32xf32>
    %52 = arith.mulf %51, %37 : vector<8x32xf32>
    %cst_19 = arith.constant 1.000000e+00 : f32
    %53 = vector.broadcast %cst_19 : f32 to vector<8x1xf32>
    %54 = arith.subf %53, %43 : vector<8x1xf32>
    %55 = vector.broadcast %54 : vector<8x1xf32> to vector<8x32xf32>
    %56 = arith.mulf %55, %3 : vector<8x32xf32>
    %57 = arith.addf %52, %56 : vector<8x32xf32>
    %58 = vector.broadcast %43 : vector<8x1xf32> to vector<8x32xf32>
    %59 = arith.mulf %58, %39 : vector<8x32xf32>
    %60 = vector.extract_strided_slice %20 {offsets = [8, 0], sizes = [8, 128], strides = [1, 1]} : vector<64x128xf32> to vector<8x128xf32>
    %cst_20 = arith.constant dense<0.000000e+00> : vector<8x128xf32>
    %61 = tpu.matmul %50, %21, %cst_20 {dimension_numbers = #tpu.dot_dimension_numbers<[1], [0], [0], [1], [0, 0, 1, 1], [], []>} : vector<8x32xf32>, vector<32x128xf32>, vector<8x128xf32> -> vector<8x128xf32>
    %62 = arith.addf %60, %61 : vector<8x128xf32>
    %63 = arith.negf %62 : vector<8x128xf32>
    %64 = math.exp %63 : vector<8x128xf32>
    %cst_21 = arith.constant 1.000000e+00 : f32
    %65 = vector.broadcast %cst_21 : f32 to vector<8x128xf32>
    %66 = arith.addf %65, %64 : vector<8x128xf32>
    %67 = arith.divf %65, %66 : vector<8x128xf32>
    %68 = math.tanh %62 : vector<8x128xf32>
    %69 = vector.extract_strided_slice %67 {offsets = [0, 0], sizes = [8, 32], strides = [1, 1]} : vector<8x128xf32> to vector<8x32xf32>
    %70 = vector.extract_strided_slice %67 {offsets = [0, 32], sizes = [8, 32], strides = [1, 1]} : vector<8x128xf32> to vector<8x32xf32>
    %71 = vector.extract_strided_slice %68 {offsets = [0, 64], sizes = [8, 32], strides = [1, 1]} : vector<8x128xf32> to vector<8x32xf32>
    %72 = vector.extract_strided_slice %67 {offsets = [0, 96], sizes = [8, 32], strides = [1, 1]} : vector<8x128xf32> to vector<8x32xf32>
    %73 = arith.mulf %70, %57 : vector<8x32xf32>
    %74 = arith.mulf %69, %71 : vector<8x32xf32>
    %75 = arith.addf %73, %74 : vector<8x32xf32>
    %76 = math.tanh %75 : vector<8x32xf32>
    %77 = arith.mulf %72, %76 : vector<8x32xf32>
    %c1_i32 = arith.constant 1 : i32
    %78 = vector.broadcast %c1_i32 : i32 to vector<8x1xi32>
    %79 = arith.cmpi sgt, %1, %78 : vector<8x1xi32>
    %80 = arith.extui %79 : vector<8x1xi1> to vector<8x1xi32>
    %81 = arith.sitofp %80 : vector<8x1xi32> to vector<8x1xf32>
    %82 = vector.broadcast %81 : vector<8x1xf32> to vector<8x32xf32>
    %83 = arith.mulf %82, %77 : vector<8x32xf32>
    %cst_22 = arith.constant 1.000000e+00 : f32
    %84 = vector.broadcast %cst_22 : f32 to vector<8x1xf32>
    %85 = arith.subf %84, %81 : vector<8x1xf32>
    %86 = vector.broadcast %85 : vector<8x1xf32> to vector<8x32xf32>
    %87 = arith.mulf %86, %50 : vector<8x32xf32>
    %88 = arith.addf %83, %87 : vector<8x32xf32>
    %89 = vector.broadcast %81 : vector<8x1xf32> to vector<8x32xf32>
    %90 = arith.mulf %89, %75 : vector<8x32xf32>
    %cst_23 = arith.constant 1.000000e+00 : f32
    %91 = vector.broadcast %cst_23 : f32 to vector<8x1xf32>
    %92 = arith.subf %91, %81 : vector<8x1xf32>
    %93 = vector.broadcast %92 : vector<8x1xf32> to vector<8x32xf32>
    %94 = arith.mulf %93, %57 : vector<8x32xf32>
    %95 = arith.addf %90, %94 : vector<8x32xf32>
    %96 = vector.broadcast %81 : vector<8x1xf32> to vector<8x32xf32>
    %97 = arith.mulf %96, %77 : vector<8x32xf32>
    %98 = vector.extract_strided_slice %20 {offsets = [16, 0], sizes = [8, 128], strides = [1, 1]} : vector<64x128xf32> to vector<8x128xf32>
    %cst_24 = arith.constant dense<0.000000e+00> : vector<8x128xf32>
    %99 = tpu.matmul %88, %21, %cst_24 {dimension_numbers = #tpu.dot_dimension_numbers<[1], [0], [0], [1], [0, 0, 1, 1], [], []>} : vector<8x32xf32>, vector<32x128xf32>, vector<8x128xf32> -> vector<8x128xf32>
    %100 = arith.addf %98, %99 : vector<8x128xf32>
    %101 = arith.negf %100 : vector<8x128xf32>
    %102 = math.exp %101 : vector<8x128xf32>
    %cst_25 = arith.constant 1.000000e+00 : f32
    %103 = vector.broadcast %cst_25 : f32 to vector<8x128xf32>
    %104 = arith.addf %103, %102 : vector<8x128xf32>
    %105 = arith.divf %103, %104 : vector<8x128xf32>
    %106 = math.tanh %100 : vector<8x128xf32>
    %107 = vector.extract_strided_slice %105 {offsets = [0, 0], sizes = [8, 32], strides = [1, 1]} : vector<8x128xf32> to vector<8x32xf32>
    %108 = vector.extract_strided_slice %105 {offsets = [0, 32], sizes = [8, 32], strides = [1, 1]} : vector<8x128xf32> to vector<8x32xf32>
    %109 = vector.extract_strided_slice %106 {offsets = [0, 64], sizes = [8, 32], strides = [1, 1]} : vector<8x128xf32> to vector<8x32xf32>
    %110 = vector.extract_strided_slice %105 {offsets = [0, 96], sizes = [8, 32], strides = [1, 1]} : vector<8x128xf32> to vector<8x32xf32>
    %111 = arith.mulf %108, %95 : vector<8x32xf32>
    %112 = arith.mulf %107, %109 : vector<8x32xf32>
    %113 = arith.addf %111, %112 : vector<8x32xf32>
    %114 = math.tanh %113 : vector<8x32xf32>
    %115 = arith.mulf %110, %114 : vector<8x32xf32>
    %c2_i32 = arith.constant 2 : i32
    %116 = vector.broadcast %c2_i32 : i32 to vector<8x1xi32>
    %117 = arith.cmpi sgt, %1, %116 : vector<8x1xi32>
    %118 = arith.extui %117 : vector<8x1xi1> to vector<8x1xi32>
    %119 = arith.sitofp %118 : vector<8x1xi32> to vector<8x1xf32>
    %120 = vector.broadcast %119 : vector<8x1xf32> to vector<8x32xf32>
    %121 = arith.mulf %120, %115 : vector<8x32xf32>
    %cst_26 = arith.constant 1.000000e+00 : f32
    %122 = vector.broadcast %cst_26 : f32 to vector<8x1xf32>
    %123 = arith.subf %122, %119 : vector<8x1xf32>
    %124 = vector.broadcast %123 : vector<8x1xf32> to vector<8x32xf32>
    %125 = arith.mulf %124, %88 : vector<8x32xf32>
    %126 = arith.addf %121, %125 : vector<8x32xf32>
    %127 = vector.broadcast %119 : vector<8x1xf32> to vector<8x32xf32>
    %128 = arith.mulf %127, %113 : vector<8x32xf32>
    %cst_27 = arith.constant 1.000000e+00 : f32
    %129 = vector.broadcast %cst_27 : f32 to vector<8x1xf32>
    %130 = arith.subf %129, %119 : vector<8x1xf32>
    %131 = vector.broadcast %130 : vector<8x1xf32> to vector<8x32xf32>
    %132 = arith.mulf %131, %95 : vector<8x32xf32>
    %133 = arith.addf %128, %132 : vector<8x32xf32>
    %134 = vector.broadcast %119 : vector<8x1xf32> to vector<8x32xf32>
    %135 = arith.mulf %134, %115 : vector<8x32xf32>
    %136 = vector.extract_strided_slice %20 {offsets = [24, 0], sizes = [8, 128], strides = [1, 1]} : vector<64x128xf32> to vector<8x128xf32>
    %cst_28 = arith.constant dense<0.000000e+00> : vector<8x128xf32>
    %137 = tpu.matmul %126, %21, %cst_28 {dimension_numbers = #tpu.dot_dimension_numbers<[1], [0], [0], [1], [0, 0, 1, 1], [], []>} : vector<8x32xf32>, vector<32x128xf32>, vector<8x128xf32> -> vector<8x128xf32>
    %138 = arith.addf %136, %137 : vector<8x128xf32>
    %139 = arith.negf %138 : vector<8x128xf32>
    %140 = math.exp %139 : vector<8x128xf32>
    %cst_29 = arith.constant 1.000000e+00 : f32
    %141 = vector.broadcast %cst_29 : f32 to vector<8x128xf32>
    %142 = arith.addf %141, %140 : vector<8x128xf32>
    %143 = arith.divf %141, %142 : vector<8x128xf32>
    %144 = math.tanh %138 : vector<8x128xf32>
    %145 = vector.extract_strided_slice %143 {offsets = [0, 0], sizes = [8, 32], strides = [1, 1]} : vector<8x128xf32> to vector<8x32xf32>
    %146 = vector.extract_strided_slice %143 {offsets = [0, 32], sizes = [8, 32], strides = [1, 1]} : vector<8x128xf32> to vector<8x32xf32>
    %147 = vector.extract_strided_slice %144 {offsets = [0, 64], sizes = [8, 32], strides = [1, 1]} : vector<8x128xf32> to vector<8x32xf32>
    %148 = vector.extract_strided_slice %143 {offsets = [0, 96], sizes = [8, 32], strides = [1, 1]} : vector<8x128xf32> to vector<8x32xf32>
    %149 = arith.mulf %146, %133 : vector<8x32xf32>
    %150 = arith.mulf %145, %147 : vector<8x32xf32>
    %151 = arith.addf %149, %150 : vector<8x32xf32>
    %152 = math.tanh %151 : vector<8x32xf32>
    %153 = arith.mulf %148, %152 : vector<8x32xf32>
    %c3_i32 = arith.constant 3 : i32
    %154 = vector.broadcast %c3_i32 : i32 to vector<8x1xi32>
    %155 = arith.cmpi sgt, %1, %154 : vector<8x1xi32>
    %156 = arith.extui %155 : vector<8x1xi1> to vector<8x1xi32>
    %157 = arith.sitofp %156 : vector<8x1xi32> to vector<8x1xf32>
    %158 = vector.broadcast %157 : vector<8x1xf32> to vector<8x32xf32>
    %159 = arith.mulf %158, %153 : vector<8x32xf32>
    %cst_30 = arith.constant 1.000000e+00 : f32
    %160 = vector.broadcast %cst_30 : f32 to vector<8x1xf32>
    %161 = arith.subf %160, %157 : vector<8x1xf32>
    %162 = vector.broadcast %161 : vector<8x1xf32> to vector<8x32xf32>
    %163 = arith.mulf %162, %126 : vector<8x32xf32>
    %164 = arith.addf %159, %163 : vector<8x32xf32>
    %165 = vector.broadcast %157 : vector<8x1xf32> to vector<8x32xf32>
    %166 = arith.mulf %165, %151 : vector<8x32xf32>
    %cst_31 = arith.constant 1.000000e+00 : f32
    %167 = vector.broadcast %cst_31 : f32 to vector<8x1xf32>
    %168 = arith.subf %167, %157 : vector<8x1xf32>
    %169 = vector.broadcast %168 : vector<8x1xf32> to vector<8x32xf32>
    %170 = arith.mulf %169, %133 : vector<8x32xf32>
    %171 = arith.addf %166, %170 : vector<8x32xf32>
    %172 = vector.broadcast %157 : vector<8x1xf32> to vector<8x32xf32>
    %173 = arith.mulf %172, %153 : vector<8x32xf32>
    %174 = vector.extract_strided_slice %20 {offsets = [32, 0], sizes = [8, 128], strides = [1, 1]} : vector<64x128xf32> to vector<8x128xf32>
    %cst_32 = arith.constant dense<0.000000e+00> : vector<8x128xf32>
    %175 = tpu.matmul %164, %21, %cst_32 {dimension_numbers = #tpu.dot_dimension_numbers<[1], [0], [0], [1], [0, 0, 1, 1], [], []>} : vector<8x32xf32>, vector<32x128xf32>, vector<8x128xf32> -> vector<8x128xf32>
    %176 = arith.addf %174, %175 : vector<8x128xf32>
    %177 = arith.negf %176 : vector<8x128xf32>
    %178 = math.exp %177 : vector<8x128xf32>
    %cst_33 = arith.constant 1.000000e+00 : f32
    %179 = vector.broadcast %cst_33 : f32 to vector<8x128xf32>
    %180 = arith.addf %179, %178 : vector<8x128xf32>
    %181 = arith.divf %179, %180 : vector<8x128xf32>
    %182 = math.tanh %176 : vector<8x128xf32>
    %183 = vector.extract_strided_slice %181 {offsets = [0, 0], sizes = [8, 32], strides = [1, 1]} : vector<8x128xf32> to vector<8x32xf32>
    %184 = vector.extract_strided_slice %181 {offsets = [0, 32], sizes = [8, 32], strides = [1, 1]} : vector<8x128xf32> to vector<8x32xf32>
    %185 = vector.extract_strided_slice %182 {offsets = [0, 64], sizes = [8, 32], strides = [1, 1]} : vector<8x128xf32> to vector<8x32xf32>
    %186 = vector.extract_strided_slice %181 {offsets = [0, 96], sizes = [8, 32], strides = [1, 1]} : vector<8x128xf32> to vector<8x32xf32>
    %187 = arith.mulf %184, %171 : vector<8x32xf32>
    %188 = arith.mulf %183, %185 : vector<8x32xf32>
    %189 = arith.addf %187, %188 : vector<8x32xf32>
    %190 = math.tanh %189 : vector<8x32xf32>
    %191 = arith.mulf %186, %190 : vector<8x32xf32>
    %c4_i32 = arith.constant 4 : i32
    %192 = vector.broadcast %c4_i32 : i32 to vector<8x1xi32>
    %193 = arith.cmpi sgt, %1, %192 : vector<8x1xi32>
    %194 = arith.extui %193 : vector<8x1xi1> to vector<8x1xi32>
    %195 = arith.sitofp %194 : vector<8x1xi32> to vector<8x1xf32>
    %196 = vector.broadcast %195 : vector<8x1xf32> to vector<8x32xf32>
    %197 = arith.mulf %196, %191 : vector<8x32xf32>
    %cst_34 = arith.constant 1.000000e+00 : f32
    %198 = vector.broadcast %cst_34 : f32 to vector<8x1xf32>
    %199 = arith.subf %198, %195 : vector<8x1xf32>
    %200 = vector.broadcast %199 : vector<8x1xf32> to vector<8x32xf32>
    %201 = arith.mulf %200, %164 : vector<8x32xf32>
    %202 = arith.addf %197, %201 : vector<8x32xf32>
    %203 = vector.broadcast %195 : vector<8x1xf32> to vector<8x32xf32>
    %204 = arith.mulf %203, %189 : vector<8x32xf32>
    %cst_35 = arith.constant 1.000000e+00 : f32
    %205 = vector.broadcast %cst_35 : f32 to vector<8x1xf32>
    %206 = arith.subf %205, %195 : vector<8x1xf32>
    %207 = vector.broadcast %206 : vector<8x1xf32> to vector<8x32xf32>
    %208 = arith.mulf %207, %171 : vector<8x32xf32>
    %209 = arith.addf %204, %208 : vector<8x32xf32>
    %210 = vector.broadcast %195 : vector<8x1xf32> to vector<8x32xf32>
    %211 = arith.mulf %210, %191 : vector<8x32xf32>
    %212 = vector.extract_strided_slice %20 {offsets = [40, 0], sizes = [8, 128], strides = [1, 1]} : vector<64x128xf32> to vector<8x128xf32>
    %cst_36 = arith.constant dense<0.000000e+00> : vector<8x128xf32>
    %213 = tpu.matmul %202, %21, %cst_36 {dimension_numbers = #tpu.dot_dimension_numbers<[1], [0], [0], [1], [0, 0, 1, 1], [], []>} : vector<8x32xf32>, vector<32x128xf32>, vector<8x128xf32> -> vector<8x128xf32>
    %214 = arith.addf %212, %213 : vector<8x128xf32>
    %215 = arith.negf %214 : vector<8x128xf32>
    %216 = math.exp %215 : vector<8x128xf32>
    %cst_37 = arith.constant 1.000000e+00 : f32
    %217 = vector.broadcast %cst_37 : f32 to vector<8x128xf32>
    %218 = arith.addf %217, %216 : vector<8x128xf32>
    %219 = arith.divf %217, %218 : vector<8x128xf32>
    %220 = math.tanh %214 : vector<8x128xf32>
    %221 = vector.extract_strided_slice %219 {offsets = [0, 0], sizes = [8, 32], strides = [1, 1]} : vector<8x128xf32> to vector<8x32xf32>
    %222 = vector.extract_strided_slice %219 {offsets = [0, 32], sizes = [8, 32], strides = [1, 1]} : vector<8x128xf32> to vector<8x32xf32>
    %223 = vector.extract_strided_slice %220 {offsets = [0, 64], sizes = [8, 32], strides = [1, 1]} : vector<8x128xf32> to vector<8x32xf32>
    %224 = vector.extract_strided_slice %219 {offsets = [0, 96], sizes = [8, 32], strides = [1, 1]} : vector<8x128xf32> to vector<8x32xf32>
    %225 = arith.mulf %222, %209 : vector<8x32xf32>
    %226 = arith.mulf %221, %223 : vector<8x32xf32>
    %227 = arith.addf %225, %226 : vector<8x32xf32>
    %228 = math.tanh %227 : vector<8x32xf32>
    %229 = arith.mulf %224, %228 : vector<8x32xf32>
    %c5_i32 = arith.constant 5 : i32
    %230 = vector.broadcast %c5_i32 : i32 to vector<8x1xi32>
    %231 = arith.cmpi sgt, %1, %230 : vector<8x1xi32>
    %232 = arith.extui %231 : vector<8x1xi1> to vector<8x1xi32>
    %233 = arith.sitofp %232 : vector<8x1xi32> to vector<8x1xf32>
    %234 = vector.broadcast %233 : vector<8x1xf32> to vector<8x32xf32>
    %235 = arith.mulf %234, %229 : vector<8x32xf32>
    %cst_38 = arith.constant 1.000000e+00 : f32
    %236 = vector.broadcast %cst_38 : f32 to vector<8x1xf32>
    %237 = arith.subf %236, %233 : vector<8x1xf32>
    %238 = vector.broadcast %237 : vector<8x1xf32> to vector<8x32xf32>
    %239 = arith.mulf %238, %202 : vector<8x32xf32>
    %240 = arith.addf %235, %239 : vector<8x32xf32>
    %241 = vector.broadcast %233 : vector<8x1xf32> to vector<8x32xf32>
    %242 = arith.mulf %241, %227 : vector<8x32xf32>
    %cst_39 = arith.constant 1.000000e+00 : f32
    %243 = vector.broadcast %cst_39 : f32 to vector<8x1xf32>
    %244 = arith.subf %243, %233 : vector<8x1xf32>
    %245 = vector.broadcast %244 : vector<8x1xf32> to vector<8x32xf32>
    %246 = arith.mulf %245, %209 : vector<8x32xf32>
    %247 = arith.addf %242, %246 : vector<8x32xf32>
    %248 = vector.broadcast %233 : vector<8x1xf32> to vector<8x32xf32>
    %249 = arith.mulf %248, %229 : vector<8x32xf32>
    %250 = vector.extract_strided_slice %20 {offsets = [48, 0], sizes = [8, 128], strides = [1, 1]} : vector<64x128xf32> to vector<8x128xf32>
    %cst_40 = arith.constant dense<0.000000e+00> : vector<8x128xf32>
    %251 = tpu.matmul %240, %21, %cst_40 {dimension_numbers = #tpu.dot_dimension_numbers<[1], [0], [0], [1], [0, 0, 1, 1], [], []>} : vector<8x32xf32>, vector<32x128xf32>, vector<8x128xf32> -> vector<8x128xf32>
    %252 = arith.addf %250, %251 : vector<8x128xf32>
    %253 = arith.negf %252 : vector<8x128xf32>
    %254 = math.exp %253 : vector<8x128xf32>
    %cst_41 = arith.constant 1.000000e+00 : f32
    %255 = vector.broadcast %cst_41 : f32 to vector<8x128xf32>
    %256 = arith.addf %255, %254 : vector<8x128xf32>
    %257 = arith.divf %255, %256 : vector<8x128xf32>
    %258 = math.tanh %252 : vector<8x128xf32>
    %259 = vector.extract_strided_slice %257 {offsets = [0, 0], sizes = [8, 32], strides = [1, 1]} : vector<8x128xf32> to vector<8x32xf32>
    %260 = vector.extract_strided_slice %257 {offsets = [0, 32], sizes = [8, 32], strides = [1, 1]} : vector<8x128xf32> to vector<8x32xf32>
    %261 = vector.extract_strided_slice %258 {offsets = [0, 64], sizes = [8, 32], strides = [1, 1]} : vector<8x128xf32> to vector<8x32xf32>
    %262 = vector.extract_strided_slice %257 {offsets = [0, 96], sizes = [8, 32], strides = [1, 1]} : vector<8x128xf32> to vector<8x32xf32>
    %263 = arith.mulf %260, %247 : vector<8x32xf32>
    %264 = arith.mulf %259, %261 : vector<8x32xf32>
    %265 = arith.addf %263, %264 : vector<8x32xf32>
    %266 = math.tanh %265 : vector<8x32xf32>
    %267 = arith.mulf %262, %266 : vector<8x32xf32>
    %c6_i32 = arith.constant 6 : i32
    %268 = vector.broadcast %c6_i32 : i32 to vector<8x1xi32>
    %269 = arith.cmpi sgt, %1, %268 : vector<8x1xi32>
    %270 = arith.extui %269 : vector<8x1xi1> to vector<8x1xi32>
    %271 = arith.sitofp %270 : vector<8x1xi32> to vector<8x1xf32>
    %272 = vector.broadcast %271 : vector<8x1xf32> to vector<8x32xf32>
    %273 = arith.mulf %272, %267 : vector<8x32xf32>
    %cst_42 = arith.constant 1.000000e+00 : f32
    %274 = vector.broadcast %cst_42 : f32 to vector<8x1xf32>
    %275 = arith.subf %274, %271 : vector<8x1xf32>
    %276 = vector.broadcast %275 : vector<8x1xf32> to vector<8x32xf32>
    %277 = arith.mulf %276, %240 : vector<8x32xf32>
    %278 = arith.addf %273, %277 : vector<8x32xf32>
    %279 = vector.broadcast %271 : vector<8x1xf32> to vector<8x32xf32>
    %280 = arith.mulf %279, %265 : vector<8x32xf32>
    %cst_43 = arith.constant 1.000000e+00 : f32
    %281 = vector.broadcast %cst_43 : f32 to vector<8x1xf32>
    %282 = arith.subf %281, %271 : vector<8x1xf32>
    %283 = vector.broadcast %282 : vector<8x1xf32> to vector<8x32xf32>
    %284 = arith.mulf %283, %247 : vector<8x32xf32>
    %285 = arith.addf %280, %284 : vector<8x32xf32>
    %286 = vector.broadcast %271 : vector<8x1xf32> to vector<8x32xf32>
    %287 = arith.mulf %286, %267 : vector<8x32xf32>
    %288 = vector.extract_strided_slice %20 {offsets = [56, 0], sizes = [8, 128], strides = [1, 1]} : vector<64x128xf32> to vector<8x128xf32>
    %cst_44 = arith.constant dense<0.000000e+00> : vector<8x128xf32>
    %289 = tpu.matmul %278, %21, %cst_44 {dimension_numbers = #tpu.dot_dimension_numbers<[1], [0], [0], [1], [0, 0, 1, 1], [], []>} : vector<8x32xf32>, vector<32x128xf32>, vector<8x128xf32> -> vector<8x128xf32>
    %290 = arith.addf %288, %289 : vector<8x128xf32>
    %291 = arith.negf %290 : vector<8x128xf32>
    %292 = math.exp %291 : vector<8x128xf32>
    %cst_45 = arith.constant 1.000000e+00 : f32
    %293 = vector.broadcast %cst_45 : f32 to vector<8x128xf32>
    %294 = arith.addf %293, %292 : vector<8x128xf32>
    %295 = arith.divf %293, %294 : vector<8x128xf32>
    %296 = math.tanh %290 : vector<8x128xf32>
    %297 = vector.extract_strided_slice %295 {offsets = [0, 0], sizes = [8, 32], strides = [1, 1]} : vector<8x128xf32> to vector<8x32xf32>
    %298 = vector.extract_strided_slice %295 {offsets = [0, 32], sizes = [8, 32], strides = [1, 1]} : vector<8x128xf32> to vector<8x32xf32>
    %299 = vector.extract_strided_slice %296 {offsets = [0, 64], sizes = [8, 32], strides = [1, 1]} : vector<8x128xf32> to vector<8x32xf32>
    %300 = vector.extract_strided_slice %295 {offsets = [0, 96], sizes = [8, 32], strides = [1, 1]} : vector<8x128xf32> to vector<8x32xf32>
    %301 = arith.mulf %298, %285 : vector<8x32xf32>
    %302 = arith.mulf %297, %299 : vector<8x32xf32>
    %303 = arith.addf %301, %302 : vector<8x32xf32>
    %304 = math.tanh %303 : vector<8x32xf32>
    %305 = arith.mulf %300, %304 : vector<8x32xf32>
    %c7_i32 = arith.constant 7 : i32
    %306 = vector.broadcast %c7_i32 : i32 to vector<8x1xi32>
    %307 = arith.cmpi sgt, %1, %306 : vector<8x1xi32>
    %308 = arith.extui %307 : vector<8x1xi1> to vector<8x1xi32>
    %309 = arith.sitofp %308 : vector<8x1xi32> to vector<8x1xf32>
    %310 = vector.broadcast %309 : vector<8x1xf32> to vector<8x32xf32>
    %311 = arith.mulf %310, %305 : vector<8x32xf32>
    %cst_46 = arith.constant 1.000000e+00 : f32
    %312 = vector.broadcast %cst_46 : f32 to vector<8x1xf32>
    %313 = arith.subf %312, %309 : vector<8x1xf32>
    %314 = vector.broadcast %313 : vector<8x1xf32> to vector<8x32xf32>
    %315 = arith.mulf %314, %278 : vector<8x32xf32>
    %316 = arith.addf %311, %315 : vector<8x32xf32>
    %317 = vector.broadcast %309 : vector<8x1xf32> to vector<8x32xf32>
    %318 = arith.mulf %317, %305 : vector<8x32xf32>
    %319 = vector.extract_strided_slice %19 {offsets = [0, 128], sizes = [64, 128], strides = [1, 1]} : vector<64x256xf32> to vector<64x128xf32>
    %c0_47 = arith.constant 0 : index
    %c0_48 = arith.constant 0 : index
    %320 = vector.load %arg8[%c0_47, %c0_48] : memref<32x128xf32, #tpu.memory_space<vmem>>, vector<32x128xf32>
    %321 = vector.extract_strided_slice %319 {offsets = [56, 0], sizes = [8, 128], strides = [1, 1]} : vector<64x128xf32> to vector<8x128xf32>
    %cst_49 = arith.constant dense<0.000000e+00> : vector<8x128xf32>
    %322 = tpu.matmul %3, %320, %cst_49 {dimension_numbers = #tpu.dot_dimension_numbers<[1], [0], [0], [1], [0, 0, 1, 1], [], []>} : vector<8x32xf32>, vector<32x128xf32>, vector<8x128xf32> -> vector<8x128xf32>
    %323 = arith.addf %321, %322 : vector<8x128xf32>
    %324 = arith.negf %323 : vector<8x128xf32>
    %325 = math.exp %324 : vector<8x128xf32>
    %cst_50 = arith.constant 1.000000e+00 : f32
    %326 = vector.broadcast %cst_50 : f32 to vector<8x128xf32>
    %327 = arith.addf %326, %325 : vector<8x128xf32>
    %328 = arith.divf %326, %327 : vector<8x128xf32>
    %329 = math.tanh %323 : vector<8x128xf32>
    %330 = vector.extract_strided_slice %328 {offsets = [0, 0], sizes = [8, 32], strides = [1, 1]} : vector<8x128xf32> to vector<8x32xf32>
    %331 = vector.extract_strided_slice %328 {offsets = [0, 32], sizes = [8, 32], strides = [1, 1]} : vector<8x128xf32> to vector<8x32xf32>
    %332 = vector.extract_strided_slice %329 {offsets = [0, 64], sizes = [8, 32], strides = [1, 1]} : vector<8x128xf32> to vector<8x32xf32>
    %333 = vector.extract_strided_slice %328 {offsets = [0, 96], sizes = [8, 32], strides = [1, 1]} : vector<8x128xf32> to vector<8x32xf32>
    %334 = arith.mulf %331, %3 : vector<8x32xf32>
    %335 = arith.mulf %330, %332 : vector<8x32xf32>
    %336 = arith.addf %334, %335 : vector<8x32xf32>
    %337 = math.tanh %336 : vector<8x32xf32>
    %338 = arith.mulf %333, %337 : vector<8x32xf32>
    %c7_i32_51 = arith.constant 7 : i32
    %339 = vector.broadcast %c7_i32_51 : i32 to vector<8x1xi32>
    %340 = arith.cmpi sgt, %1, %339 : vector<8x1xi32>
    %341 = arith.extui %340 : vector<8x1xi1> to vector<8x1xi32>
    %342 = arith.sitofp %341 : vector<8x1xi32> to vector<8x1xf32>
    %343 = vector.broadcast %342 : vector<8x1xf32> to vector<8x32xf32>
    %344 = arith.mulf %343, %338 : vector<8x32xf32>
    %cst_52 = arith.constant 1.000000e+00 : f32
    %345 = vector.broadcast %cst_52 : f32 to vector<8x1xf32>
    %346 = arith.subf %345, %342 : vector<8x1xf32>
    %347 = vector.broadcast %346 : vector<8x1xf32> to vector<8x32xf32>
    %348 = arith.mulf %347, %3 : vector<8x32xf32>
    %349 = arith.addf %344, %348 : vector<8x32xf32>
    %350 = vector.broadcast %342 : vector<8x1xf32> to vector<8x32xf32>
    %351 = arith.mulf %350, %336 : vector<8x32xf32>
    %cst_53 = arith.constant 1.000000e+00 : f32
    %352 = vector.broadcast %cst_53 : f32 to vector<8x1xf32>
    %353 = arith.subf %352, %342 : vector<8x1xf32>
    %354 = vector.broadcast %353 : vector<8x1xf32> to vector<8x32xf32>
    %355 = arith.mulf %354, %3 : vector<8x32xf32>
    %356 = arith.addf %351, %355 : vector<8x32xf32>
    %357 = vector.broadcast %342 : vector<8x1xf32> to vector<8x32xf32>
    %358 = arith.mulf %357, %338 : vector<8x32xf32>
    %359 = vector.extract_strided_slice %319 {offsets = [48, 0], sizes = [8, 128], strides = [1, 1]} : vector<64x128xf32> to vector<8x128xf32>
    %cst_54 = arith.constant dense<0.000000e+00> : vector<8x128xf32>
    %360 = tpu.matmul %349, %320, %cst_54 {dimension_numbers = #tpu.dot_dimension_numbers<[1], [0], [0], [1], [0, 0, 1, 1], [], []>} : vector<8x32xf32>, vector<32x128xf32>, vector<8x128xf32> -> vector<8x128xf32>
    %361 = arith.addf %359, %360 : vector<8x128xf32>
    %362 = arith.negf %361 : vector<8x128xf32>
    %363 = math.exp %362 : vector<8x128xf32>
    %cst_55 = arith.constant 1.000000e+00 : f32
    %364 = vector.broadcast %cst_55 : f32 to vector<8x128xf32>
    %365 = arith.addf %364, %363 : vector<8x128xf32>
    %366 = arith.divf %364, %365 : vector<8x128xf32>
    %367 = math.tanh %361 : vector<8x128xf32>
    %368 = vector.extract_strided_slice %366 {offsets = [0, 0], sizes = [8, 32], strides = [1, 1]} : vector<8x128xf32> to vector<8x32xf32>
    %369 = vector.extract_strided_slice %366 {offsets = [0, 32], sizes = [8, 32], strides = [1, 1]} : vector<8x128xf32> to vector<8x32xf32>
    %370 = vector.extract_strided_slice %367 {offsets = [0, 64], sizes = [8, 32], strides = [1, 1]} : vector<8x128xf32> to vector<8x32xf32>
    %371 = vector.extract_strided_slice %366 {offsets = [0, 96], sizes = [8, 32], strides = [1, 1]} : vector<8x128xf32> to vector<8x32xf32>
    %372 = arith.mulf %369, %356 : vector<8x32xf32>
    %373 = arith.mulf %368, %370 : vector<8x32xf32>
    %374 = arith.addf %372, %373 : vector<8x32xf32>
    %375 = math.tanh %374 : vector<8x32xf32>
    %376 = arith.mulf %371, %375 : vector<8x32xf32>
    %c6_i32_56 = arith.constant 6 : i32
    %377 = vector.broadcast %c6_i32_56 : i32 to vector<8x1xi32>
    %378 = arith.cmpi sgt, %1, %377 : vector<8x1xi32>
    %379 = arith.extui %378 : vector<8x1xi1> to vector<8x1xi32>
    %380 = arith.sitofp %379 : vector<8x1xi32> to vector<8x1xf32>
    %381 = vector.broadcast %380 : vector<8x1xf32> to vector<8x32xf32>
    %382 = arith.mulf %381, %376 : vector<8x32xf32>
    %cst_57 = arith.constant 1.000000e+00 : f32
    %383 = vector.broadcast %cst_57 : f32 to vector<8x1xf32>
    %384 = arith.subf %383, %380 : vector<8x1xf32>
    %385 = vector.broadcast %384 : vector<8x1xf32> to vector<8x32xf32>
    %386 = arith.mulf %385, %349 : vector<8x32xf32>
    %387 = arith.addf %382, %386 : vector<8x32xf32>
    %388 = vector.broadcast %380 : vector<8x1xf32> to vector<8x32xf32>
    %389 = arith.mulf %388, %374 : vector<8x32xf32>
    %cst_58 = arith.constant 1.000000e+00 : f32
    %390 = vector.broadcast %cst_58 : f32 to vector<8x1xf32>
    %391 = arith.subf %390, %380 : vector<8x1xf32>
    %392 = vector.broadcast %391 : vector<8x1xf32> to vector<8x32xf32>
    %393 = arith.mulf %392, %356 : vector<8x32xf32>
    %394 = arith.addf %389, %393 : vector<8x32xf32>
    %395 = vector.broadcast %380 : vector<8x1xf32> to vector<8x32xf32>
    %396 = arith.mulf %395, %376 : vector<8x32xf32>
    %397 = vector.extract_strided_slice %319 {offsets = [40, 0], sizes = [8, 128], strides = [1, 1]} : vector<64x128xf32> to vector<8x128xf32>
    %cst_59 = arith.constant dense<0.000000e+00> : vector<8x128xf32>
    %398 = tpu.matmul %387, %320, %cst_59 {dimension_numbers = #tpu.dot_dimension_numbers<[1], [0], [0], [1], [0, 0, 1, 1], [], []>} : vector<8x32xf32>, vector<32x128xf32>, vector<8x128xf32> -> vector<8x128xf32>
    %399 = arith.addf %397, %398 : vector<8x128xf32>
    %400 = arith.negf %399 : vector<8x128xf32>
    %401 = math.exp %400 : vector<8x128xf32>
    %cst_60 = arith.constant 1.000000e+00 : f32
    %402 = vector.broadcast %cst_60 : f32 to vector<8x128xf32>
    %403 = arith.addf %402, %401 : vector<8x128xf32>
    %404 = arith.divf %402, %403 : vector<8x128xf32>
    %405 = math.tanh %399 : vector<8x128xf32>
    %406 = vector.extract_strided_slice %404 {offsets = [0, 0], sizes = [8, 32], strides = [1, 1]} : vector<8x128xf32> to vector<8x32xf32>
    %407 = vector.extract_strided_slice %404 {offsets = [0, 32], sizes = [8, 32], strides = [1, 1]} : vector<8x128xf32> to vector<8x32xf32>
    %408 = vector.extract_strided_slice %405 {offsets = [0, 64], sizes = [8, 32], strides = [1, 1]} : vector<8x128xf32> to vector<8x32xf32>
    %409 = vector.extract_strided_slice %404 {offsets = [0, 96], sizes = [8, 32], strides = [1, 1]} : vector<8x128xf32> to vector<8x32xf32>
    %410 = arith.mulf %407, %394 : vector<8x32xf32>
    %411 = arith.mulf %406, %408 : vector<8x32xf32>
    %412 = arith.addf %410, %411 : vector<8x32xf32>
    %413 = math.tanh %412 : vector<8x32xf32>
    %414 = arith.mulf %409, %413 : vector<8x32xf32>
    %c5_i32_61 = arith.constant 5 : i32
    %415 = vector.broadcast %c5_i32_61 : i32 to vector<8x1xi32>
    %416 = arith.cmpi sgt, %1, %415 : vector<8x1xi32>
    %417 = arith.extui %416 : vector<8x1xi1> to vector<8x1xi32>
    %418 = arith.sitofp %417 : vector<8x1xi32> to vector<8x1xf32>
    %419 = vector.broadcast %418 : vector<8x1xf32> to vector<8x32xf32>
    %420 = arith.mulf %419, %414 : vector<8x32xf32>
    %cst_62 = arith.constant 1.000000e+00 : f32
    %421 = vector.broadcast %cst_62 : f32 to vector<8x1xf32>
    %422 = arith.subf %421, %418 : vector<8x1xf32>
    %423 = vector.broadcast %422 : vector<8x1xf32> to vector<8x32xf32>
    %424 = arith.mulf %423, %387 : vector<8x32xf32>
    %425 = arith.addf %420, %424 : vector<8x32xf32>
    %426 = vector.broadcast %418 : vector<8x1xf32> to vector<8x32xf32>
    %427 = arith.mulf %426, %412 : vector<8x32xf32>
    %cst_63 = arith.constant 1.000000e+00 : f32
    %428 = vector.broadcast %cst_63 : f32 to vector<8x1xf32>
    %429 = arith.subf %428, %418 : vector<8x1xf32>
    %430 = vector.broadcast %429 : vector<8x1xf32> to vector<8x32xf32>
    %431 = arith.mulf %430, %394 : vector<8x32xf32>
    %432 = arith.addf %427, %431 : vector<8x32xf32>
    %433 = vector.broadcast %418 : vector<8x1xf32> to vector<8x32xf32>
    %434 = arith.mulf %433, %414 : vector<8x32xf32>
    %435 = vector.extract_strided_slice %319 {offsets = [32, 0], sizes = [8, 128], strides = [1, 1]} : vector<64x128xf32> to vector<8x128xf32>
    %cst_64 = arith.constant dense<0.000000e+00> : vector<8x128xf32>
    %436 = tpu.matmul %425, %320, %cst_64 {dimension_numbers = #tpu.dot_dimension_numbers<[1], [0], [0], [1], [0, 0, 1, 1], [], []>} : vector<8x32xf32>, vector<32x128xf32>, vector<8x128xf32> -> vector<8x128xf32>
    %437 = arith.addf %435, %436 : vector<8x128xf32>
    %438 = arith.negf %437 : vector<8x128xf32>
    %439 = math.exp %438 : vector<8x128xf32>
    %cst_65 = arith.constant 1.000000e+00 : f32
    %440 = vector.broadcast %cst_65 : f32 to vector<8x128xf32>
    %441 = arith.addf %440, %439 : vector<8x128xf32>
    %442 = arith.divf %440, %441 : vector<8x128xf32>
    %443 = math.tanh %437 : vector<8x128xf32>
    %444 = vector.extract_strided_slice %442 {offsets = [0, 0], sizes = [8, 32], strides = [1, 1]} : vector<8x128xf32> to vector<8x32xf32>
    %445 = vector.extract_strided_slice %442 {offsets = [0, 32], sizes = [8, 32], strides = [1, 1]} : vector<8x128xf32> to vector<8x32xf32>
    %446 = vector.extract_strided_slice %443 {offsets = [0, 64], sizes = [8, 32], strides = [1, 1]} : vector<8x128xf32> to vector<8x32xf32>
    %447 = vector.extract_strided_slice %442 {offsets = [0, 96], sizes = [8, 32], strides = [1, 1]} : vector<8x128xf32> to vector<8x32xf32>
    %448 = arith.mulf %445, %432 : vector<8x32xf32>
    %449 = arith.mulf %444, %446 : vector<8x32xf32>
    %450 = arith.addf %448, %449 : vector<8x32xf32>
    %451 = math.tanh %450 : vector<8x32xf32>
    %452 = arith.mulf %447, %451 : vector<8x32xf32>
    %c4_i32_66 = arith.constant 4 : i32
    %453 = vector.broadcast %c4_i32_66 : i32 to vector<8x1xi32>
    %454 = arith.cmpi sgt, %1, %453 : vector<8x1xi32>
    %455 = arith.extui %454 : vector<8x1xi1> to vector<8x1xi32>
    %456 = arith.sitofp %455 : vector<8x1xi32> to vector<8x1xf32>
    %457 = vector.broadcast %456 : vector<8x1xf32> to vector<8x32xf32>
    %458 = arith.mulf %457, %452 : vector<8x32xf32>
    %cst_67 = arith.constant 1.000000e+00 : f32
    %459 = vector.broadcast %cst_67 : f32 to vector<8x1xf32>
    %460 = arith.subf %459, %456 : vector<8x1xf32>
    %461 = vector.broadcast %460 : vector<8x1xf32> to vector<8x32xf32>
    %462 = arith.mulf %461, %425 : vector<8x32xf32>
    %463 = arith.addf %458, %462 : vector<8x32xf32>
    %464 = vector.broadcast %456 : vector<8x1xf32> to vector<8x32xf32>
    %465 = arith.mulf %464, %450 : vector<8x32xf32>
    %cst_68 = arith.constant 1.000000e+00 : f32
    %466 = vector.broadcast %cst_68 : f32 to vector<8x1xf32>
    %467 = arith.subf %466, %456 : vector<8x1xf32>
    %468 = vector.broadcast %467 : vector<8x1xf32> to vector<8x32xf32>
    %469 = arith.mulf %468, %432 : vector<8x32xf32>
    %470 = arith.addf %465, %469 : vector<8x32xf32>
    %471 = vector.broadcast %456 : vector<8x1xf32> to vector<8x32xf32>
    %472 = arith.mulf %471, %452 : vector<8x32xf32>
    %473 = vector.extract_strided_slice %319 {offsets = [24, 0], sizes = [8, 128], strides = [1, 1]} : vector<64x128xf32> to vector<8x128xf32>
    %cst_69 = arith.constant dense<0.000000e+00> : vector<8x128xf32>
    %474 = tpu.matmul %463, %320, %cst_69 {dimension_numbers = #tpu.dot_dimension_numbers<[1], [0], [0], [1], [0, 0, 1, 1], [], []>} : vector<8x32xf32>, vector<32x128xf32>, vector<8x128xf32> -> vector<8x128xf32>
    %475 = arith.addf %473, %474 : vector<8x128xf32>
    %476 = arith.negf %475 : vector<8x128xf32>
    %477 = math.exp %476 : vector<8x128xf32>
    %cst_70 = arith.constant 1.000000e+00 : f32
    %478 = vector.broadcast %cst_70 : f32 to vector<8x128xf32>
    %479 = arith.addf %478, %477 : vector<8x128xf32>
    %480 = arith.divf %478, %479 : vector<8x128xf32>
    %481 = math.tanh %475 : vector<8x128xf32>
    %482 = vector.extract_strided_slice %480 {offsets = [0, 0], sizes = [8, 32], strides = [1, 1]} : vector<8x128xf32> to vector<8x32xf32>
    %483 = vector.extract_strided_slice %480 {offsets = [0, 32], sizes = [8, 32], strides = [1, 1]} : vector<8x128xf32> to vector<8x32xf32>
    %484 = vector.extract_strided_slice %481 {offsets = [0, 64], sizes = [8, 32], strides = [1, 1]} : vector<8x128xf32> to vector<8x32xf32>
    %485 = vector.extract_strided_slice %480 {offsets = [0, 96], sizes = [8, 32], strides = [1, 1]} : vector<8x128xf32> to vector<8x32xf32>
    %486 = arith.mulf %483, %470 : vector<8x32xf32>
    %487 = arith.mulf %482, %484 : vector<8x32xf32>
    %488 = arith.addf %486, %487 : vector<8x32xf32>
    %489 = math.tanh %488 : vector<8x32xf32>
    %490 = arith.mulf %485, %489 : vector<8x32xf32>
    %c3_i32_71 = arith.constant 3 : i32
    %491 = vector.broadcast %c3_i32_71 : i32 to vector<8x1xi32>
    %492 = arith.cmpi sgt, %1, %491 : vector<8x1xi32>
    %493 = arith.extui %492 : vector<8x1xi1> to vector<8x1xi32>
    %494 = arith.sitofp %493 : vector<8x1xi32> to vector<8x1xf32>
    %495 = vector.broadcast %494 : vector<8x1xf32> to vector<8x32xf32>
    %496 = arith.mulf %495, %490 : vector<8x32xf32>
    %cst_72 = arith.constant 1.000000e+00 : f32
    %497 = vector.broadcast %cst_72 : f32 to vector<8x1xf32>
    %498 = arith.subf %497, %494 : vector<8x1xf32>
    %499 = vector.broadcast %498 : vector<8x1xf32> to vector<8x32xf32>
    %500 = arith.mulf %499, %463 : vector<8x32xf32>
    %501 = arith.addf %496, %500 : vector<8x32xf32>
    %502 = vector.broadcast %494 : vector<8x1xf32> to vector<8x32xf32>
    %503 = arith.mulf %502, %488 : vector<8x32xf32>
    %cst_73 = arith.constant 1.000000e+00 : f32
    %504 = vector.broadcast %cst_73 : f32 to vector<8x1xf32>
    %505 = arith.subf %504, %494 : vector<8x1xf32>
    %506 = vector.broadcast %505 : vector<8x1xf32> to vector<8x32xf32>
    %507 = arith.mulf %506, %470 : vector<8x32xf32>
    %508 = arith.addf %503, %507 : vector<8x32xf32>
    %509 = vector.broadcast %494 : vector<8x1xf32> to vector<8x32xf32>
    %510 = arith.mulf %509, %490 : vector<8x32xf32>
    %511 = vector.extract_strided_slice %319 {offsets = [16, 0], sizes = [8, 128], strides = [1, 1]} : vector<64x128xf32> to vector<8x128xf32>
    %cst_74 = arith.constant dense<0.000000e+00> : vector<8x128xf32>
    %512 = tpu.matmul %501, %320, %cst_74 {dimension_numbers = #tpu.dot_dimension_numbers<[1], [0], [0], [1], [0, 0, 1, 1], [], []>} : vector<8x32xf32>, vector<32x128xf32>, vector<8x128xf32> -> vector<8x128xf32>
    %513 = arith.addf %511, %512 : vector<8x128xf32>
    %514 = arith.negf %513 : vector<8x128xf32>
    %515 = math.exp %514 : vector<8x128xf32>
    %cst_75 = arith.constant 1.000000e+00 : f32
    %516 = vector.broadcast %cst_75 : f32 to vector<8x128xf32>
    %517 = arith.addf %516, %515 : vector<8x128xf32>
    %518 = arith.divf %516, %517 : vector<8x128xf32>
    %519 = math.tanh %513 : vector<8x128xf32>
    %520 = vector.extract_strided_slice %518 {offsets = [0, 0], sizes = [8, 32], strides = [1, 1]} : vector<8x128xf32> to vector<8x32xf32>
    %521 = vector.extract_strided_slice %518 {offsets = [0, 32], sizes = [8, 32], strides = [1, 1]} : vector<8x128xf32> to vector<8x32xf32>
    %522 = vector.extract_strided_slice %519 {offsets = [0, 64], sizes = [8, 32], strides = [1, 1]} : vector<8x128xf32> to vector<8x32xf32>
    %523 = vector.extract_strided_slice %518 {offsets = [0, 96], sizes = [8, 32], strides = [1, 1]} : vector<8x128xf32> to vector<8x32xf32>
    %524 = arith.mulf %521, %508 : vector<8x32xf32>
    %525 = arith.mulf %520, %522 : vector<8x32xf32>
    %526 = arith.addf %524, %525 : vector<8x32xf32>
    %527 = math.tanh %526 : vector<8x32xf32>
    %528 = arith.mulf %523, %527 : vector<8x32xf32>
    %c2_i32_76 = arith.constant 2 : i32
    %529 = vector.broadcast %c2_i32_76 : i32 to vector<8x1xi32>
    %530 = arith.cmpi sgt, %1, %529 : vector<8x1xi32>
    %531 = arith.extui %530 : vector<8x1xi1> to vector<8x1xi32>
    %532 = arith.sitofp %531 : vector<8x1xi32> to vector<8x1xf32>
    %533 = vector.broadcast %532 : vector<8x1xf32> to vector<8x32xf32>
    %534 = arith.mulf %533, %528 : vector<8x32xf32>
    %cst_77 = arith.constant 1.000000e+00 : f32
    %535 = vector.broadcast %cst_77 : f32 to vector<8x1xf32>
    %536 = arith.subf %535, %532 : vector<8x1xf32>
    %537 = vector.broadcast %536 : vector<8x1xf32> to vector<8x32xf32>
    %538 = arith.mulf %537, %501 : vector<8x32xf32>
    %539 = arith.addf %534, %538 : vector<8x32xf32>
    %540 = vector.broadcast %532 : vector<8x1xf32> to vector<8x32xf32>
    %541 = arith.mulf %540, %526 : vector<8x32xf32>
    %cst_78 = arith.constant 1.000000e+00 : f32
    %542 = vector.broadcast %cst_78 : f32 to vector<8x1xf32>
    %543 = arith.subf %542, %532 : vector<8x1xf32>
    %544 = vector.broadcast %543 : vector<8x1xf32> to vector<8x32xf32>
    %545 = arith.mulf %544, %508 : vector<8x32xf32>
    %546 = arith.addf %541, %545 : vector<8x32xf32>
    %547 = vector.broadcast %532 : vector<8x1xf32> to vector<8x32xf32>
    %548 = arith.mulf %547, %528 : vector<8x32xf32>
    %549 = vector.extract_strided_slice %319 {offsets = [8, 0], sizes = [8, 128], strides = [1, 1]} : vector<64x128xf32> to vector<8x128xf32>
    %cst_79 = arith.constant dense<0.000000e+00> : vector<8x128xf32>
    %550 = tpu.matmul %539, %320, %cst_79 {dimension_numbers = #tpu.dot_dimension_numbers<[1], [0], [0], [1], [0, 0, 1, 1], [], []>} : vector<8x32xf32>, vector<32x128xf32>, vector<8x128xf32> -> vector<8x128xf32>
    %551 = arith.addf %549, %550 : vector<8x128xf32>
    %552 = arith.negf %551 : vector<8x128xf32>
    %553 = math.exp %552 : vector<8x128xf32>
    %cst_80 = arith.constant 1.000000e+00 : f32
    %554 = vector.broadcast %cst_80 : f32 to vector<8x128xf32>
    %555 = arith.addf %554, %553 : vector<8x128xf32>
    %556 = arith.divf %554, %555 : vector<8x128xf32>
    %557 = math.tanh %551 : vector<8x128xf32>
    %558 = vector.extract_strided_slice %556 {offsets = [0, 0], sizes = [8, 32], strides = [1, 1]} : vector<8x128xf32> to vector<8x32xf32>
    %559 = vector.extract_strided_slice %556 {offsets = [0, 32], sizes = [8, 32], strides = [1, 1]} : vector<8x128xf32> to vector<8x32xf32>
    %560 = vector.extract_strided_slice %557 {offsets = [0, 64], sizes = [8, 32], strides = [1, 1]} : vector<8x128xf32> to vector<8x32xf32>
    %561 = vector.extract_strided_slice %556 {offsets = [0, 96], sizes = [8, 32], strides = [1, 1]} : vector<8x128xf32> to vector<8x32xf32>
    %562 = arith.mulf %559, %546 : vector<8x32xf32>
    %563 = arith.mulf %558, %560 : vector<8x32xf32>
    %564 = arith.addf %562, %563 : vector<8x32xf32>
    %565 = math.tanh %564 : vector<8x32xf32>
    %566 = arith.mulf %561, %565 : vector<8x32xf32>
    %c1_i32_81 = arith.constant 1 : i32
    %567 = vector.broadcast %c1_i32_81 : i32 to vector<8x1xi32>
    %568 = arith.cmpi sgt, %1, %567 : vector<8x1xi32>
    %569 = arith.extui %568 : vector<8x1xi1> to vector<8x1xi32>
    %570 = arith.sitofp %569 : vector<8x1xi32> to vector<8x1xf32>
    %571 = vector.broadcast %570 : vector<8x1xf32> to vector<8x32xf32>
    %572 = arith.mulf %571, %566 : vector<8x32xf32>
    %cst_82 = arith.constant 1.000000e+00 : f32
    %573 = vector.broadcast %cst_82 : f32 to vector<8x1xf32>
    %574 = arith.subf %573, %570 : vector<8x1xf32>
    %575 = vector.broadcast %574 : vector<8x1xf32> to vector<8x32xf32>
    %576 = arith.mulf %575, %539 : vector<8x32xf32>
    %577 = arith.addf %572, %576 : vector<8x32xf32>
    %578 = vector.broadcast %570 : vector<8x1xf32> to vector<8x32xf32>
    %579 = arith.mulf %578, %564 : vector<8x32xf32>
    %cst_83 = arith.constant 1.000000e+00 : f32
    %580 = vector.broadcast %cst_83 : f32 to vector<8x1xf32>
    %581 = arith.subf %580, %570 : vector<8x1xf32>
    %582 = vector.broadcast %581 : vector<8x1xf32> to vector<8x32xf32>
    %583 = arith.mulf %582, %546 : vector<8x32xf32>
    %584 = arith.addf %579, %583 : vector<8x32xf32>
    %585 = vector.broadcast %570 : vector<8x1xf32> to vector<8x32xf32>
    %586 = arith.mulf %585, %566 : vector<8x32xf32>
    %587 = vector.extract_strided_slice %319 {offsets = [0, 0], sizes = [8, 128], strides = [1, 1]} : vector<64x128xf32> to vector<8x128xf32>
    %cst_84 = arith.constant dense<0.000000e+00> : vector<8x128xf32>
    %588 = tpu.matmul %577, %320, %cst_84 {dimension_numbers = #tpu.dot_dimension_numbers<[1], [0], [0], [1], [0, 0, 1, 1], [], []>} : vector<8x32xf32>, vector<32x128xf32>, vector<8x128xf32> -> vector<8x128xf32>
    %589 = arith.addf %587, %588 : vector<8x128xf32>
    %590 = arith.negf %589 : vector<8x128xf32>
    %591 = math.exp %590 : vector<8x128xf32>
    %cst_85 = arith.constant 1.000000e+00 : f32
    %592 = vector.broadcast %cst_85 : f32 to vector<8x128xf32>
    %593 = arith.addf %592, %591 : vector<8x128xf32>
    %594 = arith.divf %592, %593 : vector<8x128xf32>
    %595 = math.tanh %589 : vector<8x128xf32>
    %596 = vector.extract_strided_slice %594 {offsets = [0, 0], sizes = [8, 32], strides = [1, 1]} : vector<8x128xf32> to vector<8x32xf32>
    %597 = vector.extract_strided_slice %594 {offsets = [0, 32], sizes = [8, 32], strides = [1, 1]} : vector<8x128xf32> to vector<8x32xf32>
    %598 = vector.extract_strided_slice %595 {offsets = [0, 64], sizes = [8, 32], strides = [1, 1]} : vector<8x128xf32> to vector<8x32xf32>
    %599 = vector.extract_strided_slice %594 {offsets = [0, 96], sizes = [8, 32], strides = [1, 1]} : vector<8x128xf32> to vector<8x32xf32>
    %600 = arith.mulf %597, %584 : vector<8x32xf32>
    %601 = arith.mulf %596, %598 : vector<8x32xf32>
    %602 = arith.addf %600, %601 : vector<8x32xf32>
    %603 = math.tanh %602 : vector<8x32xf32>
    %604 = arith.mulf %599, %603 : vector<8x32xf32>
    %c0_i32_86 = arith.constant 0 : i32
    %605 = vector.broadcast %c0_i32_86 : i32 to vector<8x1xi32>
    %606 = arith.cmpi sgt, %1, %605 : vector<8x1xi32>
    %607 = arith.extui %606 : vector<8x1xi1> to vector<8x1xi32>
    %608 = arith.sitofp %607 : vector<8x1xi32> to vector<8x1xf32>
    %609 = vector.broadcast %608 : vector<8x1xf32> to vector<8x32xf32>
    %610 = arith.mulf %609, %604 : vector<8x32xf32>
    %cst_87 = arith.constant 1.000000e+00 : f32
    %611 = vector.broadcast %cst_87 : f32 to vector<8x1xf32>
    %612 = arith.subf %611, %608 : vector<8x1xf32>
    %613 = vector.broadcast %612 : vector<8x1xf32> to vector<8x32xf32>
    %614 = arith.mulf %613, %577 : vector<8x32xf32>
    %615 = arith.addf %610, %614 : vector<8x32xf32>
    %616 = vector.broadcast %608 : vector<8x1xf32> to vector<8x32xf32>
    %617 = arith.mulf %616, %604 : vector<8x32xf32>
    %618 = tpu.concatenate %59, %617 in 1 : vector<8x32xf32>, vector<8x32xf32> -> vector<8x64xf32>
    %619 = tpu.concatenate %97, %586 in 1 : vector<8x32xf32>, vector<8x32xf32> -> vector<8x64xf32>
    %620 = tpu.concatenate %135, %548 in 1 : vector<8x32xf32>, vector<8x32xf32> -> vector<8x64xf32>
    %621 = tpu.concatenate %173, %510 in 1 : vector<8x32xf32>, vector<8x32xf32> -> vector<8x64xf32>
    %622 = tpu.concatenate %211, %472 in 1 : vector<8x32xf32>, vector<8x32xf32> -> vector<8x64xf32>
    %623 = tpu.concatenate %249, %434 in 1 : vector<8x32xf32>, vector<8x32xf32> -> vector<8x64xf32>
    %624 = tpu.concatenate %287, %396 in 1 : vector<8x32xf32>, vector<8x32xf32> -> vector<8x64xf32>
    %625 = tpu.concatenate %318, %358 in 1 : vector<8x32xf32>, vector<8x32xf32> -> vector<8x64xf32>
    %626 = tpu.concatenate %618, %619, %620, %621, %622, %623, %624, %625 in 0 : vector<8x64xf32>, vector<8x64xf32>, vector<8x64xf32>, vector<8x64xf32>, vector<8x64xf32>, vector<8x64xf32>, vector<8x64xf32>, vector<8x64xf32> -> vector<64x64xf32>
    %c0_88 = arith.constant 0 : index
    %c0_89 = arith.constant 0 : index
    %627 = vector.load %arg10[%c0_88, %c0_89] : memref<64x256xf32, #tpu.memory_space<vmem>>, vector<64x256xf32>
    %cst_90 = arith.constant dense<0.000000e+00> : vector<64x256xf32>
    %628 = tpu.matmul %626, %627, %cst_90 {dimension_numbers = #tpu.dot_dimension_numbers<[1], [0], [0], [1], [0, 0, 1, 1], [], []>} : vector<64x64xf32>, vector<64x256xf32>, vector<64x256xf32> -> vector<64x256xf32>
    %c0_91 = arith.constant 0 : index
    %c0_92 = arith.constant 0 : index
    %629 = vector.load %arg13[%c0_91, %c0_92] : memref<1x256xf32, #tpu.memory_space<vmem>>, vector<1x256xf32>
    %630 = vector.broadcast %629 : vector<1x256xf32> to vector<64x256xf32>
    %631 = arith.addf %628, %630 : vector<64x256xf32>
    %632 = vector.extract_strided_slice %631 {offsets = [0, 0], sizes = [64, 128], strides = [1, 1]} : vector<64x256xf32> to vector<64x128xf32>
    %c0_93 = arith.constant 0 : index
    %c0_94 = arith.constant 0 : index
    %633 = vector.load %arg11[%c0_93, %c0_94] : memref<32x128xf32, #tpu.memory_space<vmem>>, vector<32x128xf32>
    %634 = vector.extract_strided_slice %632 {offsets = [0, 0], sizes = [8, 128], strides = [1, 1]} : vector<64x128xf32> to vector<8x128xf32>
    %cst_95 = arith.constant dense<0.000000e+00> : vector<8x128xf32>
    %635 = tpu.matmul %3, %633, %cst_95 {dimension_numbers = #tpu.dot_dimension_numbers<[1], [0], [0], [1], [0, 0, 1, 1], [], []>} : vector<8x32xf32>, vector<32x128xf32>, vector<8x128xf32> -> vector<8x128xf32>
    %636 = arith.addf %634, %635 : vector<8x128xf32>
    %637 = arith.negf %636 : vector<8x128xf32>
    %638 = math.exp %637 : vector<8x128xf32>
    %cst_96 = arith.constant 1.000000e+00 : f32
    %639 = vector.broadcast %cst_96 : f32 to vector<8x128xf32>
    %640 = arith.addf %639, %638 : vector<8x128xf32>
    %641 = arith.divf %639, %640 : vector<8x128xf32>
    %642 = math.tanh %636 : vector<8x128xf32>
    %643 = vector.extract_strided_slice %641 {offsets = [0, 0], sizes = [8, 32], strides = [1, 1]} : vector<8x128xf32> to vector<8x32xf32>
    %644 = vector.extract_strided_slice %641 {offsets = [0, 32], sizes = [8, 32], strides = [1, 1]} : vector<8x128xf32> to vector<8x32xf32>
    %645 = vector.extract_strided_slice %642 {offsets = [0, 64], sizes = [8, 32], strides = [1, 1]} : vector<8x128xf32> to vector<8x32xf32>
    %646 = vector.extract_strided_slice %641 {offsets = [0, 96], sizes = [8, 32], strides = [1, 1]} : vector<8x128xf32> to vector<8x32xf32>
    %647 = arith.mulf %644, %3 : vector<8x32xf32>
    %648 = arith.mulf %643, %645 : vector<8x32xf32>
    %649 = arith.addf %647, %648 : vector<8x32xf32>
    %650 = math.tanh %649 : vector<8x32xf32>
    %651 = arith.mulf %646, %650 : vector<8x32xf32>
    %c0_i32_97 = arith.constant 0 : i32
    %652 = vector.broadcast %c0_i32_97 : i32 to vector<8x1xi32>
    %653 = arith.cmpi sgt, %1, %652 : vector<8x1xi32>
    %654 = arith.extui %653 : vector<8x1xi1> to vector<8x1xi32>
    %655 = arith.sitofp %654 : vector<8x1xi32> to vector<8x1xf32>
    %656 = vector.broadcast %655 : vector<8x1xf32> to vector<8x32xf32>
    %657 = arith.mulf %656, %651 : vector<8x32xf32>
    %cst_98 = arith.constant 1.000000e+00 : f32
    %658 = vector.broadcast %cst_98 : f32 to vector<8x1xf32>
    %659 = arith.subf %658, %655 : vector<8x1xf32>
    %660 = vector.broadcast %659 : vector<8x1xf32> to vector<8x32xf32>
    %661 = arith.mulf %660, %3 : vector<8x32xf32>
    %662 = arith.addf %657, %661 : vector<8x32xf32>
    %663 = vector.broadcast %655 : vector<8x1xf32> to vector<8x32xf32>
    %664 = arith.mulf %663, %649 : vector<8x32xf32>
    %cst_99 = arith.constant 1.000000e+00 : f32
    %665 = vector.broadcast %cst_99 : f32 to vector<8x1xf32>
    %666 = arith.subf %665, %655 : vector<8x1xf32>
    %667 = vector.broadcast %666 : vector<8x1xf32> to vector<8x32xf32>
    %668 = arith.mulf %667, %3 : vector<8x32xf32>
    %669 = arith.addf %664, %668 : vector<8x32xf32>
    %670 = vector.extract_strided_slice %632 {offsets = [8, 0], sizes = [8, 128], strides = [1, 1]} : vector<64x128xf32> to vector<8x128xf32>
    %cst_100 = arith.constant dense<0.000000e+00> : vector<8x128xf32>
    %671 = tpu.matmul %662, %633, %cst_100 {dimension_numbers = #tpu.dot_dimension_numbers<[1], [0], [0], [1], [0, 0, 1, 1], [], []>} : vector<8x32xf32>, vector<32x128xf32>, vector<8x128xf32> -> vector<8x128xf32>
    %672 = arith.addf %670, %671 : vector<8x128xf32>
    %673 = arith.negf %672 : vector<8x128xf32>
    %674 = math.exp %673 : vector<8x128xf32>
    %cst_101 = arith.constant 1.000000e+00 : f32
    %675 = vector.broadcast %cst_101 : f32 to vector<8x128xf32>
    %676 = arith.addf %675, %674 : vector<8x128xf32>
    %677 = arith.divf %675, %676 : vector<8x128xf32>
    %678 = math.tanh %672 : vector<8x128xf32>
    %679 = vector.extract_strided_slice %677 {offsets = [0, 0], sizes = [8, 32], strides = [1, 1]} : vector<8x128xf32> to vector<8x32xf32>
    %680 = vector.extract_strided_slice %677 {offsets = [0, 32], sizes = [8, 32], strides = [1, 1]} : vector<8x128xf32> to vector<8x32xf32>
    %681 = vector.extract_strided_slice %678 {offsets = [0, 64], sizes = [8, 32], strides = [1, 1]} : vector<8x128xf32> to vector<8x32xf32>
    %682 = vector.extract_strided_slice %677 {offsets = [0, 96], sizes = [8, 32], strides = [1, 1]} : vector<8x128xf32> to vector<8x32xf32>
    %683 = arith.mulf %680, %669 : vector<8x32xf32>
    %684 = arith.mulf %679, %681 : vector<8x32xf32>
    %685 = arith.addf %683, %684 : vector<8x32xf32>
    %686 = math.tanh %685 : vector<8x32xf32>
    %687 = arith.mulf %682, %686 : vector<8x32xf32>
    %c1_i32_102 = arith.constant 1 : i32
    %688 = vector.broadcast %c1_i32_102 : i32 to vector<8x1xi32>
    %689 = arith.cmpi sgt, %1, %688 : vector<8x1xi32>
    %690 = arith.extui %689 : vector<8x1xi1> to vector<8x1xi32>
    %691 = arith.sitofp %690 : vector<8x1xi32> to vector<8x1xf32>
    %692 = vector.broadcast %691 : vector<8x1xf32> to vector<8x32xf32>
    %693 = arith.mulf %692, %687 : vector<8x32xf32>
    %cst_103 = arith.constant 1.000000e+00 : f32
    %694 = vector.broadcast %cst_103 : f32 to vector<8x1xf32>
    %695 = arith.subf %694, %691 : vector<8x1xf32>
    %696 = vector.broadcast %695 : vector<8x1xf32> to vector<8x32xf32>
    %697 = arith.mulf %696, %662 : vector<8x32xf32>
    %698 = arith.addf %693, %697 : vector<8x32xf32>
    %699 = vector.broadcast %691 : vector<8x1xf32> to vector<8x32xf32>
    %700 = arith.mulf %699, %685 : vector<8x32xf32>
    %cst_104 = arith.constant 1.000000e+00 : f32
    %701 = vector.broadcast %cst_104 : f32 to vector<8x1xf32>
    %702 = arith.subf %701, %691 : vector<8x1xf32>
    %703 = vector.broadcast %702 : vector<8x1xf32> to vector<8x32xf32>
    %704 = arith.mulf %703, %669 : vector<8x32xf32>
    %705 = arith.addf %700, %704 : vector<8x32xf32>
    %706 = vector.extract_strided_slice %632 {offsets = [16, 0], sizes = [8, 128], strides = [1, 1]} : vector<64x128xf32> to vector<8x128xf32>
    %cst_105 = arith.constant dense<0.000000e+00> : vector<8x128xf32>
    %707 = tpu.matmul %698, %633, %cst_105 {dimension_numbers = #tpu.dot_dimension_numbers<[1], [0], [0], [1], [0, 0, 1, 1], [], []>} : vector<8x32xf32>, vector<32x128xf32>, vector<8x128xf32> -> vector<8x128xf32>
    %708 = arith.addf %706, %707 : vector<8x128xf32>
    %709 = arith.negf %708 : vector<8x128xf32>
    %710 = math.exp %709 : vector<8x128xf32>
    %cst_106 = arith.constant 1.000000e+00 : f32
    %711 = vector.broadcast %cst_106 : f32 to vector<8x128xf32>
    %712 = arith.addf %711, %710 : vector<8x128xf32>
    %713 = arith.divf %711, %712 : vector<8x128xf32>
    %714 = math.tanh %708 : vector<8x128xf32>
    %715 = vector.extract_strided_slice %713 {offsets = [0, 0], sizes = [8, 32], strides = [1, 1]} : vector<8x128xf32> to vector<8x32xf32>
    %716 = vector.extract_strided_slice %713 {offsets = [0, 32], sizes = [8, 32], strides = [1, 1]} : vector<8x128xf32> to vector<8x32xf32>
    %717 = vector.extract_strided_slice %714 {offsets = [0, 64], sizes = [8, 32], strides = [1, 1]} : vector<8x128xf32> to vector<8x32xf32>
    %718 = vector.extract_strided_slice %713 {offsets = [0, 96], sizes = [8, 32], strides = [1, 1]} : vector<8x128xf32> to vector<8x32xf32>
    %719 = arith.mulf %716, %705 : vector<8x32xf32>
    %720 = arith.mulf %715, %717 : vector<8x32xf32>
    %721 = arith.addf %719, %720 : vector<8x32xf32>
    %722 = math.tanh %721 : vector<8x32xf32>
    %723 = arith.mulf %718, %722 : vector<8x32xf32>
    %c2_i32_107 = arith.constant 2 : i32
    %724 = vector.broadcast %c2_i32_107 : i32 to vector<8x1xi32>
    %725 = arith.cmpi sgt, %1, %724 : vector<8x1xi32>
    %726 = arith.extui %725 : vector<8x1xi1> to vector<8x1xi32>
    %727 = arith.sitofp %726 : vector<8x1xi32> to vector<8x1xf32>
    %728 = vector.broadcast %727 : vector<8x1xf32> to vector<8x32xf32>
    %729 = arith.mulf %728, %723 : vector<8x32xf32>
    %cst_108 = arith.constant 1.000000e+00 : f32
    %730 = vector.broadcast %cst_108 : f32 to vector<8x1xf32>
    %731 = arith.subf %730, %727 : vector<8x1xf32>
    %732 = vector.broadcast %731 : vector<8x1xf32> to vector<8x32xf32>
    %733 = arith.mulf %732, %698 : vector<8x32xf32>
    %734 = arith.addf %729, %733 : vector<8x32xf32>
    %735 = vector.broadcast %727 : vector<8x1xf32> to vector<8x32xf32>
    %736 = arith.mulf %735, %721 : vector<8x32xf32>
    %cst_109 = arith.constant 1.000000e+00 : f32
    %737 = vector.broadcast %cst_109 : f32 to vector<8x1xf32>
    %738 = arith.subf %737, %727 : vector<8x1xf32>
    %739 = vector.broadcast %738 : vector<8x1xf32> to vector<8x32xf32>
    %740 = arith.mulf %739, %705 : vector<8x32xf32>
    %741 = arith.addf %736, %740 : vector<8x32xf32>
    %742 = vector.extract_strided_slice %632 {offsets = [24, 0], sizes = [8, 128], strides = [1, 1]} : vector<64x128xf32> to vector<8x128xf32>
    %cst_110 = arith.constant dense<0.000000e+00> : vector<8x128xf32>
    %743 = tpu.matmul %734, %633, %cst_110 {dimension_numbers = #tpu.dot_dimension_numbers<[1], [0], [0], [1], [0, 0, 1, 1], [], []>} : vector<8x32xf32>, vector<32x128xf32>, vector<8x128xf32> -> vector<8x128xf32>
    %744 = arith.addf %742, %743 : vector<8x128xf32>
    %745 = arith.negf %744 : vector<8x128xf32>
    %746 = math.exp %745 : vector<8x128xf32>
    %cst_111 = arith.constant 1.000000e+00 : f32
    %747 = vector.broadcast %cst_111 : f32 to vector<8x128xf32>
    %748 = arith.addf %747, %746 : vector<8x128xf32>
    %749 = arith.divf %747, %748 : vector<8x128xf32>
    %750 = math.tanh %744 : vector<8x128xf32>
    %751 = vector.extract_strided_slice %749 {offsets = [0, 0], sizes = [8, 32], strides = [1, 1]} : vector<8x128xf32> to vector<8x32xf32>
    %752 = vector.extract_strided_slice %749 {offsets = [0, 32], sizes = [8, 32], strides = [1, 1]} : vector<8x128xf32> to vector<8x32xf32>
    %753 = vector.extract_strided_slice %750 {offsets = [0, 64], sizes = [8, 32], strides = [1, 1]} : vector<8x128xf32> to vector<8x32xf32>
    %754 = vector.extract_strided_slice %749 {offsets = [0, 96], sizes = [8, 32], strides = [1, 1]} : vector<8x128xf32> to vector<8x32xf32>
    %755 = arith.mulf %752, %741 : vector<8x32xf32>
    %756 = arith.mulf %751, %753 : vector<8x32xf32>
    %757 = arith.addf %755, %756 : vector<8x32xf32>
    %758 = math.tanh %757 : vector<8x32xf32>
    %759 = arith.mulf %754, %758 : vector<8x32xf32>
    %c3_i32_112 = arith.constant 3 : i32
    %760 = vector.broadcast %c3_i32_112 : i32 to vector<8x1xi32>
    %761 = arith.cmpi sgt, %1, %760 : vector<8x1xi32>
    %762 = arith.extui %761 : vector<8x1xi1> to vector<8x1xi32>
    %763 = arith.sitofp %762 : vector<8x1xi32> to vector<8x1xf32>
    %764 = vector.broadcast %763 : vector<8x1xf32> to vector<8x32xf32>
    %765 = arith.mulf %764, %759 : vector<8x32xf32>
    %cst_113 = arith.constant 1.000000e+00 : f32
    %766 = vector.broadcast %cst_113 : f32 to vector<8x1xf32>
    %767 = arith.subf %766, %763 : vector<8x1xf32>
    %768 = vector.broadcast %767 : vector<8x1xf32> to vector<8x32xf32>
    %769 = arith.mulf %768, %734 : vector<8x32xf32>
    %770 = arith.addf %765, %769 : vector<8x32xf32>
    %771 = vector.broadcast %763 : vector<8x1xf32> to vector<8x32xf32>
    %772 = arith.mulf %771, %757 : vector<8x32xf32>
    %cst_114 = arith.constant 1.000000e+00 : f32
    %773 = vector.broadcast %cst_114 : f32 to vector<8x1xf32>
    %774 = arith.subf %773, %763 : vector<8x1xf32>
    %775 = vector.broadcast %774 : vector<8x1xf32> to vector<8x32xf32>
    %776 = arith.mulf %775, %741 : vector<8x32xf32>
    %777 = arith.addf %772, %776 : vector<8x32xf32>
    %778 = vector.extract_strided_slice %632 {offsets = [32, 0], sizes = [8, 128], strides = [1, 1]} : vector<64x128xf32> to vector<8x128xf32>
    %cst_115 = arith.constant dense<0.000000e+00> : vector<8x128xf32>
    %779 = tpu.matmul %770, %633, %cst_115 {dimension_numbers = #tpu.dot_dimension_numbers<[1], [0], [0], [1], [0, 0, 1, 1], [], []>} : vector<8x32xf32>, vector<32x128xf32>, vector<8x128xf32> -> vector<8x128xf32>
    %780 = arith.addf %778, %779 : vector<8x128xf32>
    %781 = arith.negf %780 : vector<8x128xf32>
    %782 = math.exp %781 : vector<8x128xf32>
    %cst_116 = arith.constant 1.000000e+00 : f32
    %783 = vector.broadcast %cst_116 : f32 to vector<8x128xf32>
    %784 = arith.addf %783, %782 : vector<8x128xf32>
    %785 = arith.divf %783, %784 : vector<8x128xf32>
    %786 = math.tanh %780 : vector<8x128xf32>
    %787 = vector.extract_strided_slice %785 {offsets = [0, 0], sizes = [8, 32], strides = [1, 1]} : vector<8x128xf32> to vector<8x32xf32>
    %788 = vector.extract_strided_slice %785 {offsets = [0, 32], sizes = [8, 32], strides = [1, 1]} : vector<8x128xf32> to vector<8x32xf32>
    %789 = vector.extract_strided_slice %786 {offsets = [0, 64], sizes = [8, 32], strides = [1, 1]} : vector<8x128xf32> to vector<8x32xf32>
    %790 = vector.extract_strided_slice %785 {offsets = [0, 96], sizes = [8, 32], strides = [1, 1]} : vector<8x128xf32> to vector<8x32xf32>
    %791 = arith.mulf %788, %777 : vector<8x32xf32>
    %792 = arith.mulf %787, %789 : vector<8x32xf32>
    %793 = arith.addf %791, %792 : vector<8x32xf32>
    %794 = math.tanh %793 : vector<8x32xf32>
    %795 = arith.mulf %790, %794 : vector<8x32xf32>
    %c4_i32_117 = arith.constant 4 : i32
    %796 = vector.broadcast %c4_i32_117 : i32 to vector<8x1xi32>
    %797 = arith.cmpi sgt, %1, %796 : vector<8x1xi32>
    %798 = arith.extui %797 : vector<8x1xi1> to vector<8x1xi32>
    %799 = arith.sitofp %798 : vector<8x1xi32> to vector<8x1xf32>
    %800 = vector.broadcast %799 : vector<8x1xf32> to vector<8x32xf32>
    %801 = arith.mulf %800, %795 : vector<8x32xf32>
    %cst_118 = arith.constant 1.000000e+00 : f32
    %802 = vector.broadcast %cst_118 : f32 to vector<8x1xf32>
    %803 = arith.subf %802, %799 : vector<8x1xf32>
    %804 = vector.broadcast %803 : vector<8x1xf32> to vector<8x32xf32>
    %805 = arith.mulf %804, %770 : vector<8x32xf32>
    %806 = arith.addf %801, %805 : vector<8x32xf32>
    %807 = vector.broadcast %799 : vector<8x1xf32> to vector<8x32xf32>
    %808 = arith.mulf %807, %793 : vector<8x32xf32>
    %cst_119 = arith.constant 1.000000e+00 : f32
    %809 = vector.broadcast %cst_119 : f32 to vector<8x1xf32>
    %810 = arith.subf %809, %799 : vector<8x1xf32>
    %811 = vector.broadcast %810 : vector<8x1xf32> to vector<8x32xf32>
    %812 = arith.mulf %811, %777 : vector<8x32xf32>
    %813 = arith.addf %808, %812 : vector<8x32xf32>
    %814 = vector.extract_strided_slice %632 {offsets = [40, 0], sizes = [8, 128], strides = [1, 1]} : vector<64x128xf32> to vector<8x128xf32>
    %cst_120 = arith.constant dense<0.000000e+00> : vector<8x128xf32>
    %815 = tpu.matmul %806, %633, %cst_120 {dimension_numbers = #tpu.dot_dimension_numbers<[1], [0], [0], [1], [0, 0, 1, 1], [], []>} : vector<8x32xf32>, vector<32x128xf32>, vector<8x128xf32> -> vector<8x128xf32>
    %816 = arith.addf %814, %815 : vector<8x128xf32>
    %817 = arith.negf %816 : vector<8x128xf32>
    %818 = math.exp %817 : vector<8x128xf32>
    %cst_121 = arith.constant 1.000000e+00 : f32
    %819 = vector.broadcast %cst_121 : f32 to vector<8x128xf32>
    %820 = arith.addf %819, %818 : vector<8x128xf32>
    %821 = arith.divf %819, %820 : vector<8x128xf32>
    %822 = math.tanh %816 : vector<8x128xf32>
    %823 = vector.extract_strided_slice %821 {offsets = [0, 0], sizes = [8, 32], strides = [1, 1]} : vector<8x128xf32> to vector<8x32xf32>
    %824 = vector.extract_strided_slice %821 {offsets = [0, 32], sizes = [8, 32], strides = [1, 1]} : vector<8x128xf32> to vector<8x32xf32>
    %825 = vector.extract_strided_slice %822 {offsets = [0, 64], sizes = [8, 32], strides = [1, 1]} : vector<8x128xf32> to vector<8x32xf32>
    %826 = vector.extract_strided_slice %821 {offsets = [0, 96], sizes = [8, 32], strides = [1, 1]} : vector<8x128xf32> to vector<8x32xf32>
    %827 = arith.mulf %824, %813 : vector<8x32xf32>
    %828 = arith.mulf %823, %825 : vector<8x32xf32>
    %829 = arith.addf %827, %828 : vector<8x32xf32>
    %830 = math.tanh %829 : vector<8x32xf32>
    %831 = arith.mulf %826, %830 : vector<8x32xf32>
    %c5_i32_122 = arith.constant 5 : i32
    %832 = vector.broadcast %c5_i32_122 : i32 to vector<8x1xi32>
    %833 = arith.cmpi sgt, %1, %832 : vector<8x1xi32>
    %834 = arith.extui %833 : vector<8x1xi1> to vector<8x1xi32>
    %835 = arith.sitofp %834 : vector<8x1xi32> to vector<8x1xf32>
    %836 = vector.broadcast %835 : vector<8x1xf32> to vector<8x32xf32>
    %837 = arith.mulf %836, %831 : vector<8x32xf32>
    %cst_123 = arith.constant 1.000000e+00 : f32
    %838 = vector.broadcast %cst_123 : f32 to vector<8x1xf32>
    %839 = arith.subf %838, %835 : vector<8x1xf32>
    %840 = vector.broadcast %839 : vector<8x1xf32> to vector<8x32xf32>
    %841 = arith.mulf %840, %806 : vector<8x32xf32>
    %842 = arith.addf %837, %841 : vector<8x32xf32>
    %843 = vector.broadcast %835 : vector<8x1xf32> to vector<8x32xf32>
    %844 = arith.mulf %843, %829 : vector<8x32xf32>
    %cst_124 = arith.constant 1.000000e+00 : f32
    %845 = vector.broadcast %cst_124 : f32 to vector<8x1xf32>
    %846 = arith.subf %845, %835 : vector<8x1xf32>
    %847 = vector.broadcast %846 : vector<8x1xf32> to vector<8x32xf32>
    %848 = arith.mulf %847, %813 : vector<8x32xf32>
    %849 = arith.addf %844, %848 : vector<8x32xf32>
    %850 = vector.extract_strided_slice %632 {offsets = [48, 0], sizes = [8, 128], strides = [1, 1]} : vector<64x128xf32> to vector<8x128xf32>
    %cst_125 = arith.constant dense<0.000000e+00> : vector<8x128xf32>
    %851 = tpu.matmul %842, %633, %cst_125 {dimension_numbers = #tpu.dot_dimension_numbers<[1], [0], [0], [1], [0, 0, 1, 1], [], []>} : vector<8x32xf32>, vector<32x128xf32>, vector<8x128xf32> -> vector<8x128xf32>
    %852 = arith.addf %850, %851 : vector<8x128xf32>
    %853 = arith.negf %852 : vector<8x128xf32>
    %854 = math.exp %853 : vector<8x128xf32>
    %cst_126 = arith.constant 1.000000e+00 : f32
    %855 = vector.broadcast %cst_126 : f32 to vector<8x128xf32>
    %856 = arith.addf %855, %854 : vector<8x128xf32>
    %857 = arith.divf %855, %856 : vector<8x128xf32>
    %858 = math.tanh %852 : vector<8x128xf32>
    %859 = vector.extract_strided_slice %857 {offsets = [0, 0], sizes = [8, 32], strides = [1, 1]} : vector<8x128xf32> to vector<8x32xf32>
    %860 = vector.extract_strided_slice %857 {offsets = [0, 32], sizes = [8, 32], strides = [1, 1]} : vector<8x128xf32> to vector<8x32xf32>
    %861 = vector.extract_strided_slice %858 {offsets = [0, 64], sizes = [8, 32], strides = [1, 1]} : vector<8x128xf32> to vector<8x32xf32>
    %862 = vector.extract_strided_slice %857 {offsets = [0, 96], sizes = [8, 32], strides = [1, 1]} : vector<8x128xf32> to vector<8x32xf32>
    %863 = arith.mulf %860, %849 : vector<8x32xf32>
    %864 = arith.mulf %859, %861 : vector<8x32xf32>
    %865 = arith.addf %863, %864 : vector<8x32xf32>
    %866 = math.tanh %865 : vector<8x32xf32>
    %867 = arith.mulf %862, %866 : vector<8x32xf32>
    %c6_i32_127 = arith.constant 6 : i32
    %868 = vector.broadcast %c6_i32_127 : i32 to vector<8x1xi32>
    %869 = arith.cmpi sgt, %1, %868 : vector<8x1xi32>
    %870 = arith.extui %869 : vector<8x1xi1> to vector<8x1xi32>
    %871 = arith.sitofp %870 : vector<8x1xi32> to vector<8x1xf32>
    %872 = vector.broadcast %871 : vector<8x1xf32> to vector<8x32xf32>
    %873 = arith.mulf %872, %867 : vector<8x32xf32>
    %cst_128 = arith.constant 1.000000e+00 : f32
    %874 = vector.broadcast %cst_128 : f32 to vector<8x1xf32>
    %875 = arith.subf %874, %871 : vector<8x1xf32>
    %876 = vector.broadcast %875 : vector<8x1xf32> to vector<8x32xf32>
    %877 = arith.mulf %876, %842 : vector<8x32xf32>
    %878 = arith.addf %873, %877 : vector<8x32xf32>
    %879 = vector.broadcast %871 : vector<8x1xf32> to vector<8x32xf32>
    %880 = arith.mulf %879, %865 : vector<8x32xf32>
    %cst_129 = arith.constant 1.000000e+00 : f32
    %881 = vector.broadcast %cst_129 : f32 to vector<8x1xf32>
    %882 = arith.subf %881, %871 : vector<8x1xf32>
    %883 = vector.broadcast %882 : vector<8x1xf32> to vector<8x32xf32>
    %884 = arith.mulf %883, %849 : vector<8x32xf32>
    %885 = arith.addf %880, %884 : vector<8x32xf32>
    %886 = vector.extract_strided_slice %632 {offsets = [56, 0], sizes = [8, 128], strides = [1, 1]} : vector<64x128xf32> to vector<8x128xf32>
    %cst_130 = arith.constant dense<0.000000e+00> : vector<8x128xf32>
    %887 = tpu.matmul %878, %633, %cst_130 {dimension_numbers = #tpu.dot_dimension_numbers<[1], [0], [0], [1], [0, 0, 1, 1], [], []>} : vector<8x32xf32>, vector<32x128xf32>, vector<8x128xf32> -> vector<8x128xf32>
    %888 = arith.addf %886, %887 : vector<8x128xf32>
    %889 = arith.negf %888 : vector<8x128xf32>
    %890 = math.exp %889 : vector<8x128xf32>
    %cst_131 = arith.constant 1.000000e+00 : f32
    %891 = vector.broadcast %cst_131 : f32 to vector<8x128xf32>
    %892 = arith.addf %891, %890 : vector<8x128xf32>
    %893 = arith.divf %891, %892 : vector<8x128xf32>
    %894 = math.tanh %888 : vector<8x128xf32>
    %895 = vector.extract_strided_slice %893 {offsets = [0, 0], sizes = [8, 32], strides = [1, 1]} : vector<8x128xf32> to vector<8x32xf32>
    %896 = vector.extract_strided_slice %893 {offsets = [0, 32], sizes = [8, 32], strides = [1, 1]} : vector<8x128xf32> to vector<8x32xf32>
    %897 = vector.extract_strided_slice %894 {offsets = [0, 64], sizes = [8, 32], strides = [1, 1]} : vector<8x128xf32> to vector<8x32xf32>
    %898 = vector.extract_strided_slice %893 {offsets = [0, 96], sizes = [8, 32], strides = [1, 1]} : vector<8x128xf32> to vector<8x32xf32>
    %899 = arith.mulf %896, %885 : vector<8x32xf32>
    %900 = arith.mulf %895, %897 : vector<8x32xf32>
    %901 = arith.addf %899, %900 : vector<8x32xf32>
    %902 = math.tanh %901 : vector<8x32xf32>
    %903 = arith.mulf %898, %902 : vector<8x32xf32>
    %c7_i32_132 = arith.constant 7 : i32
    %904 = vector.broadcast %c7_i32_132 : i32 to vector<8x1xi32>
    %905 = arith.cmpi sgt, %1, %904 : vector<8x1xi32>
    %906 = arith.extui %905 : vector<8x1xi1> to vector<8x1xi32>
    %907 = arith.sitofp %906 : vector<8x1xi32> to vector<8x1xf32>
    %908 = vector.broadcast %907 : vector<8x1xf32> to vector<8x32xf32>
    %909 = arith.mulf %908, %903 : vector<8x32xf32>
    %cst_133 = arith.constant 1.000000e+00 : f32
    %910 = vector.broadcast %cst_133 : f32 to vector<8x1xf32>
    %911 = arith.subf %910, %907 : vector<8x1xf32>
    %912 = vector.broadcast %911 : vector<8x1xf32> to vector<8x32xf32>
    %913 = arith.mulf %912, %878 : vector<8x32xf32>
    %914 = arith.addf %909, %913 : vector<8x32xf32>
    %915 = vector.extract_strided_slice %631 {offsets = [0, 128], sizes = [64, 128], strides = [1, 1]} : vector<64x256xf32> to vector<64x128xf32>
    %c0_134 = arith.constant 0 : index
    %c0_135 = arith.constant 0 : index
    %916 = vector.load %arg12[%c0_134, %c0_135] : memref<32x128xf32, #tpu.memory_space<vmem>>, vector<32x128xf32>
    %917 = vector.extract_strided_slice %915 {offsets = [56, 0], sizes = [8, 128], strides = [1, 1]} : vector<64x128xf32> to vector<8x128xf32>
    %cst_136 = arith.constant dense<0.000000e+00> : vector<8x128xf32>
    %918 = tpu.matmul %3, %916, %cst_136 {dimension_numbers = #tpu.dot_dimension_numbers<[1], [0], [0], [1], [0, 0, 1, 1], [], []>} : vector<8x32xf32>, vector<32x128xf32>, vector<8x128xf32> -> vector<8x128xf32>
    %919 = arith.addf %917, %918 : vector<8x128xf32>
    %920 = arith.negf %919 : vector<8x128xf32>
    %921 = math.exp %920 : vector<8x128xf32>
    %cst_137 = arith.constant 1.000000e+00 : f32
    %922 = vector.broadcast %cst_137 : f32 to vector<8x128xf32>
    %923 = arith.addf %922, %921 : vector<8x128xf32>
    %924 = arith.divf %922, %923 : vector<8x128xf32>
    %925 = math.tanh %919 : vector<8x128xf32>
    %926 = vector.extract_strided_slice %924 {offsets = [0, 0], sizes = [8, 32], strides = [1, 1]} : vector<8x128xf32> to vector<8x32xf32>
    %927 = vector.extract_strided_slice %924 {offsets = [0, 32], sizes = [8, 32], strides = [1, 1]} : vector<8x128xf32> to vector<8x32xf32>
    %928 = vector.extract_strided_slice %925 {offsets = [0, 64], sizes = [8, 32], strides = [1, 1]} : vector<8x128xf32> to vector<8x32xf32>
    %929 = vector.extract_strided_slice %924 {offsets = [0, 96], sizes = [8, 32], strides = [1, 1]} : vector<8x128xf32> to vector<8x32xf32>
    %930 = arith.mulf %927, %3 : vector<8x32xf32>
    %931 = arith.mulf %926, %928 : vector<8x32xf32>
    %932 = arith.addf %930, %931 : vector<8x32xf32>
    %933 = math.tanh %932 : vector<8x32xf32>
    %934 = arith.mulf %929, %933 : vector<8x32xf32>
    %c7_i32_138 = arith.constant 7 : i32
    %935 = vector.broadcast %c7_i32_138 : i32 to vector<8x1xi32>
    %936 = arith.cmpi sgt, %1, %935 : vector<8x1xi32>
    %937 = arith.extui %936 : vector<8x1xi1> to vector<8x1xi32>
    %938 = arith.sitofp %937 : vector<8x1xi32> to vector<8x1xf32>
    %939 = vector.broadcast %938 : vector<8x1xf32> to vector<8x32xf32>
    %940 = arith.mulf %939, %934 : vector<8x32xf32>
    %cst_139 = arith.constant 1.000000e+00 : f32
    %941 = vector.broadcast %cst_139 : f32 to vector<8x1xf32>
    %942 = arith.subf %941, %938 : vector<8x1xf32>
    %943 = vector.broadcast %942 : vector<8x1xf32> to vector<8x32xf32>
    %944 = arith.mulf %943, %3 : vector<8x32xf32>
    %945 = arith.addf %940, %944 : vector<8x32xf32>
    %946 = vector.broadcast %938 : vector<8x1xf32> to vector<8x32xf32>
    %947 = arith.mulf %946, %932 : vector<8x32xf32>
    %cst_140 = arith.constant 1.000000e+00 : f32
    %948 = vector.broadcast %cst_140 : f32 to vector<8x1xf32>
    %949 = arith.subf %948, %938 : vector<8x1xf32>
    %950 = vector.broadcast %949 : vector<8x1xf32> to vector<8x32xf32>
    %951 = arith.mulf %950, %3 : vector<8x32xf32>
    %952 = arith.addf %947, %951 : vector<8x32xf32>
    %953 = vector.extract_strided_slice %915 {offsets = [48, 0], sizes = [8, 128], strides = [1, 1]} : vector<64x128xf32> to vector<8x128xf32>
    %cst_141 = arith.constant dense<0.000000e+00> : vector<8x128xf32>
    %954 = tpu.matmul %945, %916, %cst_141 {dimension_numbers = #tpu.dot_dimension_numbers<[1], [0], [0], [1], [0, 0, 1, 1], [], []>} : vector<8x32xf32>, vector<32x128xf32>, vector<8x128xf32> -> vector<8x128xf32>
    %955 = arith.addf %953, %954 : vector<8x128xf32>
    %956 = arith.negf %955 : vector<8x128xf32>
    %957 = math.exp %956 : vector<8x128xf32>
    %cst_142 = arith.constant 1.000000e+00 : f32
    %958 = vector.broadcast %cst_142 : f32 to vector<8x128xf32>
    %959 = arith.addf %958, %957 : vector<8x128xf32>
    %960 = arith.divf %958, %959 : vector<8x128xf32>
    %961 = math.tanh %955 : vector<8x128xf32>
    %962 = vector.extract_strided_slice %960 {offsets = [0, 0], sizes = [8, 32], strides = [1, 1]} : vector<8x128xf32> to vector<8x32xf32>
    %963 = vector.extract_strided_slice %960 {offsets = [0, 32], sizes = [8, 32], strides = [1, 1]} : vector<8x128xf32> to vector<8x32xf32>
    %964 = vector.extract_strided_slice %961 {offsets = [0, 64], sizes = [8, 32], strides = [1, 1]} : vector<8x128xf32> to vector<8x32xf32>
    %965 = vector.extract_strided_slice %960 {offsets = [0, 96], sizes = [8, 32], strides = [1, 1]} : vector<8x128xf32> to vector<8x32xf32>
    %966 = arith.mulf %963, %952 : vector<8x32xf32>
    %967 = arith.mulf %962, %964 : vector<8x32xf32>
    %968 = arith.addf %966, %967 : vector<8x32xf32>
    %969 = math.tanh %968 : vector<8x32xf32>
    %970 = arith.mulf %965, %969 : vector<8x32xf32>
    %c6_i32_143 = arith.constant 6 : i32
    %971 = vector.broadcast %c6_i32_143 : i32 to vector<8x1xi32>
    %972 = arith.cmpi sgt, %1, %971 : vector<8x1xi32>
    %973 = arith.extui %972 : vector<8x1xi1> to vector<8x1xi32>
    %974 = arith.sitofp %973 : vector<8x1xi32> to vector<8x1xf32>
    %975 = vector.broadcast %974 : vector<8x1xf32> to vector<8x32xf32>
    %976 = arith.mulf %975, %970 : vector<8x32xf32>
    %cst_144 = arith.constant 1.000000e+00 : f32
    %977 = vector.broadcast %cst_144 : f32 to vector<8x1xf32>
    %978 = arith.subf %977, %974 : vector<8x1xf32>
    %979 = vector.broadcast %978 : vector<8x1xf32> to vector<8x32xf32>
    %980 = arith.mulf %979, %945 : vector<8x32xf32>
    %981 = arith.addf %976, %980 : vector<8x32xf32>
    %982 = vector.broadcast %974 : vector<8x1xf32> to vector<8x32xf32>
    %983 = arith.mulf %982, %968 : vector<8x32xf32>
    %cst_145 = arith.constant 1.000000e+00 : f32
    %984 = vector.broadcast %cst_145 : f32 to vector<8x1xf32>
    %985 = arith.subf %984, %974 : vector<8x1xf32>
    %986 = vector.broadcast %985 : vector<8x1xf32> to vector<8x32xf32>
    %987 = arith.mulf %986, %952 : vector<8x32xf32>
    %988 = arith.addf %983, %987 : vector<8x32xf32>
    %989 = vector.extract_strided_slice %915 {offsets = [40, 0], sizes = [8, 128], strides = [1, 1]} : vector<64x128xf32> to vector<8x128xf32>
    %cst_146 = arith.constant dense<0.000000e+00> : vector<8x128xf32>
    %990 = tpu.matmul %981, %916, %cst_146 {dimension_numbers = #tpu.dot_dimension_numbers<[1], [0], [0], [1], [0, 0, 1, 1], [], []>} : vector<8x32xf32>, vector<32x128xf32>, vector<8x128xf32> -> vector<8x128xf32>
    %991 = arith.addf %989, %990 : vector<8x128xf32>
    %992 = arith.negf %991 : vector<8x128xf32>
    %993 = math.exp %992 : vector<8x128xf32>
    %cst_147 = arith.constant 1.000000e+00 : f32
    %994 = vector.broadcast %cst_147 : f32 to vector<8x128xf32>
    %995 = arith.addf %994, %993 : vector<8x128xf32>
    %996 = arith.divf %994, %995 : vector<8x128xf32>
    %997 = math.tanh %991 : vector<8x128xf32>
    %998 = vector.extract_strided_slice %996 {offsets = [0, 0], sizes = [8, 32], strides = [1, 1]} : vector<8x128xf32> to vector<8x32xf32>
    %999 = vector.extract_strided_slice %996 {offsets = [0, 32], sizes = [8, 32], strides = [1, 1]} : vector<8x128xf32> to vector<8x32xf32>
    %1000 = vector.extract_strided_slice %997 {offsets = [0, 64], sizes = [8, 32], strides = [1, 1]} : vector<8x128xf32> to vector<8x32xf32>
    %1001 = vector.extract_strided_slice %996 {offsets = [0, 96], sizes = [8, 32], strides = [1, 1]} : vector<8x128xf32> to vector<8x32xf32>
    %1002 = arith.mulf %999, %988 : vector<8x32xf32>
    %1003 = arith.mulf %998, %1000 : vector<8x32xf32>
    %1004 = arith.addf %1002, %1003 : vector<8x32xf32>
    %1005 = math.tanh %1004 : vector<8x32xf32>
    %1006 = arith.mulf %1001, %1005 : vector<8x32xf32>
    %c5_i32_148 = arith.constant 5 : i32
    %1007 = vector.broadcast %c5_i32_148 : i32 to vector<8x1xi32>
    %1008 = arith.cmpi sgt, %1, %1007 : vector<8x1xi32>
    %1009 = arith.extui %1008 : vector<8x1xi1> to vector<8x1xi32>
    %1010 = arith.sitofp %1009 : vector<8x1xi32> to vector<8x1xf32>
    %1011 = vector.broadcast %1010 : vector<8x1xf32> to vector<8x32xf32>
    %1012 = arith.mulf %1011, %1006 : vector<8x32xf32>
    %cst_149 = arith.constant 1.000000e+00 : f32
    %1013 = vector.broadcast %cst_149 : f32 to vector<8x1xf32>
    %1014 = arith.subf %1013, %1010 : vector<8x1xf32>
    %1015 = vector.broadcast %1014 : vector<8x1xf32> to vector<8x32xf32>
    %1016 = arith.mulf %1015, %981 : vector<8x32xf32>
    %1017 = arith.addf %1012, %1016 : vector<8x32xf32>
    %1018 = vector.broadcast %1010 : vector<8x1xf32> to vector<8x32xf32>
    %1019 = arith.mulf %1018, %1004 : vector<8x32xf32>
    %cst_150 = arith.constant 1.000000e+00 : f32
    %1020 = vector.broadcast %cst_150 : f32 to vector<8x1xf32>
    %1021 = arith.subf %1020, %1010 : vector<8x1xf32>
    %1022 = vector.broadcast %1021 : vector<8x1xf32> to vector<8x32xf32>
    %1023 = arith.mulf %1022, %988 : vector<8x32xf32>
    %1024 = arith.addf %1019, %1023 : vector<8x32xf32>
    %1025 = vector.extract_strided_slice %915 {offsets = [32, 0], sizes = [8, 128], strides = [1, 1]} : vector<64x128xf32> to vector<8x128xf32>
    %cst_151 = arith.constant dense<0.000000e+00> : vector<8x128xf32>
    %1026 = tpu.matmul %1017, %916, %cst_151 {dimension_numbers = #tpu.dot_dimension_numbers<[1], [0], [0], [1], [0, 0, 1, 1], [], []>} : vector<8x32xf32>, vector<32x128xf32>, vector<8x128xf32> -> vector<8x128xf32>
    %1027 = arith.addf %1025, %1026 : vector<8x128xf32>
    %1028 = arith.negf %1027 : vector<8x128xf32>
    %1029 = math.exp %1028 : vector<8x128xf32>
    %cst_152 = arith.constant 1.000000e+00 : f32
    %1030 = vector.broadcast %cst_152 : f32 to vector<8x128xf32>
    %1031 = arith.addf %1030, %1029 : vector<8x128xf32>
    %1032 = arith.divf %1030, %1031 : vector<8x128xf32>
    %1033 = math.tanh %1027 : vector<8x128xf32>
    %1034 = vector.extract_strided_slice %1032 {offsets = [0, 0], sizes = [8, 32], strides = [1, 1]} : vector<8x128xf32> to vector<8x32xf32>
    %1035 = vector.extract_strided_slice %1032 {offsets = [0, 32], sizes = [8, 32], strides = [1, 1]} : vector<8x128xf32> to vector<8x32xf32>
    %1036 = vector.extract_strided_slice %1033 {offsets = [0, 64], sizes = [8, 32], strides = [1, 1]} : vector<8x128xf32> to vector<8x32xf32>
    %1037 = vector.extract_strided_slice %1032 {offsets = [0, 96], sizes = [8, 32], strides = [1, 1]} : vector<8x128xf32> to vector<8x32xf32>
    %1038 = arith.mulf %1035, %1024 : vector<8x32xf32>
    %1039 = arith.mulf %1034, %1036 : vector<8x32xf32>
    %1040 = arith.addf %1038, %1039 : vector<8x32xf32>
    %1041 = math.tanh %1040 : vector<8x32xf32>
    %1042 = arith.mulf %1037, %1041 : vector<8x32xf32>
    %c4_i32_153 = arith.constant 4 : i32
    %1043 = vector.broadcast %c4_i32_153 : i32 to vector<8x1xi32>
    %1044 = arith.cmpi sgt, %1, %1043 : vector<8x1xi32>
    %1045 = arith.extui %1044 : vector<8x1xi1> to vector<8x1xi32>
    %1046 = arith.sitofp %1045 : vector<8x1xi32> to vector<8x1xf32>
    %1047 = vector.broadcast %1046 : vector<8x1xf32> to vector<8x32xf32>
    %1048 = arith.mulf %1047, %1042 : vector<8x32xf32>
    %cst_154 = arith.constant 1.000000e+00 : f32
    %1049 = vector.broadcast %cst_154 : f32 to vector<8x1xf32>
    %1050 = arith.subf %1049, %1046 : vector<8x1xf32>
    %1051 = vector.broadcast %1050 : vector<8x1xf32> to vector<8x32xf32>
    %1052 = arith.mulf %1051, %1017 : vector<8x32xf32>
    %1053 = arith.addf %1048, %1052 : vector<8x32xf32>
    %1054 = vector.broadcast %1046 : vector<8x1xf32> to vector<8x32xf32>
    %1055 = arith.mulf %1054, %1040 : vector<8x32xf32>
    %cst_155 = arith.constant 1.000000e+00 : f32
    %1056 = vector.broadcast %cst_155 : f32 to vector<8x1xf32>
    %1057 = arith.subf %1056, %1046 : vector<8x1xf32>
    %1058 = vector.broadcast %1057 : vector<8x1xf32> to vector<8x32xf32>
    %1059 = arith.mulf %1058, %1024 : vector<8x32xf32>
    %1060 = arith.addf %1055, %1059 : vector<8x32xf32>
    %1061 = vector.extract_strided_slice %915 {offsets = [24, 0], sizes = [8, 128], strides = [1, 1]} : vector<64x128xf32> to vector<8x128xf32>
    %cst_156 = arith.constant dense<0.000000e+00> : vector<8x128xf32>
    %1062 = tpu.matmul %1053, %916, %cst_156 {dimension_numbers = #tpu.dot_dimension_numbers<[1], [0], [0], [1], [0, 0, 1, 1], [], []>} : vector<8x32xf32>, vector<32x128xf32>, vector<8x128xf32> -> vector<8x128xf32>
    %1063 = arith.addf %1061, %1062 : vector<8x128xf32>
    %1064 = arith.negf %1063 : vector<8x128xf32>
    %1065 = math.exp %1064 : vector<8x128xf32>
    %cst_157 = arith.constant 1.000000e+00 : f32
    %1066 = vector.broadcast %cst_157 : f32 to vector<8x128xf32>
    %1067 = arith.addf %1066, %1065 : vector<8x128xf32>
    %1068 = arith.divf %1066, %1067 : vector<8x128xf32>
    %1069 = math.tanh %1063 : vector<8x128xf32>
    %1070 = vector.extract_strided_slice %1068 {offsets = [0, 0], sizes = [8, 32], strides = [1, 1]} : vector<8x128xf32> to vector<8x32xf32>
    %1071 = vector.extract_strided_slice %1068 {offsets = [0, 32], sizes = [8, 32], strides = [1, 1]} : vector<8x128xf32> to vector<8x32xf32>
    %1072 = vector.extract_strided_slice %1069 {offsets = [0, 64], sizes = [8, 32], strides = [1, 1]} : vector<8x128xf32> to vector<8x32xf32>
    %1073 = vector.extract_strided_slice %1068 {offsets = [0, 96], sizes = [8, 32], strides = [1, 1]} : vector<8x128xf32> to vector<8x32xf32>
    %1074 = arith.mulf %1071, %1060 : vector<8x32xf32>
    %1075 = arith.mulf %1070, %1072 : vector<8x32xf32>
    %1076 = arith.addf %1074, %1075 : vector<8x32xf32>
    %1077 = math.tanh %1076 : vector<8x32xf32>
    %1078 = arith.mulf %1073, %1077 : vector<8x32xf32>
    %c3_i32_158 = arith.constant 3 : i32
    %1079 = vector.broadcast %c3_i32_158 : i32 to vector<8x1xi32>
    %1080 = arith.cmpi sgt, %1, %1079 : vector<8x1xi32>
    %1081 = arith.extui %1080 : vector<8x1xi1> to vector<8x1xi32>
    %1082 = arith.sitofp %1081 : vector<8x1xi32> to vector<8x1xf32>
    %1083 = vector.broadcast %1082 : vector<8x1xf32> to vector<8x32xf32>
    %1084 = arith.mulf %1083, %1078 : vector<8x32xf32>
    %cst_159 = arith.constant 1.000000e+00 : f32
    %1085 = vector.broadcast %cst_159 : f32 to vector<8x1xf32>
    %1086 = arith.subf %1085, %1082 : vector<8x1xf32>
    %1087 = vector.broadcast %1086 : vector<8x1xf32> to vector<8x32xf32>
    %1088 = arith.mulf %1087, %1053 : vector<8x32xf32>
    %1089 = arith.addf %1084, %1088 : vector<8x32xf32>
    %1090 = vector.broadcast %1082 : vector<8x1xf32> to vector<8x32xf32>
    %1091 = arith.mulf %1090, %1076 : vector<8x32xf32>
    %cst_160 = arith.constant 1.000000e+00 : f32
    %1092 = vector.broadcast %cst_160 : f32 to vector<8x1xf32>
    %1093 = arith.subf %1092, %1082 : vector<8x1xf32>
    %1094 = vector.broadcast %1093 : vector<8x1xf32> to vector<8x32xf32>
    %1095 = arith.mulf %1094, %1060 : vector<8x32xf32>
    %1096 = arith.addf %1091, %1095 : vector<8x32xf32>
    %1097 = vector.extract_strided_slice %915 {offsets = [16, 0], sizes = [8, 128], strides = [1, 1]} : vector<64x128xf32> to vector<8x128xf32>
    %cst_161 = arith.constant dense<0.000000e+00> : vector<8x128xf32>
    %1098 = tpu.matmul %1089, %916, %cst_161 {dimension_numbers = #tpu.dot_dimension_numbers<[1], [0], [0], [1], [0, 0, 1, 1], [], []>} : vector<8x32xf32>, vector<32x128xf32>, vector<8x128xf32> -> vector<8x128xf32>
    %1099 = arith.addf %1097, %1098 : vector<8x128xf32>
    %1100 = arith.negf %1099 : vector<8x128xf32>
    %1101 = math.exp %1100 : vector<8x128xf32>
    %cst_162 = arith.constant 1.000000e+00 : f32
    %1102 = vector.broadcast %cst_162 : f32 to vector<8x128xf32>
    %1103 = arith.addf %1102, %1101 : vector<8x128xf32>
    %1104 = arith.divf %1102, %1103 : vector<8x128xf32>
    %1105 = math.tanh %1099 : vector<8x128xf32>
    %1106 = vector.extract_strided_slice %1104 {offsets = [0, 0], sizes = [8, 32], strides = [1, 1]} : vector<8x128xf32> to vector<8x32xf32>
    %1107 = vector.extract_strided_slice %1104 {offsets = [0, 32], sizes = [8, 32], strides = [1, 1]} : vector<8x128xf32> to vector<8x32xf32>
    %1108 = vector.extract_strided_slice %1105 {offsets = [0, 64], sizes = [8, 32], strides = [1, 1]} : vector<8x128xf32> to vector<8x32xf32>
    %1109 = vector.extract_strided_slice %1104 {offsets = [0, 96], sizes = [8, 32], strides = [1, 1]} : vector<8x128xf32> to vector<8x32xf32>
    %1110 = arith.mulf %1107, %1096 : vector<8x32xf32>
    %1111 = arith.mulf %1106, %1108 : vector<8x32xf32>
    %1112 = arith.addf %1110, %1111 : vector<8x32xf32>
    %1113 = math.tanh %1112 : vector<8x32xf32>
    %1114 = arith.mulf %1109, %1113 : vector<8x32xf32>
    %c2_i32_163 = arith.constant 2 : i32
    %1115 = vector.broadcast %c2_i32_163 : i32 to vector<8x1xi32>
    %1116 = arith.cmpi sgt, %1, %1115 : vector<8x1xi32>
    %1117 = arith.extui %1116 : vector<8x1xi1> to vector<8x1xi32>
    %1118 = arith.sitofp %1117 : vector<8x1xi32> to vector<8x1xf32>
    %1119 = vector.broadcast %1118 : vector<8x1xf32> to vector<8x32xf32>
    %1120 = arith.mulf %1119, %1114 : vector<8x32xf32>
    %cst_164 = arith.constant 1.000000e+00 : f32
    %1121 = vector.broadcast %cst_164 : f32 to vector<8x1xf32>
    %1122 = arith.subf %1121, %1118 : vector<8x1xf32>
    %1123 = vector.broadcast %1122 : vector<8x1xf32> to vector<8x32xf32>
    %1124 = arith.mulf %1123, %1089 : vector<8x32xf32>
    %1125 = arith.addf %1120, %1124 : vector<8x32xf32>
    %1126 = vector.broadcast %1118 : vector<8x1xf32> to vector<8x32xf32>
    %1127 = arith.mulf %1126, %1112 : vector<8x32xf32>
    %cst_165 = arith.constant 1.000000e+00 : f32
    %1128 = vector.broadcast %cst_165 : f32 to vector<8x1xf32>
    %1129 = arith.subf %1128, %1118 : vector<8x1xf32>
    %1130 = vector.broadcast %1129 : vector<8x1xf32> to vector<8x32xf32>
    %1131 = arith.mulf %1130, %1096 : vector<8x32xf32>
    %1132 = arith.addf %1127, %1131 : vector<8x32xf32>
    %1133 = vector.extract_strided_slice %915 {offsets = [8, 0], sizes = [8, 128], strides = [1, 1]} : vector<64x128xf32> to vector<8x128xf32>
    %cst_166 = arith.constant dense<0.000000e+00> : vector<8x128xf32>
    %1134 = tpu.matmul %1125, %916, %cst_166 {dimension_numbers = #tpu.dot_dimension_numbers<[1], [0], [0], [1], [0, 0, 1, 1], [], []>} : vector<8x32xf32>, vector<32x128xf32>, vector<8x128xf32> -> vector<8x128xf32>
    %1135 = arith.addf %1133, %1134 : vector<8x128xf32>
    %1136 = arith.negf %1135 : vector<8x128xf32>
    %1137 = math.exp %1136 : vector<8x128xf32>
    %cst_167 = arith.constant 1.000000e+00 : f32
    %1138 = vector.broadcast %cst_167 : f32 to vector<8x128xf32>
    %1139 = arith.addf %1138, %1137 : vector<8x128xf32>
    %1140 = arith.divf %1138, %1139 : vector<8x128xf32>
    %1141 = math.tanh %1135 : vector<8x128xf32>
    %1142 = vector.extract_strided_slice %1140 {offsets = [0, 0], sizes = [8, 32], strides = [1, 1]} : vector<8x128xf32> to vector<8x32xf32>
    %1143 = vector.extract_strided_slice %1140 {offsets = [0, 32], sizes = [8, 32], strides = [1, 1]} : vector<8x128xf32> to vector<8x32xf32>
    %1144 = vector.extract_strided_slice %1141 {offsets = [0, 64], sizes = [8, 32], strides = [1, 1]} : vector<8x128xf32> to vector<8x32xf32>
    %1145 = vector.extract_strided_slice %1140 {offsets = [0, 96], sizes = [8, 32], strides = [1, 1]} : vector<8x128xf32> to vector<8x32xf32>
    %1146 = arith.mulf %1143, %1132 : vector<8x32xf32>
    %1147 = arith.mulf %1142, %1144 : vector<8x32xf32>
    %1148 = arith.addf %1146, %1147 : vector<8x32xf32>
    %1149 = math.tanh %1148 : vector<8x32xf32>
    %1150 = arith.mulf %1145, %1149 : vector<8x32xf32>
    %c1_i32_168 = arith.constant 1 : i32
    %1151 = vector.broadcast %c1_i32_168 : i32 to vector<8x1xi32>
    %1152 = arith.cmpi sgt, %1, %1151 : vector<8x1xi32>
    %1153 = arith.extui %1152 : vector<8x1xi1> to vector<8x1xi32>
    %1154 = arith.sitofp %1153 : vector<8x1xi32> to vector<8x1xf32>
    %1155 = vector.broadcast %1154 : vector<8x1xf32> to vector<8x32xf32>
    %1156 = arith.mulf %1155, %1150 : vector<8x32xf32>
    %cst_169 = arith.constant 1.000000e+00 : f32
    %1157 = vector.broadcast %cst_169 : f32 to vector<8x1xf32>
    %1158 = arith.subf %1157, %1154 : vector<8x1xf32>
    %1159 = vector.broadcast %1158 : vector<8x1xf32> to vector<8x32xf32>
    %1160 = arith.mulf %1159, %1125 : vector<8x32xf32>
    %1161 = arith.addf %1156, %1160 : vector<8x32xf32>
    %1162 = vector.broadcast %1154 : vector<8x1xf32> to vector<8x32xf32>
    %1163 = arith.mulf %1162, %1148 : vector<8x32xf32>
    %cst_170 = arith.constant 1.000000e+00 : f32
    %1164 = vector.broadcast %cst_170 : f32 to vector<8x1xf32>
    %1165 = arith.subf %1164, %1154 : vector<8x1xf32>
    %1166 = vector.broadcast %1165 : vector<8x1xf32> to vector<8x32xf32>
    %1167 = arith.mulf %1166, %1132 : vector<8x32xf32>
    %1168 = arith.addf %1163, %1167 : vector<8x32xf32>
    %1169 = vector.extract_strided_slice %915 {offsets = [0, 0], sizes = [8, 128], strides = [1, 1]} : vector<64x128xf32> to vector<8x128xf32>
    %cst_171 = arith.constant dense<0.000000e+00> : vector<8x128xf32>
    %1170 = tpu.matmul %1161, %916, %cst_171 {dimension_numbers = #tpu.dot_dimension_numbers<[1], [0], [0], [1], [0, 0, 1, 1], [], []>} : vector<8x32xf32>, vector<32x128xf32>, vector<8x128xf32> -> vector<8x128xf32>
    %1171 = arith.addf %1169, %1170 : vector<8x128xf32>
    %1172 = arith.negf %1171 : vector<8x128xf32>
    %1173 = math.exp %1172 : vector<8x128xf32>
    %cst_172 = arith.constant 1.000000e+00 : f32
    %1174 = vector.broadcast %cst_172 : f32 to vector<8x128xf32>
    %1175 = arith.addf %1174, %1173 : vector<8x128xf32>
    %1176 = arith.divf %1174, %1175 : vector<8x128xf32>
    %1177 = math.tanh %1171 : vector<8x128xf32>
    %1178 = vector.extract_strided_slice %1176 {offsets = [0, 0], sizes = [8, 32], strides = [1, 1]} : vector<8x128xf32> to vector<8x32xf32>
    %1179 = vector.extract_strided_slice %1176 {offsets = [0, 32], sizes = [8, 32], strides = [1, 1]} : vector<8x128xf32> to vector<8x32xf32>
    %1180 = vector.extract_strided_slice %1177 {offsets = [0, 64], sizes = [8, 32], strides = [1, 1]} : vector<8x128xf32> to vector<8x32xf32>
    %1181 = vector.extract_strided_slice %1176 {offsets = [0, 96], sizes = [8, 32], strides = [1, 1]} : vector<8x128xf32> to vector<8x32xf32>
    %1182 = arith.mulf %1179, %1168 : vector<8x32xf32>
    %1183 = arith.mulf %1178, %1180 : vector<8x32xf32>
    %1184 = arith.addf %1182, %1183 : vector<8x32xf32>
    %1185 = math.tanh %1184 : vector<8x32xf32>
    %1186 = arith.mulf %1181, %1185 : vector<8x32xf32>
    %c0_i32_173 = arith.constant 0 : i32
    %1187 = vector.broadcast %c0_i32_173 : i32 to vector<8x1xi32>
    %1188 = arith.cmpi sgt, %1, %1187 : vector<8x1xi32>
    %1189 = arith.extui %1188 : vector<8x1xi1> to vector<8x1xi32>
    %1190 = arith.sitofp %1189 : vector<8x1xi32> to vector<8x1xf32>
    %1191 = vector.broadcast %1190 : vector<8x1xf32> to vector<8x32xf32>
    %1192 = arith.mulf %1191, %1186 : vector<8x32xf32>
    %cst_174 = arith.constant 1.000000e+00 : f32
    %1193 = vector.broadcast %cst_174 : f32 to vector<8x1xf32>
    %1194 = arith.subf %1193, %1190 : vector<8x1xf32>
    %1195 = vector.broadcast %1194 : vector<8x1xf32> to vector<8x32xf32>
    %1196 = arith.mulf %1195, %1161 : vector<8x32xf32>
    %1197 = arith.addf %1192, %1196 : vector<8x32xf32>
    %1198 = tpu.concatenate %316, %615, %914, %1197 in 1 : vector<8x32xf32>, vector<8x32xf32>, vector<8x32xf32>, vector<8x32xf32> -> vector<8x128xf32>
    %c0_175 = arith.constant 0 : index
    %c0_176 = arith.constant 0 : index
    %1199 = vector.load %arg14[%c0_175, %c0_176] : memref<128x32xf32, #tpu.memory_space<vmem>>, vector<128x32xf32>
    %cst_177 = arith.constant dense<0.000000e+00> : vector<8x32xf32>
    %1200 = tpu.matmul %1198, %1199, %cst_177 {dimension_numbers = #tpu.dot_dimension_numbers<[1], [0], [0], [1], [0, 0, 1, 1], [], []>} : vector<8x128xf32>, vector<128x32xf32>, vector<8x32xf32> -> vector<8x32xf32>
    %c0_178 = arith.constant 0 : index
    %c0_179 = arith.constant 0 : index
    %1201 = vector.load %arg15[%c0_178, %c0_179] : memref<1x32xf32, #tpu.memory_space<vmem>>, vector<1x32xf32>
    %1202 = vector.broadcast %1201 : vector<1x32xf32> to vector<8x32xf32>
    %1203 = arith.addf %1200, %1202 : vector<8x32xf32>
    %cst_180 = arith.constant 0.000000e+00 : f32
    %1204 = vector.broadcast %cst_180 : f32 to vector<8x32xf32>
    %1205 = arith.maximumf %1203, %1204 : vector<8x32xf32>
    %c0_181 = arith.constant 0 : index
    %c0_182 = arith.constant 0 : index
    %1206 = vector.load %arg16[%c0_181, %c0_182] : memref<32x32xf32, #tpu.memory_space<vmem>>, vector<32x32xf32>
    %cst_183 = arith.constant dense<0.000000e+00> : vector<8x32xf32>
    %1207 = tpu.matmul %1205, %1206, %cst_183 {dimension_numbers = #tpu.dot_dimension_numbers<[1], [0], [0], [1], [0, 0, 1, 1], [], []>} : vector<8x32xf32>, vector<32x32xf32>, vector<8x32xf32> -> vector<8x32xf32>
    %c0_184 = arith.constant 0 : index
    %c0_185 = arith.constant 0 : index
    %1208 = vector.load %arg17[%c0_184, %c0_185] : memref<1x32xf32, #tpu.memory_space<vmem>>, vector<1x32xf32>
    %1209 = vector.broadcast %1208 : vector<1x32xf32> to vector<8x32xf32>
    %1210 = arith.addf %1207, %1209 : vector<8x32xf32>
    %c0_186 = arith.constant 0 : index
    %c0_187 = arith.constant 0 : index
    %1211 = vector.load %arg1[%c0_186, %c0_187] : memref<8x8xi32, #tpu.memory_space<vmem>>, vector<8x8xi32>
    %1212 = tpu.iota {dimensions = array<i32: 2>} : vector<8x8x128xi32>
    %1213 = vector.shape_cast %1211 : vector<8x8xi32> to vector<8x8x1xi32>
    %1214 = vector.broadcast %1213 : vector<8x8x1xi32> to vector<8x8x128xi32>
    %1215 = arith.cmpi eq, %1212, %1214 : vector<8x8x128xi32>
    %1216 = arith.extui %1215 : vector<8x8x128xi1> to vector<8x8x128xi32>
    %1217 = arith.sitofp %1216 : vector<8x8x128xi32> to vector<8x8x128xf32>
    %1218 = vector.shape_cast %1217 : vector<8x8x128xf32> to vector<64x128xf32>
    %cst_188 = arith.constant dense<0.000000e+00> : vector<64x32xf32>
    %1219 = tpu.matmul %1218, %0, %cst_188 {dimension_numbers = #tpu.dot_dimension_numbers<[1], [0], [0], [1], [0, 0, 1, 1], [], []>} : vector<64x128xf32>, vector<128x32xf32>, vector<64x32xf32> -> vector<64x32xf32>
    %cst_189 = arith.constant 5.65685415 : f32
    %1220 = vector.broadcast %cst_189 : f32 to vector<64x32xf32>
    %1221 = arith.mulf %1219, %1220 : vector<64x32xf32>
    %c0_190 = arith.constant 0 : index
    %c0_191 = arith.constant 0 : index
    %1222 = vector.load %arg18[%c0_190, %c0_191] : memref<32x128xf32, #tpu.memory_space<vmem>>, vector<32x128xf32>
    %cst_192 = arith.constant dense<0.000000e+00> : vector<64x128xf32>
    %1223 = tpu.matmul %1221, %1222, %cst_192 {dimension_numbers = #tpu.dot_dimension_numbers<[1], [0], [0], [1], [0, 0, 1, 1], [], []>} : vector<64x32xf32>, vector<32x128xf32>, vector<64x128xf32> -> vector<64x128xf32>
    %c0_193 = arith.constant 0 : index
    %c0_194 = arith.constant 0 : index
    %1224 = vector.load %arg20[%c0_193, %c0_194] : memref<1x128xf32, #tpu.memory_space<vmem>>, vector<1x128xf32>
    %1225 = vector.broadcast %1224 : vector<1x128xf32> to vector<64x128xf32>
    %1226 = arith.addf %1223, %1225 : vector<64x128xf32>
    %c0_195 = arith.constant 0 : index
    %c0_196 = arith.constant 0 : index
    %1227 = vector.load %arg21[%c0_195, %c0_196] : memref<1x32xf32, #tpu.memory_space<vmem>>, vector<1x32xf32>
    %1228 = vector.shape_cast %1227 : vector<1x32xf32> to vector<1x32xf32>
    %1229 = vector.broadcast %1228 : vector<1x32xf32> to vector<8x32xf32>
    %c0_197 = arith.constant 0 : index
    %c0_198 = arith.constant 0 : index
    %1230 = vector.load %arg19[%c0_197, %c0_198] : memref<32x128xf32, #tpu.memory_space<vmem>>, vector<32x128xf32>
    %c1_i32_199 = arith.constant 1 : i32
    %1231 = vector.broadcast %c1_i32_199 : i32 to vector<8x1xi32>
    %1232 = arith.subi %2, %1231 : vector<8x1xi32>
    %1233 = vector.extract_strided_slice %1226 {offsets = [0, 0], sizes = [8, 128], strides = [1, 1]} : vector<64x128xf32> to vector<8x128xf32>
    %cst_200 = arith.constant dense<0.000000e+00> : vector<8x128xf32>
    %1234 = tpu.matmul %1210, %1230, %cst_200 {dimension_numbers = #tpu.dot_dimension_numbers<[1], [0], [0], [1], [0, 0, 1, 1], [], []>} : vector<8x32xf32>, vector<32x128xf32>, vector<8x128xf32> -> vector<8x128xf32>
    %1235 = arith.addf %1233, %1234 : vector<8x128xf32>
    %1236 = arith.negf %1235 : vector<8x128xf32>
    %1237 = math.exp %1236 : vector<8x128xf32>
    %cst_201 = arith.constant 1.000000e+00 : f32
    %1238 = vector.broadcast %cst_201 : f32 to vector<8x128xf32>
    %1239 = arith.addf %1238, %1237 : vector<8x128xf32>
    %1240 = arith.divf %1238, %1239 : vector<8x128xf32>
    %1241 = math.tanh %1235 : vector<8x128xf32>
    %1242 = vector.extract_strided_slice %1240 {offsets = [0, 0], sizes = [8, 32], strides = [1, 1]} : vector<8x128xf32> to vector<8x32xf32>
    %1243 = vector.extract_strided_slice %1240 {offsets = [0, 32], sizes = [8, 32], strides = [1, 1]} : vector<8x128xf32> to vector<8x32xf32>
    %1244 = vector.extract_strided_slice %1241 {offsets = [0, 64], sizes = [8, 32], strides = [1, 1]} : vector<8x128xf32> to vector<8x32xf32>
    %1245 = vector.extract_strided_slice %1240 {offsets = [0, 96], sizes = [8, 32], strides = [1, 1]} : vector<8x128xf32> to vector<8x32xf32>
    %1246 = arith.mulf %1243, %1229 : vector<8x32xf32>
    %1247 = arith.mulf %1242, %1244 : vector<8x32xf32>
    %1248 = arith.addf %1246, %1247 : vector<8x32xf32>
    %1249 = math.tanh %1248 : vector<8x32xf32>
    %1250 = arith.mulf %1245, %1249 : vector<8x32xf32>
    %c0_i32_202 = arith.constant 0 : i32
    %1251 = vector.broadcast %c0_i32_202 : i32 to vector<8x1xi32>
    %1252 = arith.cmpi sgt, %1232, %1251 : vector<8x1xi32>
    %1253 = arith.extui %1252 : vector<8x1xi1> to vector<8x1xi32>
    %1254 = arith.sitofp %1253 : vector<8x1xi32> to vector<8x1xf32>
    %1255 = vector.broadcast %1254 : vector<8x1xf32> to vector<8x32xf32>
    %1256 = arith.mulf %1255, %1250 : vector<8x32xf32>
    %cst_203 = arith.constant 1.000000e+00 : f32
    %1257 = vector.broadcast %cst_203 : f32 to vector<8x1xf32>
    %1258 = arith.subf %1257, %1254 : vector<8x1xf32>
    %1259 = vector.broadcast %1258 : vector<8x1xf32> to vector<8x32xf32>
    %1260 = arith.mulf %1259, %1210 : vector<8x32xf32>
    %1261 = arith.addf %1256, %1260 : vector<8x32xf32>
    %1262 = vector.broadcast %1254 : vector<8x1xf32> to vector<8x32xf32>
    %1263 = arith.mulf %1262, %1248 : vector<8x32xf32>
    %cst_204 = arith.constant 1.000000e+00 : f32
    %1264 = vector.broadcast %cst_204 : f32 to vector<8x1xf32>
    %1265 = arith.subf %1264, %1254 : vector<8x1xf32>
    %1266 = vector.broadcast %1265 : vector<8x1xf32> to vector<8x32xf32>
    %1267 = arith.mulf %1266, %1229 : vector<8x32xf32>
    %1268 = arith.addf %1263, %1267 : vector<8x32xf32>
    %1269 = vector.broadcast %1254 : vector<8x1xf32> to vector<8x32xf32>
    %1270 = arith.mulf %1269, %1250 : vector<8x32xf32>
    %1271 = vector.extract_strided_slice %1226 {offsets = [8, 0], sizes = [8, 128], strides = [1, 1]} : vector<64x128xf32> to vector<8x128xf32>
    %cst_205 = arith.constant dense<0.000000e+00> : vector<8x128xf32>
    %1272 = tpu.matmul %1261, %1230, %cst_205 {dimension_numbers = #tpu.dot_dimension_numbers<[1], [0], [0], [1], [0, 0, 1, 1], [], []>} : vector<8x32xf32>, vector<32x128xf32>, vector<8x128xf32> -> vector<8x128xf32>
    %1273 = arith.addf %1271, %1272 : vector<8x128xf32>
    %1274 = arith.negf %1273 : vector<8x128xf32>
    %1275 = math.exp %1274 : vector<8x128xf32>
    %cst_206 = arith.constant 1.000000e+00 : f32
    %1276 = vector.broadcast %cst_206 : f32 to vector<8x128xf32>
    %1277 = arith.addf %1276, %1275 : vector<8x128xf32>
    %1278 = arith.divf %1276, %1277 : vector<8x128xf32>
    %1279 = math.tanh %1273 : vector<8x128xf32>
    %1280 = vector.extract_strided_slice %1278 {offsets = [0, 0], sizes = [8, 32], strides = [1, 1]} : vector<8x128xf32> to vector<8x32xf32>
    %1281 = vector.extract_strided_slice %1278 {offsets = [0, 32], sizes = [8, 32], strides = [1, 1]} : vector<8x128xf32> to vector<8x32xf32>
    %1282 = vector.extract_strided_slice %1279 {offsets = [0, 64], sizes = [8, 32], strides = [1, 1]} : vector<8x128xf32> to vector<8x32xf32>
    %1283 = vector.extract_strided_slice %1278 {offsets = [0, 96], sizes = [8, 32], strides = [1, 1]} : vector<8x128xf32> to vector<8x32xf32>
    %1284 = arith.mulf %1281, %1268 : vector<8x32xf32>
    %1285 = arith.mulf %1280, %1282 : vector<8x32xf32>
    %1286 = arith.addf %1284, %1285 : vector<8x32xf32>
    %1287 = math.tanh %1286 : vector<8x32xf32>
    %1288 = arith.mulf %1283, %1287 : vector<8x32xf32>
    %c1_i32_207 = arith.constant 1 : i32
    %1289 = vector.broadcast %c1_i32_207 : i32 to vector<8x1xi32>
    %1290 = arith.cmpi sgt, %1232, %1289 : vector<8x1xi32>
    %1291 = arith.extui %1290 : vector<8x1xi1> to vector<8x1xi32>
    %1292 = arith.sitofp %1291 : vector<8x1xi32> to vector<8x1xf32>
    %1293 = vector.broadcast %1292 : vector<8x1xf32> to vector<8x32xf32>
    %1294 = arith.mulf %1293, %1288 : vector<8x32xf32>
    %cst_208 = arith.constant 1.000000e+00 : f32
    %1295 = vector.broadcast %cst_208 : f32 to vector<8x1xf32>
    %1296 = arith.subf %1295, %1292 : vector<8x1xf32>
    %1297 = vector.broadcast %1296 : vector<8x1xf32> to vector<8x32xf32>
    %1298 = arith.mulf %1297, %1261 : vector<8x32xf32>
    %1299 = arith.addf %1294, %1298 : vector<8x32xf32>
    %1300 = vector.broadcast %1292 : vector<8x1xf32> to vector<8x32xf32>
    %1301 = arith.mulf %1300, %1286 : vector<8x32xf32>
    %cst_209 = arith.constant 1.000000e+00 : f32
    %1302 = vector.broadcast %cst_209 : f32 to vector<8x1xf32>
    %1303 = arith.subf %1302, %1292 : vector<8x1xf32>
    %1304 = vector.broadcast %1303 : vector<8x1xf32> to vector<8x32xf32>
    %1305 = arith.mulf %1304, %1268 : vector<8x32xf32>
    %1306 = arith.addf %1301, %1305 : vector<8x32xf32>
    %1307 = vector.broadcast %1292 : vector<8x1xf32> to vector<8x32xf32>
    %1308 = arith.mulf %1307, %1288 : vector<8x32xf32>
    %1309 = vector.extract_strided_slice %1226 {offsets = [16, 0], sizes = [8, 128], strides = [1, 1]} : vector<64x128xf32> to vector<8x128xf32>
    %cst_210 = arith.constant dense<0.000000e+00> : vector<8x128xf32>
    %1310 = tpu.matmul %1299, %1230, %cst_210 {dimension_numbers = #tpu.dot_dimension_numbers<[1], [0], [0], [1], [0, 0, 1, 1], [], []>} : vector<8x32xf32>, vector<32x128xf32>, vector<8x128xf32> -> vector<8x128xf32>
    %1311 = arith.addf %1309, %1310 : vector<8x128xf32>
    %1312 = arith.negf %1311 : vector<8x128xf32>
    %1313 = math.exp %1312 : vector<8x128xf32>
    %cst_211 = arith.constant 1.000000e+00 : f32
    %1314 = vector.broadcast %cst_211 : f32 to vector<8x128xf32>
    %1315 = arith.addf %1314, %1313 : vector<8x128xf32>
    %1316 = arith.divf %1314, %1315 : vector<8x128xf32>
    %1317 = math.tanh %1311 : vector<8x128xf32>
    %1318 = vector.extract_strided_slice %1316 {offsets = [0, 0], sizes = [8, 32], strides = [1, 1]} : vector<8x128xf32> to vector<8x32xf32>
    %1319 = vector.extract_strided_slice %1316 {offsets = [0, 32], sizes = [8, 32], strides = [1, 1]} : vector<8x128xf32> to vector<8x32xf32>
    %1320 = vector.extract_strided_slice %1317 {offsets = [0, 64], sizes = [8, 32], strides = [1, 1]} : vector<8x128xf32> to vector<8x32xf32>
    %1321 = vector.extract_strided_slice %1316 {offsets = [0, 96], sizes = [8, 32], strides = [1, 1]} : vector<8x128xf32> to vector<8x32xf32>
    %1322 = arith.mulf %1319, %1306 : vector<8x32xf32>
    %1323 = arith.mulf %1318, %1320 : vector<8x32xf32>
    %1324 = arith.addf %1322, %1323 : vector<8x32xf32>
    %1325 = math.tanh %1324 : vector<8x32xf32>
    %1326 = arith.mulf %1321, %1325 : vector<8x32xf32>
    %c2_i32_212 = arith.constant 2 : i32
    %1327 = vector.broadcast %c2_i32_212 : i32 to vector<8x1xi32>
    %1328 = arith.cmpi sgt, %1232, %1327 : vector<8x1xi32>
    %1329 = arith.extui %1328 : vector<8x1xi1> to vector<8x1xi32>
    %1330 = arith.sitofp %1329 : vector<8x1xi32> to vector<8x1xf32>
    %1331 = vector.broadcast %1330 : vector<8x1xf32> to vector<8x32xf32>
    %1332 = arith.mulf %1331, %1326 : vector<8x32xf32>
    %cst_213 = arith.constant 1.000000e+00 : f32
    %1333 = vector.broadcast %cst_213 : f32 to vector<8x1xf32>
    %1334 = arith.subf %1333, %1330 : vector<8x1xf32>
    %1335 = vector.broadcast %1334 : vector<8x1xf32> to vector<8x32xf32>
    %1336 = arith.mulf %1335, %1299 : vector<8x32xf32>
    %1337 = arith.addf %1332, %1336 : vector<8x32xf32>
    %1338 = vector.broadcast %1330 : vector<8x1xf32> to vector<8x32xf32>
    %1339 = arith.mulf %1338, %1324 : vector<8x32xf32>
    %cst_214 = arith.constant 1.000000e+00 : f32
    %1340 = vector.broadcast %cst_214 : f32 to vector<8x1xf32>
    %1341 = arith.subf %1340, %1330 : vector<8x1xf32>
    %1342 = vector.broadcast %1341 : vector<8x1xf32> to vector<8x32xf32>
    %1343 = arith.mulf %1342, %1306 : vector<8x32xf32>
    %1344 = arith.addf %1339, %1343 : vector<8x32xf32>
    %1345 = vector.broadcast %1330 : vector<8x1xf32> to vector<8x32xf32>
    %1346 = arith.mulf %1345, %1326 : vector<8x32xf32>
    %1347 = vector.extract_strided_slice %1226 {offsets = [24, 0], sizes = [8, 128], strides = [1, 1]} : vector<64x128xf32> to vector<8x128xf32>
    %cst_215 = arith.constant dense<0.000000e+00> : vector<8x128xf32>
    %1348 = tpu.matmul %1337, %1230, %cst_215 {dimension_numbers = #tpu.dot_dimension_numbers<[1], [0], [0], [1], [0, 0, 1, 1], [], []>} : vector<8x32xf32>, vector<32x128xf32>, vector<8x128xf32> -> vector<8x128xf32>
    %1349 = arith.addf %1347, %1348 : vector<8x128xf32>
    %1350 = arith.negf %1349 : vector<8x128xf32>
    %1351 = math.exp %1350 : vector<8x128xf32>
    %cst_216 = arith.constant 1.000000e+00 : f32
    %1352 = vector.broadcast %cst_216 : f32 to vector<8x128xf32>
    %1353 = arith.addf %1352, %1351 : vector<8x128xf32>
    %1354 = arith.divf %1352, %1353 : vector<8x128xf32>
    %1355 = math.tanh %1349 : vector<8x128xf32>
    %1356 = vector.extract_strided_slice %1354 {offsets = [0, 0], sizes = [8, 32], strides = [1, 1]} : vector<8x128xf32> to vector<8x32xf32>
    %1357 = vector.extract_strided_slice %1354 {offsets = [0, 32], sizes = [8, 32], strides = [1, 1]} : vector<8x128xf32> to vector<8x32xf32>
    %1358 = vector.extract_strided_slice %1355 {offsets = [0, 64], sizes = [8, 32], strides = [1, 1]} : vector<8x128xf32> to vector<8x32xf32>
    %1359 = vector.extract_strided_slice %1354 {offsets = [0, 96], sizes = [8, 32], strides = [1, 1]} : vector<8x128xf32> to vector<8x32xf32>
    %1360 = arith.mulf %1357, %1344 : vector<8x32xf32>
    %1361 = arith.mulf %1356, %1358 : vector<8x32xf32>
    %1362 = arith.addf %1360, %1361 : vector<8x32xf32>
    %1363 = math.tanh %1362 : vector<8x32xf32>
    %1364 = arith.mulf %1359, %1363 : vector<8x32xf32>
    %c3_i32_217 = arith.constant 3 : i32
    %1365 = vector.broadcast %c3_i32_217 : i32 to vector<8x1xi32>
    %1366 = arith.cmpi sgt, %1232, %1365 : vector<8x1xi32>
    %1367 = arith.extui %1366 : vector<8x1xi1> to vector<8x1xi32>
    %1368 = arith.sitofp %1367 : vector<8x1xi32> to vector<8x1xf32>
    %1369 = vector.broadcast %1368 : vector<8x1xf32> to vector<8x32xf32>
    %1370 = arith.mulf %1369, %1364 : vector<8x32xf32>
    %cst_218 = arith.constant 1.000000e+00 : f32
    %1371 = vector.broadcast %cst_218 : f32 to vector<8x1xf32>
    %1372 = arith.subf %1371, %1368 : vector<8x1xf32>
    %1373 = vector.broadcast %1372 : vector<8x1xf32> to vector<8x32xf32>
    %1374 = arith.mulf %1373, %1337 : vector<8x32xf32>
    %1375 = arith.addf %1370, %1374 : vector<8x32xf32>
    %1376 = vector.broadcast %1368 : vector<8x1xf32> to vector<8x32xf32>
    %1377 = arith.mulf %1376, %1362 : vector<8x32xf32>
    %cst_219 = arith.constant 1.000000e+00 : f32
    %1378 = vector.broadcast %cst_219 : f32 to vector<8x1xf32>
    %1379 = arith.subf %1378, %1368 : vector<8x1xf32>
    %1380 = vector.broadcast %1379 : vector<8x1xf32> to vector<8x32xf32>
    %1381 = arith.mulf %1380, %1344 : vector<8x32xf32>
    %1382 = arith.addf %1377, %1381 : vector<8x32xf32>
    %1383 = vector.broadcast %1368 : vector<8x1xf32> to vector<8x32xf32>
    %1384 = arith.mulf %1383, %1364 : vector<8x32xf32>
    %1385 = vector.extract_strided_slice %1226 {offsets = [32, 0], sizes = [8, 128], strides = [1, 1]} : vector<64x128xf32> to vector<8x128xf32>
    %cst_220 = arith.constant dense<0.000000e+00> : vector<8x128xf32>
    %1386 = tpu.matmul %1375, %1230, %cst_220 {dimension_numbers = #tpu.dot_dimension_numbers<[1], [0], [0], [1], [0, 0, 1, 1], [], []>} : vector<8x32xf32>, vector<32x128xf32>, vector<8x128xf32> -> vector<8x128xf32>
    %1387 = arith.addf %1385, %1386 : vector<8x128xf32>
    %1388 = arith.negf %1387 : vector<8x128xf32>
    %1389 = math.exp %1388 : vector<8x128xf32>
    %cst_221 = arith.constant 1.000000e+00 : f32
    %1390 = vector.broadcast %cst_221 : f32 to vector<8x128xf32>
    %1391 = arith.addf %1390, %1389 : vector<8x128xf32>
    %1392 = arith.divf %1390, %1391 : vector<8x128xf32>
    %1393 = math.tanh %1387 : vector<8x128xf32>
    %1394 = vector.extract_strided_slice %1392 {offsets = [0, 0], sizes = [8, 32], strides = [1, 1]} : vector<8x128xf32> to vector<8x32xf32>
    %1395 = vector.extract_strided_slice %1392 {offsets = [0, 32], sizes = [8, 32], strides = [1, 1]} : vector<8x128xf32> to vector<8x32xf32>
    %1396 = vector.extract_strided_slice %1393 {offsets = [0, 64], sizes = [8, 32], strides = [1, 1]} : vector<8x128xf32> to vector<8x32xf32>
    %1397 = vector.extract_strided_slice %1392 {offsets = [0, 96], sizes = [8, 32], strides = [1, 1]} : vector<8x128xf32> to vector<8x32xf32>
    %1398 = arith.mulf %1395, %1382 : vector<8x32xf32>
    %1399 = arith.mulf %1394, %1396 : vector<8x32xf32>
    %1400 = arith.addf %1398, %1399 : vector<8x32xf32>
    %1401 = math.tanh %1400 : vector<8x32xf32>
    %1402 = arith.mulf %1397, %1401 : vector<8x32xf32>
    %c4_i32_222 = arith.constant 4 : i32
    %1403 = vector.broadcast %c4_i32_222 : i32 to vector<8x1xi32>
    %1404 = arith.cmpi sgt, %1232, %1403 : vector<8x1xi32>
    %1405 = arith.extui %1404 : vector<8x1xi1> to vector<8x1xi32>
    %1406 = arith.sitofp %1405 : vector<8x1xi32> to vector<8x1xf32>
    %1407 = vector.broadcast %1406 : vector<8x1xf32> to vector<8x32xf32>
    %1408 = arith.mulf %1407, %1402 : vector<8x32xf32>
    %cst_223 = arith.constant 1.000000e+00 : f32
    %1409 = vector.broadcast %cst_223 : f32 to vector<8x1xf32>
    %1410 = arith.subf %1409, %1406 : vector<8x1xf32>
    %1411 = vector.broadcast %1410 : vector<8x1xf32> to vector<8x32xf32>
    %1412 = arith.mulf %1411, %1375 : vector<8x32xf32>
    %1413 = arith.addf %1408, %1412 : vector<8x32xf32>
    %1414 = vector.broadcast %1406 : vector<8x1xf32> to vector<8x32xf32>
    %1415 = arith.mulf %1414, %1400 : vector<8x32xf32>
    %cst_224 = arith.constant 1.000000e+00 : f32
    %1416 = vector.broadcast %cst_224 : f32 to vector<8x1xf32>
    %1417 = arith.subf %1416, %1406 : vector<8x1xf32>
    %1418 = vector.broadcast %1417 : vector<8x1xf32> to vector<8x32xf32>
    %1419 = arith.mulf %1418, %1382 : vector<8x32xf32>
    %1420 = arith.addf %1415, %1419 : vector<8x32xf32>
    %1421 = vector.broadcast %1406 : vector<8x1xf32> to vector<8x32xf32>
    %1422 = arith.mulf %1421, %1402 : vector<8x32xf32>
    %1423 = vector.extract_strided_slice %1226 {offsets = [40, 0], sizes = [8, 128], strides = [1, 1]} : vector<64x128xf32> to vector<8x128xf32>
    %cst_225 = arith.constant dense<0.000000e+00> : vector<8x128xf32>
    %1424 = tpu.matmul %1413, %1230, %cst_225 {dimension_numbers = #tpu.dot_dimension_numbers<[1], [0], [0], [1], [0, 0, 1, 1], [], []>} : vector<8x32xf32>, vector<32x128xf32>, vector<8x128xf32> -> vector<8x128xf32>
    %1425 = arith.addf %1423, %1424 : vector<8x128xf32>
    %1426 = arith.negf %1425 : vector<8x128xf32>
    %1427 = math.exp %1426 : vector<8x128xf32>
    %cst_226 = arith.constant 1.000000e+00 : f32
    %1428 = vector.broadcast %cst_226 : f32 to vector<8x128xf32>
    %1429 = arith.addf %1428, %1427 : vector<8x128xf32>
    %1430 = arith.divf %1428, %1429 : vector<8x128xf32>
    %1431 = math.tanh %1425 : vector<8x128xf32>
    %1432 = vector.extract_strided_slice %1430 {offsets = [0, 0], sizes = [8, 32], strides = [1, 1]} : vector<8x128xf32> to vector<8x32xf32>
    %1433 = vector.extract_strided_slice %1430 {offsets = [0, 32], sizes = [8, 32], strides = [1, 1]} : vector<8x128xf32> to vector<8x32xf32>
    %1434 = vector.extract_strided_slice %1431 {offsets = [0, 64], sizes = [8, 32], strides = [1, 1]} : vector<8x128xf32> to vector<8x32xf32>
    %1435 = vector.extract_strided_slice %1430 {offsets = [0, 96], sizes = [8, 32], strides = [1, 1]} : vector<8x128xf32> to vector<8x32xf32>
    %1436 = arith.mulf %1433, %1420 : vector<8x32xf32>
    %1437 = arith.mulf %1432, %1434 : vector<8x32xf32>
    %1438 = arith.addf %1436, %1437 : vector<8x32xf32>
    %1439 = math.tanh %1438 : vector<8x32xf32>
    %1440 = arith.mulf %1435, %1439 : vector<8x32xf32>
    %c5_i32_227 = arith.constant 5 : i32
    %1441 = vector.broadcast %c5_i32_227 : i32 to vector<8x1xi32>
    %1442 = arith.cmpi sgt, %1232, %1441 : vector<8x1xi32>
    %1443 = arith.extui %1442 : vector<8x1xi1> to vector<8x1xi32>
    %1444 = arith.sitofp %1443 : vector<8x1xi32> to vector<8x1xf32>
    %1445 = vector.broadcast %1444 : vector<8x1xf32> to vector<8x32xf32>
    %1446 = arith.mulf %1445, %1440 : vector<8x32xf32>
    %cst_228 = arith.constant 1.000000e+00 : f32
    %1447 = vector.broadcast %cst_228 : f32 to vector<8x1xf32>
    %1448 = arith.subf %1447, %1444 : vector<8x1xf32>
    %1449 = vector.broadcast %1448 : vector<8x1xf32> to vector<8x32xf32>
    %1450 = arith.mulf %1449, %1413 : vector<8x32xf32>
    %1451 = arith.addf %1446, %1450 : vector<8x32xf32>
    %1452 = vector.broadcast %1444 : vector<8x1xf32> to vector<8x32xf32>
    %1453 = arith.mulf %1452, %1438 : vector<8x32xf32>
    %cst_229 = arith.constant 1.000000e+00 : f32
    %1454 = vector.broadcast %cst_229 : f32 to vector<8x1xf32>
    %1455 = arith.subf %1454, %1444 : vector<8x1xf32>
    %1456 = vector.broadcast %1455 : vector<8x1xf32> to vector<8x32xf32>
    %1457 = arith.mulf %1456, %1420 : vector<8x32xf32>
    %1458 = arith.addf %1453, %1457 : vector<8x32xf32>
    %1459 = vector.broadcast %1444 : vector<8x1xf32> to vector<8x32xf32>
    %1460 = arith.mulf %1459, %1440 : vector<8x32xf32>
    %1461 = vector.extract_strided_slice %1226 {offsets = [48, 0], sizes = [8, 128], strides = [1, 1]} : vector<64x128xf32> to vector<8x128xf32>
    %cst_230 = arith.constant dense<0.000000e+00> : vector<8x128xf32>
    %1462 = tpu.matmul %1451, %1230, %cst_230 {dimension_numbers = #tpu.dot_dimension_numbers<[1], [0], [0], [1], [0, 0, 1, 1], [], []>} : vector<8x32xf32>, vector<32x128xf32>, vector<8x128xf32> -> vector<8x128xf32>
    %1463 = arith.addf %1461, %1462 : vector<8x128xf32>
    %1464 = arith.negf %1463 : vector<8x128xf32>
    %1465 = math.exp %1464 : vector<8x128xf32>
    %cst_231 = arith.constant 1.000000e+00 : f32
    %1466 = vector.broadcast %cst_231 : f32 to vector<8x128xf32>
    %1467 = arith.addf %1466, %1465 : vector<8x128xf32>
    %1468 = arith.divf %1466, %1467 : vector<8x128xf32>
    %1469 = math.tanh %1463 : vector<8x128xf32>
    %1470 = vector.extract_strided_slice %1468 {offsets = [0, 0], sizes = [8, 32], strides = [1, 1]} : vector<8x128xf32> to vector<8x32xf32>
    %1471 = vector.extract_strided_slice %1468 {offsets = [0, 32], sizes = [8, 32], strides = [1, 1]} : vector<8x128xf32> to vector<8x32xf32>
    %1472 = vector.extract_strided_slice %1469 {offsets = [0, 64], sizes = [8, 32], strides = [1, 1]} : vector<8x128xf32> to vector<8x32xf32>
    %1473 = vector.extract_strided_slice %1468 {offsets = [0, 96], sizes = [8, 32], strides = [1, 1]} : vector<8x128xf32> to vector<8x32xf32>
    %1474 = arith.mulf %1471, %1458 : vector<8x32xf32>
    %1475 = arith.mulf %1470, %1472 : vector<8x32xf32>
    %1476 = arith.addf %1474, %1475 : vector<8x32xf32>
    %1477 = math.tanh %1476 : vector<8x32xf32>
    %1478 = arith.mulf %1473, %1477 : vector<8x32xf32>
    %c6_i32_232 = arith.constant 6 : i32
    %1479 = vector.broadcast %c6_i32_232 : i32 to vector<8x1xi32>
    %1480 = arith.cmpi sgt, %1232, %1479 : vector<8x1xi32>
    %1481 = arith.extui %1480 : vector<8x1xi1> to vector<8x1xi32>
    %1482 = arith.sitofp %1481 : vector<8x1xi32> to vector<8x1xf32>
    %1483 = vector.broadcast %1482 : vector<8x1xf32> to vector<8x32xf32>
    %1484 = arith.mulf %1483, %1478 : vector<8x32xf32>
    %cst_233 = arith.constant 1.000000e+00 : f32
    %1485 = vector.broadcast %cst_233 : f32 to vector<8x1xf32>
    %1486 = arith.subf %1485, %1482 : vector<8x1xf32>
    %1487 = vector.broadcast %1486 : vector<8x1xf32> to vector<8x32xf32>
    %1488 = arith.mulf %1487, %1451 : vector<8x32xf32>
    %1489 = arith.addf %1484, %1488 : vector<8x32xf32>
    %1490 = vector.broadcast %1482 : vector<8x1xf32> to vector<8x32xf32>
    %1491 = arith.mulf %1490, %1476 : vector<8x32xf32>
    %cst_234 = arith.constant 1.000000e+00 : f32
    %1492 = vector.broadcast %cst_234 : f32 to vector<8x1xf32>
    %1493 = arith.subf %1492, %1482 : vector<8x1xf32>
    %1494 = vector.broadcast %1493 : vector<8x1xf32> to vector<8x32xf32>
    %1495 = arith.mulf %1494, %1458 : vector<8x32xf32>
    %1496 = arith.addf %1491, %1495 : vector<8x32xf32>
    %1497 = vector.broadcast %1482 : vector<8x1xf32> to vector<8x32xf32>
    %1498 = arith.mulf %1497, %1478 : vector<8x32xf32>
    %1499 = vector.extract_strided_slice %1226 {offsets = [56, 0], sizes = [8, 128], strides = [1, 1]} : vector<64x128xf32> to vector<8x128xf32>
    %cst_235 = arith.constant dense<0.000000e+00> : vector<8x128xf32>
    %1500 = tpu.matmul %1489, %1230, %cst_235 {dimension_numbers = #tpu.dot_dimension_numbers<[1], [0], [0], [1], [0, 0, 1, 1], [], []>} : vector<8x32xf32>, vector<32x128xf32>, vector<8x128xf32> -> vector<8x128xf32>
    %1501 = arith.addf %1499, %1500 : vector<8x128xf32>
    %1502 = arith.negf %1501 : vector<8x128xf32>
    %1503 = math.exp %1502 : vector<8x128xf32>
    %cst_236 = arith.constant 1.000000e+00 : f32
    %1504 = vector.broadcast %cst_236 : f32 to vector<8x128xf32>
    %1505 = arith.addf %1504, %1503 : vector<8x128xf32>
    %1506 = arith.divf %1504, %1505 : vector<8x128xf32>
    %1507 = math.tanh %1501 : vector<8x128xf32>
    %1508 = vector.extract_strided_slice %1506 {offsets = [0, 0], sizes = [8, 32], strides = [1, 1]} : vector<8x128xf32> to vector<8x32xf32>
    %1509 = vector.extract_strided_slice %1506 {offsets = [0, 32], sizes = [8, 32], strides = [1, 1]} : vector<8x128xf32> to vector<8x32xf32>
    %1510 = vector.extract_strided_slice %1507 {offsets = [0, 64], sizes = [8, 32], strides = [1, 1]} : vector<8x128xf32> to vector<8x32xf32>
    %1511 = vector.extract_strided_slice %1506 {offsets = [0, 96], sizes = [8, 32], strides = [1, 1]} : vector<8x128xf32> to vector<8x32xf32>
    %1512 = arith.mulf %1509, %1496 : vector<8x32xf32>
    %1513 = arith.mulf %1508, %1510 : vector<8x32xf32>
    %1514 = arith.addf %1512, %1513 : vector<8x32xf32>
    %1515 = math.tanh %1514 : vector<8x32xf32>
    %1516 = arith.mulf %1511, %1515 : vector<8x32xf32>
    %c7_i32_237 = arith.constant 7 : i32
    %1517 = vector.broadcast %c7_i32_237 : i32 to vector<8x1xi32>
    %1518 = arith.cmpi sgt, %1232, %1517 : vector<8x1xi32>
    %1519 = arith.extui %1518 : vector<8x1xi1> to vector<8x1xi32>
    %1520 = arith.sitofp %1519 : vector<8x1xi32> to vector<8x1xf32>
    %1521 = vector.broadcast %1520 : vector<8x1xf32> to vector<8x32xf32>
    %1522 = arith.mulf %1521, %1516 : vector<8x32xf32>
    %1523 = vector.shape_cast %1270 : vector<8x32xf32> to vector<8x1x32xf32>
    %1524 = vector.shape_cast %1308 : vector<8x32xf32> to vector<8x1x32xf32>
    %1525 = vector.shape_cast %1346 : vector<8x32xf32> to vector<8x1x32xf32>
    %1526 = vector.shape_cast %1384 : vector<8x32xf32> to vector<8x1x32xf32>
    %1527 = vector.shape_cast %1422 : vector<8x32xf32> to vector<8x1x32xf32>
    %1528 = vector.shape_cast %1460 : vector<8x32xf32> to vector<8x1x32xf32>
    %1529 = vector.shape_cast %1498 : vector<8x32xf32> to vector<8x1x32xf32>
    %1530 = vector.shape_cast %1522 : vector<8x32xf32> to vector<8x1x32xf32>
    %1531 = tpu.concatenate %1523, %1524, %1525, %1526, %1527, %1528, %1529, %1530 in 1 : vector<8x1x32xf32>, vector<8x1x32xf32>, vector<8x1x32xf32>, vector<8x1x32xf32>, vector<8x1x32xf32>, vector<8x1x32xf32>, vector<8x1x32xf32>, vector<8x1x32xf32> -> vector<8x8x32xf32>
    %1532 = vector.shape_cast %1531 : vector<8x8x32xf32> to vector<64x32xf32>
    %c0_238 = arith.constant 0 : index
    %c0_239 = arith.constant 0 : index
    %1533 = vector.load %arg5[%c0_238, %c0_239] : memref<32x128xf32, #tpu.memory_space<vmem>>, vector<32x128xf32>
    %cst_240 = arith.constant dense<0.000000e+00> : vector<64x128xf32>
    %1534 = tpu.matmul %1532, %1533, %cst_240 {dimension_numbers = #tpu.dot_dimension_numbers<[1], [0], [0], [1], [0, 0, 1, 1], [], []>} : vector<64x32xf32>, vector<32x128xf32>, vector<64x128xf32> -> vector<64x128xf32>
    %1535 = vector.shape_cast %1534 : vector<64x128xf32> to vector<8x8x128xf32>
    %c0_241 = arith.constant 0 : index
    %c0_242 = arith.constant 0 : index
    %c0_243 = arith.constant 0 : index
    %1536 = vector.load %arg22[%c0_241, %c0_242, %c0_243] : memref<8x8x128xf32, #tpu.memory_space<vmem>>, vector<8x8x128xf32>
    tpu.vector_store %arg22[%c0_241, %c0_242, %c0_243], %1535 {strides = array<i32>} : memref<8x8x128xf32, #tpu.memory_space<vmem>>, vector<8x8x128xf32>,
    return
  }
}

</mosaic_0001>

<bundles_post_ra>
// kernel: seq2seq_lstm_forward.1
= control target key start
LH: loop header
LB: loop body
LE: loop exit
PB: predicated region body
PF: predicated region fallthrough
CT: control target
= control target key end

     0   :  { %s6620_s0 = inlined_call_operand.vmem [shape: s32[8,8], index: 0, kind: input, shape index: {}]   ;;  %s6621_s1 = inlined_call_operand.vmem [shape: s32[8,8], index: 1, kind: input, shape index: {}]   ;;  %s6622_s2 = inlined_call_operand.vmem [shape: s32[8,1], index: 2, kind: input, shape index: {}]   ;;  %s6623_s3 = inlined_call_operand.vmem [shape: s32[8,1], index: 3, kind: input, shape index: {}]   ;;  %s6624_s4 = inlined_call_operand.vmem [shape: f32[128,32], index: 4, kind: input, shape index: {}]   ;;  %s6625_s5 = inlined_call_operand.vmem [shape: f32[32,128], index: 5, kind: input, shape index: {}]   ;;  %s6626_s6 = inlined_call_operand.vmem [shape: f32[32,256], index: 6, kind: input, shape index: {}]   ;;  %s6627_s7 = inlined_call_operand.vmem [shape: f32[32,128], index: 7, kind: input, shape index: {}]   ;;  %s6628_s8 = inlined_call_operand.vmem [shape: f32[32,128], index: 8, kind: input, shape index: {}]   ;;  %s6629_s9 = inlined_call_operand.vmem [shape: f32[1,256], index: 9, kind: input, shape index: {}]   ;;  %s6630_s10 = inlined_call_operand.vmem [shape: f32[64,256], index: 10, kind: input, shape index: {}]   ;;  %s6631_s11 = inlined_call_operand.vmem [shape: f32[32,128], index: 11, kind: input, shape index: {}]   ;;  %s6632_s12 = inlined_call_operand.vmem [shape: f32[32,128], index: 12, kind: input, shape index: {}]   ;;  %s6633_s13 = inlined_call_operand.vmem [shape: f32[1,256], index: 13, kind: input, shape index: {}]   ;;  %s6634_s14 = inlined_call_operand.vmem [shape: f32[128,32], index: 14, kind: input, shape index: {}]   ;;  %s6635_s15 = inlined_call_operand.vmem [shape: f32[1,32], index: 15, kind: input, shape index: {}]   ;;  %s6636_s16 = inlined_call_operand.vmem [shape: f32[32,32], index: 16, kind: input, shape index: {}]   ;;  %s6637_s17 = inlined_call_operand.vmem [shape: f32[1,32], index: 17, kind: input, shape index: {}]   ;;  %s6638_s18 = inlined_call_operand.vmem [shape: f32[32,128], index: 18, kind: input, shape index: {}]   ;;  %s6639_s19 = inlined_call_operand.vmem [shape: f32[32,128], index: 19, kind: input, shape index: {}]   ;;  %s6640_s20 = inlined_call_operand.vmem [shape: f32[1,128], index: 20, kind: input, shape index: {}]   ;;  %s6641_s21 = inlined_call_operand.vmem [shape: f32[1,32], index: 21, kind: input, shape index: {}]   ;;  %s6642_s22 = inlined_call_operand.hbm [shape: f32[8,8,128], index: 22, kind: output, shape index: {}]  }
   0x1   :  { %6648 = sst [smem:[#allocation5_spill]] %s6620_s0 }
   0x2   :  { %6649 = sst [smem:[#allocation6_spill]] %s6621_s1 }
   0x3   :  { %6650 = sst [smem:[#allocation7_spill]] %s6622_s2 }
   0x4   :  { %6651 = sst [smem:[#allocation8_spill]] %s6623_s3 }
   0x5   :  { %6652 = sst [smem:[#allocation9_spill]] %s6624_s4 }
   0x6   :  { %6653 = sst [smem:[#allocation10_spill]] %s6625_s5 }
   0x7   :  { %6654 = sst [smem:[#allocation11_spill]] %s6626_s6 }
   0x8   :  { %v91_v0 = vlaneseq  ;;  %s6655_s29 = sld [smem:[#allocation9_spill]] }
   0x9   :  { %s6656_s24 = sld [smem:[#allocation5_spill]] }
   0xa   :  { %v4877_v3 = vshrl.u32 %v91_v0, 7 }
   0xc   :  { %4351 = vset.pattern.permute.xlu0 %v4877_v3  ;;  %4352 = vset.pattern.permute.xlu1 %v4877_v3 }
   0xe   :  { %v87_v1 = vld [vmem:[%s6655_s29 + $0x78] sm:$0xff]  ;;  %v86_v2 = vld [vmem:[%s6655_s29 + $0x70] sm:$0xff]  ;;  %v85_v4 = vld [vmem:[%s6655_s29 + $0x68] sm:$0xff] }
   0xf   :  { %173 = vmatpush.msra.mxu0 %v87_v1  ;;  %v4886_v5 = vld [vmem:[%s6656_s24] sm:$0xff]  ;;  %v83_v7 = vld [vmem:[%s6655_s29 + $0x58] sm:$0xff] }
  0x10   :  { %v84_v6 = vld [vmem:[%s6655_s29 + $0x60] sm:$0xff] }
  0x11   :  { %174 = vmatpush.msra.mxu0 %v86_v2 }
  0x13   :  { %175 = vmatpush.msra.mxu0 %v85_v4 }
  0x14   :  { %27 = vsyncpa [#allocation3], 0  ;;  %v93_v8 = vperm.slane %v4886_v5, 0  ;;  %v82_v9 = vld [vmem:[%s6655_s29 + $0x50] sm:$0xff]  ;;  %v81_v10 = vld [vmem:[%s6655_s29 + $0x48] sm:$0xff]  ;;  %s6657_s27 = sld [smem:[#allocation11_spill]] }
  0x15   :  { %176 = vmatpush.msra.mxu0 %v84_v6  ;;  %v80_v11 = vld [vmem:[%s6655_s29 + $0x40] sm:$0xff]  ;;  %v79_v12 = vld [vmem:[%s6655_s29 + $0x38] sm:$0xff]  ;;  %v78_v13 = vld [vmem:[%s6655_s29 + $0x30] sm:$0xff]  ;;  %v4746_v28 = vmov 0.0   ;;  %v4975_v29 = vand.u32 127, %v91_v0  ;;  %v4747_v31 = vmov 1.0  }
  0x16   :  { %98 = vperm.xlu0 %4351, %v93_v8   ;;  %v77_v14 = vld [vmem:[%s6655_s29 + $0x28] sm:$0xff]  ;;  %v76_v15 = vld [vmem:[%s6655_s29 + $0x20] sm:$0xff]  ;;  %v75_v16 = vld [vmem:[%s6655_s29 + $0x18] sm:$0xff]  ;;  %vm236_vm1 = vcmask 261120   ;;  %v100_v38 = vperm.slane %v4886_v5, 1  ;;  %s6658_s5 = sld [smem:[#allocation7_spill]] }
  0x17   :  { %177 = vmatpush.msra.mxu0 %v83_v7  ;;  %v74_v17 = vld [vmem:[%s6655_s29 + $0x10] sm:$0xff]  ;;  %v73_v18 = vld [vmem:[%s6655_s29 + $0x8] sm:$0xff]  ;;  %v72_v19 = vld [vmem:[%s6655_s29] sm:$0xff]  ;;  %v4749_v50 = vmov 0   ;;  %s4750_s24 = smov 32   ;;  %s6659_s28 = sld [smem:[#allocation6_spill]] }
  0x18   :  { %v4932_v20 = vld [vmem:[%s6627_s7 + $0x18] sm:$0xff]  ;;  %v4937_v21 = vld [vmem:[%s6627_s7 + $0x10] sm:$0xff]  ;;  %v4952_v25 = vld [vmem:[%s6627_s7 + $0x8] sm:$0xff]  ;;  %105 = vperm.xlu1 %4352, %v100_v38   ;;  %4353 = vset.pattern.permute.xlu2 %v4749_v50  ;;  %s6660_s6 = sld [smem:[#allocation8_spill]]  ;;  %s4753_s30 = smov 128  }
  0x19   :  { %178 = vmatpush.msra.mxu0 %v82_v9  ;;  %362 = vmatpush.msra.mxu3 %v4932_v20  ;;  %v4961_v27 = vld [vmem:[%s6627_s7] sm:$0xff]  ;;  %s4751_s7 = smov 96  }
  0x1a   :  { %v228_v22 = vld [vmem:[%s6657_s27 + $0x30] sm:$0xff]  ;;  %v229_v23 = vld [vmem:[%s6657_s27 + $0x38] sm:$0xff]  ;;  %v226_v24 = vld [vmem:[%s6657_s27 + $0x20] sm:$0xff] }
  0x1b   :  { %179 = vmatpush.msra.mxu0 %v81_v10  ;;  %273 = vmatpush.msra.mxu1 %v228_v22  ;;  %v227_v26 = vld [vmem:[%s6657_s27 + $0x28] sm:$0xff]  ;;  %v224_v32 = vld [vmem:[%s6657_s27 + $0x10] sm:$0xff]  ;;  %v225_v33 = vld [vmem:[%s6657_s27 + $0x18] sm:$0xff] }
  0x1c   :  { %314 = vmatpush.msra.mxu2 %v229_v23  ;;  %363 = vmatpush.msra.mxu3 %v4937_v21  ;;  %v222_v34 = vld [vmem:[%s6657_s27] sm:$0xff]  ;;  %v223_v35 = vld [vmem:[%s6657_s27 + $0x8] sm:$0xff]  ;;  %s4748_s27 = smov 64  }
  0x1d   :  { %180 = vmatpush.msra.mxu0 %v80_v11  ;;  %274 = vmatpush.msra.mxu1 %v226_v24  ;;  %v4997_v39 = vld [vmem:[%s6629_s9] sm:$0x3] }
  0x1e   :  { %315 = vmatpush.msra.mxu2 %v227_v26  ;;  %364 = vmatpush.msra.mxu3 %v4952_v25  ;;  %v5000_v40 = vperm.slane %v4997_v39, 0  ;;  %v5007_v49 = vld [vmem:[%s6658_s5] sm:$0xff] }
  0x1f   :  { %181 = vmatpush.msra.mxu0 %v79_v12  ;;  %275 = vmatpush.msra.mxu1 %v224_v32  ;;  %vm408_vm2 = vcmp.gt.s32.totalorder %v5007_v49, 0  ;;  %vm490_vm9 = vcmp.gt.s32.totalorder %v5007_v49, 1  ;;  %vm573_vm14 = vcmp.gt.s32.totalorder %v5007_v49, 2 }
  0x20   :  { %365 = vmatpush.msra.mxu3 %v4961_v27  ;;  %316 = vmatpush.msra.mxu2 %v225_v33  ;;  %v4197_v51 = vsel %vm408_vm2, 1.0, %v4746_v28  ;;  %v4200_v22 = vsel %vm490_vm9, 1.0, %v4746_v28  ;;  %vm656_vm9 = vcmp.gt.s32.totalorder %v5007_v49, 3 }
  0x21   :  { %182 = vmatpush.msra.mxu0 %v78_v13  ;;  %366 = vmatmul.f32.vlgmr.msra.gmra.mxu3 %v4746_v28  ;;  %v417_v53 = vsub.f32 1.0, %v4197_v51 }
  0x22   :  { %444 = vmatpush.msrb.mxu3 %v4932_v20  ;;  %276 = vmatpush.msra.mxu1 %v222_v34 }
  0x23   :  { %183 = vmatpush.msra.mxu0 %v77_v14  ;;  %317 = vmatpush.msra.mxu2 %v223_v35 }
  0x24   :  { %445 = vmatpush.msrb.mxu3 %v4937_v21  ;;  %4354 = vset.pattern.permute.xlu0 %v4749_v50 }
  0x25   :  { %184 = vmatpush.msra.mxu0 %v76_v15 }
  0x26   :  { %446 = vmatpush.msrb.mxu3 %v4952_v25 }
  0x27   :  { %185 = vmatpush.msra.mxu0 %v75_v16 }
  0x28   :  { %447 = vmatpush.msrb.mxu3 %v4961_v27 }
  0x29   :  { %186 = vmatpush.msra.mxu0 %v74_v17  ;;  %v107_v17 = vperm.slane %v4886_v5, 2 }
  0x2a   :  { %527 = vmatpush.msra.mxu3 %v4932_v20 }
  0x2b   :  { %187 = vmatpush.msra.mxu0 %v73_v18 }
  0x2c   :  { %528 = vmatpush.msra.mxu3 %v4937_v21 }
  0x2d   :  { %188 = vmatpush.msra.mxu0 %v72_v19 }
  0x2e   :  { %529 = vmatpush.msra.mxu3 %v4952_v25 }
  0x30   :  { %530 = vmatpush.msra.mxu3 %v4961_v27 }
  0x88   :  { %v99_v30 = vpop.permute.xlu0 %98 }
  0x89   :  { %vm149_vm0 = vcmp.eq.s32.totalorder %v4975_v29, %v99_v30 }
  0x8a   :  { %4172 = vmatmul.msk.f32.vlgmr.msra.gmra.mxu0 %vm149_vm0, %v4747_v31  ;;  %v106_v52 = vpop.permute.xlu1 %105 }
  0x8b   :  { %vm150_vm3 = vcmp.eq.s32.totalorder %v4975_v29, %v106_v52 }
  0x92   :  { %4173 = vmatmul.msk.f32.gmra.mxu0 %vm150_vm3, %v4747_v31 }
  0xa4   :  { %v367_v42 = vpop.f32.mrf.mxu3 }
 0x107   :  { %v190_v36 = vpop.f32.mrf.mxu0 }
 0x108   :  { %v214_v37 = vmul.f32 5.656854, %v190_v36 }
 0x10a   :  { %4180 = vmatmul.msk.f32.vlgmr.msra.gmra.mxu1 %vm236_vm1, %v214_v37  ;;  %4188 = vmatmul.msk.f32.vlgmr.msra.gmra.mxu2 %vm236_vm1, %v214_v37 }
 0x10f   :  { %v193_v8 = vpop.f32.mrf.mxu0 }
 0x110   :  { %v215_v9 = vmul.f32 5.656854, %v193_v8 }
 0x112   :  { %4181 = vmatmul.msk.f32.gmra.mxu1 %vm236_vm1, %v215_v9  ;;  %4189 = vmatmul.msk.f32.gmra.mxu2 %vm236_vm1, %v215_v9 }
 0x187   :  { %v278_v41 = vpop.f32.mrf.mxu1 }
 0x188   :  { %v279_v43 = vadd.f32 %v278_v41, %v5000_v40 }
 0x18a   :  { %v370_v44 = vadd.f32 %v367_v42, %v279_v43 }
 0x18c   :  { %4381 = vtanh.f32 %v370_v44  ;;  %v4196_v46 = vmul.f32 -1.442695, %v370_v44 }
 0x18e   :  { %4383 = vpow2.f32 %v4196_v46 }
 0x18f   :  { %v281_v23 = vpop.f32.mrf.mxu1 }
 0x190   :  { %v282_v24 = vadd.f32 %v281_v23, %v5000_v40 }
 0x192   :  { %v4382_v45 = vpop.eup %4381 }
 0x193   :  { %393 = vrot.lane.b32.xlu0 %v4382_v45, %s4748_s27 }
 0x194   :  { %v4384_v47 = vpop.eup %4383 }
 0x195   :  { %v374_v48 = vadd.f32 1.0, %v4384_v47 }
 0x197   :  { %4385 = vrcp.f32 %v374_v48  ;;  %v386_v59 = vand.u32 2147483648, %v374_v48  ;;  %vm380_vm5 = vweird.f32 %v374_v48  ;;  %v384_v60 = vand.u32 2147483647, %v374_v48 }
 0x199   :  { %v387_v62 = vor.u32 1.1754944e-38, %v386_v59  ;;  %vm385_vm7 = vcmp.eq.f32.partialorder %v384_v60, 8.507059e+37 }
 0x19b   :  { %420 = vperm.xlu0 %4354, %v417_v53  }
 0x19d   :  { %v4386_v54 = vpop.eup %4385 }
 0x19e   :  { %v376_v55 = vmul.f32 %v4386_v54, %v374_v48  ;;  %vm381_vm4 = vweird.f32 %v4386_v54 }
 0x19f   :  { %vm382_vm6 = vmor %vm380_vm5, %vm381_vm4 }
 0x1a0   :  { %v377_v56 = vsub.f32 1.0, %v376_v55 }
 0x1a2   :  { %v378_v57 = vmul.f32 %v4386_v54, %v377_v56 }
 0x1a4   :  { %v379_v58 = vadd.f32 %v4386_v54, %v378_v57 }
 0x1a6   :  { %v383_v61 = vsel %vm382_vm6, %v4386_v54, %v379_v58  ;;  %v499_v54 = vsub.f32 1.0, %v4200_v22 }
 0x1a7   :  { %v388_v0 = vsel %vm385_vm7, %v387_v62, %v383_v61 }
 0x1a8   :  { %v391_v2 = vmul.f32 0.0, %v388_v0 }
 0x205   :  { %v394_v63 = vpop.permute.xlu0 %393 }
 0x206   :  { %v396_v1 = vmul.f32 %v394_v63, %v388_v0 }
 0x208   :  { %398 = vrot.lane.b32.xlu1 %v396_v1, %s4750_s24 }
 0x20d   :  { %v5022_v11 = vpop.permute.xlu0 %420 }
 0x20e   :  { %v5025_v13 = vmul.f32 0.0, %v5022_v11 }
 0x27a   :  { %v399_v4 = vpop.permute.xlu1 %398 }
 0x27b   :  { %v5016_v6 = vadd.f32 %v399_v4, %v391_v2 }
 0x27d   :  { %4387 = vtanh.f32 %v5016_v6 }
 0x283   :  { %v4388_v7 = vpop.eup %4387 }
 0x284   :  { %404 = vrot.lane.b32.xlu2 %v4388_v7, %s4748_s27 }
 0x28c   :  { %413 = vperm.xlu2 %4353, %v4197_v51  }
 0x2de   :  { %v405_v10 = vpop.permute.xlu2 %404 }
 0x2df   :  { %v407_v12 = vmul.f32 %v405_v10, %v388_v0 }
 0x2e6   :  { %v5027_v14 = vpop.permute.xlu2 %413 }
 0x2e7   :  { %v5030_v15 = vmul.f32 %v5027_v14, %v407_v12  ;;  %v425_v55 = vmul.f32 %v5027_v14, %v5016_v6 }
 0x2e9   :  { %v5034_v16 = vadd.f32 %v5025_v13, %v5030_v15  ;;  %v426_v56 = vadd.f32 %v425_v55, %v5025_v13 }
 0x2eb   :  { %428 = vrot.lane.b32.xlu1 %v5034_v16, %s4750_s24 }
 0x2f3   :  { %112 = vperm.xlu1 %4352, %v107_v17  }
 0x2fb   :  { %4355 = vset.pattern.permute.xlu1 %v4749_v50 }
 0x2fc   :  { %495 = vperm.xlu1 %4355, %v4200_v22   ;;  %v114_v22 = vperm.slane %v4886_v5, 3 }
 0x35d   :  { %v429_v18 = vpop.permute.xlu1 %428 }
 0x35e   :  { %4198 = vmatmul.msk.f32.vlgmr.msrb.gmra.mxu3 %vm236_vm1, %v429_v18 }
 0x35f   :  { %610 = vmatpush.msrb.mxu3 %v4932_v20 }
 0x361   :  { %611 = vmatpush.msrb.mxu3 %v4937_v21 }
 0x363   :  { %612 = vmatpush.msrb.mxu3 %v4952_v25 }
 0x365   :  { %v113_v19 = vpop.permute.xlu1 %112  ;;  %613 = vmatpush.msrb.mxu3 %v4961_v27 }
 0x366   :  { %vm151_vm8 = vcmp.eq.s32.totalorder %v4975_v29, %v113_v19 }
 0x367   :  { %4174 = vmatmul.msk.f32.gmra.mxu0 %vm151_vm8, %v4747_v31 }
 0x36e   :  { %v5061_v0 = vpop.permute.xlu1 %495 }
 0x3e1   :  { %v449_v26 = vpop.f32.mrf.mxu3 }
 0x3e2   :  { %v452_v30 = vadd.f32 %v449_v26, %v282_v24 }
 0x3e4   :  { %4389 = vtanh.f32 %v452_v30  ;;  %v196_v32 = vpop.f32.mrf.mxu0  ;;  %v4199_v35 = vmul.f32 -1.442695, %v452_v30  ;;  %v4203_v30 = vsel %vm573_vm14, 1.0, %v4746_v28 }
 0x3e5   :  { %v216_v33 = vmul.f32 5.656854, %v196_v32 }
 0x3e6   :  { %4391 = vpow2.f32 %v4199_v35 }
 0x3e7   :  { %4182 = vmatmul.msk.f32.gmra.mxu1 %vm236_vm1, %v216_v33  ;;  %4190 = vmatmul.msk.f32.gmra.mxu2 %vm236_vm1, %v216_v33 }
 0x3ea   :  { %v4390_v34 = vpop.eup %4389 }
 0x3eb   :  { %475 = vrot.lane.b32.xlu2 %v4390_v34, %s4748_s27 }
 0x3ec   :  { %v4392_v36 = vpop.eup %4391 }
 0x3ed   :  { %v456_v37 = vadd.f32 1.0, %v4392_v36 }
 0x3ef   :  { %4393 = vrcp.f32 %v456_v37  ;;  %v468_v45 = vand.u32 2147483648, %v456_v37  ;;  %vm462_vm11 = vweird.f32 %v456_v37  ;;  %v466_v46 = vand.u32 2147483647, %v456_v37 }
 0x3f1   :  { %v469_v48 = vor.u32 1.1754944e-38, %v468_v45  ;;  %vm467_vm13 = vcmp.eq.f32.partialorder %v466_v46, 8.507059e+37 }
 0x3f5   :  { %v4394_v38 = vpop.eup %4393 }
 0x3f6   :  { %v458_v41 = vmul.f32 %v4394_v38, %v456_v37  ;;  %vm463_vm10 = vweird.f32 %v4394_v38 }
 0x3f7   :  { %vm464_vm12 = vmor %vm462_vm11, %vm463_vm10 }
 0x3f8   :  { %v459_v42 = vsub.f32 1.0, %v458_v41 }
 0x3fa   :  { %v460_v43 = vmul.f32 %v4394_v38, %v459_v42  ;;  %v582_v42 = vsub.f32 1.0, %v4203_v30 }
 0x3fc   :  { %v461_v44 = vadd.f32 %v4394_v38, %v460_v43 }
 0x3fe   :  { %v465_v47 = vsel %vm464_vm12, %v4394_v38, %v461_v44 }
 0x3ff   :  { %v470_v52 = vsel %vm467_vm13, %v469_v48, %v465_v47  ;;  %vm739_vm13 = vcmp.gt.s32.totalorder %v5007_v49, 4 }
 0x400   :  { %v473_v57 = vmul.f32 %v470_v52, %v426_v56 }
 0x445   :  { %v476_v51 = vpop.permute.xlu2 %475 }
 0x446   :  { %v478_v53 = vmul.f32 %v476_v51, %v470_v52 }
 0x448   :  { %480 = vrot.lane.b32.xlu2 %v478_v53, %s4750_s24 }
 0x450   :  { %502 = vperm.xlu2 %4353, %v499_v54  }
 0x458   :  { %4356 = vset.pattern.permute.xlu2 %v4877_v3 }
 0x460   :  { %119 = vperm.xlu2 %4356, %v114_v22  }
 0x464   :  { %v284_v7 = vpop.f32.mrf.mxu1 }
 0x465   :  { %v285_v8 = vadd.f32 %v284_v7, %v5000_v40 }
 0x468   :  { %4357 = vset.pattern.permute.xlu2 %v4749_v50 }
 0x469   :  { %578 = vperm.xlu2 %4357, %v4203_v30  }
 0x4a2   :  { %v481_v58 = vpop.permute.xlu2 %480 }
 0x4a3   :  { %v483_v59 = vadd.f32 %v481_v58, %v473_v57 }
 0x4a5   :  { %4395 = vtanh.f32 %v483_v59  ;;  %v507_v45 = vmul.f32 %v5061_v0, %v483_v59 }
 0x4aa   :  { %v5059_v61 = vpop.permute.xlu2 %502 }
 0x4ab   :  { %v4396_v60 = vpop.eup %4395  ;;  %v505_v2 = vmul.f32 %v5059_v61, %v5034_v16  ;;  %v508_v44 = vmul.f32 %v5059_v61, %v426_v56 }
 0x4ac   :  { %486 = vrot.lane.b32.xlu0 %v4396_v60, %s4748_s27 }
 0x4ad   :  { %v509_v46 = vadd.f32 %v508_v44, %v507_v45 }
 0x4ba   :  { %v120_v43 = vpop.permute.xlu2 %119 }
 0x4bb   :  { %vm152_vm4 = vcmp.eq.s32.totalorder %v4975_v29, %v120_v43 }
 0x4bc   :  { %4175 = vmatmul.msk.f32.gmra.mxu0 %vm152_vm4, %v4747_v31 }
 0x4c3   :  { %v5095_v58 = vpop.permute.xlu2 %578 }
 0x51e   :  { %v487_v62 = vpop.permute.xlu0 %486 }
 0x51f   :  { %v489_v63 = vmul.f32 %v487_v62, %v470_v52 }
 0x521   :  { %v5064_v1 = vmul.f32 %v5061_v0, %v489_v63 }
 0x523   :  { %v5069_v4 = vadd.f32 %v505_v2, %v5064_v1 }
 0x525   :  { %511 = vrot.lane.b32.xlu0 %v5069_v4, %s4750_s24 }
 0x539   :  { %v199_v53 = vpop.f32.mrf.mxu0 }
 0x53a   :  { %v217_v54 = vmul.f32 5.656854, %v199_v53 }
 0x53c   :  { %4183 = vmatmul.msk.f32.gmra.mxu1 %vm236_vm1, %v217_v54  ;;  %4191 = vmatmul.msk.f32.gmra.mxu2 %vm236_vm1, %v217_v54 }
 0x597   :  { %v512_v6 = vpop.permute.xlu0 %511 }
 0x598   :  { %4201 = vmatmul.msk.f32.vlgmr.msra.gmra.mxu3 %vm236_vm1, %v512_v6 }
 0x599   :  { %693 = vmatpush.msra.mxu3 %v4932_v20 }
 0x59b   :  { %694 = vmatpush.msra.mxu3 %v4937_v21 }
 0x59d   :  { %695 = vmatpush.msra.mxu3 %v4952_v25 }
 0x59f   :  { %696 = vmatpush.msra.mxu3 %v4961_v27 }
 0x5b9   :  { %v287_v2 = vpop.f32.mrf.mxu1 }
 0x61b   :  { %v532_v9 = vpop.f32.mrf.mxu3 }
 0x61c   :  { %v535_v10 = vadd.f32 %v532_v9, %v285_v8 }
 0x61e   :  { %4397 = vtanh.f32 %v535_v10  ;;  %v4202_v16 = vmul.f32 -1.442695, %v535_v10 }
 0x620   :  { %4399 = vpow2.f32 %v4202_v16 }
 0x624   :  { %v4398_v12 = vpop.eup %4397 }
 0x625   :  { %558 = vrot.lane.b32.xlu1 %v4398_v12, %s4748_s27 }
 0x626   :  { %v4400_v17 = vpop.eup %4399 }
 0x627   :  { %v539_v18 = vadd.f32 1.0, %v4400_v17  ;;  %v121_v17 = vperm.slane %v4886_v5, 4 }
 0x629   :  { %4401 = vrcp.f32 %v539_v18  ;;  %v551_v33 = vand.u32 2147483648, %v539_v18  ;;  %vm545_vm0 = vweird.f32 %v539_v18  ;;  %v549_v34 = vand.u32 2147483647, %v539_v18 }
 0x62b   :  { %v552_v36 = vor.u32 1.1754944e-38, %v551_v33  ;;  %vm550_vm3 = vcmp.eq.f32.partialorder %v549_v34, 8.507059e+37 }
 0x62f   :  { %v4402_v19 = vpop.eup %4401 }
 0x630   :  { %v541_v23 = vmul.f32 %v4402_v19, %v539_v18  ;;  %vm546_vm15 = vweird.f32 %v4402_v19 }
 0x631   :  { %vm547_vm2 = vmor %vm545_vm0, %vm546_vm15 }
 0x632   :  { %v542_v24 = vsub.f32 1.0, %v541_v23 }
 0x634   :  { %v543_v26 = vmul.f32 %v4402_v19, %v542_v24 }
 0x636   :  { %v544_v32 = vadd.f32 %v4402_v19, %v543_v26 }
 0x638   :  { %v548_v35 = vsel %vm547_vm2, %v4402_v19, %v544_v32 }
 0x639   :  { %v553_v38 = vsel %vm550_vm3, %v552_v36, %v548_v35  ;;  %v4206_v36 = vsel %vm656_vm9, 1.0, %v4746_v28  ;;  %vm988_vm9 = vcmp.gt.s32.totalorder %v5007_v49, 7 }
 0x63a   :  { %v556_v47 = vmul.f32 %v553_v38, %v509_v46 }
 0x697   :  { %v559_v37 = vpop.permute.xlu1 %558 }
 0x698   :  { %v561_v41 = vmul.f32 %v559_v37, %v553_v38 }
 0x69a   :  { %563 = vrot.lane.b32.xlu0 %v561_v41, %s4750_s24 }
 0x6a2   :  { %585 = vperm.xlu0 %4354, %v582_v42  }
 0x6aa   :  { %4358 = vset.pattern.permute.xlu0 %v4877_v3 }
 0x6b2   :  { %126 = vperm.xlu0 %4358, %v121_v17  }
 0x70c   :  { %v564_v48 = vpop.permute.xlu0 %563 }
 0x70d   :  { %v566_v51 = vadd.f32 %v564_v48, %v556_v47  ;;  %v665_v47 = vsub.f32 1.0, %v4206_v36 }
 0x70f   :  { %4403 = vtanh.f32 %v566_v51 }
 0x714   :  { %v5093_v55 = vpop.permute.xlu0 %585 }
 0x715   :  { %v4404_v52 = vpop.eup %4403  ;;  %v588_v60 = vmul.f32 %v5093_v55, %v5069_v4  ;;  %v288_v4 = vadd.f32 %v287_v2, %v5000_v40  ;;  %v591_v37 = vmul.f32 %v5093_v55, %v509_v46  ;;  %v128_v46 = vperm.slane %v4886_v5, 5 }
 0x716   :  { %569 = vrot.lane.b32.xlu1 %v4404_v52, %s4748_s27 }
 0x724   :  { %v127_v48 = vpop.permute.xlu0 %126 }
 0x725   :  { %vm153_vm10 = vcmp.eq.s32.totalorder %v4975_v29, %v127_v48 }
 0x726   :  { %4176 = vmatmul.msk.f32.gmra.mxu0 %vm153_vm10, %v4747_v31 }
 0x788   :  { %v570_v57 = vpop.permute.xlu1 %569 }
 0x789   :  { %v572_v56 = vmul.f32 %v570_v57, %v553_v38  ;;  %v590_v38 = vmul.f32 %v5095_v58, %v566_v51 }
 0x78b   :  { %v5098_v59 = vmul.f32 %v5095_v58, %v572_v56  ;;  %v5121_v41 = vadd.f32 %v591_v37, %v590_v38 }
 0x78d   :  { %v5103_v62 = vadd.f32 %v588_v60, %v5098_v59 }
 0x78f   :  { %594 = vrot.lane.b32.xlu1 %v5103_v62, %s4750_s24 }
 0x801   :  { %v595_v63 = vpop.permute.xlu1 %594 }
 0x802   :  { %4204 = vmatmul.msk.f32.vlgmr.msrb.gmra.mxu3 %vm236_vm1, %v595_v63  ;;  %v135_v63 = vperm.slane %v4886_v5, 6 }
 0x803   :  { %776 = vmatpush.msrb.mxu3 %v4932_v20 }
 0x805   :  { %777 = vmatpush.msrb.mxu3 %v4937_v21 }
 0x807   :  { %778 = vmatpush.msrb.mxu3 %v4952_v25 }
 0x809   :  { %779 = vmatpush.msrb.mxu3 %v4961_v27 }
 0x885   :  { %v615_v6 = vpop.f32.mrf.mxu3 }
 0x886   :  { %v618_v7 = vadd.f32 %v615_v6, %v288_v4  ;;  %v202_v4 = vpop.f32.mrf.mxu0 }
 0x887   :  { %v218_v6 = vmul.f32 5.656854, %v202_v4 }
 0x888   :  { %4405 = vtanh.f32 %v618_v7  ;;  %v4205_v9 = vmul.f32 -1.442695, %v618_v7 }
 0x889   :  { %4184 = vmatmul.msk.f32.gmra.mxu1 %vm236_vm1, %v218_v6  ;;  %4192 = vmatmul.msk.f32.gmra.mxu2 %vm236_vm1, %v218_v6 }
 0x88a   :  { %4407 = vpow2.f32 %v4205_v9 }
 0x88e   :  { %v4406_v8 = vpop.eup %4405 }
 0x88f   :  { %641 = vrot.lane.b32.xlu2 %v4406_v8, %s4748_s27 }
 0x890   :  { %v4408_v10 = vpop.eup %4407 }
 0x891   :  { %v622_v12 = vadd.f32 1.0, %v4408_v10  ;;  %v142_v10 = vperm.slane %v4886_v5, 7 }
 0x893   :  { %4409 = vrcp.f32 %v622_v12  ;;  %v634_v24 = vand.u32 2147483648, %v622_v12  ;;  %vm628_vm6 = vweird.f32 %v622_v12  ;;  %v632_v26 = vand.u32 2147483647, %v622_v12 }
 0x895   :  { %v635_v32 = vor.u32 1.1754944e-38, %v634_v24  ;;  %vm633_vm8 = vcmp.eq.f32.partialorder %v632_v26, 8.507059e+37 }
 0x899   :  { %v4410_v16 = vpop.eup %4409 }
 0x89a   :  { %v624_v18 = vmul.f32 %v4410_v16, %v622_v12  ;;  %vm629_vm5 = vweird.f32 %v4410_v16  ;;  %v4209_v12 = vsel %vm739_vm13, 1.0, %v4746_v28 }
 0x89b   :  { %vm630_vm7 = vmor %vm628_vm6, %vm629_vm5 }
 0x89c   :  { %v625_v19 = vsub.f32 1.0, %v624_v18 }
 0x89e   :  { %v626_v22 = vmul.f32 %v4410_v16, %v625_v19 }
 0x8a0   :  { %v627_v23 = vadd.f32 %v4410_v16, %v626_v22 }
 0x8a2   :  { %v631_v30 = vsel %vm630_vm7, %v4410_v16, %v627_v23 }
 0x8a3   :  { %v636_v34 = vsel %vm633_vm8, %v635_v32, %v631_v30  ;;  %vm822_vm8 = vcmp.gt.s32.totalorder %v5007_v49, 5 }
 0x8a4   :  { %v639_v42 = vmul.f32 %v636_v34, %v5121_v41 }
 0x8e9   :  { %v642_v33 = vpop.permute.xlu2 %641 }
 0x8ea   :  { %v644_v35 = vmul.f32 %v642_v33, %v636_v34 }
 0x8ec   :  { %646 = vrot.lane.b32.xlu1 %v644_v35, %s4750_s24 }
 0x8f4   :  { %661 = vperm.xlu1 %4355, %v4206_v36  }
 0x8fc   :  { %4359 = vset.pattern.permute.xlu1 %v4877_v3 }
 0x904   :  { %133 = vperm.xlu1 %4359, %v128_v46   ;;  %v748_v46 = vsub.f32 1.0, %v4209_v12 }
 0x906   :  { %v290_v16 = vpop.f32.mrf.mxu1 }
 0x907   :  { %v291_v17 = vadd.f32 %v290_v16, %v5000_v40 }
 0x90c   :  { %147 = vperm.xlu1 %4359, %v142_v10  }
 0x914   :  { %4360 = vset.pattern.permute.xlu1 %v4749_v50 }
 0x915   :  { %744 = vperm.xlu1 %4360, %v4209_v12  }
 0x95e   :  { %v647_v43 = vpop.permute.xlu1 %646 }
 0x95f   :  { %v5124_v44 = vadd.f32 %v647_v43, %v639_v42 }
 0x961   :  { %4411 = vtanh.f32 %v5124_v44 }
 0x966   :  { %v5131_v53 = vpop.permute.xlu1 %661 }
 0x967   :  { %v4412_v45 = vpop.eup %4411 }
 0x968   :  { %652 = vrot.lane.b32.xlu2 %v4412_v45, %s4748_s27 }
 0x970   :  { %668 = vperm.xlu2 %4357, %v665_v47  }
 0x976   :  { %v134_v2 = vpop.permute.xlu1 %133 }
 0x977   :  { %vm154_vm11 = vcmp.eq.s32.totalorder %v4975_v29, %v134_v2 }
 0x978   :  { %4177 = vmatmul.msk.f32.gmra.mxu0 %vm154_vm11, %v4747_v31 }
 0x9c2   :  { %v653_v51 = vpop.permute.xlu2 %652 }
 0x9c3   :  { %v655_v52 = vmul.f32 %v653_v51, %v636_v34  ;;  %v148_v51 = vpop.permute.xlu1 %147 }
 0x9c4   :  { %vm156_vm3 = vcmp.eq.s32.totalorder %v4975_v29, %v148_v51 }
 0x9c5   :  { %v5136_v57 = vmul.f32 %v5131_v53, %v655_v52 }
 0x9ca   :  { %v5133_v54 = vpop.permute.xlu2 %668 }
 0x9cb   :  { %v671_v56 = vmul.f32 %v5133_v54, %v5103_v62  ;;  %v674_v52 = vmul.f32 %v5133_v54, %v5121_v41  ;;  %v5190_v41 = vld [vmem:[%s6628_s8 + $0x10] sm:$0xff] }
 0x9cd   :  { %v5141_v60 = vadd.f32 %v671_v56, %v5136_v57  ;;  %v673_v56 = vmul.f32 %v5131_v53, %v5124_v44  ;;  %v5197_v44 = vld [vmem:[%s6628_s8 + $0x8] sm:$0xff] }
 0x9cf   :  { %677 = vrot.lane.b32.xlu0 %v5141_v60, %s4750_s24 }
 0x9d7   :  { %140 = vperm.xlu0 %4358, %v135_v63   ;;  %v5175_v63 = vadd.f32 %v674_v52, %v673_v56 }
 0x9df   :  { %4361 = vset.pattern.permute.xlu0 %v4749_v50 }
 0x9f5   :  { %v205_v8 = vpop.f32.mrf.mxu0 }
 0x9f6   :  { %v219_v9 = vmul.f32 5.656854, %v205_v8  ;;  %v5204_v8 = vld [vmem:[%s6628_s8] sm:$0xff] }
 0x9f8   :  { %4185 = vmatmul.msk.f32.gmra.mxu1 %vm236_vm1, %v219_v9  ;;  %4193 = vmatmul.msk.f32.gmra.mxu2 %vm236_vm1, %v219_v9 }
 0xa41   :  { %v678_v62 = vpop.permute.xlu0 %677 }
 0xa42   :  { %4207 = vmatmul.msk.f32.vlgmr.msra.gmra.mxu3 %vm236_vm1, %v678_v62 }
 0xa43   :  { %859 = vmatpush.msra.mxu3 %v4932_v20 }
 0xa45   :  { %860 = vmatpush.msra.mxu3 %v4937_v21 }
 0xa47   :  { %861 = vmatpush.msra.mxu3 %v4952_v25 }
 0xa49   :  { %v141_v7 = vpop.permute.xlu0 %140  ;;  %862 = vmatpush.msra.mxu3 %v4961_v27 }
 0xa4a   :  { %vm155_vm12 = vcmp.eq.s32.totalorder %v4975_v29, %v141_v7  ;;  %v5185_v7 = vld [vmem:[%s6628_s8 + $0x18] sm:$0xff] }
 0xa4b   :  { %4178 = vmatmul.msk.f32.gmra.mxu0 %vm155_vm12, %v4747_v31  ;;  %1021 = vmatpush.msrb.mxu1 %v5185_v7 }
 0xa4c   :  { %1089 = vmatpush.msrb.mxu2 %v5185_v7 }
 0xa4d   :  { %1022 = vmatpush.msrb.mxu1 %v5190_v41 }
 0xa4e   :  { %1090 = vmatpush.msrb.mxu2 %v5190_v41 }
 0xa4f   :  { %1023 = vmatpush.msrb.mxu1 %v5197_v44 }
 0xa50   :  { %1091 = vmatpush.msrb.mxu2 %v5197_v44 }
 0xa51   :  { %1024 = vmatpush.msrb.mxu1 %v5204_v8 }
 0xa52   :  { %1092 = vmatpush.msrb.mxu2 %v5204_v8 }
 0xa53   :  { %4179 = vmatmul.msk.f32.gmra.mxu0 %vm156_vm3, %v4747_v31  ;;  %1227 = vmatpush.msra.mxu1 %v5185_v7 }
 0xa54   :  { %1296 = vmatpush.msra.mxu2 %v5185_v7 }
 0xa55   :  { %1228 = vmatpush.msra.mxu1 %v5190_v41 }
 0xa56   :  { %1297 = vmatpush.msra.mxu2 %v5190_v41 }
 0xa57   :  { %1229 = vmatpush.msra.mxu1 %v5197_v44 }
 0xa58   :  { %1298 = vmatpush.msra.mxu2 %v5197_v44 }
 0xa59   :  { %1230 = vmatpush.msra.mxu1 %v5204_v8 }
 0xa5a   :  { %1299 = vmatpush.msra.mxu2 %v5204_v8 }
 0xac5   :  { %v698_v18 = vpop.f32.mrf.mxu3 }
 0xac6   :  { %v701_v19 = vadd.f32 %v698_v18, %v291_v17  ;;  %v5227_v18 = vpop.permute.xlu1 %744 }
 0xac8   :  { %4413 = vtanh.f32 %v701_v19  ;;  %v208_v22 = vpop.f32.mrf.mxu0  ;;  %v4208_v24 = vmul.f32 -1.442695, %v701_v19 }
 0xac9   :  { %v220_v23 = vmul.f32 5.656854, %v208_v22 }
 0xaca   :  { %4415 = vpow2.f32 %v4208_v24 }
 0xacb   :  { %4186 = vmatmul.msk.f32.gmra.mxu1 %vm236_vm1, %v220_v23  ;;  %4194 = vmatmul.msk.f32.gmra.mxu2 %vm236_vm1, %v220_v23 }
 0xace   :  { %v4414_v5 = vpop.eup %4413 }
 0xacf   :  { %724 = vrot.lane.b32.xlu2 %v4414_v5, %s4748_s27  ;;  %v5239_v5 = vpop.f32.mrf.mxu2 }
 0xad0   :  { %v4416_v26 = vpop.eup %4415  ;;  %v211_v9 = vpop.f32.mrf.mxu0 }
 0xad1   :  { %v705_v30 = vadd.f32 1.0, %v4416_v26  ;;  %v221_v10 = vmul.f32 5.656854, %v211_v9 }
 0xad3   :  { %4417 = vrcp.f32 %v705_v30  ;;  %v717_v37 = vand.u32 2147483648, %v705_v30  ;;  %vm711_vm15 = vweird.f32 %v705_v30  ;;  %v715_v38 = vand.u32 2147483647, %v705_v30  ;;  %4187 = vmatmul.msk.f32.gmra.mxu1 %vm236_vm1, %v221_v10  ;;  %4195 = vmatmul.msk.f32.gmra.mxu2 %vm236_vm1, %v221_v10 }
 0xad5   :  { %v718_v43 = vor.u32 1.1754944e-38, %v717_v37  ;;  %vm716_vm2 = vcmp.eq.f32.partialorder %v715_v38, 8.507059e+37  ;;  %v5258_v37 = vperm.slane %v4997_v39, 1 }
 0xad7   :  { %v5241_v24 = vpop.f32.mrf.mxu2 }
 0xad9   :  { %v4418_v32 = vpop.eup %4417 }
 0xada   :  { %v707_v33 = vmul.f32 %v4418_v32, %v705_v30  ;;  %vm712_vm14 = vweird.f32 %v4418_v32 }
 0xadb   :  { %vm713_vm0 = vmor %vm711_vm15, %vm712_vm14  ;;  %1025 = vmatmul.f32.vlgmr.msrb.gmra.mxu1 %v4746_v28 }
 0xadc   :  { %v708_v34 = vsub.f32 1.0, %v707_v33  ;;  %1434 = vmatpush.msrb.mxu1 %v5185_v7  ;;  %v293_v33 = vpop.f32.mrf.mxu1 }
 0xade   :  { %v709_v35 = vmul.f32 %v4418_v32, %v708_v34  ;;  %1435 = vmatpush.msrb.mxu1 %v5190_v41 }
 0xadf   :  { %v5243_v26 = vpop.f32.mrf.mxu2 }
 0xae0   :  { %v710_v36 = vadd.f32 %v4418_v32, %v709_v35  ;;  %1436 = vmatpush.msrb.mxu1 %v5197_v44 }
 0xae2   :  { %v714_v42 = vsel %vm713_vm0, %v4418_v32, %v710_v36  ;;  %1437 = vmatpush.msrb.mxu1 %v5204_v8 }
 0xae3   :  { %v719_v47 = vsel %vm716_vm2, %v718_v43, %v714_v42 }
 0xae4   :  { %v722_v2 = vmul.f32 %v719_v47, %v5175_v63 }
 0xae7   :  { %v5245_v30 = vpop.f32.mrf.mxu2 }
 0xaef   :  { %v5247_v32 = vpop.f32.mrf.mxu2 }
 0xaf7   :  { %v5249_v34 = vpop.f32.mrf.mxu2 }
 0xb29   :  { %v725_v45 = vpop.permute.xlu2 %724 }
 0xb2a   :  { %v727_v48 = vmul.f32 %v725_v45, %v719_v47 }
 0xb2c   :  { %729 = vrot.lane.b32.xlu2 %v727_v48, %s4750_s24 }
 0xb34   :  { %751 = vperm.xlu2 %4357, %v748_v46  }
 0xb4e   :  { %v5253_v35 = vpop.f32.mrf.mxu2 }
 0xb56   :  { %v340_v38 = vpop.f32.mrf.mxu2 }
 0xb57   :  { %v341_v42 = vadd.f32 %v340_v38, %v5258_v37 }
 0xb86   :  { %v730_v4 = vpop.permute.xlu2 %729 }
 0xb87   :  { %v5178_v6 = vadd.f32 %v730_v4, %v722_v2  ;;  %v294_v4 = vadd.f32 %v293_v33, %v5000_v40  ;;  %v4212_v33 = vsel %vm822_vm8, 1.0, %v4746_v28 }
 0xb89   :  { %4419 = vtanh.f32 %v5178_v6 }
 0xb8e   :  { %v5225_v12 = vpop.permute.xlu2 %751 }
 0xb8f   :  { %v4420_v62 = vpop.eup %4419  ;;  %v754_v22 = vmul.f32 %v5225_v12, %v5141_v60  ;;  %v5251_v60 = vpop.f32.mrf.mxu1 }
 0xb90   :  { %735 = vrot.lane.b32.xlu0 %v4420_v62, %s4748_s27 }
 0xb97   :  { %v5255_v36 = vpop.f32.mrf.mxu1 }
 0xb9f   :  { %v1026_v43 = vpop.f32.mrf.mxu1 }
 0xba0   :  { %v1029_v45 = vadd.f32 %v1026_v43, %v341_v42  ;;  %v831_v43 = vsub.f32 1.0, %v4212_v33 }
 0xba2   :  { %4421 = vtanh.f32 %v1029_v45  ;;  %v4219_v39 = vmul.f32 -1.442695, %v1029_v45  ;;  %v4218_v45 = vsel %vm988_vm9, 1.0, %v4746_v28 }
 0xba4   :  { %4423 = vpow2.f32 %v4219_v39 }
 0xba8   :  { %v4422_v48 = vpop.eup %4421 }
 0xba9   :  { %1052 = vrot.lane.b32.xlu2 %v4422_v48, %s4748_s27 }
 0xbaa   :  { %v4424_v46 = vpop.eup %4423 }
 0xbab   :  { %v1033_v51 = vadd.f32 1.0, %v4424_v46 }
 0xbad   :  { %4425 = vrcp.f32 %v1033_v51  ;;  %vm1039_vm4 = vweird.f32 %v1033_v51  ;;  %v1043_v10 = vand.u32 2147483647, %v1033_v51 }
 0xbaf   :  { %vm1044_vm7 = vcmp.eq.f32.partialorder %v1043_v10, 8.507059e+37  ;;  %v757_v10 = vmul.f32 %v5225_v12, %v5175_v63 }
 0xbb3   :  { %v4426_v52 = vpop.eup %4425 }
 0xbb4   :  { %v1035_v56 = vmul.f32 %v4426_v52, %v1033_v51  ;;  %vm1040_vm5 = vweird.f32 %v4426_v52 }
 0xbb5   :  { %vm1041_vm6 = vmor %vm1039_vm4, %vm1040_vm5 }
 0xbb6   :  { %v1036_v2 = vsub.f32 1.0, %v1035_v56 }
 0xbb8   :  { %v1037_v9 = vmul.f32 %v4426_v52, %v1036_v2 }
 0xc02   :  { %v736_v16 = vpop.permute.xlu0 %735 }
 0xc03   :  { %v738_v17 = vmul.f32 %v736_v16, %v719_v47 }
 0xc05   :  { %v5230_v19 = vmul.f32 %v5227_v18, %v738_v17 }
 0xc07   :  { %v5235_v23 = vadd.f32 %v754_v22, %v5230_v19  ;;  %v1053_v22 = vpop.permute.xlu2 %1052 }
 0xc09   :  { %760 = vrot.lane.b32.xlu0 %v5235_v23, %s4750_s24 }
 0xc7b   :  { %v761_v47 = vpop.permute.xlu0 %760 }
 0xc7c   :  { %4210 = vmatmul.msk.f32.vlgmr.msrb.gmra.mxu3 %vm236_vm1, %v761_v47 }
 0xc7d   :  { %942 = vmatpush.msrb.mxu3 %v4932_v20 }
 0xc7f   :  { %943 = vmatpush.msrb.mxu3 %v4937_v21  ;;  %v1045_v21 = vand.u32 2147483648, %v1033_v51 }
 0xc81   :  { %944 = vmatpush.msrb.mxu3 %v4952_v25  ;;  %v1038_v25 = vadd.f32 %v4426_v52, %v1037_v9  ;;  %v1046_v16 = vor.u32 1.1754944e-38, %v1045_v21 }
 0xc83   :  { %945 = vmatpush.msrb.mxu3 %v4961_v27  ;;  %v1042_v17 = vsel %vm1041_vm6, %v4426_v52, %v1038_v25 }
 0xc84   :  { %v1047_v38 = vsel %vm1044_vm7, %v1046_v16, %v1042_v17 }
 0xc85   :  { %v1055_v42 = vmul.f32 %v1053_v22, %v1047_v38 }
 0xcff   :  { %v781_v20 = vpop.f32.mrf.mxu3 }
 0xd00   :  { %v784_v62 = vadd.f32 %v781_v20, %v294_v4 }
 0xd02   :  { %4427 = vtanh.f32 %v784_v62  ;;  %v4211_v47 = vmul.f32 -1.442695, %v784_v62 }
 0xd04   :  { %4429 = vpow2.f32 %v4211_v47  ;;  %v1050_v47 = vmul.f32 0.0, %v1047_v38 }
 0xd08   :  { %v4428_v27 = vpop.eup %4427 }
 0xd09   :  { %807 = vrot.lane.b32.xlu1 %v4428_v27, %s4748_s27  ;;  %v756_v27 = vmul.f32 %v5227_v18, %v5178_v6  ;;  %v997_v6 = vsub.f32 1.0, %v4218_v45 }
 0xd0a   :  { %v4430_v48 = vpop.eup %4429 }
 0xd0b   :  { %v788_v39 = vadd.f32 1.0, %v4430_v48  ;;  %v5280_v16 = vadd.f32 %v757_v10, %v756_v27  ;;  %v297_v10 = vadd.f32 %v5251_v60, %v5000_v40 }
 0xd0d   :  { %4431 = vrcp.f32 %v788_v39  ;;  %v800_v4 = vand.u32 2147483648, %v788_v39  ;;  %vm794_vm11 = vweird.f32 %v788_v39  ;;  %v798_v20 = vand.u32 2147483647, %v788_v39 }
 0xd0f   :  { %v801_v49 = vor.u32 1.1754944e-38, %v800_v4  ;;  %vm799_vm13 = vcmp.eq.f32.partialorder %v798_v20, 8.507059e+37 }
 0xd11   :  { %1057 = vrot.lane.b32.xlu1 %v1055_v42, %s4750_s24 }
 0xd13   :  { %v4432_v46 = vpop.eup %4431 }
 0xd14   :  { %v790_v51 = vmul.f32 %v4432_v46, %v788_v39  ;;  %vm795_vm10 = vweird.f32 %v4432_v46 }
 0xd15   :  { %vm796_vm12 = vmor %vm794_vm11, %vm795_vm10 }
 0xd16   :  { %v791_v52 = vsub.f32 1.0, %v790_v51 }
 0xd18   :  { %v792_v56 = vmul.f32 %v4432_v46, %v791_v52 }
 0xd19   :  { %834 = vperm.xlu1 %4360, %v831_v43  }
 0xd1a   :  { %v793_v2 = vadd.f32 %v4432_v46, %v792_v56 }
 0xd1c   :  { %v797_v9 = vsel %vm796_vm12, %v4432_v46, %v793_v2 }
 0xd1d   :  { %v802_v25 = vsel %vm799_vm13, %v801_v49, %v797_v9 }
 0xd1e   :  { %v805_v17 = vmul.f32 %v802_v25, %v5280_v16 }
 0xd21   :  { %993 = vperm.xlu1 %4360, %v4218_v45  }
 0xd7b   :  { %v808_v21 = vpop.permute.xlu1 %807 }
 0xd7c   :  { %v810_v62 = vmul.f32 %v808_v21, %v802_v25 }
 0xd7e   :  { %812 = vrot.lane.b32.xlu0 %v810_v62, %s4750_s24 }
 0xd83   :  { %v1058_v43 = vpop.permute.xlu1 %1057 }
 0xd86   :  { %827 = vperm.xlu0 %4361, %v4212_v33   ;;  %v5286_v33 = vadd.f32 %v1058_v43, %v1050_v47  ;;  %v338_v43 = vadd.f32 %v5253_v35, %v5258_v37 }
 0xd8b   :  { %v5291_v39 = vpop.permute.xlu1 %834 }
 0xd8c   :  { %v837_v2 = vmul.f32 %v5291_v39, %v5235_v23 }
 0xd8e   :  { %4363 = vset.pattern.permute.xlu0 %v4877_v3 }
 0xd93   :  { %v5305_v9 = vpop.permute.xlu1 %993 }
 0xdf0   :  { %v813_v22 = vpop.permute.xlu0 %812 }
 0xdf1   :  { %v5283_v42 = vadd.f32 %v813_v22, %v805_v17 }
 0xdf3   :  { %4433 = vtanh.f32 %v5283_v42 }
 0xdf4   :  { %4435 = vtanh.f32 %v5286_v33 }
 0xdf8   :  { %v5293_v52 = vpop.permute.xlu0 %827 }
 0xdf9   :  { %v4434_v48 = vpop.eup %4433 }
 0xdfa   :  { %818 = vrot.lane.b32.xlu2 %v4434_v48, %s4748_s27  ;;  %v4436_v63 = vpop.eup %4435 }
 0xe02   :  { %1063 = vrot.lane.b32.xlu2 %v4436_v63, %s4748_s27 }
 0xe0a   :  { %1000 = vperm.xlu2 %4357, %v997_v6  }
 0xe54   :  { %v819_v46 = vpop.permute.xlu2 %818 }
 0xe55   :  { %v821_v51 = vmul.f32 %v819_v46, %v802_v25 }
 0xe57   :  { %v5296_v56 = vmul.f32 %v5293_v52, %v821_v51 }
 0xe59   :  { %v5301_v4 = vadd.f32 %v837_v2, %v5296_v56 }
 0xe5b   :  { %843 = vrot.lane.b32.xlu0 %v5301_v4, %s4750_s24 }
 0xe5c   :  { %v1064_v45 = vpop.permute.xlu2 %1063 }
 0xe5d   :  { %v1066_v20 = vmul.f32 %v1064_v45, %v1047_v38 }
 0xe5f   :  { %v5310_v21 = vmul.f32 %v1066_v20, %v5305_v9 }
 0xe64   :  { %v5307_v49 = vpop.permute.xlu2 %1000 }
 0xe65   :  { %v5313_v25 = vmul.f32 0.0, %v5307_v49 }
 0xe67   :  { %v5317_v23 = vadd.f32 %v5313_v25, %v5310_v21 }
 0xe69   :  { %1073 = vrot.lane.b32.xlu1 %v5317_v23, %s4750_s24 }
 0xecd   :  { %v844_v62 = vpop.permute.xlu0 %843 }
 0xece   :  { %4213 = vmatmul.msk.f32.vlgmr.msra.gmra.mxu3 %vm236_vm1, %v844_v62 }
 0xecf   :  { %1158 = vmatpush.msra.mxu3 %v5185_v7 }
 0xed1   :  { %1159 = vmatpush.msra.mxu3 %v5190_v41 }
 0xed3   :  { %1160 = vmatpush.msra.mxu3 %v5197_v44 }
 0xed5   :  { %1161 = vmatpush.msra.mxu3 %v5204_v8 }
 0xedb   :  { %v1074_v38 = vpop.permute.xlu1 %1073 }
 0xedc   :  { %4220 = vmatmul.msk.f32.vlgmr.msrb.gmra.mxu2 %vm236_vm1, %v1074_v38 }
 0xedd   :  { %1503 = vmatpush.msrb.mxu2 %v5185_v7 }
 0xedf   :  { %1504 = vmatpush.msrb.mxu2 %v5190_v41 }
 0xee1   :  { %1505 = vmatpush.msrb.mxu2 %v5197_v44 }
 0xee3   :  { %1506 = vmatpush.msrb.mxu2 %v5204_v8 }
 0xf51   :  { %v864_v27 = vpop.f32.mrf.mxu3 }
 0xf52   :  { %v867_v17 = vadd.f32 %v864_v27, %v297_v10 }
 0xf54   :  { %4437 = vtanh.f32 %v867_v17  ;;  %v4214_v6 = vmul.f32 -1.442695, %v867_v17 }
 0xf5a   :  { %v4438_v22 = vpop.eup %4437 }
 0xf5b   :  { %890 = vrot.lane.b32.xlu2 %v4438_v22, %s4748_s27 }
 0xf5f   :  { %v1094_v47 = vpop.f32.mrf.mxu2 }
 0xf60   :  { %v1097_v48 = vadd.f32 %v1094_v47, %v338_v43 }
 0xf62   :  { %4439 = vtanh.f32 %v1097_v48  ;;  %v4221_v62 = vmul.f32 -1.442695, %v1097_v48  ;;  %v4701_v48 = vld [vmem:[%s6658_s5] sm:$0xff] }
 0xf63   :  { %4441 = vpow2.f32 %v4214_v6  ;;  %vm905_vm3 = vcmp.gt.s32.totalorder %v4701_v48, 6  ;;  %v840_v48 = vmul.f32 %v5291_v39, %v5280_v16 }
 0xf68   :  { %v4440_v63 = vpop.eup %4439 }
 0xf69   :  { %1120 = vrot.lane.b32.xlu0 %v4440_v63, %s4748_s27  ;;  %v4442_v46 = vpop.eup %4441 }
 0xf6a   :  { %v871_v51 = vadd.f32 1.0, %v4442_v46  ;;  %v4215_v46 = vsel %vm905_vm3, 1.0, %v4746_v28 }
 0xf6c   :  { %4443 = vrcp.f32 %v871_v51  ;;  %v883_v10 = vand.u32 2147483648, %v871_v51  ;;  %vm877_vm15 = vweird.f32 %v871_v51  ;;  %v881_v35 = vand.u32 2147483647, %v871_v51 }
 0xf6d   :  { %4445 = vpow2.f32 %v4221_v62 }
 0xf6e   :  { %v884_v22 = vor.u32 1.1754944e-38, %v883_v10  ;;  %vm882_vm2 = vcmp.eq.f32.partialorder %v881_v35, 8.507059e+37 }
 0xf72   :  { %v4444_v60 = vpop.eup %4443 }
 0xf73   :  { %v873_v2 = vmul.f32 %v4444_v60, %v871_v51  ;;  %vm878_vm14 = vweird.f32 %v4444_v60  ;;  %v4446_v63 = vpop.eup %4445 }
 0xf74   :  { %vm879_vm0 = vmor %vm877_vm15, %vm878_vm14  ;;  %v1101_v6 = vadd.f32 1.0, %v4446_v63  ;;  %v839_v63 = vmul.f32 %v5293_v52, %v5283_v42 }
 0xf75   :  { %v874_v45 = vsub.f32 1.0, %v873_v2 }
 0xf76   :  { %4447 = vrcp.f32 %v1101_v6  ;;  %v1113_v62 = vand.u32 2147483648, %v1101_v6  ;;  %vm1107_vm5 = vweird.f32 %v1101_v6 }
 0xf77   :  { %v875_v20 = vmul.f32 %v4444_v60, %v874_v45 }
 0xf78   :  { %v1114_v35 = vor.u32 1.1754944e-38, %v1113_v62 }
 0xf79   :  { %v876_v38 = vadd.f32 %v4444_v60, %v875_v20 }
 0xf7b   :  { %v880_v27 = vsel %vm879_vm0, %v4444_v60, %v876_v38  ;;  %v1111_v38 = vand.u32 2147483647, %v1101_v6 }
 0xf7c   :  { %v885_v17 = vsel %vm882_vm2, %v884_v22, %v880_v27  ;;  %v4448_v51 = vpop.eup %4447 }
 0xf7d   :  { %v1103_v60 = vmul.f32 %v4448_v51, %v1101_v6  ;;  %vm1108_vm4 = vweird.f32 %v4448_v51  ;;  %vm1112_vm7 = vcmp.eq.f32.partialorder %v1111_v38, 8.507059e+37  ;;  %v5348_v6 = vadd.f32 %v840_v48, %v839_v63 }
 0xf7e   :  { %vm1109_vm6 = vmor %vm1107_vm5, %vm1108_vm4 }
 0xf7f   :  { %v1104_v2 = vsub.f32 1.0, %v1103_v60 }
 0xf81   :  { %v1105_v45 = vmul.f32 %v4448_v51, %v1104_v2 }
 0xf83   :  { %v1106_v20 = vadd.f32 %v4448_v51, %v1105_v45 }
 0xf85   :  { %v1110_v10 = vsel %vm1109_vm6, %v4448_v51, %v1106_v20  ;;  %v888_v51 = vmul.f32 %v885_v17, %v5348_v6 }
 0xf86   :  { %v1115_v22 = vsel %vm1112_vm7, %v1114_v35, %v1110_v10 }
 0xfb5   :  { %v891_v43 = vpop.permute.xlu2 %890 }
 0xfb6   :  { %v893_v47 = vmul.f32 %v891_v43, %v885_v17 }
 0xfb8   :  { %895 = vrot.lane.b32.xlu1 %v893_v47, %s4750_s24  ;;  %v914_v47 = vsub.f32 1.0, %v4215_v46 }
 0xfc0   :  { %910 = vperm.xlu1 %4360, %v4215_v46   ;;  %v1070_v46 = vmul.f32 %v5286_v33, %v5305_v9 }
 0xfc2   :  { %v1071_v42 = vadd.f32 %v1070_v46, %v5313_v25 }
 0xfc4   :  { %v1118_v20 = vmul.f32 %v1115_v22, %v1071_v42 }
 0xfdb   :  { %v1121_v27 = vpop.permute.xlu0 %1120 }
 0xfdc   :  { %v1123_v43 = vmul.f32 %v1121_v27, %v1115_v22 }
 0xfde   :  { %1125 = vrot.lane.b32.xlu2 %v1123_v43, %s4750_s24 }
 0xfe6   :  { %917 = vperm.xlu2 %4357, %v914_v47  }
 0xfee   :  { %4362 = vset.pattern.permute.xlu2 %v4877_v3 }
0x102a   :  { %v896_v60 = vpop.permute.xlu1 %895 }
0x102b   :  { %v5351_v2 = vadd.f32 %v896_v60, %v888_v51 }
0x102d   :  { %4449 = vtanh.f32 %v5351_v2 }
0x1032   :  { %v5361_v43 = vpop.permute.xlu1 %910 }
0x1033   :  { %v4450_v45 = vpop.eup %4449 }
0x1034   :  { %901 = vrot.lane.b32.xlu0 %v4450_v45, %s4748_s27 }
0x1038   :  { %v1126_v62 = vpop.permute.xlu2 %1125 }
0x1039   :  { %v1128_v16 = vadd.f32 %v1126_v62, %v1118_v20  ;;  %v335_v62 = vadd.f32 %v5249_v34, %v5258_v37 }
0x103b   :  { %4451 = vtanh.f32 %v1128_v16 }
0x1040   :  { %v5359_v10 = vpop.permute.xlu2 %917 }
0x1041   :  { %v4452_v38 = vpop.eup %4451  ;;  %v920_v33 = vmul.f32 %v5359_v10, %v5301_v4 }
0x1042   :  { %1131 = vrot.lane.b32.xlu0 %v4452_v38, %s4748_s27 }
0x10a6   :  { %v902_v35 = vpop.permute.xlu0 %901 }
0x10a7   :  { %v904_v27 = vmul.f32 %v902_v35, %v885_v17  ;;  %v1136_v17 = vmul.f32 %v5317_v23, %v5359_v10  ;;  %v300_v23 = vadd.f32 %v5255_v36, %v5000_v40 }
0x10a9   :  { %v5364_v47 = vmul.f32 %v5361_v43, %v904_v27 }
0x10ab   :  { %v5369_v63 = vadd.f32 %v920_v33, %v5364_v47 }
0x10ad   :  { %926 = vrot.lane.b32.xlu1 %v5369_v63, %s4750_s24 }
0x10b4   :  { %v1132_v48 = vpop.permute.xlu0 %1131 }
0x10b5   :  { %v1134_v51 = vmul.f32 %v1132_v48, %v1115_v22 }
0x10b7   :  { %v5374_v60 = vmul.f32 %v1134_v51, %v5361_v43 }
0x10b9   :  { %v1137_v45 = vadd.f32 %v1136_v17, %v5374_v60 }
0x10bb   :  { %1142 = vrot.lane.b32.xlu2 %v1137_v45, %s4750_s24 }
0x1115   :  { %v1143_v4 = vpop.permute.xlu2 %1142 }
0x111f   :  { %v927_v46 = vpop.permute.xlu1 %926 }
0x1120   :  { %4216 = vmatmul.msk.f32.vlgmr.msrb.gmra.mxu3 %vm236_vm1, %v927_v46 }
0x1121   :  { %1365 = vmatpush.msrb.mxu3 %v5185_v7 }
0x1123   :  { %1366 = vmatpush.msrb.mxu3 %v5190_v41 }
0x1125   :  { %1367 = vmatpush.msrb.mxu3 %v5197_v44 }
0x1127   :  { %1368 = vmatpush.msrb.mxu3 %v5204_v8 }
0x1128   :  { %4222 = vmatmul.msk.f32.vlgmr.msra.gmra.mxu3 %vm236_vm1, %v1143_v4 }
0x11a3   :  { %v947_v22 = vpop.f32.mrf.mxu3 }
0x11a4   :  { %v5388_v20 = vadd.f32 %v947_v22, %v300_v23 }
0x11ab   :  { %v1163_v38 = vpop.f32.mrf.mxu3 }
0x11ac   :  { %v1166_v7 = vadd.f32 %v1163_v38, %v335_v62  ;;  %v1139_v62 = vmul.f32 %v1071_v42, %v5359_v10  ;;  %v1138_v38 = vmul.f32 %v1128_v16, %v5361_v43  ;;  %v332_v16 = vadd.f32 %v5247_v32, %v5258_v37 }
0x11ae   :  { %4453 = vtanh.f32 %v1166_v7  ;;  %v4223_v44 = vmul.f32 -1.442695, %v1166_v7  ;;  %v1140_v7 = vadd.f32 %v1139_v62, %v1138_v38 }
0x11b0   :  { %4455 = vpow2.f32 %v4223_v44 }
0x11b4   :  { %v4454_v41 = vpop.eup %4453 }
0x11b5   :  { %1189 = vrot.lane.b32.xlu0 %v4454_v41, %s4748_s27 }
0x11b6   :  { %v4456_v8 = vpop.eup %4455 }
0x11b7   :  { %v1170_v35 = vadd.f32 1.0, %v4456_v8 }
0x11b9   :  { %4457 = vrcp.f32 %v1170_v35  ;;  %v1182_v51 = vand.u32 2147483648, %v1170_v35  ;;  %vm1176_vm9 = vweird.f32 %v1170_v35  ;;  %v1180_v34 = vand.u32 2147483647, %v1170_v35 }
0x11bb   :  { %v1183_v46 = vor.u32 1.1754944e-38, %v1182_v51  ;;  %vm1181_vm11 = vcmp.eq.f32.partialorder %v1180_v34, 8.507059e+37 }
0x11bf   :  { %v4458_v27 = vpop.eup %4457 }
0x11c0   :  { %v1172_v33 = vmul.f32 %v4458_v27, %v1170_v35  ;;  %vm1177_vm8 = vweird.f32 %v4458_v27 }
0x11c1   :  { %vm1178_vm10 = vmor %vm1176_vm9, %vm1177_vm8 }
0x11c2   :  { %v1173_v40 = vsub.f32 1.0, %v1172_v33 }
0x11c4   :  { %v1174_v36 = vmul.f32 %v4458_v27, %v1173_v40 }
0x11c6   :  { %v1175_v48 = vadd.f32 %v4458_v27, %v1174_v36  ;;  %v1205_v36 = vmul.f32 %v1137_v45, %v5291_v39 }
0x11c8   :  { %v1179_v17 = vsel %vm1178_vm10, %v4458_v27, %v1175_v48 }
0x11c9   :  { %v1184_v23 = vsel %vm1181_vm11, %v1183_v46, %v1179_v17 }
0x11ca   :  { %v1187_v41 = vmul.f32 %v1184_v23, %v1140_v7 }
0x1227   :  { %v1190_v4 = vpop.permute.xlu0 %1189 }
0x1228   :  { %v1192_v22 = vmul.f32 %v1190_v4, %v1184_v23 }
0x122a   :  { %1194 = vrot.lane.b32.xlu1 %v1192_v22, %s4750_s24 }
0x129c   :  { %v1195_v44 = vpop.permute.xlu1 %1194 }
0x129d   :  { %v1197_v8 = vadd.f32 %v1195_v44, %v1187_v41 }
0x129f   :  { %4459 = vtanh.f32 %v1197_v8 }
0x12a5   :  { %v4460_v33 = vpop.eup %4459 }
0x12a6   :  { %1200 = vrot.lane.b32.xlu2 %v4460_v33, %s4748_s27 }
0x1300   :  { %v1201_v35 = vpop.permute.xlu2 %1200 }
0x1301   :  { %v1203_v27 = vmul.f32 %v1201_v35, %v1184_v23 }
0x1303   :  { %v5398_v40 = vmul.f32 %v1203_v27, %v5293_v52 }
0x1305   :  { %v1206_v48 = vadd.f32 %v1205_v36, %v5398_v40 }
0x1307   :  { %1211 = vrot.lane.b32.xlu0 %v1206_v48, %s4750_s24 }
0x1379   :  { %v1212_v42 = vpop.permute.xlu0 %1211 }
0x137a   :  { %4224 = vmatmul.msk.f32.vlgmr.msra.gmra.mxu1 %vm236_vm1, %v1212_v42 }
0x13f7   :  { %v1232_v51 = vpop.f32.mrf.mxu1 }
0x13f8   :  { %v1235_v34 = vadd.f32 %v1232_v51, %v332_v16  ;;  %v1207_v16 = vmul.f32 %v1197_v8, %v5293_v52  ;;  %v1208_v51 = vmul.f32 %v1140_v7, %v5291_v39  ;;  %v329_v8 = vadd.f32 %v5245_v30, %v5258_v37 }
0x13fa   :  { %4461 = vtanh.f32 %v1235_v34  ;;  %v4225_v46 = vmul.f32 -1.442695, %v1235_v34  ;;  %v1209_v34 = vadd.f32 %v1208_v51, %v1207_v16 }
0x13fc   :  { %4463 = vpow2.f32 %v4225_v46 }
0x1400   :  { %v4462_v17 = vpop.eup %4461 }
0x1401   :  { %1258 = vrot.lane.b32.xlu1 %v4462_v17, %s4748_s27 }
0x1402   :  { %v4464_v4 = vpop.eup %4463 }
0x1403   :  { %v1239_v45 = vadd.f32 1.0, %v4464_v4 }
0x1405   :  { %4465 = vrcp.f32 %v1239_v45  ;;  %v1251_v44 = vand.u32 2147483648, %v1239_v45  ;;  %vm1245_vm13 = vweird.f32 %v1239_v45  ;;  %v1249_v32 = vand.u32 2147483647, %v1239_v45 }
0x1407   :  { %v1252_v35 = vor.u32 1.1754944e-38, %v1251_v44  ;;  %vm1250_vm15 = vcmp.eq.f32.partialorder %v1249_v32, 8.507059e+37 }
0x140b   :  { %v4466_v23 = vpop.eup %4465 }
0x140c   :  { %v1241_v22 = vmul.f32 %v4466_v23, %v1239_v45  ;;  %vm1246_vm12 = vweird.f32 %v4466_v23 }
0x140d   :  { %vm1247_vm14 = vmor %vm1245_vm13, %vm1246_vm12 }
0x140e   :  { %v1242_v62 = vsub.f32 1.0, %v1241_v22 }
0x1410   :  { %v1243_v38 = vmul.f32 %v4466_v23, %v1242_v62 }
0x1412   :  { %v1244_v41 = vadd.f32 %v4466_v23, %v1243_v38  ;;  %v1274_v38 = vmul.f32 %v1206_v48, %v5225_v12 }
0x1414   :  { %v1248_v33 = vsel %vm1247_vm14, %v4466_v23, %v1244_v41 }
0x1415   :  { %v1253_v36 = vsel %vm1250_vm15, %v1252_v35, %v1248_v33 }
0x1416   :  { %v1256_v17 = vmul.f32 %v1253_v36, %v1209_v34 }
0x1473   :  { %v1259_v27 = vpop.permute.xlu1 %1258 }
0x1474   :  { %v1261_v42 = vmul.f32 %v1259_v27, %v1253_v36 }
0x1476   :  { %1263 = vrot.lane.b32.xlu2 %v1261_v42, %s4750_s24 }
0x14d0   :  { %v1264_v46 = vpop.permute.xlu2 %1263 }
0x14d1   :  { %v1266_v4 = vadd.f32 %v1264_v46, %v1256_v17 }
0x14d3   :  { %4467 = vtanh.f32 %v1266_v4 }
0x14d9   :  { %v4468_v22 = vpop.eup %4467 }
0x14da   :  { %1269 = vrot.lane.b32.xlu0 %v4468_v22, %s4748_s27 }
0x154c   :  { %v1270_v45 = vpop.permute.xlu0 %1269 }
0x154d   :  { %v1272_v23 = vmul.f32 %v1270_v45, %v1253_v36 }
0x154f   :  { %v5412_v62 = vmul.f32 %v1272_v23, %v5227_v18 }
0x1551   :  { %v1275_v41 = vadd.f32 %v1274_v38, %v5412_v62 }
0x1553   :  { %1280 = vrot.lane.b32.xlu1 %v1275_v41, %s4750_s24 }
0x15c5   :  { %v1281_v7 = vpop.permute.xlu1 %1280 }
0x15c6   :  { %4226 = vmatmul.msk.f32.vlgmr.msra.gmra.mxu2 %vm236_vm1, %v1281_v7 }
0x1649   :  { %v1301_v44 = vpop.f32.mrf.mxu2 }
0x164a   :  { %v1304_v32 = vadd.f32 %v1301_v44, %v329_v8  ;;  %v1276_v8 = vmul.f32 %v1266_v4, %v5227_v18  ;;  %v1277_v44 = vmul.f32 %v1209_v34, %v5225_v12  ;;  %v326_v4 = vadd.f32 %v5243_v26, %v5258_v37 }
0x164c   :  { %4469 = vtanh.f32 %v1304_v32  ;;  %v4227_v35 = vmul.f32 -1.442695, %v1304_v32  ;;  %v1278_v32 = vadd.f32 %v1277_v44, %v1276_v8 }
0x164e   :  { %4471 = vpow2.f32 %v4227_v35 }
0x1652   :  { %v4470_v33 = vpop.eup %4469 }
0x1653   :  { %1327 = vrot.lane.b32.xlu2 %v4470_v33, %s4748_s27 }
0x1654   :  { %v4472_v27 = vpop.eup %4471 }
0x1655   :  { %v1308_v48 = vadd.f32 1.0, %v4472_v27 }
0x1657   :  { %4473 = vrcp.f32 %v1308_v48  ;;  %v1320_v46 = vand.u32 2147483648, %v1308_v48  ;;  %vm1314_vm2 = vweird.f32 %v1308_v48  ;;  %v1318_v30 = vand.u32 2147483647, %v1308_v48 }
0x1659   :  { %v1321_v45 = vor.u32 1.1754944e-38, %v1320_v46  ;;  %vm1319_vm4 = vcmp.eq.f32.partialorder %v1318_v30, 8.507059e+37 }
0x165d   :  { %v4474_v36 = vpop.eup %4473 }
0x165e   :  { %v1310_v42 = vmul.f32 %v4474_v36, %v1308_v48  ;;  %vm1315_vm0 = vweird.f32 %v4474_v36 }
0x165f   :  { %vm1316_vm3 = vmor %vm1314_vm2, %vm1315_vm0  ;;  %vm1646_vm2 = vcmask 523264  }
0x1660   :  { %v1311_v16 = vsub.f32 1.0, %v1310_v42 }
0x1662   :  { %v1312_v51 = vmul.f32 %v4474_v36, %v1311_v16 }
0x1664   :  { %v1313_v17 = vadd.f32 %v4474_v36, %v1312_v51  ;;  %v1343_v51 = vmul.f32 %v1275_v41, %v5133_v54 }
0x1666   :  { %v1317_v22 = vsel %vm1316_vm3, %v4474_v36, %v1313_v17 }
0x1667   :  { %v1322_v38 = vsel %vm1319_vm4, %v1321_v45, %v1317_v22 }
0x1668   :  { %v1325_v33 = vmul.f32 %v1322_v38, %v1278_v32 }
0x16ad   :  { %v1328_v23 = vpop.permute.xlu2 %1327 }
0x16ae   :  { %v1330_v7 = vmul.f32 %v1328_v23, %v1322_v38 }
0x16b0   :  { %1332 = vrot.lane.b32.xlu0 %v1330_v7, %s4750_s24 }
0x1722   :  { %v1333_v35 = vpop.permute.xlu0 %1332 }
0x1723   :  { %v1335_v27 = vadd.f32 %v1333_v35, %v1325_v33 }
0x1725   :  { %4475 = vtanh.f32 %v1335_v27 }
0x172b   :  { %v4476_v42 = vpop.eup %4475 }
0x172c   :  { %1338 = vrot.lane.b32.xlu1 %v4476_v42, %s4748_s27 }
0x179e   :  { %v1339_v48 = vpop.permute.xlu1 %1338 }
0x179f   :  { %v1341_v36 = vmul.f32 %v1339_v48, %v1322_v38 }
0x17a1   :  { %v5426_v16 = vmul.f32 %v1341_v36, %v5131_v53 }
0x17a3   :  { %v1344_v17 = vadd.f32 %v1343_v51, %v5426_v16 }
0x17a5   :  { %1349 = vrot.lane.b32.xlu2 %v1344_v17, %s4750_s24 }
0x17ff   :  { %v1350_v34 = vpop.permute.xlu2 %1349 }
0x1800   :  { %4228 = vmatmul.msk.f32.vlgmr.msrb.gmra.mxu3 %vm236_vm1, %v1350_v34 }
0x1883   :  { %v1370_v46 = vpop.f32.mrf.mxu3 }
0x1884   :  { %v1373_v30 = vadd.f32 %v1370_v46, %v326_v4  ;;  %v1345_v4 = vmul.f32 %v1335_v27, %v5131_v53  ;;  %v1346_v46 = vmul.f32 %v1278_v32, %v5133_v54  ;;  %v323_v27 = vadd.f32 %v5241_v24, %v5258_v37 }
0x1886   :  { %4477 = vtanh.f32 %v1373_v30  ;;  %v4229_v45 = vmul.f32 -1.442695, %v1373_v30  ;;  %v1347_v30 = vadd.f32 %v1346_v46, %v1345_v4 }
0x1888   :  { %4479 = vpow2.f32 %v4229_v45 }
0x188c   :  { %v4478_v22 = vpop.eup %4477 }
0x188d   :  { %1396 = vrot.lane.b32.xlu0 %v4478_v22, %s4748_s27 }
0x188e   :  { %v4480_v23 = vpop.eup %4479 }
0x188f   :  { %v1377_v41 = vadd.f32 1.0, %v4480_v23 }
0x1891   :  { %4481 = vrcp.f32 %v1377_v41  ;;  %v1389_v35 = vand.u32 2147483648, %v1377_v41  ;;  %vm1383_vm6 = vweird.f32 %v1377_v41  ;;  %v1387_v26 = vand.u32 2147483647, %v1377_v41 }
0x1893   :  { %v1390_v48 = vor.u32 1.1754944e-38, %v1389_v35  ;;  %vm1388_vm8 = vcmp.eq.f32.partialorder %v1387_v26, 8.507059e+37 }
0x1897   :  { %v4482_v38 = vpop.eup %4481 }
0x1898   :  { %v1379_v7 = vmul.f32 %v4482_v38, %v1377_v41  ;;  %vm1384_vm5 = vweird.f32 %v4482_v38 }
0x1899   :  { %vm1385_vm7 = vmor %vm1383_vm6, %vm1384_vm5 }
0x189a   :  { %v1380_v8 = vsub.f32 1.0, %v1379_v7 }
0x189c   :  { %v1381_v44 = vmul.f32 %v4482_v38, %v1380_v8 }
0x189e   :  { %v1382_v33 = vadd.f32 %v4482_v38, %v1381_v44  ;;  %v1412_v44 = vmul.f32 %v1344_v17, %v5093_v55 }
0x18a0   :  { %v1386_v42 = vsel %vm1385_vm7, %v4482_v38, %v1382_v33 }
0x18a1   :  { %v1391_v51 = vsel %vm1388_vm8, %v1390_v48, %v1386_v42 }
0x18a2   :  { %v1394_v22 = vmul.f32 %v1391_v51, %v1347_v30 }
0x18ff   :  { %v1397_v36 = vpop.permute.xlu0 %1396 }
0x1900   :  { %v1399_v34 = vmul.f32 %v1397_v36, %v1391_v51 }
0x1902   :  { %1401 = vrot.lane.b32.xlu1 %v1399_v34, %s4750_s24 }
0x1974   :  { %v1402_v45 = vpop.permute.xlu1 %1401 }
0x1975   :  { %v1404_v23 = vadd.f32 %v1402_v45, %v1394_v22 }
0x1977   :  { %4483 = vtanh.f32 %v1404_v23 }
0x197d   :  { %v4484_v7 = vpop.eup %4483 }
0x197e   :  { %1407 = vrot.lane.b32.xlu2 %v4484_v7, %s4748_s27 }
0x19d8   :  { %v1408_v41 = vpop.permute.xlu2 %1407 }
0x19d9   :  { %v1410_v38 = vmul.f32 %v1408_v41, %v1391_v51 }
0x19db   :  { %v5440_v8 = vmul.f32 %v1410_v38, %v5095_v58 }
0x19dd   :  { %v1413_v33 = vadd.f32 %v1412_v44, %v5440_v8 }
0x19df   :  { %1418 = vrot.lane.b32.xlu0 %v1413_v33, %s4750_s24 }
0x1a51   :  { %v1419_v32 = vpop.permute.xlu0 %1418 }
0x1a52   :  { %4230 = vmatmul.msk.f32.vlgmr.msrb.gmra.mxu1 %vm236_vm1, %v1419_v32 }
0x1acf   :  { %v1439_v35 = vpop.f32.mrf.mxu1 }
0x1ad0   :  { %v1442_v26 = vadd.f32 %v1439_v35, %v323_v27  ;;  %v1414_v27 = vmul.f32 %v1404_v23, %v5095_v58  ;;  %v1415_v35 = vmul.f32 %v1347_v30, %v5093_v55  ;;  %v320_v23 = vadd.f32 %v5239_v5, %v5258_v37 }
0x1ad2   :  { %4485 = vtanh.f32 %v1442_v26  ;;  %v4231_v48 = vmul.f32 -1.442695, %v1442_v26  ;;  %v1416_v26 = vadd.f32 %v1415_v35, %v1414_v27 }
0x1ad4   :  { %4487 = vpow2.f32 %v4231_v48 }
0x1ad8   :  { %v4486_v42 = vpop.eup %4485 }
0x1ad9   :  { %1465 = vrot.lane.b32.xlu1 %v4486_v42, %s4748_s27 }
0x1ada   :  { %v4488_v36 = vpop.eup %4487 }
0x1adb   :  { %v1446_v17 = vadd.f32 1.0, %v4488_v36 }
0x1add   :  { %4489 = vrcp.f32 %v1446_v17  ;;  %v1458_v45 = vand.u32 2147483648, %v1446_v17  ;;  %vm1452_vm10 = vweird.f32 %v1446_v17  ;;  %v1456_v24 = vand.u32 2147483647, %v1446_v17 }
0x1adf   :  { %v1459_v41 = vor.u32 1.1754944e-38, %v1458_v45  ;;  %vm1457_vm12 = vcmp.eq.f32.partialorder %v1456_v24, 8.507059e+37 }
0x1ae3   :  { %v4490_v51 = vpop.eup %4489 }
0x1ae4   :  { %v1448_v34 = vmul.f32 %v4490_v51, %v1446_v17  ;;  %vm1453_vm9 = vweird.f32 %v4490_v51 }
0x1ae5   :  { %vm1454_vm11 = vmor %vm1452_vm10, %vm1453_vm9 }
0x1ae6   :  { %v1449_v4 = vsub.f32 1.0, %v1448_v34 }
0x1ae8   :  { %v1450_v46 = vmul.f32 %v4490_v51, %v1449_v4 }
0x1aea   :  { %v1451_v22 = vadd.f32 %v4490_v51, %v1450_v46  ;;  %v1481_v46 = vmul.f32 %v1413_v33, %v5059_v61 }
0x1aec   :  { %v1455_v7 = vsel %vm1454_vm11, %v4490_v51, %v1451_v22 }
0x1aed   :  { %v1460_v44 = vsel %vm1457_vm12, %v1459_v41, %v1455_v7 }
0x1aee   :  { %v1463_v42 = vmul.f32 %v1460_v44, %v1416_v26 }
0x1b4b   :  { %v1466_v38 = vpop.permute.xlu1 %1465 }
0x1b4c   :  { %v1468_v32 = vmul.f32 %v1466_v38, %v1460_v44 }
0x1b4e   :  { %1470 = vrot.lane.b32.xlu2 %v1468_v32, %s4750_s24 }
0x1ba8   :  { %v1471_v48 = vpop.permute.xlu2 %1470 }
0x1ba9   :  { %v1473_v36 = vadd.f32 %v1471_v48, %v1463_v42 }
0x1bab   :  { %4491 = vtanh.f32 %v1473_v36 }
0x1bb1   :  { %v4492_v34 = vpop.eup %4491 }
0x1bb2   :  { %1476 = vrot.lane.b32.xlu0 %v4492_v34, %s4748_s27 }
0x1c24   :  { %v1477_v17 = vpop.permute.xlu0 %1476 }
0x1c25   :  { %v1479_v51 = vmul.f32 %v1477_v17, %v1460_v44 }
0x1c27   :  { %v5454_v4 = vmul.f32 %v1479_v51, %v5061_v0 }
0x1c29   :  { %v5458_v22 = vadd.f32 %v1481_v46, %v5454_v4  ;;  %v1483_v46 = vmul.f32 %v1473_v36, %v5061_v0  ;;  %v1639_v36 = vld [vmem:[%s6630_s10 + $0x78] sm:$0xff] }
0x1c2a   :  { %1720 = vmatpush.msra.mxu3 %v1639_v36  ;;  %v4704_v36 = vld [vmem:[%s6655_s29 + $0x68] sm:$0xff] }
0x1c2b   :  { %1487 = vrot.lane.b32.xlu1 %v5458_v22, %s4750_s24 }
0x1c9d   :  { %v1488_v30 = vpop.permute.xlu1 %1487 }
0x1c9e   :  { %4232 = vmatmul.msk.f32.vlgmr.msrb.gmra.mxu2 %vm236_vm1, %v1488_v30  ;;  %v1484_v30 = vmul.f32 %v1416_v26, %v5059_v61  ;;  %v1634_v26 = vld [vmem:[%s6630_s10 + $0x50] sm:$0xff] }
0x1d21   :  { %v1508_v45 = vpop.f32.mrf.mxu2 }
0x1d22   :  { %v1511_v24 = vadd.f32 %v1508_v45, %v320_v23  ;;  %v1485_v23 = vadd.f32 %v1484_v30, %v1483_v46  ;;  %v1629_v46 = vld [vmem:[%s6630_s10 + $0x28] sm:$0xff]  ;;  %v1624_v30 = vld [vmem:[%s6630_s10] sm:$0xff] }
0x1d24   :  { %4493 = vtanh.f32 %v1511_v24  ;;  %v4233_v33 = vmul.f32 -1.442695, %v1511_v24 }
0x1d26   :  { %4495 = vpow2.f32 %v4233_v33 }
0x1d2a   :  { %v4494_v7 = vpop.eup %4493 }
0x1d2b   :  { %1534 = vrot.lane.b32.xlu2 %v4494_v7, %s4748_s27 }
0x1d2c   :  { %v4496_v41 = vpop.eup %4495 }
0x1d2d   :  { %v1515_v38 = vadd.f32 1.0, %v4496_v41  ;;  %v1638_v41 = vld [vmem:[%s6630_s10 + $0x70] sm:$0xff] }
0x1d2e   :  { %1679 = vmatpush.msrb.mxu0 %v1638_v41 }
0x1d2f   :  { %4497 = vrcp.f32 %v1515_v38  ;;  %v1527_v5 = vand.u32 2147483648, %v1515_v38  ;;  %vm1521_vm14 = vweird.f32 %v1515_v38  ;;  %v1525_v37 = vand.u32 2147483647, %v1515_v38 }
0x1d31   :  { %v1528_v34 = vor.u32 1.1754944e-38, %v1527_v5  ;;  %vm1526_vm0 = vcmp.eq.f32.partialorder %v1525_v37, 8.507059e+37  ;;  %v1630_v5 = vld [vmem:[%s6630_s10 + $0x30] sm:$0xff]  ;;  %v1633_v37 = vld [vmem:[%s6630_s10 + $0x48] sm:$0xff] }
0x1d33   :  { %1553 = vrot.lane.b32.xlu2 %v5030_v15, %s4750_s24 }
0x1d35   :  { %v4498_v44 = vpop.eup %4497 }
0x1d36   :  { %v1517_v32 = vmul.f32 %v4498_v44, %v1515_v38  ;;  %vm1522_vm13 = vweird.f32 %v4498_v44  ;;  %v1636_v38 = vld [vmem:[%s6630_s10 + $0x60] sm:$0xff] }
0x1d37   :  { %vm1523_vm15 = vmor %vm1521_vm14, %vm1522_vm13  ;;  %1680 = vmatpush.msrb.mxu0 %v1636_v38  ;;  %v1625_v38 = vld [vmem:[%s6630_s10 + $0x8] sm:$0xff] }
0x1d38   :  { %v1518_v27 = vsub.f32 1.0, %v1517_v32  ;;  %v1632_v32 = vld [vmem:[%s6630_s10 + $0x40] sm:$0xff] }
0x1d39   :  { %1681 = vmatpush.msrb.mxu0 %v1634_v26  ;;  %v5550_v26 = vld [vmem:[%s6631_s11] sm:$0xff] }
0x1d3a   :  { %v1519_v35 = vmul.f32 %v4498_v44, %v1518_v27  ;;  %v1635_v27 = vld [vmem:[%s6630_s10 + $0x58] sm:$0xff] }
0x1d3b   :  { %1682 = vmatpush.msrb.mxu0 %v1632_v32  ;;  %v4706_v32 = vld [vmem:[%s6655_s29 + $0x58] sm:$0xff] }
0x1d3c   :  { %v1520_v42 = vadd.f32 %v4498_v44, %v1519_v35  ;;  %v5496_v35 = vld [vmem:[%s6631_s11 + $0x18] sm:$0xff] }
0x1d3d   :  { %1769 = vmatpush.msra.mxu1 %v5496_v35  ;;  %1836 = vmatpush.msra.mxu2 %v5496_v35 }
0x1d3e   :  { %v1524_v48 = vsel %vm1523_vm15, %v4498_v44, %v1520_v42  ;;  %v1637_v44 = vld [vmem:[%s6630_s10 + $0x68] sm:$0xff]  ;;  %v5501_v42 = vld [vmem:[%s6631_s11 + $0x10] sm:$0xff]  ;;  %1683 = vmatpush.msrb.mxu0 %v1630_v5 }
0x1d3f   :  { %v1529_v15 = vsel %vm1526_vm0, %v1528_v34, %v1524_v48  ;;  %1721 = vmatpush.msra.mxu3 %v1637_v44  ;;  %v5514_v48 = vld [vmem:[%s6631_s11 + $0x8] sm:$0xff]  ;;  %v1628_v34 = vld [vmem:[%s6630_s10 + $0x20] sm:$0xff]  ;;  %1770 = vmatpush.msra.mxu1 %v5501_v42  ;;  %s4754_s11 = smov 8  }
0x1d40   :  { %v1532_v45 = vmul.f32 %v1529_v15, %v1485_v23  ;;  %1837 = vmatpush.msra.mxu2 %v5501_v42  ;;  %1684 = vmatpush.msrb.mxu0 %v1628_v34  ;;  %v1627_v23 = vld [vmem:[%s6630_s10 + $0x18] sm:$0xff]  ;;  %v4705_v44 = vld [vmem:[%s6655_s29 + $0x60] sm:$0xff]  ;;  %v4708_v5 = vld [vmem:[%s6655_s29 + $0x48] sm:$0xff] }
0x1d41   :  { %1722 = vmatpush.msra.mxu3 %v1635_v27  ;;  %1771 = vmatpush.msra.mxu1 %v5514_v48  ;;  %v4707_v27 = vld [vmem:[%s6655_s29 + $0x50] sm:$0xff]  ;;  %v4710_v34 = vld [vmem:[%s6655_s29 + $0x38] sm:$0xff] }
0x1d42   :  { %1838 = vmatpush.msra.mxu2 %v5514_v48 }
0x1d43   :  { %1723 = vmatpush.msra.mxu3 %v1633_v37  ;;  %1772 = vmatpush.msra.mxu1 %v5550_v26  ;;  %v4709_v37 = vld [vmem:[%s6655_s29 + $0x40] sm:$0xff] }
0x1d44   :  { %1839 = vmatpush.msra.mxu2 %v5550_v26  ;;  %1773 = vmatmul.f32.vlgmr.msra.gmra.mxu1 %v4746_v28 }
0x1d45   :  { %1905 = vmatpush.msrb.mxu1 %v5496_v35 }
0x1d46   :  { %1974 = vmatpush.msrb.mxu2 %v5496_v35 }
0x1d47   :  { %1906 = vmatpush.msrb.mxu1 %v5501_v42 }
0x1d48   :  { %1975 = vmatpush.msrb.mxu2 %v5501_v42 }
0x1d49   :  { %1907 = vmatpush.msrb.mxu1 %v5514_v48 }
0x1d4a   :  { %1976 = vmatpush.msrb.mxu2 %v5514_v48 }
0x1d4b   :  { %1908 = vmatpush.msrb.mxu1 %v5550_v26 }
0x1d4c   :  { %1977 = vmatpush.msrb.mxu2 %v5550_v26 }
0x1d4d   :  { %2043 = vmatpush.msra.mxu1 %v5496_v35 }
0x1d4f   :  { %2044 = vmatpush.msra.mxu1 %v5501_v42 }
0x1d51   :  { %2045 = vmatpush.msra.mxu1 %v5514_v48 }
0x1d53   :  { %2046 = vmatpush.msra.mxu1 %v5550_v26 }
0x1d85   :  { %v1535_v17 = vpop.permute.xlu2 %1534 }
0x1d86   :  { %v1537_v51 = vmul.f32 %v1535_v17, %v1529_v15  ;;  %v1631_v17 = vld [vmem:[%s6630_s10 + $0x38] sm:$0xff] }
0x1d87   :  { %1724 = vmatpush.msra.mxu3 %v1631_v17  ;;  %v4711_v17 = vld [vmem:[%s6655_s29 + $0x30] sm:$0xff] }
0x1d88   :  { %1539 = vrot.lane.b32.xlu0 %v1537_v51, %s4750_s24  ;;  %v1626_v51 = vld [vmem:[%s6630_s10 + $0x10] sm:$0xff]  ;;  %s4152_s10 = sshll.u32 %s6642_s22, 4  ;;  %s4153_s10 = int_to_ptr.hbm [resolvable:$true] %s4152_s10 }
0x1d89   :  { %1685 = vmatpush.msrb.mxu0 %v1626_v51  ;;  %1725 = vmatpush.msra.mxu3 %v1629_v46  ;;  %v4712_v51 = vld [vmem:[%s6655_s29 + $0x28] sm:$0xff]  ;;  %v4713_v46 = vld [vmem:[%s6655_s29 + $0x20] sm:$0xff] }
0x1d8b   :  { %1686 = vmatpush.msrb.mxu0 %v1624_v30  ;;  %1726 = vmatpush.msra.mxu3 %v1627_v23  ;;  %v4714_v30 = vld [vmem:[%s6655_s29 + $0x18] sm:$0xff]  ;;  %v4715_v23 = vld [vmem:[%s6655_s29 + $0x10] sm:$0xff] }
0x1d8d   :  { %1727 = vmatpush.msra.mxu3 %v1625_v38  ;;  %v4717_v38 = vld [vmem:[%s6655_s29] sm:$0xff] }
0x1dfa   :  { %v1540_v24 = vpop.permute.xlu0 %1539 }
0x1dfb   :  { %v1542_v7 = vadd.f32 %v1540_v24, %v1532_v45 }
0x1dfd   :  { %4499 = vtanh.f32 %v1542_v7  ;;  %v1550_v7 = vmul.f32 %v5458_v22, %v5022_v11  ;;  %v4702_v22 = vld [vmem:[%s6655_s29 + $0x78] sm:$0xff] }
0x1dfe   :  { %3014 = vmatpush.msrb.mxu3 %v4702_v22  ;;  %v5621_v22 = vld [vmem:[%s6633_s13] sm:$0x3] }
0x1e03   :  { %v4500_v33 = vpop.eup %4499 }
0x1e04   :  { %1545 = vrot.lane.b32.xlu1 %v4500_v33, %s4748_s27 }
0x1e76   :  { %v1546_v45 = vpop.permute.xlu1 %1545 }
0x1e77   :  { %v1548_v24 = vmul.f32 %v1546_v45, %v1529_v15  ;;  %v4703_v15 = vld [vmem:[%s6655_s29 + $0x70] sm:$0xff]  ;;  %v4716_v45 = vld [vmem:[%s6655_s29 + $0x8] sm:$0xff] }
0x1e78   :  { %3015 = vmatpush.msrb.mxu3 %v4703_v15  ;;  %v5624_v15 = vperm.slane %v5621_v22, 0 }
0x1e79   :  { %v1549_v33 = vmul.f32 %v1548_v24, %v5027_v14  ;;  %v1554_v24 = vpop.permute.xlu2 %1553 }
0x1e7a   :  { %3016 = vmatpush.msrb.mxu3 %v4704_v36 }
0x1e7b   :  { %v5541_v41 = vadd.f32 %v1550_v7, %v1549_v33  ;;  %1557 = vrot.lane.b32.xlu0 %v1549_v33, %s4748_s27 }
0x1e7c   :  { %3017 = vmatpush.msrb.mxu3 %v4705_v44  ;;  %v1774_v44 = vpop.f32.mrf.mxu1 }
0x1e7e   :  { %3018 = vmatpush.msrb.mxu3 %v4706_v32 }
0x1e80   :  { %3019 = vmatpush.msrb.mxu3 %v4707_v27 }
0x1e82   :  { %3020 = vmatpush.msrb.mxu3 %v4708_v5 }
0x1e84   :  { %3021 = vmatpush.msrb.mxu3 %v4709_v37 }
0x1e86   :  { %3022 = vmatpush.msrb.mxu3 %v4710_v34 }
0x1e88   :  { %3023 = vmatpush.msrb.mxu3 %v4711_v17 }
0x1e8a   :  { %3024 = vmatpush.msrb.mxu3 %v4712_v51 }
0x1e8c   :  { %3025 = vmatpush.msrb.mxu3 %v4713_v46 }
0x1e8e   :  { %3026 = vmatpush.msrb.mxu3 %v4714_v30 }
0x1e90   :  { %3027 = vmatpush.msrb.mxu3 %v4715_v23 }
0x1e92   :  { %3028 = vmatpush.msrb.mxu3 %v4716_v45 }
0x1e94   :  { %3029 = vmatpush.msrb.mxu3 %v4717_v38 }
0x1eed   :  { %v1558_v7 = vpop.permute.xlu0 %1557 }
0x1eee   :  { %v1560_v33 = vsel %vm236_vm1, %v1554_v24, %v1558_v7 }
0x1eef   :  { %4234 = vmatmul.msk.f32.vlgmr.msrb.gmra.mxu0 %vm1646_vm2, %v1560_v33  ;;  %4242 = vmatmul.msk.f32.vlgmr.msra.gmra.mxu3 %vm1646_vm2, %v1560_v33 }
0x1f6c   :  { %v1688_v36 = vpop.f32.mrf.mxu0 }
0x1f6d   :  { %v1689_v32 = vadd.f32 %v1688_v36, %v5624_v15 }
0x1f6f   :  { %v1777_v27 = vadd.f32 %v1774_v44, %v1689_v32 }
0x1f71   :  { %4501 = vtanh.f32 %v1777_v27  ;;  %v4250_v37 = vmul.f32 -1.442695, %v1777_v27 }
0x1f73   :  { %4503 = vpow2.f32 %v4250_v37 }
0x1f77   :  { %v4502_v5 = vpop.eup %4501 }
0x1f78   :  { %1800 = vrot.lane.b32.xlu1 %v4502_v5, %s4748_s27 }
0x1f79   :  { %v4504_v34 = vpop.eup %4503 }
0x1f7a   :  { %v1781_v17 = vadd.f32 1.0, %v4504_v34 }
0x1f7c   :  { %4505 = vrcp.f32 %v1781_v17  ;;  %v1793_v24 = vand.u32 2147483648, %v1781_v17  ;;  %vm1787_vm4 = vweird.f32 %v1781_v17  ;;  %v1791_v7 = vand.u32 2147483647, %v1781_v17 }
0x1f7e   :  { %v1794_v38 = vor.u32 1.1754944e-38, %v1793_v24  ;;  %vm1792_vm6 = vcmp.eq.f32.partialorder %v1791_v7, 8.507059e+37 }
0x1f82   :  { %v4506_v51 = vpop.eup %4505 }
0x1f83   :  { %v1783_v46 = vmul.f32 %v4506_v51, %v1781_v17  ;;  %vm1788_vm3 = vweird.f32 %v4506_v51 }
0x1f84   :  { %vm1789_vm5 = vmor %vm1787_vm4, %vm1788_vm3 }
0x1f85   :  { %v1784_v30 = vsub.f32 1.0, %v1783_v46 }
0x1f87   :  { %v1785_v23 = vmul.f32 %v4506_v51, %v1784_v30 }
0x1f89   :  { %v1786_v45 = vadd.f32 %v4506_v51, %v1785_v23 }
0x1f8b   :  { %v1790_v33 = vsel %vm1789_vm5, %v4506_v51, %v1786_v45 }
0x1f8c   :  { %v1795_v44 = vsel %vm1792_vm6, %v1794_v38, %v1790_v33 }
0x1f8d   :  { %v1798_v27 = vmul.f32 0.0, %v1795_v44 }
0x1fea   :  { %v1801_v36 = vpop.permute.xlu1 %1800 }
0x1feb   :  { %v1803_v32 = vmul.f32 %v1801_v36, %v1795_v44 }
0x1fed   :  { %1805 = vrot.lane.b32.xlu2 %v1803_v32, %s4750_s24 }
0x1ff5   :  { %1562 = vrot.lane.b32.xlu2 %v5064_v1, %s4750_s24 }
0x2047   :  { %v1806_v5 = vpop.permute.xlu2 %1805 }
0x2048   :  { %v1808_v37 = vadd.f32 %v1806_v5, %v1798_v27 }
0x204a   :  { %4507 = vtanh.f32 %v1808_v37 }
0x204f   :  { %v1563_v23 = vpop.permute.xlu2 %1562 }
0x2050   :  { %v4508_v34 = vpop.eup %4507 }
0x2051   :  { %1811 = vrot.lane.b32.xlu0 %v4508_v34, %s4748_s27 }
0x2059   :  { %1566 = vrot.lane.b32.xlu0 %v5454_v4, %s4748_s27 }
0x20c3   :  { %v1812_v17 = vpop.permute.xlu0 %1811 }
0x20c4   :  { %v1814_v51 = vmul.f32 %v1812_v17, %v1795_v44 }
0x20c6   :  { %v1815_v46 = vmul.f32 %v1814_v51, %v5027_v14 }
0x20c8   :  { %v1816_v30 = vadd.f32 %v1815_v46, %v5025_v13 }
0x20ca   :  { %1820 = vrot.lane.b32.xlu1 %v1816_v30, %s4750_s24 }
0x20cb   :  { %v1567_v1 = vpop.permute.xlu0 %1566 }
0x20cc   :  { %v1569_v45 = vsel %vm236_vm1, %v1563_v23, %v1567_v1 }
0x20cd   :  { %4235 = vmatmul.msk.f32.gmra.mxu0 %vm1646_vm2, %v1569_v45  ;;  %4243 = vmatmul.msk.f32.gmra.mxu3 %vm1646_vm2, %v1569_v45 }
0x213c   :  { %v1821_v24 = vpop.permute.xlu1 %1820 }
0x213d   :  { %4251 = vmatmul.msk.f32.vlgmr.msra.gmra.mxu2 %vm236_vm1, %v1821_v24 }
0x213e   :  { %2112 = vmatpush.msra.mxu2 %v5496_v35 }
0x2140   :  { %2113 = vmatpush.msra.mxu2 %v5501_v42 }
0x2142   :  { %2114 = vmatpush.msra.mxu2 %v5514_v48 }
0x2144   :  { %2115 = vmatpush.msra.mxu2 %v5550_v26 }
0x214a   :  { %v1691_v4 = vpop.f32.mrf.mxu0 }
0x214b   :  { %v1692_v7 = vadd.f32 %v1691_v4, %v5624_v15 }
0x21c0   :  { %v1841_v33 = vpop.f32.mrf.mxu2 }
0x21c1   :  { %v1844_v38 = vadd.f32 %v1841_v33, %v1692_v7  ;;  %v1817_v33 = vmul.f32 %v1808_v37, %v5027_v14 }
0x21c3   :  { %4509 = vtanh.f32 %v1844_v38  ;;  %v4252_v44 = vmul.f32 -1.442695, %v1844_v38  ;;  %v1818_v38 = vadd.f32 %v1817_v33, %v5025_v13  ;;  %v1883_v13 = vmul.f32 %v1816_v30, %v5059_v61 }
0x21c5   :  { %4511 = vpow2.f32 %v4252_v44 }
0x21c9   :  { %v4510_v36 = vpop.eup %4509 }
0x21ca   :  { %1867 = vrot.lane.b32.xlu1 %v4510_v36, %s4748_s27 }
0x21cb   :  { %v4512_v32 = vpop.eup %4511 }
0x21cc   :  { %v1848_v27 = vadd.f32 1.0, %v4512_v32 }
0x21ce   :  { %4513 = vrcp.f32 %v1848_v27  ;;  %v1860_v23 = vand.u32 2147483648, %v1848_v27  ;;  %vm1854_vm8 = vweird.f32 %v1848_v27  ;;  %v1858_v1 = vand.u32 2147483647, %v1848_v27 }
0x21d0   :  { %v1861_v24 = vor.u32 1.1754944e-38, %v1860_v23  ;;  %vm1859_vm10 = vcmp.eq.f32.partialorder %v1858_v1, 8.507059e+37 }
0x21d2   :  { %1571 = vrot.lane.b32.xlu1 %v5098_v59, %s4750_s24 }
0x21d4   :  { %v4514_v5 = vpop.eup %4513 }
0x21d5   :  { %v1850_v34 = vmul.f32 %v4514_v5, %v1848_v27  ;;  %vm1855_vm7 = vweird.f32 %v4514_v5 }
0x21d6   :  { %vm1856_vm9 = vmor %vm1854_vm8, %vm1855_vm7 }
0x21d7   :  { %v1851_v17 = vsub.f32 1.0, %v1850_v34 }
0x21d9   :  { %v1852_v51 = vmul.f32 %v4514_v5, %v1851_v17 }
0x21db   :  { %v1853_v46 = vadd.f32 %v4514_v5, %v1852_v51 }
0x21dd   :  { %v1857_v45 = vsel %vm1856_vm9, %v4514_v5, %v1853_v46 }
0x21de   :  { %v1862_v59 = vsel %vm1859_vm10, %v1861_v24, %v1857_v45 }
0x21df   :  { %v1865_v36 = vmul.f32 %v1862_v59, %v1818_v38 }
0x223c   :  { %v1868_v4 = vpop.permute.xlu1 %1867 }
0x223d   :  { %v1870_v7 = vmul.f32 %v1868_v4, %v1862_v59 }
0x223f   :  { %1872 = vrot.lane.b32.xlu2 %v1870_v7, %s4750_s24 }
0x2244   :  { %v1572_v27 = vpop.permute.xlu1 %1571 }
0x2247   :  { %1575 = vrot.lane.b32.xlu2 %v5440_v8, %s4748_s27 }
0x2299   :  { %v1873_v44 = vpop.permute.xlu2 %1872 }
0x229a   :  { %v1875_v32 = vadd.f32 %v1873_v44, %v1865_v36 }
0x229c   :  { %4515 = vtanh.f32 %v1875_v32 }
0x22a1   :  { %v1576_v5 = vpop.permute.xlu2 %1575 }
0x22a2   :  { %v4516_v34 = vpop.eup %4515  ;;  %v1578_v17 = vsel %vm236_vm1, %v1572_v27, %v1576_v5 }
0x22a3   :  { %4236 = vmatmul.msk.f32.gmra.mxu0 %vm1646_vm2, %v1578_v17  ;;  %4244 = vmatmul.msk.f32.gmra.mxu3 %vm1646_vm2, %v1578_v17 }
0x22a4   :  { %1878 = vrot.lane.b32.xlu0 %v4516_v34, %s4748_s27 }
0x2316   :  { %v1879_v8 = vpop.permute.xlu0 %1878 }
0x2317   :  { %v1881_v51 = vmul.f32 %v1879_v8, %v1862_v59 }
0x2319   :  { %v1882_v37 = vmul.f32 %v1881_v51, %v5061_v0 }
0x231b   :  { %v1884_v46 = vadd.f32 %v1883_v13, %v1882_v37 }
0x231d   :  { %1889 = vrot.lane.b32.xlu0 %v1884_v46, %s4750_s24 }
0x2320   :  { %v1694_v1 = vpop.f32.mrf.mxu0 }
0x2321   :  { %v1695_v45 = vadd.f32 %v1694_v1, %v5624_v15 }
0x238f   :  { %v1890_v23 = vpop.permute.xlu0 %1889 }
0x2390   :  { %4253 = vmatmul.msk.f32.vlgmr.msrb.gmra.mxu1 %vm236_vm1, %v1890_v23 }
0x2391   :  { %2181 = vmatpush.msrb.mxu1 %v5496_v35 }
0x2393   :  { %2182 = vmatpush.msrb.mxu1 %v5501_v42 }
0x2395   :  { %2183 = vmatpush.msrb.mxu1 %v5514_v48 }
0x2397   :  { %2184 = vmatpush.msrb.mxu1 %v5550_v26 }
0x240d   :  { %v1910_v24 = vpop.f32.mrf.mxu1 }
0x240e   :  { %v1913_v4 = vadd.f32 %v1910_v24, %v1695_v45  ;;  %v1885_v45 = vmul.f32 %v1875_v32, %v5061_v0  ;;  %v1886_v24 = vmul.f32 %v1818_v38, %v5059_v61 }
0x2410   :  { %4517 = vtanh.f32 %v1913_v4  ;;  %v4254_v59 = vmul.f32 -1.442695, %v1913_v4  ;;  %v1887_v4 = vadd.f32 %v1886_v24, %v1885_v45 }
0x2412   :  { %4519 = vpow2.f32 %v4254_v59 }
0x2416   :  { %v4518_v30 = vpop.eup %4517 }
0x2417   :  { %1936 = vrot.lane.b32.xlu1 %v4518_v30, %s4748_s27 }
0x2418   :  { %v4520_v7 = vpop.eup %4519 }
0x2419   :  { %v1917_v33 = vadd.f32 1.0, %v4520_v7 }
0x241b   :  { %4521 = vrcp.f32 %v1917_v33  ;;  %v1929_v17 = vand.u32 2147483648, %v1917_v33  ;;  %vm1923_vm12 = vweird.f32 %v1917_v33  ;;  %v1927_v8 = vand.u32 2147483647, %v1917_v33 }
0x241d   :  { %v1930_v37 = vor.u32 1.1754944e-38, %v1929_v17  ;;  %vm1928_vm14 = vcmp.eq.f32.partialorder %v1927_v8, 8.507059e+37 }
0x2421   :  { %v4522_v36 = vpop.eup %4521 }
0x2422   :  { %v1919_v44 = vmul.f32 %v4522_v36, %v1917_v33  ;;  %vm1924_vm11 = vweird.f32 %v4522_v36 }
0x2423   :  { %vm1925_vm13 = vmor %vm1923_vm12, %vm1924_vm11 }
0x2424   :  { %v1920_v27 = vsub.f32 1.0, %v1919_v44 }
0x2426   :  { %v1921_v5 = vmul.f32 %v4522_v36, %v1920_v27 }
0x2428   :  { %v1922_v34 = vadd.f32 %v4522_v36, %v1921_v5 }
0x242a   :  { %v1926_v51 = vsel %vm1925_vm13, %v4522_v36, %v1922_v34 }
0x242b   :  { %v1931_v23 = vsel %vm1928_vm14, %v1930_v37, %v1926_v51 }
0x242c   :  { %v1934_v30 = vmul.f32 %v1931_v23, %v1887_v4 }
0x2489   :  { %v1937_v13 = vpop.permute.xlu1 %1936 }
0x248a   :  { %v1939_v1 = vmul.f32 %v1937_v13, %v1931_v23 }
0x248c   :  { %1941 = vrot.lane.b32.xlu2 %v1939_v1, %s4750_s24 }
0x2494   :  { %1580 = vrot.lane.b32.xlu2 %v5136_v57, %s4750_s24  ;;  %v1952_v57 = vmul.f32 %v1884_v46, %v5093_v55 }
0x24e6   :  { %v1942_v59 = vpop.permute.xlu2 %1941 }
0x24e7   :  { %v1944_v7 = vadd.f32 %v1942_v59, %v1934_v30 }
0x24e9   :  { %4523 = vtanh.f32 %v1944_v7 }
0x24ee   :  { %v1581_v38 = vpop.permute.xlu2 %1580 }
0x24ef   :  { %v4524_v33 = vpop.eup %4523 }
0x24f0   :  { %1947 = vrot.lane.b32.xlu0 %v4524_v33, %s4748_s27 }
0x24f8   :  { %1584 = vrot.lane.b32.xlu0 %v5426_v16, %s4748_s27 }
0x2562   :  { %v1948_v36 = vpop.permute.xlu0 %1947 }
0x2563   :  { %v1950_v44 = vmul.f32 %v1948_v36, %v1931_v23 }
0x2565   :  { %v1951_v27 = vmul.f32 %v1950_v44, %v5095_v58 }
0x2567   :  { %v1953_v32 = vadd.f32 %v1952_v57, %v1951_v27  ;;  %v1954_v27 = vmul.f32 %v1944_v7, %v5095_v58  ;;  %v1955_v57 = vmul.f32 %v1887_v4, %v5093_v55 }
0x2569   :  { %1958 = vrot.lane.b32.xlu1 %v1953_v32, %s4750_s24 }
0x256a   :  { %v1585_v5 = vpop.permute.xlu0 %1584 }
0x256b   :  { %v1587_v34 = vsel %vm236_vm1, %v1581_v38, %v1585_v5  ;;  %v1956_v38 = vadd.f32 %v1955_v57, %v1954_v27 }
0x256c   :  { %4237 = vmatmul.msk.f32.gmra.mxu0 %vm1646_vm2, %v1587_v34  ;;  %4245 = vmatmul.msk.f32.gmra.mxu3 %vm1646_vm2, %v1587_v34 }
0x25db   :  { %v1959_v17 = vpop.permute.xlu1 %1958 }
0x25dc   :  { %4255 = vmatmul.msk.f32.vlgmr.msrb.gmra.mxu2 %vm236_vm1, %v1959_v17 }
0x25dd   :  { %2250 = vmatpush.msrb.mxu2 %v5496_v35 }
0x25df   :  { %2251 = vmatpush.msrb.mxu2 %v5501_v42 }
0x25e1   :  { %2252 = vmatpush.msrb.mxu2 %v5514_v48 }
0x25e3   :  { %2253 = vmatpush.msrb.mxu2 %v5550_v26 }
0x25e9   :  { %v1697_v16 = vpop.f32.mrf.mxu0 }
0x25ea   :  { %v1698_v46 = vadd.f32 %v1697_v16, %v5624_v15 }
0x265f   :  { %v1979_v8 = vpop.f32.mrf.mxu2 }
0x2660   :  { %v1982_v51 = vadd.f32 %v1979_v8, %v1698_v46 }
0x2662   :  { %4525 = vtanh.f32 %v1982_v51  ;;  %v4256_v13 = vmul.f32 -1.442695, %v1982_v51 }
0x2664   :  { %4527 = vpow2.f32 %v4256_v13 }
0x2668   :  { %v4526_v37 = vpop.eup %4525 }
0x2669   :  { %2005 = vrot.lane.b32.xlu1 %v4526_v37, %s4748_s27  ;;  %v2021_v37 = vmul.f32 %v1953_v32, %v5133_v54 }
0x266a   :  { %v4528_v35 = vpop.eup %4527 }
0x266b   :  { %v1986_v42 = vadd.f32 1.0, %v4528_v35 }
0x266d   :  { %4529 = vrcp.f32 %v1986_v42  ;;  %v1998_v24 = vand.u32 2147483648, %v1986_v42  ;;  %vm1992_vm0 = vweird.f32 %v1986_v42  ;;  %v1996_v30 = vand.u32 2147483647, %v1986_v42 }
0x266f   :  { %v1999_v33 = vor.u32 1.1754944e-38, %v1998_v24  ;;  %vm1997_vm4 = vcmp.eq.f32.partialorder %v1996_v30, 8.507059e+37 }
0x2671   :  { %1589 = vrot.lane.b32.xlu1 %v5230_v19, %s4750_s24 }
0x2673   :  { %v4530_v48 = vpop.eup %4529 }
0x2674   :  { %v1988_v23 = vmul.f32 %v4530_v48, %v1986_v42  ;;  %vm1993_vm15 = vweird.f32 %v4530_v48 }
0x2675   :  { %vm1994_vm3 = vmor %vm1992_vm0, %vm1993_vm15 }
0x2676   :  { %v1989_v26 = vsub.f32 1.0, %v1988_v23 }
0x2678   :  { %v1990_v1 = vmul.f32 %v4530_v48, %v1989_v26 }
0x267a   :  { %v1991_v45 = vadd.f32 %v4530_v48, %v1990_v1 }
0x267c   :  { %v1995_v59 = vsel %vm1994_vm3, %v4530_v48, %v1991_v45 }
0x267d   :  { %v2000_v19 = vsel %vm1997_vm4, %v1999_v33, %v1995_v59 }
0x267e   :  { %v2003_v5 = vmul.f32 %v2000_v19, %v1956_v38 }
0x26db   :  { %v2006_v36 = vpop.permute.xlu1 %2005 }
0x26dc   :  { %v2008_v44 = vmul.f32 %v2006_v36, %v2000_v19 }
0x26de   :  { %2010 = vrot.lane.b32.xlu2 %v2008_v44, %s4750_s24 }
0x26e3   :  { %v1590_v16 = vpop.permute.xlu1 %1589 }
0x26e6   :  { %1593 = vrot.lane.b32.xlu2 %v5412_v62, %s4748_s27 }
0x2738   :  { %v2011_v34 = vpop.permute.xlu2 %2010 }
0x2739   :  { %v2013_v17 = vadd.f32 %v2011_v34, %v2003_v5 }
0x273b   :  { %4531 = vtanh.f32 %v2013_v17 }
0x2740   :  { %v1594_v46 = vpop.permute.xlu2 %1593 }
0x2741   :  { %v4532_v8 = vpop.eup %4531  ;;  %v1596_v51 = vsel %vm236_vm1, %v1590_v16, %v1594_v46 }
0x2742   :  { %4238 = vmatmul.msk.f32.gmra.mxu0 %vm1646_vm2, %v1596_v51  ;;  %4246 = vmatmul.msk.f32.gmra.mxu3 %vm1646_vm2, %v1596_v51  ;;  %v2023_v51 = vmul.f32 %v2013_v17, %v5131_v53 }
0x2743   :  { %2016 = vrot.lane.b32.xlu0 %v4532_v8, %s4748_s27 }
0x27b5   :  { %v2017_v62 = vpop.permute.xlu0 %2016 }
0x27b6   :  { %v2019_v7 = vmul.f32 %v2017_v62, %v2000_v19  ;;  %v2024_v62 = vmul.f32 %v1956_v38, %v5133_v54 }
0x27b8   :  { %v2020_v4 = vmul.f32 %v2019_v7, %v5131_v53  ;;  %v5713_v7 = vadd.f32 %v2024_v62, %v2023_v51 }
0x27ba   :  { %v2022_v13 = vadd.f32 %v2021_v37, %v2020_v4 }
0x27bc   :  { %2027 = vrot.lane.b32.xlu0 %v2022_v13, %s4750_s24  ;;  %v2090_v38 = vmul.f32 %v2022_v13, %v5225_v12 }
0x27bf   :  { %v1700_v42 = vpop.f32.mrf.mxu0 }
0x27c0   :  { %v1701_v48 = vadd.f32 %v1700_v42, %v5624_v15 }
0x282e   :  { %v2028_v35 = vpop.permute.xlu0 %2027 }
0x282f   :  { %4257 = vmatmul.msk.f32.vlgmr.msra.gmra.mxu1 %vm236_vm1, %v2028_v35 }
0x28ac   :  { %v2048_v23 = vpop.f32.mrf.mxu1 }
0x28ad   :  { %v2051_v26 = vadd.f32 %v2048_v23, %v1701_v48 }
0x28af   :  { %4533 = vtanh.f32 %v2051_v26  ;;  %v4258_v45 = vmul.f32 -1.442695, %v2051_v26 }
0x28b1   :  { %4535 = vpow2.f32 %v4258_v45 }
0x28b5   :  { %v4534_v1 = vpop.eup %4533 }
0x28b6   :  { %2074 = vrot.lane.b32.xlu1 %v4534_v1, %s4748_s27 }
0x28b7   :  { %v4536_v24 = vpop.eup %4535 }
0x28b8   :  { %v2055_v30 = vadd.f32 1.0, %v4536_v24  ;;  %v4217_v24 = vmul.f32 -1.442695, %v5388_v20 }
0x28ba   :  { %4537 = vrcp.f32 %v2055_v30  ;;  %v2067_v44 = vand.u32 2147483648, %v2055_v30  ;;  %vm2061_vm6 = vweird.f32 %v2055_v30  ;;  %v2065_v27 = vand.u32 2147483647, %v2055_v30 }
0x28bb   :  { %4539 = vtanh.f32 %v5388_v20 }
0x28bc   :  { %v2068_v5 = vor.u32 1.1754944e-38, %v2067_v44  ;;  %vm2066_vm8 = vcmp.eq.f32.partialorder %v2065_v27, 8.507059e+37 }
0x28c0   :  { %v4538_v32 = vpop.eup %4537 }
0x28c1   :  { %v2057_v59 = vmul.f32 %v4538_v32, %v2055_v30  ;;  %vm2062_vm5 = vweird.f32 %v4538_v32  ;;  %v4540_v8 = vpop.eup %4539 }
0x28c2   :  { %vm2063_vm7 = vmor %vm2061_vm6, %vm2062_vm5 }
0x28c3   :  { %v2058_v33 = vsub.f32 1.0, %v2057_v59 }
0x28c5   :  { %v2059_v36 = vmul.f32 %v4538_v32, %v2058_v33 }
0x28c7   :  { %v2060_v19 = vadd.f32 %v4538_v32, %v2059_v36 }
0x28c9   :  { %v2064_v57 = vsel %vm2063_vm7, %v4538_v32, %v2060_v19 }
0x28ca   :  { %v2069_v16 = vsel %vm2066_vm8, %v2068_v5, %v2064_v57 }
0x28cb   :  { %v2072_v4 = vmul.f32 %v2069_v16, %v5713_v7 }
0x2928   :  { %v2075_v34 = vpop.permute.xlu1 %2074 }
0x2929   :  { %v2077_v46 = vmul.f32 %v2075_v34, %v2069_v16 }
0x292b   :  { %2079 = vrot.lane.b32.xlu2 %v2077_v46, %s4750_s24 }
0x2933   :  { %1598 = vrot.lane.b32.xlu2 %v5296_v56, %s4750_s24 }
0x293b   :  { %973 = vrot.lane.b32.xlu2 %v4540_v8, %s4748_s27 }
0x2985   :  { %v2080_v37 = vpop.permute.xlu2 %2079 }
0x2986   :  { %v5716_v35 = vadd.f32 %v2080_v37, %v2072_v4 }
0x2988   :  { %4541 = vtanh.f32 %v5716_v35 }
0x2989   :  { %4543 = vpow2.f32 %v4217_v24 }
0x298d   :  { %v1599_v26 = vpop.permute.xlu2 %1598 }
0x298e   :  { %v4542_v42 = vpop.eup %4541 }
0x298f   :  { %2085 = vrot.lane.b32.xlu0 %v4542_v42, %s4748_s27  ;;  %v4544_v13 = vpop.eup %4543 }
0x2990   :  { %v954_v30 = vadd.f32 1.0, %v4544_v13 }
0x2992   :  { %4545 = vrcp.f32 %v954_v30  ;;  %vm960_vm10 = vweird.f32 %v954_v30  ;;  %v964_v20 = vand.u32 2147483647, %v954_v30 }
0x2994   :  { %vm965_vm12 = vcmp.eq.f32.partialorder %v964_v20, 8.507059e+37 }
0x2995   :  { %v974_v8 = vpop.permute.xlu2 %973 }
0x2997   :  { %1602 = vrot.lane.b32.xlu0 %v5398_v40, %s4748_s27 }
0x2998   :  { %v4546_v32 = vpop.eup %4545 }
0x2999   :  { %v956_v59 = vmul.f32 %v4546_v32, %v954_v30  ;;  %vm961_vm9 = vweird.f32 %v4546_v32 }
0x299a   :  { %vm962_vm11 = vmor %vm960_vm10, %vm961_vm9 }
0x299b   :  { %v957_v19 = vsub.f32 1.0, %v956_v59  ;;  %v922_v59 = vmul.f32 %v5361_v43, %v5351_v2 }
0x299d   :  { %v958_v57 = vmul.f32 %v4546_v32, %v957_v19 }
0x299f   :  { %v959_v5 = vadd.f32 %v4546_v32, %v958_v57  ;;  %v2092_v57 = vmul.f32 %v5716_v35, %v5227_v18  ;;  %v1003_v35 = vmul.f32 %v5307_v49, %v5369_v63 }
0x29a1   :  { %v963_v46 = vsel %vm962_vm11, %v4546_v32, %v959_v5  ;;  %v923_v32 = vmul.f32 %v5359_v10, %v5348_v6  ;;  %v2093_v5 = vmul.f32 %v5713_v7, %v5225_v12 }
0x29a3   :  { %v5750_v6 = vadd.f32 %v2093_v5, %v2092_v57  ;;  %v5832_v5 = vperm.slane %v5621_v22, 1 }
0x2a01   :  { %v2086_v56 = vpop.permute.xlu0 %2085 }
0x2a02   :  { %v2088_v48 = vmul.f32 %v2086_v56, %v2069_v16  ;;  %v966_v16 = vand.u32 2147483648, %v954_v30 }
0x2a04   :  { %v2089_v17 = vmul.f32 %v2088_v48, %v5227_v18  ;;  %v967_v51 = vor.u32 1.1754944e-38, %v966_v16 }
0x2a06   :  { %v5724_v23 = vadd.f32 %v2090_v38, %v2089_v17  ;;  %v968_v62 = vsel %vm965_vm12, %v967_v51, %v963_v46 }
0x2a07   :  { %v976_v4 = vmul.f32 %v974_v8, %v968_v62 }
0x2a08   :  { %2096 = vrot.lane.b32.xlu1 %v5724_v23, %s4750_s24 }
0x2a09   :  { %v1603_v1 = vpop.permute.xlu0 %1602 }
0x2a0a   :  { %v1605_v45 = vsel %vm236_vm1, %v1599_v26, %v1603_v1 }
0x2a0b   :  { %4239 = vmatmul.msk.f32.gmra.mxu0 %vm1646_vm2, %v1605_v45  ;;  %4247 = vmatmul.msk.f32.gmra.mxu3 %vm1646_vm2, %v1605_v45 }
0x2a7a   :  { %v2097_v40 = vpop.permute.xlu1 %2096 }
0x2a7b   :  { %4259 = vmatmul.msk.f32.vlgmr.msra.gmra.mxu2 %vm236_vm1, %v2097_v40 }
0x2a88   :  { %v1703_v33 = vpop.f32.mrf.mxu0 }
0x2a89   :  { %v1704_v36 = vadd.f32 %v1703_v33, %v5624_v15  ;;  %v924_v33 = vadd.f32 %v923_v32, %v922_v59 }
0x2afe   :  { %v2117_v44 = vpop.f32.mrf.mxu2 }
0x2aff   :  { %v2120_v27 = vadd.f32 %v2117_v44, %v1704_v36  ;;  %v971_v36 = vmul.f32 %v968_v62, %v924_v33 }
0x2b01   :  { %4547 = vtanh.f32 %v2120_v27  ;;  %v4260_v37 = vmul.f32 -1.442695, %v2120_v27 }
0x2b03   :  { %4549 = vpow2.f32 %v4260_v37 }
0x2b07   :  { %v4548_v34 = vpop.eup %4547 }
0x2b08   :  { %2143 = vrot.lane.b32.xlu1 %v4548_v34, %s4748_s27 }
0x2b09   :  { %v4550_v42 = vpop.eup %4549 }
0x2b0a   :  { %v2124_v56 = vadd.f32 1.0, %v4550_v42 }
0x2b0c   :  { %4551 = vrcp.f32 %v2124_v56  ;;  %v2136_v45 = vand.u32 2147483648, %v2124_v56  ;;  %vm2130_vm14 = vweird.f32 %v2124_v56  ;;  %v2134_v40 = vand.u32 2147483647, %v2124_v56 }
0x2b0e   :  { %vm2135_vm0 = vcmp.eq.f32.partialorder %v2134_v40, 8.507059e+37  ;;  %v5800_v40 = vld [vmem:[%s6632_s12] sm:$0xff] }
0x2b10   :  { %978 = vrot.lane.b32.xlu1 %v976_v4, %s4750_s24 }
0x2b12   :  { %v4552_v48 = vpop.eup %4551 }
0x2b13   :  { %v2126_v17 = vmul.f32 %v4552_v48, %v2124_v56  ;;  %vm2131_vm13 = vweird.f32 %v4552_v48  ;;  %v2159_v56 = vmul.f32 %v5724_v23, %v5291_v39  ;;  %v5781_v23 = vld [vmem:[%s6632_s12 + $0x18] sm:$0xff] }
0x2b14   :  { %vm2132_vm15 = vmor %vm2130_vm14, %vm2131_vm13  ;;  %2315 = vmatpush.msra.mxu1 %v5781_v23  ;;  %2382 = vmatpush.msra.mxu2 %v5781_v23 }
0x2b15   :  { %v2127_v38 = vsub.f32 1.0, %v2126_v17 }
0x2b17   :  { %v2128_v26 = vmul.f32 %v4552_v48, %v2127_v38 }
0x2b18   :  { %1607 = vrot.lane.b32.xlu1 %v5364_v47, %s4750_s24  ;;  %v2137_v47 = vor.u32 1.1754944e-38, %v2136_v45  ;;  %v5793_v45 = vld [vmem:[%s6632_s12 + $0x8] sm:$0xff] }
0x2b19   :  { %v2129_v1 = vadd.f32 %v4552_v48, %v2128_v26 }
0x2b1b   :  { %v2133_v24 = vsel %vm2132_vm15, %v4552_v48, %v2129_v1  ;;  %v5786_v1 = vld [vmem:[%s6632_s12 + $0x10] sm:$0xff] }
0x2b1c   :  { %2316 = vmatpush.msra.mxu1 %v5786_v1  ;;  %2383 = vmatpush.msra.mxu2 %v5786_v1 }
0x2b1e   :  { %2317 = vmatpush.msra.mxu1 %v5793_v45  ;;  %2384 = vmatpush.msra.mxu2 %v5793_v45 }
0x2b20   :  { %1620 = vrot.lane.b32.xlu1 %v5310_v21, %s4748_s27  ;;  %v2138_v21 = vsel %vm2135_vm0, %v2137_v47, %v2133_v24  ;;  %2318 = vmatpush.msra.mxu1 %v5800_v40  ;;  %v5816_v47 = vpop.f32.mrf.mxu3 }
0x2b21   :  { %v2141_v34 = vmul.f32 %v2138_v21, %v5750_v6  ;;  %2385 = vmatpush.msra.mxu2 %v5800_v40 }
0x2b7a   :  { %v2144_v13 = vpop.permute.xlu1 %2143 }
0x2b7b   :  { %v2146_v30 = vmul.f32 %v2144_v13, %v2138_v21  ;;  %v5818_v13 = vpop.f32.mrf.mxu3 }
0x2b7d   :  { %2148 = vrot.lane.b32.xlu0 %v2146_v30, %s4750_s24 }
0x2b82   :  { %v979_v19 = vpop.permute.xlu1 %978 }
0x2b83   :  { %v981_v44 = vadd.f32 %v979_v19, %v971_v36 }
0x2b85   :  { %4553 = vtanh.f32 %v981_v44 }
0x2b8a   :  { %v1608_v63 = vpop.permute.xlu1 %1607 }
0x2b8b   :  { %v4554_v27 = vpop.eup %4553 }
0x2b8c   :  { %984 = vrot.lane.b32.xlu0 %v4554_v27, %s4748_s27 }
0x2b92   :  { %v1621_v17 = vpop.permute.xlu1 %1620 }
0x2bef   :  { %v2149_v16 = vpop.permute.xlu0 %2148 }
0x2bf0   :  { %v5753_v2 = vadd.f32 %v2149_v16, %v2141_v34 }
0x2bf2   :  { %4555 = vtanh.f32 %v5753_v2 }
0x2bf8   :  { %v4556_v20 = vpop.eup %4555 }
0x2bf9   :  { %2154 = vrot.lane.b32.xlu2 %v4556_v20, %s4748_s27 }
0x2bfe   :  { %v985_v46 = vpop.permute.xlu0 %984 }
0x2bff   :  { %v987_v8 = vmul.f32 %v985_v46, %v968_v62 }
0x2c01   :  { %v996_v51 = vmul.f32 %v5305_v9, %v987_v8  ;;  %1611 = vrot.lane.b32.xlu2 %v5374_v60, %s4748_s27 }
0x2c03   :  { %v5762_v7 = vadd.f32 %v1003_v35, %v996_v51  ;;  %1616 = vrot.lane.b32.xlu0 %v996_v51, %s4750_s24 }
0x2c53   :  { %v2155_v4 = vpop.permute.xlu2 %2154 }
0x2c54   :  { %v2157_v37 = vmul.f32 %v2155_v4, %v2138_v21  ;;  %v5820_v21 = vpop.f32.mrf.mxu3 }
0x2c56   :  { %v2158_v42 = vmul.f32 %v2157_v37, %v5293_v52 }
0x2c58   :  { %v5768_v62 = vadd.f32 %v2159_v56, %v2158_v42 }
0x2c5a   :  { %2165 = vrot.lane.b32.xlu2 %v5768_v62, %s4750_s24 }
0x2c5b   :  { %v1612_v48 = vpop.permute.xlu2 %1611 }
0x2c5c   :  { %v1614_v60 = vsel %vm236_vm1, %v1608_v63, %v1612_v48  ;;  %v5822_v30 = vpop.f32.mrf.mxu3 }
0x2c5d   :  { %4240 = vmatmul.msk.f32.gmra.mxu0 %vm1646_vm2, %v1614_v60  ;;  %4248 = vmatmul.msk.f32.gmra.mxu3 %vm1646_vm2, %v1614_v60 }
0x2c64   :  { %v5824_v32 = vpop.f32.mrf.mxu3 }
0x2c6c   :  { %v5826_v59 = vpop.f32.mrf.mxu3 }
0x2c75   :  { %v1617_v38 = vpop.permute.xlu0 %1616 }
0x2c76   :  { %v1623_v26 = vsel %vm236_vm1, %v1617_v38, %v1621_v17 }
0x2c77   :  { %4241 = vmatmul.msk.f32.gmra.mxu0 %vm1646_vm2, %v1623_v26  ;;  %4249 = vmatmul.msk.f32.gmra.mxu3 %vm1646_vm2, %v1623_v26 }
0x2cb4   :  { %v2166_v24 = vpop.permute.xlu2 %2165 }
0x2cb5   :  { %4261 = vmatmul.msk.f32.vlgmr.msrb.gmra.mxu1 %vm236_vm1, %v2166_v24 }
0x2cb6   :  { %2451 = vmatpush.msrb.mxu1 %v5781_v23 }
0x2cb8   :  { %2452 = vmatpush.msrb.mxu1 %v5786_v1 }
0x2cba   :  { %2453 = vmatpush.msrb.mxu1 %v5793_v45 }
0x2cbc   :  { %2454 = vmatpush.msrb.mxu1 %v5800_v40 }
0x2cbd   :  { %2319 = vmatmul.f32.vlgmr.msra.gmra.mxu1 %v4746_v28 }
0x2cbe   :  { %2589 = vmatpush.msra.mxu1 %v5781_v23 }
0x2cc0   :  { %2590 = vmatpush.msra.mxu1 %v5786_v1 }
0x2cc2   :  { %2591 = vmatpush.msra.mxu1 %v5793_v45 }
0x2cc4   :  { %2592 = vmatpush.msra.mxu1 %v5800_v40 }
0x2cda   :  { %v1706_v33 = vpop.f32.mrf.mxu0 }
0x2cdb   :  { %v1707_v19 = vadd.f32 %v1706_v33, %v5624_v15 }
0x2ce0   :  { %v5828_v36 = vpop.f32.mrf.mxu3 }
0x2cfa   :  { %v1750_v57 = vpop.f32.mrf.mxu3 }
0x2cfb   :  { %v1751_v34 = vadd.f32 %v1750_v57, %v5832_v5 }
0x2d32   :  { %v2186_v44 = vpop.f32.mrf.mxu1 }
0x2d33   :  { %v2189_v27 = vadd.f32 %v2186_v44, %v1707_v19 }
0x2d35   :  { %4557 = vtanh.f32 %v2189_v27  ;;  %v4262_v35 = vmul.f32 -1.442695, %v2189_v27 }
0x2d3a   :  { %v2320_v16 = vpop.f32.mrf.mxu1 }
0x2d3b   :  { %v4558_v20 = vpop.eup %4557  ;;  %v2323_v46 = vadd.f32 %v2320_v16, %v1751_v34 }
0x2d3c   :  { %2212 = vrot.lane.b32.xlu0 %v4558_v20, %s4748_s27 }
0x2d3d   :  { %4559 = vtanh.f32 %v2323_v46  ;;  %v4265_v51 = vmul.f32 -1.442695, %v2323_v46 }
0x2d3e   :  { %4561 = vpow2.f32 %v4262_v35 }
0x2d3f   :  { %4563 = vpow2.f32 %v4265_v51 }
0x2d43   :  { %v4560_v8 = vpop.eup %4559 }
0x2d44   :  { %2346 = vrot.lane.b32.xlu1 %v4560_v8, %s4748_s27  ;;  %v4562_v4 = vpop.eup %4561 }
0x2d45   :  { %v2193_v37 = vadd.f32 1.0, %v4562_v4  ;;  %v4564_v22 = vpop.eup %4563 }
0x2d46   :  { %v2327_v42 = vadd.f32 1.0, %v4564_v22 }
0x2d47   :  { %4565 = vrcp.f32 %v2193_v37  ;;  %v2205_v33 = vand.u32 2147483648, %v2193_v37  ;;  %vm2199_vm4 = vweird.f32 %v2193_v37  ;;  %v2203_v19 = vand.u32 2147483647, %v2193_v37 }
0x2d48   :  { %4567 = vrcp.f32 %v2327_v42  ;;  %v2339_v8 = vand.u32 2147483648, %v2327_v42  ;;  %vm2333_vm8 = vweird.f32 %v2327_v42  ;;  %v2337_v35 = vand.u32 2147483647, %v2327_v42 }
0x2d49   :  { %v2206_v57 = vor.u32 1.1754944e-38, %v2205_v33  ;;  %vm2204_vm6 = vcmp.eq.f32.partialorder %v2203_v19, 8.507059e+37 }
0x2d4a   :  { %v2340_v4 = vor.u32 1.1754944e-38, %v2339_v8  ;;  %vm2338_vm10 = vcmp.eq.f32.partialorder %v2337_v35, 8.507059e+37 }
0x2d4d   :  { %v4566_v56 = vpop.eup %4565 }
0x2d4e   :  { %v2195_v63 = vmul.f32 %v4566_v56, %v2193_v37  ;;  %v4568_v60 = vpop.eup %4567  ;;  %vm2200_vm3 = vweird.f32 %v4566_v56 }
0x2d4f   :  { %v2329_v38 = vmul.f32 %v4568_v60, %v2327_v42  ;;  %vm2201_vm5 = vmor %vm2199_vm4, %vm2200_vm3  ;;  %vm2334_vm7 = vweird.f32 %v4568_v60 }
0x2d50   :  { %v2196_v48 = vsub.f32 1.0, %v2195_v63  ;;  %vm2335_vm9 = vmor %vm2333_vm8, %vm2334_vm7  ;;  %v2161_v63 = vmul.f32 %v5753_v2, %v5293_v52 }
0x2d51   :  { %v2330_v24 = vsub.f32 1.0, %v2329_v38 }
0x2d52   :  { %v2197_v17 = vmul.f32 %v4566_v56, %v2196_v48  ;;  %v2162_v48 = vmul.f32 %v5750_v6, %v5291_v39 }
0x2d53   :  { %v2331_v27 = vmul.f32 %v4568_v60, %v2330_v24 }
0x2d54   :  { %v2198_v26 = vadd.f32 %v4566_v56, %v2197_v17  ;;  %v5843_v17 = vadd.f32 %v2162_v48, %v2161_v63 }
0x2d55   :  { %v2332_v46 = vadd.f32 %v4568_v60, %v2331_v27 }
0x2d56   :  { %v2202_v44 = vsel %vm2201_vm5, %v4566_v56, %v2198_v26 }
0x2d57   :  { %v2207_v34 = vsel %vm2204_vm6, %v2206_v57, %v2202_v44  ;;  %v2336_v51 = vsel %vm2335_vm9, %v4568_v60, %v2332_v46  ;;  %v2228_v57 = vmul.f32 %v5768_v62, %v5359_v10 }
0x2d58   :  { %v2341_v22 = vsel %vm2338_vm10, %v2340_v4, %v2336_v51  ;;  %v2210_v38 = vmul.f32 %v2207_v34, %v5843_v17  ;;  %v1748_v4 = vadd.f32 %v5828_v36, %v5832_v5 }
0x2d59   :  { %v2344_v24 = vmul.f32 0.0, %v2341_v22 }
0x2dae   :  { %v2213_v16 = vpop.permute.xlu0 %2212 }
0x2daf   :  { %v2215_v20 = vmul.f32 %v2213_v16, %v2207_v34 }
0x2db1   :  { %2217 = vrot.lane.b32.xlu2 %v2215_v20, %s4750_s24 }
0x2db6   :  { %v2347_v37 = vpop.permute.xlu1 %2346 }
0x2db7   :  { %v2349_v56 = vmul.f32 %v2347_v37, %v2341_v22 }
0x2db9   :  { %2351 = vrot.lane.b32.xlu0 %v2349_v56, %s4750_s24 }
0x2e0b   :  { %v2218_v42 = vpop.permute.xlu2 %2217 }
0x2e0c   :  { %v5846_v26 = vadd.f32 %v2218_v42, %v2210_v38 }
0x2e0e   :  { %4569 = vtanh.f32 %v5846_v26 }
0x2e14   :  { %v4570_v60 = vpop.eup %4569 }
0x2e15   :  { %2223 = vrot.lane.b32.xlu1 %v4570_v60, %s4748_s27 }
0x2e2b   :  { %v2352_v33 = vpop.permute.xlu0 %2351 }
0x2e2c   :  { %v2354_v19 = vadd.f32 %v2352_v33, %v2344_v24 }
0x2e2e   :  { %4571 = vtanh.f32 %v2354_v19 }
0x2e34   :  { %v4572_v2 = vpop.eup %4571 }
0x2e35   :  { %2357 = vrot.lane.b32.xlu2 %v4572_v2, %s4748_s27 }
0x2e87   :  { %v2224_v6 = vpop.permute.xlu1 %2223 }
0x2e88   :  { %v2226_v44 = vmul.f32 %v2224_v6, %v2207_v34 }
0x2e8a   :  { %v2227_v27 = vmul.f32 %v2226_v44, %v5361_v43 }
0x2e8c   :  { %v5854_v16 = vadd.f32 %v2228_v57, %v2227_v27 }
0x2e8e   :  { %2234 = vrot.lane.b32.xlu0 %v5854_v16, %s4750_s24 }
0x2e8f   :  { %v2358_v20 = vpop.permute.xlu2 %2357 }
0x2e90   :  { %v2360_v46 = vmul.f32 %v2358_v20, %v2341_v22 }
0x2e92   :  { %v2361_v8 = vmul.f32 %v2360_v46, %v5305_v9 }
0x2e94   :  { %v2362_v35 = vadd.f32 %v2361_v8, %v5313_v25  ;;  %v2363_v8 = vmul.f32 %v2354_v19, %v5305_v9 }
0x2e96   :  { %2366 = vrot.lane.b32.xlu1 %v2362_v35, %s4750_s24 }
0x2f00   :  { %v2235_v51 = vpop.permute.xlu0 %2234 }
0x2f01   :  { %4263 = vmatmul.msk.f32.vlgmr.msrb.gmra.mxu2 %vm236_vm1, %v2235_v51  ;;  %v2364_v51 = vadd.f32 %v2363_v8, %v5313_v25  ;;  %v1745_v25 = vadd.f32 %v5826_v59, %v5832_v5 }
0x2f02   :  { %2520 = vmatpush.msrb.mxu2 %v5781_v23 }
0x2f04   :  { %2521 = vmatpush.msrb.mxu2 %v5786_v1 }
0x2f06   :  { %2522 = vmatpush.msrb.mxu2 %v5793_v45 }
0x2f08   :  { %v2367_v62 = vpop.permute.xlu1 %2366  ;;  %2523 = vmatpush.msrb.mxu2 %v5800_v40 }
0x2f09   :  { %4266 = vmatmul.msk.f32.vlgmr.msra.gmra.mxu2 %vm236_vm1, %v2367_v62 }
0x2f0a   :  { %2658 = vmatpush.msra.mxu2 %v5781_v23 }
0x2f0c   :  { %2659 = vmatpush.msra.mxu2 %v5786_v1 }
0x2f0e   :  { %2660 = vmatpush.msra.mxu2 %v5793_v45 }
0x2f10   :  { %2661 = vmatpush.msra.mxu2 %v5800_v40 }
0x2f84   :  { %v5871_v34 = vpop.f32.mrf.mxu2 }
0x2f8c   :  { %v2387_v37 = vpop.f32.mrf.mxu2 }
0x2f8d   :  { %v2390_v22 = vadd.f32 %v2387_v37, %v1748_v4 }
0x2f8f   :  { %4573 = vtanh.f32 %v2390_v22  ;;  %v4267_v63 = vmul.f32 -1.442695, %v2390_v22 }
0x2f91   :  { %4575 = vpow2.f32 %v4267_v63 }
0x2f95   :  { %v4574_v56 = vpop.eup %4573 }
0x2f96   :  { %2413 = vrot.lane.b32.xlu2 %v4574_v56, %s4748_s27 }
0x2f97   :  { %v4576_v48 = vpop.eup %4575 }
0x2f98   :  { %v2394_v38 = vadd.f32 1.0, %v4576_v48 }
0x2f9a   :  { %4577 = vrcp.f32 %v2394_v38  ;;  %v2406_v6 = vand.u32 2147483648, %v2394_v38  ;;  %vm2400_vm12 = vweird.f32 %v2394_v38  ;;  %v2404_v36 = vand.u32 2147483647, %v2394_v38 }
0x2f9c   :  { %v2407_v27 = vor.u32 1.1754944e-38, %v2406_v6  ;;  %vm2405_vm14 = vcmp.eq.f32.partialorder %v2404_v36, 8.507059e+37 }
0x2fa0   :  { %v4578_v42 = vpop.eup %4577 }
0x2fa1   :  { %v2396_v60 = vmul.f32 %v4578_v42, %v2394_v38  ;;  %vm2401_vm11 = vweird.f32 %v4578_v42  ;;  %v2429_v38 = vmul.f32 %v2362_v35, %v5359_v10 }
0x2fa2   :  { %vm2402_vm13 = vmor %vm2400_vm12, %vm2401_vm11 }
0x2fa3   :  { %v2397_v24 = vsub.f32 1.0, %v2396_v60 }
0x2fa5   :  { %v2398_v33 = vmul.f32 %v4578_v42, %v2397_v24 }
0x2fa7   :  { %v2399_v2 = vadd.f32 %v4578_v42, %v2398_v33 }
0x2fa9   :  { %v2403_v44 = vsel %vm2402_vm13, %v4578_v42, %v2399_v2 }
0x2faa   :  { %v2408_v20 = vsel %vm2405_vm14, %v2407_v27, %v2403_v44 }
0x2fab   :  { %v2411_v62 = vmul.f32 %v2408_v20, %v2364_v51 }
0x2ff0   :  { %v2414_v57 = vpop.permute.xlu2 %2413 }
0x2ff1   :  { %v2416_v46 = vmul.f32 %v2414_v57, %v2408_v20 }
0x2ff3   :  { %2418 = vrot.lane.b32.xlu0 %v2416_v46, %s4750_s24 }
0x3065   :  { %v2419_v4 = vpop.permute.xlu0 %2418 }
0x3066   :  { %v2421_v37 = vadd.f32 %v2419_v4, %v2411_v62 }
0x3068   :  { %4579 = vtanh.f32 %v2421_v37 }
0x306e   :  { %v4580_v22 = vpop.eup %4579 }
0x306f   :  { %2424 = vrot.lane.b32.xlu1 %v4580_v22, %s4748_s27 }
0x30e1   :  { %v2425_v56 = vpop.permute.xlu1 %2424 }
0x30e2   :  { %v2427_v63 = vmul.f32 %v2425_v56, %v2408_v20 }
0x30e4   :  { %v2428_v48 = vmul.f32 %v2427_v63, %v5361_v43  ;;  %v2431_v63 = vmul.f32 %v2421_v37, %v5361_v43 }
0x30e6   :  { %v2430_v42 = vadd.f32 %v2429_v38, %v2428_v48  ;;  %v2432_v48 = vmul.f32 %v2364_v51, %v5359_v10  ;;  %v1742_v51 = vadd.f32 %v5824_v32, %v5832_v5 }
0x30e8   :  { %2435 = vrot.lane.b32.xlu2 %v2430_v42, %s4750_s24  ;;  %v2433_v38 = vadd.f32 %v2432_v48, %v2431_v63 }
0x3142   :  { %v2436_v60 = vpop.permute.xlu2 %2435 }
0x3143   :  { %4268 = vmatmul.msk.f32.vlgmr.msrb.gmra.mxu1 %vm236_vm1, %v2436_v60 }
0x3144   :  { %2727 = vmatpush.msrb.mxu1 %v5781_v23 }
0x3146   :  { %2728 = vmatpush.msrb.mxu1 %v5786_v1 }
0x3148   :  { %2729 = vmatpush.msrb.mxu1 %v5793_v45 }
0x314a   :  { %2730 = vmatpush.msrb.mxu1 %v5800_v40 }
0x31c0   :  { %v2456_v19 = vpop.f32.mrf.mxu1 }
0x31c1   :  { %v2459_v24 = vadd.f32 %v2456_v19, %v1745_v25 }
0x31c3   :  { %4581 = vtanh.f32 %v2459_v24  ;;  %v4269_v33 = vmul.f32 -1.442695, %v2459_v24 }
0x31c5   :  { %4583 = vpow2.f32 %v4269_v33 }
0x31c9   :  { %v4582_v35 = vpop.eup %4581 }
0x31ca   :  { %2482 = vrot.lane.b32.xlu0 %v4582_v35, %s4748_s27 }
0x31cb   :  { %v4584_v2 = vpop.eup %4583 }
0x31cc   :  { %v2463_v6 = vadd.f32 1.0, %v4584_v2 }
0x31ce   :  { %4585 = vrcp.f32 %v2463_v6  ;;  %v2475_v46 = vand.u32 2147483648, %v2463_v6  ;;  %vm2469_vm0 = vweird.f32 %v2463_v6  ;;  %v2473_v59 = vand.u32 2147483647, %v2463_v6 }
0x31d0   :  { %v2476_v62 = vor.u32 1.1754944e-38, %v2475_v46  ;;  %vm2474_vm4 = vcmp.eq.f32.partialorder %v2473_v59, 8.507059e+37 }
0x31d4   :  { %v4586_v36 = vpop.eup %4585 }
0x31d5   :  { %v2465_v44 = vmul.f32 %v4586_v36, %v2463_v6  ;;  %vm2470_vm15 = vweird.f32 %v4586_v36  ;;  %v2498_v6 = vmul.f32 %v2430_v42, %v5291_v39 }
0x31d6   :  { %vm2471_vm3 = vmor %vm2469_vm0, %vm2470_vm15 }
0x31d7   :  { %v2466_v27 = vsub.f32 1.0, %v2465_v44 }
0x31d9   :  { %v2467_v57 = vmul.f32 %v4586_v36, %v2466_v27 }
0x31db   :  { %v2468_v20 = vadd.f32 %v4586_v36, %v2467_v57 }
0x31dd   :  { %v2472_v8 = vsel %vm2471_vm3, %v4586_v36, %v2468_v20 }
0x31de   :  { %v2477_v22 = vsel %vm2474_vm4, %v2476_v62, %v2472_v8 }
0x31df   :  { %v2480_v60 = vmul.f32 %v2477_v22, %v2433_v38 }
0x323c   :  { %v2483_v4 = vpop.permute.xlu0 %2482 }
0x323d   :  { %v2485_v56 = vmul.f32 %v2483_v4, %v2477_v22 }
0x323f   :  { %2487 = vrot.lane.b32.xlu1 %v2485_v56, %s4750_s24 }
0x32b1   :  { %v2488_v25 = vpop.permute.xlu1 %2487 }
0x32b2   :  { %v2490_v19 = vadd.f32 %v2488_v25, %v2480_v60  ;;  %v2501_v60 = vmul.f32 %v2433_v38, %v5291_v39  ;;  %v1739_v39 = vadd.f32 %v5822_v30, %v5832_v5 }
0x32b4   :  { %4587 = vtanh.f32 %v2490_v19  ;;  %v2500_v48 = vmul.f32 %v2490_v19, %v5293_v52 }
0x32b6   :  { %v2502_v25 = vadd.f32 %v2501_v60, %v2500_v48 }
0x32ba   :  { %v4588_v24 = vpop.eup %4587 }
0x32bb   :  { %2493 = vrot.lane.b32.xlu2 %v4588_v24, %s4748_s27 }
0x3315   :  { %v2494_v35 = vpop.permute.xlu2 %2493 }
0x3316   :  { %v2496_v33 = vmul.f32 %v2494_v35, %v2477_v22 }
0x3318   :  { %v2497_v2 = vmul.f32 %v2496_v33, %v5293_v52 }
0x331a   :  { %v2499_v36 = vadd.f32 %v2498_v6, %v2497_v2 }
0x331c   :  { %2504 = vrot.lane.b32.xlu0 %v2499_v36, %s4750_s24 }
0x338e   :  { %v2505_v37 = vpop.permute.xlu0 %2504 }
0x338f   :  { %4270 = vmatmul.msk.f32.vlgmr.msrb.gmra.mxu2 %vm236_vm1, %v2505_v37 }
0x3390   :  { %2796 = vmatpush.msrb.mxu2 %v5781_v23 }
0x3392   :  { %2797 = vmatpush.msrb.mxu2 %v5786_v1 }
0x3394   :  { %2798 = vmatpush.msrb.mxu2 %v5793_v45 }
0x3396   :  { %2799 = vmatpush.msrb.mxu2 %v5800_v40 }
0x3412   :  { %v2525_v44 = vpop.f32.mrf.mxu2 }
0x3413   :  { %v2528_v27 = vadd.f32 %v2525_v44, %v1742_v51  ;;  %v2567_v51 = vmul.f32 %v2499_v36, %v5225_v12 }
0x3415   :  { %4589 = vtanh.f32 %v2528_v27  ;;  %v4271_v57 = vmul.f32 -1.442695, %v2528_v27 }
0x3417   :  { %4591 = vpow2.f32 %v4271_v57 }
0x341b   :  { %v4590_v42 = vpop.eup %4589 }
0x341c   :  { %2551 = vrot.lane.b32.xlu1 %v4590_v42, %s4748_s27 }
0x341d   :  { %v4592_v20 = vpop.eup %4591 }
0x341e   :  { %v2532_v46 = vadd.f32 1.0, %v4592_v20 }
0x3420   :  { %4593 = vrcp.f32 %v2532_v46  ;;  %v2544_v40 = vand.u32 2147483648, %v2532_v46  ;;  %vm2538_vm6 = vweird.f32 %v2532_v46  ;;  %v2542_v32 = vand.u32 2147483647, %v2532_v46 }
0x3422   :  { %v2545_v4 = vor.u32 1.1754944e-38, %v2544_v40  ;;  %vm2543_vm8 = vcmp.eq.f32.partialorder %v2542_v32, 8.507059e+37 }
0x3426   :  { %v4594_v23 = vpop.eup %4593 }
0x3427   :  { %v2534_v1 = vmul.f32 %v4594_v23, %v2532_v46  ;;  %vm2539_vm5 = vweird.f32 %v4594_v23 }
0x3428   :  { %vm2540_vm7 = vmor %vm2538_vm6, %vm2539_vm5 }
0x3429   :  { %v2535_v59 = vsub.f32 1.0, %v2534_v1 }
0x342b   :  { %v2536_v45 = vmul.f32 %v4594_v23, %v2535_v59 }
0x342d   :  { %v2537_v8 = vadd.f32 %v4594_v23, %v2536_v45 }
0x342f   :  { %v2541_v62 = vsel %vm2540_vm7, %v4594_v23, %v2537_v8 }
0x3430   :  { %v2546_v56 = vsel %vm2543_vm8, %v2545_v4, %v2541_v62 }
0x3431   :  { %v2549_v24 = vmul.f32 %v2546_v56, %v2502_v25 }
0x348e   :  { %v2552_v22 = vpop.permute.xlu1 %2551 }
0x348f   :  { %v2554_v63 = vmul.f32 %v2552_v22, %v2546_v56 }
0x3491   :  { %2556 = vrot.lane.b32.xlu2 %v2554_v63, %s4750_s24  ;;  %v2570_v63 = vmul.f32 %v2502_v25, %v5225_v12  ;;  %v1736_v12 = vadd.f32 %v5820_v21, %v5832_v5 }
0x34eb   :  { %v2557_v35 = vpop.permute.xlu2 %2556 }
0x34ec   :  { %v2559_v33 = vadd.f32 %v2557_v35, %v2549_v24 }
0x34ee   :  { %4595 = vtanh.f32 %v2559_v33 }
0x34f4   :  { %v4596_v2 = vpop.eup %4595 }
0x34f5   :  { %2562 = vrot.lane.b32.xlu0 %v4596_v2, %s4748_s27 }
0x3567   :  { %v2563_v6 = vpop.permute.xlu0 %2562 }
0x3568   :  { %v2565_v37 = vmul.f32 %v2563_v6, %v2546_v56  ;;  %v2569_v56 = vmul.f32 %v2559_v33, %v5227_v18 }
0x356a   :  { %v2566_v44 = vmul.f32 %v2565_v37, %v5227_v18  ;;  %v2571_v48 = vadd.f32 %v2570_v63, %v2569_v56 }
0x356c   :  { %v2568_v27 = vadd.f32 %v2567_v51, %v2566_v44 }
0x356e   :  { %2573 = vrot.lane.b32.xlu1 %v2568_v27, %s4750_s24  ;;  %v2636_v44 = vmul.f32 %v2568_v27, %v5133_v54 }
0x35e0   :  { %v2574_v52 = vpop.permute.xlu1 %2573 }
0x35e1   :  { %4272 = vmatmul.msk.f32.vlgmr.msra.gmra.mxu1 %vm236_vm1, %v2574_v52 }
0x365e   :  { %v2594_v38 = vpop.f32.mrf.mxu1 }
0x365f   :  { %v2597_v19 = vadd.f32 %v2594_v38, %v1739_v39 }
0x3661   :  { %4597 = vtanh.f32 %v2597_v19  ;;  %v4273_v57 = vmul.f32 -1.442695, %v2597_v19 }
0x3663   :  { %4599 = vpow2.f32 %v4273_v57 }
0x3667   :  { %v4598_v42 = vpop.eup %4597 }
0x3668   :  { %2620 = vrot.lane.b32.xlu2 %v4598_v42, %s4748_s27 }
0x3669   :  { %v4600_v36 = vpop.eup %4599 }
0x366a   :  { %v2601_v20 = vadd.f32 1.0, %v4600_v36 }
0x366c   :  { %4601 = vrcp.f32 %v2601_v20  ;;  %v2613_v8 = vand.u32 2147483648, %v2601_v20  ;;  %vm2607_vm10 = vweird.f32 %v2601_v20  ;;  %v2611_v30 = vand.u32 2147483647, %v2601_v20 }
0x366e   :  { %v2614_v32 = vor.u32 1.1754944e-38, %v2613_v8  ;;  %vm2612_vm12 = vcmp.eq.f32.partialorder %v2611_v30, 8.507059e+37 }
0x3672   :  { %v4602_v46 = vpop.eup %4601 }
0x3673   :  { %v2603_v23 = vmul.f32 %v4602_v46, %v2601_v20  ;;  %vm2608_vm9 = vweird.f32 %v4602_v46 }
0x3674   :  { %vm2609_vm11 = vmor %vm2607_vm10, %vm2608_vm9 }
0x3675   :  { %v2604_v1 = vsub.f32 1.0, %v2603_v23 }
0x3677   :  { %v2605_v59 = vmul.f32 %v4602_v46, %v2604_v1 }
0x3679   :  { %v2606_v45 = vadd.f32 %v4602_v46, %v2605_v59 }
0x367b   :  { %v2610_v40 = vsel %vm2609_vm11, %v4602_v46, %v2606_v45 }
0x367c   :  { %v2615_v4 = vsel %vm2612_vm12, %v2614_v32, %v2610_v40  ;;  %v2639_v32 = vmul.f32 %v2571_v48, %v5133_v54  ;;  %v1733_v54 = vadd.f32 %v5818_v13, %v5832_v5 }
0x367d   :  { %v2618_v60 = vmul.f32 %v2615_v4, %v2571_v48 }
0x36c2   :  { %v2621_v62 = vpop.permute.xlu2 %2620 }
0x36c3   :  { %v2623_v22 = vmul.f32 %v2621_v62, %v2615_v4 }
0x36c5   :  { %2625 = vrot.lane.b32.xlu0 %v2623_v22, %s4750_s24 }
0x3737   :  { %v2626_v24 = vpop.permute.xlu0 %2625 }
0x3738   :  { %v2628_v35 = vadd.f32 %v2626_v24, %v2618_v60 }
0x373a   :  { %4603 = vtanh.f32 %v2628_v35  ;;  %v2638_v40 = vmul.f32 %v2628_v35, %v5131_v53 }
0x373c   :  { %v2640_v62 = vadd.f32 %v2639_v32, %v2638_v40 }
0x3740   :  { %v4604_v2 = vpop.eup %4603 }
0x3741   :  { %2631 = vrot.lane.b32.xlu1 %v4604_v2, %s4748_s27 }
0x37b3   :  { %v2632_v6 = vpop.permute.xlu1 %2631 }
0x37b4   :  { %v2634_v37 = vmul.f32 %v2632_v6, %v2615_v4 }
0x37b6   :  { %v2635_v51 = vmul.f32 %v2634_v37, %v5131_v53 }
0x37b8   :  { %v2637_v52 = vadd.f32 %v2636_v44, %v2635_v51 }
0x37ba   :  { %2642 = vrot.lane.b32.xlu2 %v2637_v52, %s4750_s24  ;;  %v2705_v6 = vmul.f32 %v2637_v52, %v5093_v55 }
0x3814   :  { %v2643_v18 = vpop.permute.xlu2 %2642 }
0x3815   :  { %4274 = vmatmul.msk.f32.vlgmr.msra.gmra.mxu2 %vm236_vm1, %v2643_v18 }
0x3898   :  { %v2663_v25 = vpop.f32.mrf.mxu2 }
0x3899   :  { %v2666_v33 = vadd.f32 %v2663_v25, %v1736_v12 }
0x389b   :  { %4605 = vtanh.f32 %v2666_v33  ;;  %v4275_v38 = vmul.f32 -1.442695, %v2666_v33 }
0x389d   :  { %4607 = vpow2.f32 %v4275_v38 }
0x38a1   :  { %v4606_v39 = vpop.eup %4605 }
0x38a2   :  { %2689 = vrot.lane.b32.xlu0 %v4606_v39, %s4748_s27 }
0x38a3   :  { %v4608_v19 = vpop.eup %4607 }
0x38a4   :  { %v2670_v42 = vadd.f32 1.0, %v4608_v19 }
0x38a6   :  { %4609 = vrcp.f32 %v2670_v42  ;;  %v2682_v23 = vand.u32 2147483648, %v2670_v42  ;;  %vm2676_vm14 = vweird.f32 %v2670_v42  ;;  %v2680_v21 = vand.u32 2147483647, %v2670_v42 }
0x38a8   :  { %v2683_v59 = vor.u32 1.1754944e-38, %v2682_v23  ;;  %vm2681_vm0 = vcmp.eq.f32.partialorder %v2680_v21, 8.507059e+37 }
0x38ac   :  { %v4610_v27 = vpop.eup %4609 }
0x38ad   :  { %v2672_v57 = vmul.f32 %v4610_v27, %v2670_v42  ;;  %vm2677_vm13 = vweird.f32 %v4610_v27  ;;  %v1709_v42 = vpop.f32.mrf.mxu0 }
0x38ae   :  { %vm2678_vm15 = vmor %vm2676_vm14, %vm2677_vm13 }
0x38af   :  { %v2673_v36 = vsub.f32 1.0, %v2672_v57  ;;  %v1710_v57 = vadd.f32 %v1709_v42, %v5624_v15 }
0x38b1   :  { %v2674_v20 = vmul.f32 %v4610_v27, %v2673_v36 }
0x38b3   :  { %v2675_v46 = vadd.f32 %v4610_v27, %v2674_v20  ;;  %v2258_v20 = vadd.f32 %v5871_v34, %v1710_v57 }
0x38b5   :  { %v2679_v1 = vsel %vm2678_vm15, %v4610_v27, %v2675_v46  ;;  %v4264_v32 = vmul.f32 -1.442695, %v2258_v20  ;;  %vm2859_vm15 = vcmask 785408  }
0x38b6   :  { %v2684_v8 = vsel %vm2681_vm0, %v2683_v59, %v2679_v1 }
0x38b7   :  { %v2687_v4 = vmul.f32 %v2684_v8, %v2640_v62 }
0x3914   :  { %v2690_v45 = vpop.permute.xlu0 %2689 }
0x3915   :  { %v2692_v30 = vmul.f32 %v2690_v45, %v2684_v8  ;;  %v2708_v45 = vmul.f32 %v2640_v62, %v5093_v55 }
0x3917   :  { %2694 = vrot.lane.b32.xlu1 %v2692_v30, %s4750_s24 }
0x3989   :  { %v2695_v22 = vpop.permute.xlu1 %2694 }
0x398a   :  { %v2697_v56 = vadd.f32 %v2695_v22, %v2687_v4 }
0x398c   :  { %4611 = vtanh.f32 %v2697_v56  ;;  %v2707_v59 = vmul.f32 %v2697_v56, %v5095_v58 }
0x3992   :  { %v4612_v63 = vpop.eup %4611 }
0x3993   :  { %2700 = vrot.lane.b32.xlu2 %v4612_v63, %s4748_s27 }
0x39ed   :  { %v2701_v60 = vpop.permute.xlu2 %2700 }
0x39ee   :  { %v2703_v24 = vmul.f32 %v2701_v60, %v2684_v8  ;;  %v5945_v8 = vadd.f32 %v2708_v45, %v2707_v59 }
0x39f0   :  { %v2704_v2 = vmul.f32 %v2703_v24, %v5095_v58 }
0x39f2   :  { %v2706_v37 = vadd.f32 %v2705_v6, %v2704_v2 }
0x39f4   :  { %2711 = vrot.lane.b32.xlu0 %v2706_v37, %s4750_s24  ;;  %v2774_v2 = vmul.f32 %v2706_v37, %v5059_v61 }
0x3a66   :  { %v2712_v53 = vpop.permute.xlu0 %2711 }
0x3a67   :  { %4276 = vmatmul.msk.f32.vlgmr.msrb.gmra.mxu1 %vm236_vm1, %v2712_v53 }
0x3ae4   :  { %v2732_v48 = vpop.f32.mrf.mxu1 }
0x3ae5   :  { %v2735_v35 = vadd.f32 %v2732_v48, %v1733_v54 }
0x3ae7   :  { %4613 = vtanh.f32 %v2735_v35  ;;  %v4277_v44 = vmul.f32 -1.442695, %v2735_v35 }
0x3ae9   :  { %4615 = vpow2.f32 %v4277_v44 }
0x3aed   :  { %v4614_v51 = vpop.eup %4613 }
0x3aee   :  { %2758 = vrot.lane.b32.xlu1 %v4614_v51, %s4748_s27 }
0x3aef   :  { %v4616_v18 = vpop.eup %4615 }
0x3af0   :  { %v2739_v12 = vadd.f32 1.0, %v4616_v18 }
0x3af2   :  { %4617 = vrcp.f32 %v2739_v12  ;;  %v2751_v19 = vand.u32 2147483648, %v2739_v12  ;;  %vm2745_vm4 = vweird.f32 %v2739_v12  ;;  %v2749_v13 = vand.u32 2147483647, %v2739_v12 }
0x3af3   :  { %4619 = vtanh.f32 %v2258_v20 }
0x3af4   :  { %v2752_v36 = vor.u32 1.1754944e-38, %v2751_v19  ;;  %vm2750_vm6 = vcmp.eq.f32.partialorder %v2749_v13, 8.507059e+37 }
0x3af8   :  { %v4618_v52 = vpop.eup %4617 }
0x3af9   :  { %v2741_v25 = vmul.f32 %v4618_v52, %v2739_v12  ;;  %vm2746_vm3 = vweird.f32 %v4618_v52  ;;  %v4620_v1 = vpop.eup %4619 }
0x3afa   :  { %vm2747_vm5 = vmor %vm2745_vm4, %vm2746_vm3 }
0x3afb   :  { %v2742_v33 = vsub.f32 1.0, %v2741_v25  ;;  %v2230_v25 = vmul.f32 %v5846_v26, %v5361_v43 }
0x3afd   :  { %v2743_v39 = vmul.f32 %v4618_v52, %v2742_v33 }
0x3aff   :  { %v2744_v38 = vadd.f32 %v4618_v52, %v2743_v39  ;;  %v2231_v39 = vmul.f32 %v5843_v17, %v5359_v10 }
0x3b01   :  { %v2748_v27 = vsel %vm2747_vm5, %v4618_v52, %v2744_v38  ;;  %v1730_v52 = vadd.f32 %v5816_v47, %v5832_v5  ;;  %v2232_v19 = vadd.f32 %v2231_v39, %v2230_v25 }
0x3b02   :  { %v2753_v23 = vsel %vm2750_vm6, %v2752_v36, %v2748_v27 }
0x3b03   :  { %v2756_v15 = vmul.f32 %v2753_v23, %v5945_v8 }
0x3b60   :  { %v2759_v46 = vpop.permute.xlu1 %2758 }
0x3b61   :  { %v2761_v21 = vmul.f32 %v2759_v46, %v2753_v23 }
0x3b63   :  { %2763 = vrot.lane.b32.xlu2 %v2761_v21, %s4750_s24 }
0x3b6b   :  { %2281 = vrot.lane.b32.xlu2 %v4620_v1, %s4748_s27 }
0x3bbd   :  { %v2764_v30 = vpop.permute.xlu2 %2763 }
0x3bbe   :  { %v5948_v40 = vadd.f32 %v2764_v30, %v2756_v15  ;;  %v2876_v30 = vld [vmem:[%s6634_s14 + $0x78] sm:$0xff] }
0x3bbf   :  { %2881 = vmatpush.msra.mxu0 %v2876_v30  ;;  %v6097_v30 = vld [vmem:[%s6639_s19 + $0x18] sm:$0xff] }
0x3bc0   :  { %4621 = vtanh.f32 %v5948_v40 }
0x3bc1   :  { %4623 = vpow2.f32 %v4264_v32  ;;  %v2874_v32 = vld [vmem:[%s6634_s14 + $0x68] sm:$0xff] }
0x3bc5   :  { %v2282_v51 = vpop.permute.xlu2 %2281 }
0x3bc6   :  { %v4622_v34 = vpop.eup %4621 }
0x3bc7   :  { %2769 = vrot.lane.b32.xlu0 %v4622_v34, %s4748_s27  ;;  %v4624_v4 = vpop.eup %4623  ;;  %v2875_v34 = vld [vmem:[%s6634_s14 + $0x70] sm:$0xff] }
0x3bc8   :  { %v2262_v22 = vadd.f32 1.0, %v4624_v4  ;;  %2882 = vmatpush.msra.mxu0 %v2875_v34  ;;  %v2873_v4 = vld [vmem:[%s6634_s14 + $0x60] sm:$0xff]  ;;  %v6102_v34 = vld [vmem:[%s6639_s19 + $0x10] sm:$0xff] }
0x3bca   :  { %4625 = vrcp.f32 %v2262_v22  ;;  %v2274_v54 = vand.u32 2147483648, %v2262_v22  ;;  %vm2268_vm8 = vweird.f32 %v2262_v22  ;;  %v2272_v48 = vand.u32 2147483647, %v2262_v22  ;;  %2883 = vmatpush.msra.mxu0 %v2874_v32  ;;  %v6109_v32 = vld [vmem:[%s6639_s19 + $0x8] sm:$0xff] }
0x3bcc   :  { %v2275_v44 = vor.u32 1.1754944e-38, %v2274_v54  ;;  %vm2273_vm10 = vcmp.eq.f32.partialorder %v2272_v48, 8.507059e+37  ;;  %2884 = vmatpush.msra.mxu0 %v2873_v4  ;;  %v2864_v48 = vld [vmem:[%s6634_s14 + $0x18] sm:$0xff] }
0x3bd0   :  { %v4626_v58 = vpop.eup %4625 }
0x3bd1   :  { %v2264_v56 = vmul.f32 %v4626_v58, %v2262_v22  ;;  %vm2269_vm7 = vweird.f32 %v4626_v58  ;;  %v2776_v22 = vmul.f32 %v5948_v40, %v5061_v0 }
0x3bd2   :  { %vm2270_vm9 = vmor %vm2268_vm8, %vm2269_vm7 }
0x3bd3   :  { %v2265_v55 = vsub.f32 1.0, %v2264_v56  ;;  %v2777_v56 = vmul.f32 %v5945_v8, %v5059_v61  ;;  %v2867_v61 = vld [vmem:[%s6634_s14 + $0x30] sm:$0xff]  ;;  %v2866_v8 = vld [vmem:[%s6634_s14 + $0x28] sm:$0xff] }
0x3bd5   :  { %v2266_v63 = vmul.f32 %v4626_v58, %v2265_v55  ;;  %v2870_v55 = vld [vmem:[%s6634_s14 + $0x48] sm:$0xff] }
0x3bd7   :  { %v2267_v6 = vadd.f32 %v4626_v58, %v2266_v63  ;;  %v2869_v63 = vld [vmem:[%s6634_s14 + $0x40] sm:$0xff] }
0x3bd9   :  { %v2271_v35 = vsel %vm2270_vm9, %v4626_v58, %v2267_v6  ;;  %v2871_v58 = vld [vmem:[%s6634_s14 + $0x50] sm:$0xff]  ;;  %v2865_v6 = vld [vmem:[%s6634_s14 + $0x20] sm:$0xff] }
0x3bda   :  { %v5958_v18 = vsel %vm2273_vm10, %v2275_v44, %v2271_v35 }
0x3bdb   :  { %v2284_v12 = vmul.f32 %v2282_v51, %v5958_v18  ;;  %v2279_v13 = vmul.f32 %v5958_v18, %v2232_v19  ;;  %v2863_v51 = vld [vmem:[%s6634_s14 + $0x10] sm:$0xff] }
0x3c39   :  { %v2770_v62 = vpop.permute.xlu0 %2769 }
0x3c3a   :  { %v2772_v60 = vmul.f32 %v2770_v62, %v2753_v23  ;;  %v2778_v62 = vadd.f32 %v2777_v56, %v2776_v22  ;;  %v6119_v22 = vld [vmem:[%s6639_s19] sm:$0xff] }
0x3c3b   :  { %v4379_v56 = vld [vmem:[%s6637_s17] ss:$0 sm:$0xff] }
0x3c3c   :  { %v2773_v24 = vmul.f32 %v2772_v60, %v5061_v0  ;;  %v2868_v60 = vld [vmem:[%s6634_s14 + $0x38] sm:$0xff] }
0x3c3e   :  { %v5954_v53 = vadd.f32 %v2774_v2, %v2773_v24 }
0x3c40   :  { %2780 = vrot.lane.b32.xlu1 %v5954_v53, %s4750_s24 }
0x3c48   :  { %2286 = vrot.lane.b32.xlu1 %v2284_v12, %s4750_s24  ;;  %v2297_v12 = vmul.f32 %v5854_v16, %v5307_v49 }
0x3cb2   :  { %v2781_v37 = vpop.permute.xlu1 %2780 }
0x3cb3   :  { %4278 = vmatmul.msk.f32.vlgmr.msrb.gmra.mxu2 %vm236_vm1, %v2781_v37  ;;  %v2862_v37 = vld [vmem:[%s6634_s14 + $0x8] sm:$0xff] }
0x3cba   :  { %v2287_v42 = vpop.permute.xlu1 %2286 }
0x3cbb   :  { %v2289_v27 = vadd.f32 %v2287_v42, %v2279_v13 }
0x3d36   :  { %v2801_v33 = vpop.f32.mrf.mxu2 }
0x3d37   :  { %v2804_v38 = vadd.f32 %v2801_v33, %v1730_v52  ;;  %v2861_v52 = vld [vmem:[%s6634_s14] sm:$0xff] }
0x3d39   :  { %4627 = vtanh.f32 %v2804_v38  ;;  %v4279_v43 = vmul.f32 -1.442695, %v2804_v38  ;;  %v2843_v38 = vmul.f32 %v5954_v53, %v5022_v11  ;;  %v2903_v53 = vld [vmem:[%s6636_s16 + $0x8] sm:$0xff] }
0x3d3a   :  { %4629 = vtanh.f32 %v2289_v27 }
0x3d3b   :  { %4631 = vpow2.f32 %v4279_v43  ;;  %v2905_v43 = vld [vmem:[%s6636_s16 + $0x18] sm:$0xff] }
0x3d3c   :  { %2925 = vmatpush.msra.mxu1 %v2905_v43 }
0x3d3f   :  { %v4628_v57 = vpop.eup %4627 }
0x3d40   :  { %2827 = vrot.lane.b32.xlu0 %v4628_v57, %s4748_s27  ;;  %v4630_v36 = vpop.eup %4629 }
0x3d41   :  { %v4632_v10 = vpop.eup %4631 }
0x3d42   :  { %v2808_v47 = vadd.f32 1.0, %v4632_v10  ;;  %v2902_v10 = vld [vmem:[%s6636_s16] sm:$0xff] }
0x3d44   :  { %4633 = vrcp.f32 %v2808_v47  ;;  %v2820_v23 = vand.u32 2147483648, %v2808_v47  ;;  %vm2814_vm12 = vweird.f32 %v2808_v47  ;;  %v2818_v21 = vand.u32 2147483647, %v2808_v47 }
0x3d46   :  { %v2821_v59 = vor.u32 1.1754944e-38, %v2820_v23  ;;  %vm2819_vm14 = vcmp.eq.f32.partialorder %v2818_v21, 8.507059e+37 }
0x3d48   :  { %2292 = vrot.lane.b32.xlu0 %v4630_v36, %s4748_s27 }
0x3d4a   :  { %v4634_v5 = vpop.eup %4633 }
0x3d4b   :  { %v2810_v17 = vmul.f32 %v4634_v5, %v2808_v47  ;;  %vm2815_vm11 = vweird.f32 %v4634_v5  ;;  %v6064_v47 = vld [vmem:[%s6641_s21] ss:$0 sm:$0xff] }
0x3d4c   :  { %vm2816_vm13 = vmor %vm2814_vm12, %vm2815_vm11 }
0x3d4d   :  { %v2811_v26 = vsub.f32 1.0, %v2810_v17  ;;  %v3066_v17 = vld [vmem:[%s6638_s18 + $0x18] sm:$0xff] }
0x3d4e   :  { %3107 = vmatpush.msra.mxu2 %v3066_v17 }
0x3d4f   :  { %v2812_v20 = vmul.f32 %v4634_v5, %v2811_v26 }
0x3d50   :  { %2850 = vrot.lane.b32.xlu0 %v5541_v41, %s4748_s27 }
0x3d51   :  { %v2813_v46 = vadd.f32 %v4634_v5, %v2812_v20  ;;  %v3065_v20 = vld [vmem:[%s6638_s18 + $0x10] sm:$0xff] }
0x3d52   :  { %3108 = vmatpush.msra.mxu2 %v3065_v20 }
0x3d53   :  { %v2817_v1 = vsel %vm2816_vm13, %v4634_v5, %v2813_v46  ;;  %v89_v5 = vld [vmem:[%s6660_s6] sm:$0xff]  ;;  %v3064_v46 = vld [vmem:[%s6638_s18 + $0x8] sm:$0xff]  ;;  %s6661_s6 = sld [smem:[#allocation10_spill]] }
0x3d54   :  { %v2822_v41 = vsel %vm2819_vm14, %v2821_v59, %v2817_v1  ;;  %v6072_v26 = vadd.s32 4294967295, %v89_v5  ;;  %3109 = vmatpush.msra.mxu2 %v3064_v46  ;;  %v4377_v1 = vld [vmem:[%s6635_s15] ss:$0 sm:$0xff] }
0x3d55   :  { %v2825_v0 = vmul.f32 %v2822_v41, %v2778_v62 }
0x3d56   :  { %vm3300_vm8 = vcmp.gt.s32.totalorder %v6072_v26, 1  ;;  %vm3383_vm14 = vcmp.gt.s32.totalorder %v6072_v26, 2 }
0x3db2   :  { %v2828_v45 = vpop.permute.xlu0 %2827 }
0x3db3   :  { %v2830_v15 = vmul.f32 %v2828_v45, %v2822_v41 }
0x3db5   :  { %2832 = vrot.lane.b32.xlu2 %v2830_v15, %s4750_s24  ;;  %v3063_v15 = vld [vmem:[%s6638_s18] sm:$0xff] }
0x3db6   :  { %3110 = vmatpush.msra.mxu2 %v3063_v15 }
0x3dba   :  { %v2293_v2 = vpop.permute.xlu0 %2292 }
0x3dbb   :  { %v2295_v54 = vmul.f32 %v2293_v2, %v5958_v18 }
0x3dbd   :  { %2846 = vrot.lane.b32.xlu2 %v5762_v7, %s4750_s24  ;;  %v2872_v7 = vld [vmem:[%s6634_s14 + $0x58] sm:$0xff]  ;;  %v2296_v44 = vmul.f32 %v2295_v54, %v5305_v9  ;;  %v6038_v9 = vld [vmem:[%s6659_s28] sm:$0xff] }
0x3dbe   :  { %2885 = vmatpush.msra.mxu0 %v2872_v7  ;;  %v2934_v49 = vperm.slane %v6038_v9, 0 }
0x3dbf   :  { %v2298_v18 = vadd.f32 %v2297_v12, %v2296_v44 }
0x3dc0   :  { %2886 = vmatpush.msra.mxu0 %v2871_v58 }
0x3dc2   :  { %2887 = vmatpush.msra.mxu0 %v2870_v55  ;;  %v2851_v19 = vpop.permute.xlu0 %2850 }
0x3dc4   :  { %2888 = vmatpush.msra.mxu0 %v2869_v63 }
0x3dc5   :  { %2939 = vperm.xlu2 %4362, %v2934_v49  }
0x3dc6   :  { %2889 = vmatpush.msra.mxu0 %v2868_v60 }
0x3dc8   :  { %2890 = vmatpush.msra.mxu0 %v2867_v61 }
0x3dca   :  { %2891 = vmatpush.msra.mxu0 %v2866_v8 }
0x3dcc   :  { %2892 = vmatpush.msra.mxu0 %v2865_v6 }
0x3dcd   :  { %4364 = vset.pattern.permute.xlu2 %v4749_v50 }
0x3dce   :  { %2893 = vmatpush.msra.mxu0 %v2864_v48  ;;  %3189 = vrot.lane.b32.xlu2 %v6064_v47, %s4750_s24 }
0x3dd0   :  { %2894 = vmatpush.msra.mxu0 %v2863_v51  ;;  %v2941_v51 = vperm.slane %v6038_v9, 1 }
0x3dd2   :  { %2895 = vmatpush.msra.mxu0 %v2862_v37  ;;  %2946 = vperm.xlu0 %4363, %v2941_v51  }
0x3dd4   :  { %2896 = vmatpush.msra.mxu0 %v2861_v52 }
0x3dd6   :  { %3160 = vmatpush.msrb.mxu0 %v6097_v30 }
0x3dd8   :  { %3161 = vmatpush.msrb.mxu0 %v6102_v34 }
0x3dda   :  { %3162 = vmatpush.msrb.mxu0 %v6109_v32  ;;  %4366 = vset.pattern.permute.xlu0 %v4749_v50 }
0x3ddc   :  { %3163 = vmatpush.msrb.mxu0 %v6119_v22 }
0x3e0f   :  { %v2833_v40 = vpop.permute.xlu2 %2832 }
0x3e10   :  { %v2835_v24 = vadd.f32 %v2833_v40, %v2825_v0  ;;  %v6146_v40 = vld [vmem:[%s6640_s20] ss:$0 sm:$0xff] }
0x3e12   :  { %4635 = vtanh.f32 %v2835_v24 }
0x3e17   :  { %v2847_v39 = vpop.permute.xlu2 %2846 }
0x3e18   :  { %v4636_v35 = vpop.eup %4635  ;;  %v2857_v42 = vsel %vm236_vm1, %v2847_v39, %v2851_v19 }
0x3e19   :  { %2838 = vrot.lane.b32.xlu1 %v4636_v35, %s4748_s27 }
0x3e1f   :  { %v2940_v11 = vpop.permute.xlu2 %2939 }
0x3e20   :  { %vm2990_vm0 = vcmp.eq.s32.totalorder %v4975_v29, %v2940_v11 }
0x3e21   :  { %2854 = vrot.lane.b32.xlu1 %v2298_v18, %s4751_s7  ;;  %4289 = vmatmul.msk.f32.vlgmr.msrb.gmra.mxu3 %vm2990_vm0, %v4747_v31 }
0x3e28   :  { %v3190_v58 = vpop.permute.xlu2 %3189 }
0x3e44   :  { %v2947_v19 = vpop.permute.xlu0 %2946 }
0x3e45   :  { %vm2991_vm7 = vcmp.eq.s32.totalorder %v4975_v29, %v2947_v19 }
0x3e46   :  { %4290 = vmatmul.msk.f32.gmra.mxu3 %vm2991_vm7, %v4747_v31  ;;  %vm3466_vm7 = vcmp.gt.s32.totalorder %v6072_v26, 3 }
0x3e8b   :  { %v2839_v16 = vpop.permute.xlu1 %2838 }
0x3e8c   :  { %v2841_v25 = vmul.f32 %v2839_v16, %v2822_v41 }
0x3e8e   :  { %v2842_v33 = vmul.f32 %v2841_v25, %v5027_v14  ;;  %v2904_v14 = vld [vmem:[%s6636_s16 + $0x10] sm:$0xff] }
0x3e8f   :  { %2926 = vmatpush.msra.mxu1 %v2904_v14 }
0x3e90   :  { %v2844_v13 = vadd.f32 %v2843_v38, %v2842_v33 }
0x3e91   :  { %2927 = vmatpush.msra.mxu1 %v2903_v53 }
0x3e93   :  { %v2855_v27 = vpop.permute.xlu1 %2854  ;;  %2928 = vmatpush.msra.mxu1 %v2902_v10 }
0x3e94   :  { %v2858_v57 = vsel %vm1646_vm2, %v2857_v42, %v2855_v27  ;;  %vm3209_vm2 = vcmp.gt.s32.totalorder %v6072_v26, 0 }
0x3e95   :  { %v2860_v36 = vsel %vm2859_vm15, %v2858_v57, %v2844_v13  ;;  %v6084_v23 = vsel %vm3209_vm2, 1.0, %v4746_v28  ;;  %3254 = vmatpush.msrb.mxu1 %v6097_v30 }
0x3e96   :  { %2897 = vmatmul.f32.vlgmr.msra.gmra.mxu0 %v2860_v36  ;;  %v3218_v21 = vsub.f32 1.0, %v6084_v23 }
0x3e97   :  { %3255 = vmatpush.msrb.mxu1 %v6102_v34  ;;  %3337 = vmatpush.msra.mxu0 %v6097_v30 }
0x3e98   :  { %3221 = vperm.xlu2 %4364, %v3218_v21  }
0x3e99   :  { %3256 = vmatpush.msrb.mxu1 %v6109_v32  ;;  %3338 = vmatpush.msra.mxu0 %v6102_v34 }
0x3e9b   :  { %3257 = vmatpush.msrb.mxu1 %v6119_v22  ;;  %3339 = vmatpush.msra.mxu0 %v6109_v32 }
0x3e9d   :  { %3340 = vmatpush.msra.mxu0 %v6119_v22 }
0x3ea4   :  { %v3031_v4 = vpop.f32.mrf.mxu3 }
0x3ea5   :  { %v3055_v7 = vmul.f32 5.656854, %v3031_v4 }
0x3ea7   :  { %4297 = vmatmul.msk.f32.vlgmr.msra.gmra.mxu2 %vm236_vm1, %v3055_v7  ;;  %v4311_v7 = vsel %vm3300_vm8, 1.0, %v4746_v28  ;;  %vm3549_vm8 = vcmp.gt.s32.totalorder %v6072_v26, 4 }
0x3ec9   :  { %v3034_v36 = vpop.f32.mrf.mxu3 }
0x3eca   :  { %v3056_v43 = vmul.f32 5.656854, %v3034_v36 }
0x3ecc   :  { %4298 = vmatmul.msk.f32.gmra.mxu2 %vm236_vm1, %v3056_v43 }
0x3ef2   :  { %v6134_v62 = vpop.permute.xlu2 %3221 }
0x3ef3   :  { %v3231_v20 = vmul.f32 %v6064_v47, %v6134_v62 }
0x3f13   :  { %v2898_v59 = vpop.f32.mrf.mxu0 }
0x3f14   :  { %v2899_v45 = vadd.f32 %v4377_v1, %v2898_v59 }
0x3f16   :  { %v2901_v41 = vmax.f32 %v2899_v45, 0.0 }
0x3f18   :  { %4280 = vmatmul.msk.f32.vlgmr.msra.gmra.mxu1 %vm236_vm1, %v2901_v41 }
0x3f19   :  { %3420 = vmatpush.msra.mxu1 %v6097_v30 }
0x3f1b   :  { %3421 = vmatpush.msra.mxu1 %v6102_v34 }
0x3f1d   :  { %3422 = vmatpush.msra.mxu1 %v6109_v32 }
0x3f1f   :  { %3423 = vmatpush.msra.mxu1 %v6119_v22 }
0x3f2a   :  { %v3112_v60 = vpop.f32.mrf.mxu2 }
0x3f2b   :  { %v3113_v24 = vadd.f32 %v6146_v40, %v3112_v60 }
0x3f4f   :  { %v3115_v21 = vpop.f32.mrf.mxu2 }
0x3f50   :  { %v3116_v47 = vadd.f32 %v6146_v40, %v3115_v21 }
0x3f95   :  { %v2930_v55 = vpop.f32.mrf.mxu1 }
0x3f96   :  { %v2931_v63 = vadd.f32 %v4379_v56, %v2930_v55 }
0x3f98   :  { %v3224_v0 = vmul.f32 %v6134_v62, %v2931_v63  ;;  %4306 = vmatmul.msk.f32.vlgmr.msrb.gmra.mxu0 %vm236_vm1, %v2931_v63 }
0x3f99   :  { %3503 = vmatpush.msrb.mxu0 %v6097_v30 }
0x3f9a   :  { %3226 = vrot.lane.b32.xlu2 %v3224_v0, %s4751_s7 }
0x3f9b   :  { %3504 = vmatpush.msrb.mxu0 %v6102_v34 }
0x3f9d   :  { %3505 = vmatpush.msrb.mxu0 %v6109_v32 }
0x3f9f   :  { %3506 = vmatpush.msrb.mxu0 %v6119_v22 }
0x3ff4   :  { %v3227_v5 = vpop.permute.xlu2 %3226 }
0x4015   :  { %v3165_v61 = vpop.f32.mrf.mxu0 }
0x4016   :  { %v3168_v8 = vadd.f32 %v3165_v61, %v3113_v24 }
0x4018   :  { %4637 = vtanh.f32 %v3168_v8  ;;  %v4307_v6 = vmul.f32 -1.442695, %v3168_v8 }
0x401a   :  { %4639 = vpow2.f32 %v4307_v6 }
0x401e   :  { %v4638_v2 = vpop.eup %4637 }
0x401f   :  { %3194 = vrot.lane.b32.xlu1 %v4638_v2, %s4748_s27 }
0x4020   :  { %v4640_v54 = vpop.eup %4639 }
0x4021   :  { %v3172_v48 = vadd.f32 1.0, %v4640_v54 }
0x4023   :  { %4641 = vrcp.f32 %v3172_v48  ;;  %v3184_v52 = vand.u32 2147483648, %v3172_v48  ;;  %vm3178_vm4 = vweird.f32 %v3172_v48  ;;  %v3182_v49 = vand.u32 2147483647, %v3172_v48 }
0x4025   :  { %v3185_v25 = vor.u32 1.1754944e-38, %v3184_v52  ;;  %vm3183_vm6 = vcmp.eq.f32.partialorder %v3182_v49, 8.507059e+37 }
0x4029   :  { %v4642_v35 = vpop.eup %4641 }
0x402a   :  { %v3174_v44 = vmul.f32 %v4642_v35, %v3172_v48  ;;  %vm3179_vm3 = vweird.f32 %v4642_v35  ;;  %v3309_v48 = vsub.f32 1.0, %v4311_v7 }
0x402b   :  { %vm3180_vm5 = vmor %vm3178_vm4, %vm3179_vm3 }
0x402c   :  { %v3175_v12 = vsub.f32 1.0, %v3174_v44 }
0x402e   :  { %v3176_v18 = vmul.f32 %v4642_v35, %v3175_v12 }
0x4030   :  { %v3177_v37 = vadd.f32 %v4642_v35, %v3176_v18 }
0x4032   :  { %v3181_v16 = vsel %vm3180_vm5, %v4642_v35, %v3177_v37  ;;  %vm3990_vm5 = vcmask 1040384  }
0x4033   :  { %v3186_v39 = vsel %vm3183_vm6, %v3185_v25, %v3181_v16  ;;  %vm3999_vm6 = vcmask 1041408  }
0x4034   :  { %v3192_v42 = vmul.f32 %v3190_v58, %v3186_v39 }
0x4091   :  { %v3195_v33 = vpop.permute.xlu1 %3194 }
0x4092   :  { %v3197_v38 = vmul.f32 %v3195_v33, %v3186_v39 }
0x4094   :  { %3199 = vrot.lane.b32.xlu1 %v3197_v38, %s4750_s24 }
0x409c   :  { %3214 = vperm.xlu1 %4360, %v6084_v23   ;;  %v2948_v23 = vperm.slane %v6038_v9, 2 }
0x40a4   :  { %4365 = vset.pattern.permute.xlu1 %v4877_v3 }
0x40ac   :  { %2953 = vperm.xlu1 %4365, %v2948_v23   ;;  %v2955_v23 = vperm.slane %v6038_v9, 3 }
0x40b4   :  { %4367 = vset.pattern.permute.xlu1 %v4749_v50 }
0x4106   :  { %v3200_v13 = vpop.permute.xlu1 %3199 }
0x4107   :  { %v6157_v27 = vadd.f32 %v3200_v13, %v3192_v42 }
0x4109   :  { %4643 = vtanh.f32 %v6157_v27 }
0x410e   :  { %v3215_v53 = vpop.permute.xlu1 %3214 }
0x410f   :  { %v4644_v57 = vpop.eup %4643  ;;  %v3230_v51 = vmul.f32 %v3215_v53, %v6157_v27 }
0x4110   :  { %3205 = vrot.lane.b32.xlu0 %v4644_v57, %s4748_s27 }
0x411e   :  { %v2954_v8 = vpop.permute.xlu1 %2953 }
0x411f   :  { %vm2992_vm13 = vcmp.eq.s32.totalorder %v4975_v29, %v2954_v8 }
0x4120   :  { %4291 = vmatmul.msk.f32.gmra.mxu3 %vm2992_vm13, %v4747_v31 }
0x4182   :  { %v3206_v14 = vpop.permute.xlu0 %3205 }
0x4183   :  { %v3208_v11 = vmul.f32 %v3206_v14, %v3186_v39 }
0x4185   :  { %v6162_v10 = vmul.f32 %v3215_v53, %v3208_v11  ;;  %v4314_v53 = vsel %vm3383_vm14, 1.0, %v4746_v28 }
0x4187   :  { %v6165_v17 = vadd.f32 %v3227_v5, %v6162_v10 }
0x4189   :  { %3238 = vrot.lane.b32.xlu0 %v6165_v17, %s4750_s24 }
0x4191   :  { %3233 = vrot.lane.b32.xlu0 %v3231_v20, %s4750_s24 }
0x4199   :  { %3305 = vperm.xlu0 %4366, %v4311_v7  }
0x41a3   :  { %v3037_v49 = vpop.f32.mrf.mxu3 }
0x41a4   :  { %v3057_v16 = vmul.f32 5.656854, %v3037_v49 }
0x41a6   :  { %4299 = vmatmul.msk.f32.gmra.mxu2 %vm236_vm1, %v3057_v16 }
0x41fb   :  { %v3239_v46 = vpop.permute.xlu0 %3238 }
0x41fc   :  { %4309 = vmatmul.msk.f32.vlgmr.msrb.gmra.mxu1 %vm236_vm1, %v3239_v46 }
0x41fd   :  { %3586 = vmatpush.msrb.mxu1 %v6097_v30 }
0x41ff   :  { %3587 = vmatpush.msrb.mxu1 %v6102_v34 }
0x4201   :  { %3588 = vmatpush.msrb.mxu1 %v6109_v32 }
0x4203   :  { %3589 = vmatpush.msrb.mxu1 %v6119_v22  ;;  %v3234_v35 = vpop.permute.xlu0 %3233 }
0x4204   :  { %v6188_v44 = vadd.f32 %v3234_v35, %v3230_v51 }
0x420b   :  { %v3306_v38 = vpop.permute.xlu0 %3305 }
0x4229   :  { %v3118_v57 = vpop.f32.mrf.mxu2 }
0x422a   :  { %v3119_v36 = vadd.f32 %v6146_v40, %v3118_v57 }
0x4279   :  { %v3259_v1 = vpop.f32.mrf.mxu1 }
0x427a   :  { %v3262_v59 = vadd.f32 %v3259_v1, %v3116_v47 }
0x427c   :  { %4645 = vtanh.f32 %v3262_v59  ;;  %v4310_v41 = vmul.f32 -1.442695, %v3262_v59 }
0x427e   :  { %4647 = vpow2.f32 %v4310_v41 }
0x4282   :  { %v4646_v45 = vpop.eup %4645 }
0x4283   :  { %3285 = vrot.lane.b32.xlu2 %v4646_v45, %s4748_s27 }
0x4284   :  { %v4648_v15 = vpop.eup %4647 }
0x4285   :  { %v3266_v4 = vadd.f32 1.0, %v4648_v15 }
0x4287   :  { %4649 = vrcp.f32 %v3266_v4  ;;  %v3278_v0 = vand.u32 2147483648, %v3266_v4  ;;  %vm3272_vm10 = vweird.f32 %v3266_v4  ;;  %v3276_v60 = vand.u32 2147483647, %v3266_v4 }
0x4289   :  { %v3279_v61 = vor.u32 1.1754944e-38, %v3278_v0  ;;  %vm3277_vm12 = vcmp.eq.f32.partialorder %v3276_v60, 8.507059e+37 }
0x428d   :  { %v4650_v58 = vpop.eup %4649 }
0x428e   :  { %v3268_v56 = vmul.f32 %v4650_v58, %v3266_v4  ;;  %vm3273_vm9 = vweird.f32 %v4650_v58 }
0x428f   :  { %vm3274_vm11 = vmor %vm3272_vm10, %vm3273_vm9 }
0x4290   :  { %v3269_v55 = vsub.f32 1.0, %v3268_v56 }
0x4292   :  { %v3270_v62 = vmul.f32 %v4650_v58, %v3269_v55  ;;  %v3392_v55 = vsub.f32 1.0, %v4314_v53 }
0x4294   :  { %v3271_v63 = vadd.f32 %v4650_v58, %v3270_v62 }
0x4296   :  { %v3275_v24 = vsel %vm3274_vm11, %v4650_v58, %v3271_v63 }
0x4297   :  { %v3280_v6 = vsel %vm3277_vm12, %v3279_v61, %v3275_v24 }
0x4298   :  { %v3283_v12 = vmul.f32 %v3280_v6, %v6188_v44 }
0x42dd   :  { %v3286_v2 = vpop.permute.xlu2 %3285 }
0x42de   :  { %v3288_v54 = vmul.f32 %v3286_v2, %v3280_v6 }
0x42e0   :  { %3290 = vrot.lane.b32.xlu1 %v3288_v54, %s4750_s24 }
0x42e8   :  { %3312 = vperm.xlu1 %4367, %v3309_v48  }
0x42f0   :  { %4368 = vset.pattern.permute.xlu1 %v4877_v3 }
0x42f8   :  { %2960 = vperm.xlu1 %4368, %v2955_v23   ;;  %v3814_v23 = vrot.slane %v6162_v10, 7 }
0x4300   :  { %4370 = vset.pattern.permute.xlu1 %v4749_v50 }
0x4352   :  { %v3291_v18 = vpop.permute.xlu1 %3290 }
0x4353   :  { %v6191_v37 = vadd.f32 %v3291_v18, %v3283_v12 }
0x4355   :  { %4651 = vtanh.f32 %v6191_v37  ;;  %v3317_v0 = vmul.f32 %v3306_v38, %v6191_v37 }
0x435a   :  { %v3313_v25 = vpop.permute.xlu1 %3312 }
0x435b   :  { %v4652_v52 = vpop.eup %4651  ;;  %v3315_v19 = vmul.f32 %v3313_v25, %v6165_v17  ;;  %v3318_v63 = vmul.f32 %v3313_v25, %v6188_v44  ;;  %v3808_v25 = vrot.slane %v6162_v10, 1 }
0x435c   :  { %3296 = vrot.lane.b32.xlu2 %v4652_v52, %s4748_s27  ;;  %v3811_v52 = vrot.slane %v6162_v10, 4 }
0x435d   :  { %v6221_v60 = vadd.f32 %v3318_v63, %v3317_v0 }
0x436a   :  { %v2961_v62 = vpop.permute.xlu1 %2960 }
0x436b   :  { %vm2993_vm4 = vcmp.eq.s32.totalorder %v4975_v29, %v2961_v62 }
0x436c   :  { %4292 = vmatmul.msk.f32.gmra.mxu3 %vm2993_vm4, %v4747_v31 }
0x43b6   :  { %v3297_v33 = vpop.permute.xlu2 %3296 }
0x43b7   :  { %v3299_v39 = vmul.f32 %v3297_v33, %v3280_v6 }
0x43b9   :  { %v6197_v42 = vmul.f32 %v3306_v38, %v3299_v39 }
0x43bb   :  { %v6200_v13 = vadd.f32 %v3315_v19, %v6197_v42  ;;  %v3826_v48 = vrot.slane %v6197_v42, 4  ;;  %v3823_v35 = vrot.slane %v6197_v42, 1  ;;  %v3827_v51 = vrot.slane %v6197_v42, 5 }
0x43bc   :  { %v3824_v44 = vrot.slane %v6197_v42, 2  ;;  %v3828_v12 = vrot.slane %v6197_v42, 6  ;;  %v3825_v18 = vrot.slane %v6197_v42, 3  ;;  %v3878_v37 = vperm.slane %v6197_v42, 0 }
0x43bd   :  { %3321 = vrot.lane.b32.xlu2 %v6200_v13, %s4750_s24  ;;  %v3882_v49 = vperm.slane %v3826_v48, 0  ;;  %v3879_v16 = vperm.slane %v3823_v35, 0  ;;  %v3883_v33 = vperm.slane %v3827_v51, 0  ;;  %v3829_v39 = vrot.slane %v6197_v42, 7 }
0x43be   :  { %v3880_v57 = vperm.slane %v3824_v44, 0  ;;  %v3991_v42 = vsel %vm3990_vm5, %v6162_v10, %v3878_v37 }
0x43ef   :  { %v3040_v6 = vpop.f32.mrf.mxu3 }
0x43f0   :  { %v3058_v54 = vmul.f32 5.656854, %v3040_v6 }
0x43f2   :  { %4300 = vmatmul.msk.f32.gmra.mxu2 %vm236_vm1, %v3058_v54 }
0x4417   :  { %v3322_v27 = vpop.permute.xlu2 %3321 }
0x4418   :  { %4312 = vmatmul.msk.f32.vlgmr.msra.gmra.mxu0 %vm236_vm1, %v3322_v27  ;;  %v3812_v27 = vrot.slane %v6162_v10, 5 }
0x4419   :  { %3669 = vmatpush.msra.mxu0 %v6097_v30 }
0x441b   :  { %3670 = vmatpush.msra.mxu0 %v6102_v34 }
0x441d   :  { %3671 = vmatpush.msra.mxu0 %v6109_v32 }
0x441f   :  { %3672 = vmatpush.msra.mxu0 %v6119_v22 }
0x4495   :  { %v3342_v43 = vpop.f32.mrf.mxu0 }
0x4496   :  { %v3345_v14 = vadd.f32 %v3342_v43, %v3119_v36  ;;  %v3884_v36 = vperm.slane %v3828_v12, 0  ;;  %v3881_v43 = vperm.slane %v3825_v18, 0 }
0x4498   :  { %4653 = vtanh.f32 %v3345_v14  ;;  %v4313_v5 = vmul.f32 -1.442695, %v3345_v14 }
0x449a   :  { %4655 = vpow2.f32 %v4313_v5  ;;  %v3810_v5 = vrot.slane %v6162_v10, 3 }
0x449e   :  { %v4654_v11 = vpop.eup %4653 }
0x449f   :  { %3368 = vrot.lane.b32.xlu2 %v4654_v11, %s4748_s27  ;;  %v3809_v11 = vrot.slane %v6162_v10, 2 }
0x44a0   :  { %v4656_v17 = vpop.eup %4655 }
0x44a1   :  { %v3349_v20 = vadd.f32 1.0, %v4656_v17 }
0x44a3   :  { %4657 = vrcp.f32 %v3349_v20  ;;  %v3361_v45 = vand.u32 2147483648, %v3349_v20  ;;  %vm3355_vm0 = vweird.f32 %v3349_v20  ;;  %v3359_v41 = vand.u32 2147483647, %v3349_v20 }
0x44a5   :  { %v3362_v4 = vor.u32 1.1754944e-38, %v3361_v45  ;;  %vm3360_vm3 = vcmp.eq.f32.partialorder %v3359_v41, 8.507059e+37  ;;  %v3993_v45 = vsel %vm3990_vm5, %v3809_v11, %v3880_v57  ;;  %v6302_v11 = vsel %vm3549_vm8, 1.0, %v4746_v28 }
0x44a7   :  { %3388 = vperm.xlu2 %4364, %v4314_v53   ;;  %v3813_v53 = vrot.slane %v6162_v10, 6 }
0x44a9   :  { %v4658_v46 = vpop.eup %4657  ;;  %v3997_v41 = vsel %vm3990_vm5, %v3813_v53, %v3884_v36  ;;  %v4317_v36 = vsel %vm3466_vm7, 1.0, %v4746_v28 }
0x44aa   :  { %v3351_v21 = vmul.f32 %v4658_v46, %v3349_v20  ;;  %vm3356_vm15 = vweird.f32 %v4658_v46  ;;  %v3995_v20 = vsel %vm3990_vm5, %v3811_v52, %v3882_v49 }
0x44ab   :  { %vm3357_vm2 = vmor %vm3355_vm0, %vm3356_vm15  ;;  %vm4008_vm15 = vcmask 1042432  }
0x44ac   :  { %v3352_v47 = vsub.f32 1.0, %v3351_v21 }
0x44ae   :  { %v3353_v1 = vmul.f32 %v4658_v46, %v3352_v47 }
0x44af   :  { %4369 = vset.pattern.permute.xlu2 %v4877_v3 }
0x44b0   :  { %v3354_v59 = vadd.f32 %v4658_v46, %v3353_v1  ;;  %v3996_v1 = vsel %vm3990_vm5, %v3812_v27, %v3883_v33  ;;  %v3121_v33 = vpop.f32.mrf.mxu2 }
0x44b2   :  { %v3358_v15 = vsel %vm3357_vm2, %v4658_v46, %v3354_v59  ;;  %v3992_v46 = vsel %vm3990_vm5, %v3808_v25, %v3879_v16  ;;  %v3885_v59 = vperm.slane %v3829_v39, 0  ;;  %v3122_v39 = vadd.f32 %v6146_v40, %v3121_v33 }
0x44b3   :  { %v3363_v58 = vsel %vm3360_vm3, %v3362_v4, %v3358_v15  ;;  %v3994_v15 = vsel %vm3990_vm5, %v3810_v5, %v3881_v43  ;;  %v3558_v5 = vsub.f32 1.0, %v6302_v11 }
0x44b4   :  { %v3366_v24 = vmul.f32 %v3363_v58, %v6221_v60  ;;  %v3998_v12 = vsel %vm3990_vm5, %v3814_v23, %v3885_v59  ;;  %vm4017_vm5 = vcmask 1043456  }
0x44f9   :  { %v3369_v7 = vpop.permute.xlu2 %3368 }
0x44fa   :  { %v3371_v56 = vmul.f32 %v3369_v7, %v3363_v58 }
0x44fc   :  { %3373 = vrot.lane.b32.xlu0 %v3371_v56, %s4750_s24 }
0x4501   :  { %v6245_v17 = vpop.permute.xlu2 %3388 }
0x4504   :  { %3395 = vperm.xlu0 %4366, %v3392_v55  }
0x456e   :  { %v3374_v61 = vpop.permute.xlu0 %3373 }
0x456f   :  { %v6224_v8 = vadd.f32 %v3374_v61, %v3366_v24 }
0x4571   :  { %4659 = vtanh.f32 %v6224_v8 }
0x4576   :  { %v6239_v38 = vpop.permute.xlu0 %3395 }
0x4577   :  { %v4660_v2 = vpop.eup %4659  ;;  %v3398_v21 = vmul.f32 %v6239_v38, %v6200_v13 }
0x4578   :  { %3379 = vrot.lane.b32.xlu1 %v4660_v2, %s4748_s27 }
0x45ea   :  { %v3380_v19 = vpop.permute.xlu1 %3379 }
0x45eb   :  { %v3382_v14 = vmul.f32 %v3380_v19, %v3363_v58 }
0x45ed   :  { %v3391_v47 = vmul.f32 %v6245_v17, %v3382_v14  ;;  %v2962_v14 = vperm.slane %v6038_v9, 4 }
0x45ef   :  { %v6259_v4 = vadd.f32 %v3398_v21, %v3391_v47  ;;  %v3894_v7 = vperm.slane %v3391_v47, 0  ;;  %v3834_v58 = vrot.slane %v3391_v47, 4  ;;  %v3831_v10 = vrot.slane %v3391_v47, 1  ;;  %2967 = vperm.xlu2 %4369, %v2962_v14  }
0x45f0   :  { %v3835_v56 = vrot.slane %v3391_v47, 5  ;;  %v3832_v55 = vrot.slane %v3391_v47, 2  ;;  %v3836_v13 = vrot.slane %v3391_v47, 6  ;;  %v3833_v62 = vrot.slane %v3391_v47, 3 }
0x45f1   :  { %3404 = vrot.lane.b32.xlu1 %v6259_v4, %s4750_s24  ;;  %v6264_v63 = vsel %vm3999_vm6, %v3991_v42, %v3894_v7  ;;  %v3898_v0 = vperm.slane %v3834_v58, 0  ;;  %v3895_v24 = vperm.slane %v3831_v10, 0  ;;  %v3837_v61 = vrot.slane %v3391_v47, 7 }
0x45f2   :  { %v3899_v2 = vperm.slane %v3835_v56, 0  ;;  %v3896_v6 = vperm.slane %v3832_v55, 0  ;;  %v3900_v54 = vperm.slane %v3836_v13, 0  ;;  %v3897_v48 = vperm.slane %v3833_v62, 0 }
0x45f3   :  { %v6267_v35 = vsel %vm3999_vm6, %v3995_v20, %v3898_v0  ;;  %v6270_v51 = vsel %vm3999_vm6, %v3992_v46, %v3895_v24  ;;  %v3901_v44 = vperm.slane %v3837_v61, 0  ;;  %v3401_v56 = vmul.f32 %v6239_v38, %v6221_v60 }
0x45f4   :  { %v6274_v18 = vsel %vm3999_vm6, %v3996_v1, %v3899_v2  ;;  %v6277_v37 = vsel %vm3999_vm6, %v3993_v45, %v3896_v6  ;;  %v6280_v52 = vsel %vm3999_vm6, %v3997_v41, %v3900_v54  ;;  %v6283_v49 = vsel %vm3999_vm6, %v3994_v15, %v3897_v48 }
0x45f5   :  { %v6286_v16 = vsel %vm3999_vm6, %v3998_v12, %v3901_v44  ;;  %v3475_v15 = vsub.f32 1.0, %v4317_v36  ;;  %v3400_v55 = vmul.f32 %v6245_v17, %v6224_v8  ;;  %vm3632_vm6 = vcmp.gt.s32.totalorder %v6072_v26, 5 }
0x45f7   :  { %4372 = vset.pattern.permute.xlu2 %v4749_v50  ;;  %v6318_v13 = vadd.f32 %v3401_v56, %v3400_v55 }
0x4649   :  { %v2968_v58 = vpop.permute.xlu2 %2967 }
0x464a   :  { %vm2994_vm13 = vcmp.eq.s32.totalorder %v4975_v29, %v2968_v58 }
0x464b   :  { %4293 = vmatmul.msk.f32.gmra.mxu3 %vm2994_vm13, %v4747_v31  ;;  %vm3715_vm13 = vcmp.gt.s32.totalorder %v6072_v26, 6 }
0x4663   :  { %v3405_v25 = vpop.permute.xlu1 %3404 }
0x4664   :  { %4315 = vmatmul.msk.f32.vlgmr.msra.gmra.mxu1 %vm236_vm1, %v3405_v25 }
0x4665   :  { %3752 = vmatpush.msra.mxu1 %v6097_v30 }
0x4667   :  { %3753 = vmatpush.msra.mxu1 %v6102_v34 }
0x4669   :  { %3754 = vmatpush.msra.mxu1 %v6109_v32 }
0x466b   :  { %3755 = vmatpush.msra.mxu1 %v6119_v22  ;;  %v2969_v22 = vperm.slane %v6038_v9, 5 }
0x46e1   :  { %v3425_v19 = vpop.f32.mrf.mxu1 }
0x46e2   :  { %v3428_v27 = vadd.f32 %v3425_v19, %v3122_v39 }
0x46e4   :  { %4661 = vtanh.f32 %v3428_v27  ;;  %v4316_v30 = vmul.f32 -1.442695, %v3428_v27 }
0x46e6   :  { %4663 = vpow2.f32 %v4316_v30 }
0x46ea   :  { %v4662_v57 = vpop.eup %4661 }
0x46eb   :  { %3451 = vrot.lane.b32.xlu0 %v4662_v57, %s4748_s27 }
0x46ec   :  { %v4664_v34 = vpop.eup %4663 }
0x46ed   :  { %v3432_v32 = vadd.f32 1.0, %v4664_v34 }
0x46ef   :  { %4665 = vrcp.f32 %v3432_v32  ;;  %v3444_v23 = vand.u32 2147483648, %v3432_v32  ;;  %vm3438_vm10 = vweird.f32 %v3432_v32  ;;  %v3442_v21 = vand.u32 2147483647, %v3432_v32 }
0x46f1   :  { %v3445_v1 = vor.u32 1.1754944e-38, %v3444_v23  ;;  %vm3443_vm12 = vcmp.eq.f32.partialorder %v3442_v21, 8.507059e+37 }
0x46f3   :  { %3471 = vperm.xlu0 %4366, %v4317_v36  }
0x46f5   :  { %v4666_v43 = vpop.eup %4665 }
0x46f6   :  { %v3434_v53 = vmul.f32 %v4666_v43, %v3432_v32  ;;  %vm3439_vm9 = vweird.f32 %v4666_v43 }
0x46f7   :  { %vm3440_vm11 = vmor %vm3438_vm10, %vm3439_vm9 }
0x46f8   :  { %v3435_v42 = vsub.f32 1.0, %v3434_v53 }
0x46fa   :  { %v3436_v20 = vmul.f32 %v4666_v43, %v3435_v42  ;;  %v3043_v42 = vpop.f32.mrf.mxu3 }
0x46fb   :  { %4371 = vset.pattern.permute.xlu0 %v4877_v3 }
0x46fc   :  { %v3437_v46 = vadd.f32 %v4666_v43, %v3436_v20 }
0x46fe   :  { %v3441_v47 = vsel %vm3440_vm11, %v4666_v43, %v3437_v46 }
0x46ff   :  { %v3446_v45 = vsel %vm3443_vm12, %v3445_v1, %v3441_v47  ;;  %vm4026_vm12 = vcmask 1044480  }
0x4700   :  { %v3449_v62 = vmul.f32 %v3446_v45, %v6318_v13 }
0x4703   :  { %2974 = vperm.xlu0 %4371, %v2969_v22  }
0x470b   :  { %4373 = vset.pattern.permute.xlu0 %v4749_v50 }
0x470c   :  { %3561 = vperm.xlu0 %4373, %v3558_v5  }
0x475d   :  { %v3452_v59 = vpop.permute.xlu0 %3451 }
0x475e   :  { %v3454_v41 = vmul.f32 %v3452_v59, %v3446_v45 }
0x4760   :  { %3456 = vrot.lane.b32.xlu1 %v3454_v41, %s4750_s24 }
0x4765   :  { %v6308_v7 = vpop.permute.xlu0 %3471 }
0x4768   :  { %3478 = vperm.xlu1 %4370, %v3475_v15  }
0x4775   :  { %v2975_v10 = vpop.permute.xlu0 %2974 }
0x4776   :  { %vm2995_vm14 = vcmp.eq.s32.totalorder %v4975_v29, %v2975_v10 }
0x4777   :  { %4294 = vmatmul.msk.f32.gmra.mxu3 %vm2995_vm14, %v4747_v31 }
0x47d2   :  { %v3457_v0 = vpop.permute.xlu1 %3456 }
0x47d3   :  { %v6321_v24 = vadd.f32 %v3457_v0, %v3449_v62 }
0x47d5   :  { %4667 = vtanh.f32 %v6321_v24 }
0x47da   :  { %v6325_v2 = vpop.permute.xlu1 %3478 }
0x47db   :  { %v4668_v61 = vpop.eup %4667  ;;  %v3481_v60 = vmul.f32 %v6325_v2, %v6259_v4 }
0x47dc   :  { %3462 = vrot.lane.b32.xlu2 %v4668_v61, %s4748_s27 }
0x4836   :  { %v3463_v6 = vpop.permute.xlu2 %3462 }
0x4837   :  { %v3465_v54 = vmul.f32 %v3463_v6, %v3446_v45  ;;  %v3484_v6 = vmul.f32 %v6325_v2, %v6318_v13 }
0x4839   :  { %v3474_v8 = vmul.f32 %v6308_v7, %v3465_v54  ;;  %v3483_v54 = vmul.f32 %v6308_v7, %v6321_v24 }
0x483b   :  { %v6330_v38 = vadd.f32 %v3481_v60, %v3474_v8  ;;  %v3910_v17 = vperm.slane %v3474_v8, 0  ;;  %v3842_v48 = vrot.slane %v3474_v8, 4  ;;  %v3839_v44 = vrot.slane %v3474_v8, 1 }
0x483c   :  { %v3843_v12 = vrot.slane %v3474_v8, 5  ;;  %v3840_v25 = vrot.slane %v3474_v8, 2  ;;  %v3844_v33 = vrot.slane %v3474_v8, 6  ;;  %v3841_v39 = vrot.slane %v3474_v8, 3 }
0x483d   :  { %3487 = vrot.lane.b32.xlu2 %v6330_v38, %s4750_s24  ;;  %v6336_v19 = vsel %vm4008_vm15, %v6264_v63, %v3910_v17  ;;  %v3914_v4 = vperm.slane %v3842_v48, 0  ;;  %v3911_v27 = vperm.slane %v3839_v44, 0  ;;  %v3845_v43 = vrot.slane %v3474_v8, 7 }
0x483e   :  { %v3915_v57 = vperm.slane %v3843_v12, 0  ;;  %v3912_v36 = vperm.slane %v3840_v25, 0  ;;  %v3916_v30 = vperm.slane %v3844_v33, 0  ;;  %v3913_v34 = vperm.slane %v3841_v39, 0  ;;  %v6385_v25 = vpop.permute.xlu0 %3561 }
0x483f   :  { %v6340_v32 = vsel %vm4008_vm15, %v6267_v35, %v3914_v4  ;;  %v6344_v22 = vsel %vm4008_vm15, %v6270_v51, %v3911_v27  ;;  %v3917_v5 = vperm.slane %v3845_v43, 0  ;;  %v6377_v60 = vadd.f32 %v3484_v6, %v3483_v54 }
0x4840   :  { %v6348_v14 = vsel %vm4008_vm15, %v6274_v18, %v3915_v57  ;;  %v6352_v63 = vsel %vm4008_vm15, %v6277_v37, %v3912_v36  ;;  %v6356_v53 = vsel %vm4008_vm15, %v6280_v52, %v3916_v30  ;;  %v6360_v35 = vsel %vm4008_vm15, %v6283_v49, %v3913_v34 }
0x4841   :  { %v6364_v51 = vsel %vm4008_vm15, %v6286_v16, %v3917_v5  ;;  %v3059_v18 = vmul.f32 5.656854, %v3043_v42  ;;  %v3564_v33 = vmul.f32 %v6385_v25, %v6330_v38 }
0x4843   :  { %4301 = vmatmul.msk.f32.gmra.mxu2 %vm236_vm1, %v3059_v18 }
0x4897   :  { %v3488_v20 = vpop.permute.xlu2 %3487 }
0x4898   :  { %4318 = vmatmul.msk.f32.vlgmr.msrb.gmra.mxu0 %vm236_vm1, %v3488_v20 }
0x48c6   :  { %v3124_v37 = vpop.f32.mrf.mxu2 }
0x48c7   :  { %v3125_v52 = vadd.f32 %v6146_v40, %v3124_v37 }
0x4915   :  { %v3508_v46 = vpop.f32.mrf.mxu0 }
0x4916   :  { %v3511_v23 = vadd.f32 %v3508_v46, %v3125_v52 }
0x4918   :  { %4669 = vtanh.f32 %v3511_v23  ;;  %v4319_v21 = vmul.f32 -1.442695, %v3511_v23 }
0x491a   :  { %4671 = vpow2.f32 %v4319_v21 }
0x491e   :  { %v4670_v49 = vpop.eup %4669 }
0x491f   :  { %3534 = vrot.lane.b32.xlu1 %v4670_v49, %s4748_s27 }
0x4920   :  { %v4672_v16 = vpop.eup %4671 }
0x4921   :  { %v3515_v47 = vadd.f32 1.0, %v4672_v16 }
0x4923   :  { %4673 = vrcp.f32 %v3515_v47  ;;  %v3527_v58 = vand.u32 2147483648, %v3515_v47  ;;  %vm3521_vm2 = vweird.f32 %v3515_v47  ;;  %v3525_v10 = vand.u32 2147483647, %v3515_v47 }
0x4925   :  { %v3528_v55 = vor.u32 1.1754944e-38, %v3527_v58  ;;  %vm3526_vm4 = vcmp.eq.f32.partialorder %v3525_v10, 8.507059e+37 }
0x4929   :  { %v4674_v1 = vpop.eup %4673 }
0x492a   :  { %v3517_v59 = vmul.f32 %v4674_v1, %v3515_v47  ;;  %vm3522_vm0 = vweird.f32 %v4674_v1 }
0x492b   :  { %vm3523_vm3 = vmor %vm3521_vm2, %vm3522_vm0 }
0x492c   :  { %v3518_v45 = vsub.f32 1.0, %v3517_v59 }
0x492e   :  { %v3519_v41 = vmul.f32 %v4674_v1, %v3518_v45 }
0x4930   :  { %v3520_v15 = vadd.f32 %v4674_v1, %v3519_v41 }
0x4932   :  { %v3524_v56 = vsel %vm3523_vm3, %v4674_v1, %v3520_v15 }
0x4933   :  { %v3529_v0 = vsel %vm3526_vm4, %v3528_v55, %v3524_v56  ;;  %vm4035_vm4 = vcmask 1045504  }
0x4934   :  { %v3532_v8 = vmul.f32 %v3529_v0, %v6377_v60 }
0x4991   :  { %v3535_v62 = vpop.permute.xlu1 %3534 }
0x4992   :  { %v3537_v61 = vmul.f32 %v3535_v62, %v3529_v0 }
0x4994   :  { %3539 = vrot.lane.b32.xlu2 %v3537_v61, %s4750_s24 }
0x499c   :  { %3554 = vperm.xlu2 %4372, %v6302_v11   ;;  %v3046_v11 = vpop.f32.mrf.mxu3 }
0x499d   :  { %v3060_v12 = vmul.f32 5.656854, %v3046_v11  ;;  %v3567_v11 = vmul.f32 %v6385_v25, %v6377_v60 }
0x499f   :  { %4302 = vmatmul.msk.f32.gmra.mxu2 %vm236_vm1, %v3060_v12 }
0x49a4   :  { %4374 = vset.pattern.permute.xlu2 %v4877_v3 }
0x49ee   :  { %v3540_v17 = vpop.permute.xlu2 %3539 }
0x49ef   :  { %v6380_v48 = vadd.f32 %v3540_v17, %v3532_v8 }
0x49f1   :  { %4675 = vtanh.f32 %v6380_v48 }
0x49f6   :  { %v6387_v7 = vpop.permute.xlu2 %3554 }
0x49f7   :  { %v4676_v44 = vpop.eup %4675 }
0x49f8   :  { %3545 = vrot.lane.b32.xlu1 %v4676_v44, %s4748_s27  ;;  %v3566_v44 = vmul.f32 %v6387_v7, %v6380_v48 }
0x49fa   :  { %v6443_v12 = vadd.f32 %v3567_v11, %v3566_v44 }
0x4a6a   :  { %v3546_v13 = vpop.permute.xlu1 %3545 }
0x4a6b   :  { %v3548_v2 = vmul.f32 %v3546_v13, %v3529_v0 }
0x4a6d   :  { %v3557_v24 = vmul.f32 %v6387_v7, %v3548_v2 }
0x4a6f   :  { %v6392_v39 = vadd.f32 %v3564_v33, %v3557_v24  ;;  %v3926_v4 = vperm.slane %v3557_v24, 0  ;;  %v3850_v27 = vrot.slane %v3557_v24, 4  ;;  %v3847_v57 = vrot.slane %v3557_v24, 1 }
0x4a70   :  { %v3851_v36 = vrot.slane %v3557_v24, 5  ;;  %v3848_v30 = vrot.slane %v3557_v24, 2  ;;  %v3852_v34 = vrot.slane %v3557_v24, 6  ;;  %v3849_v43 = vrot.slane %v3557_v24, 3 }
0x4a71   :  { %3570 = vrot.lane.b32.xlu1 %v6392_v39, %s4750_s24  ;;  %v6398_v5 = vsel %vm4017_vm5, %v6336_v19, %v3926_v4  ;;  %v3930_v42 = vperm.slane %v3850_v27, 0  ;;  %v3927_v18 = vperm.slane %v3847_v57, 0  ;;  %v3853_v38 = vrot.slane %v3557_v24, 7 }
0x4a72   :  { %v3931_v20 = vperm.slane %v3851_v36, 0  ;;  %v3928_v37 = vperm.slane %v3848_v30, 0  ;;  %v3932_v52 = vperm.slane %v3852_v34, 0  ;;  %v3929_v46 = vperm.slane %v3849_v43, 0 }
0x4a73   :  { %v6402_v23 = vsel %vm4017_vm5, %v6340_v32, %v3930_v42  ;;  %v6406_v49 = vsel %vm4017_vm5, %v6344_v22, %v3927_v18  ;;  %v3933_v21 = vperm.slane %v3853_v38, 0 }
0x4a74   :  { %v6410_v19 = vsel %vm4017_vm5, %v6348_v14, %v3931_v20  ;;  %v6414_v16 = vsel %vm4017_vm5, %v6352_v63, %v3928_v37  ;;  %v6418_v47 = vsel %vm4017_vm5, %v6356_v53, %v3932_v52  ;;  %v6422_v32 = vsel %vm4017_vm5, %v6360_v35, %v3929_v46  ;;  %v3127_v63 = vpop.f32.mrf.mxu2 }
0x4a75   :  { %v6426_v22 = vsel %vm4017_vm5, %v6364_v51, %v3933_v21  ;;  %v2976_v14 = vperm.slane %v6038_v9, 6  ;;  %v3128_v53 = vadd.f32 %v6146_v40, %v3127_v63  ;;  %v4323_v51 = vsel %vm3632_vm6, 1.0, %v4746_v28 }
0x4a76   :  { %v3641_v17 = vsub.f32 1.0, %v4323_v51  ;;  %vm3798_vm5 = vcmp.gt.s32.totalorder %v6072_v26, 7 }
0x4a77   :  { %2981 = vperm.xlu2 %4374, %v2976_v14  }
0x4a7f   :  { %4375 = vset.pattern.permute.xlu2 %v4749_v50 }
0x4ad1   :  { %v2982_v40 = vpop.permute.xlu2 %2981 }
0x4ad2   :  { %vm2996_vm7 = vcmp.eq.s32.totalorder %v4975_v29, %v2982_v40 }
0x4ad3   :  { %4295 = vmatmul.msk.f32.gmra.mxu3 %vm2996_vm7, %v4747_v31 }
0x4ae3   :  { %v3571_v1 = vpop.permute.xlu1 %3570 }
0x4ae4   :  { %4321 = vmatmul.msk.f32.vlgmr.msrb.gmra.mxu1 %vm236_vm1, %v3571_v1 }
0x4b56   :  { %v3049_v4 = vpop.f32.mrf.mxu3 }
0x4b57   :  { %v3061_v27 = vmul.f32 5.656854, %v3049_v4 }
0x4b59   :  { %4303 = vmatmul.msk.f32.gmra.mxu2 %vm236_vm1, %v3061_v27 }
0x4b61   :  { %v3591_v59 = vpop.f32.mrf.mxu1 }
0x4b62   :  { %v3594_v45 = vadd.f32 %v3591_v59, %v3128_v53 }
0x4b64   :  { %4677 = vtanh.f32 %v3594_v45  ;;  %v4322_v9 = vmul.f32 -1.442695, %v3594_v45 }
0x4b66   :  { %4679 = vpow2.f32 %v4322_v9 }
0x4b6a   :  { %v4678_v35 = vpop.eup %4677 }
0x4b6b   :  { %3617 = vrot.lane.b32.xlu1 %v4678_v35, %s4748_s27 }
0x4b6c   :  { %v4680_v41 = vpop.eup %4679 }
0x4b6d   :  { %v3598_v15 = vadd.f32 1.0, %v4680_v41 }
0x4b6f   :  { %4681 = vrcp.f32 %v3598_v15  ;;  %v3610_v62 = vand.u32 2147483648, %v3598_v15  ;;  %vm3604_vm9 = vweird.f32 %v3598_v15  ;;  %v3608_v0 = vand.u32 2147483647, %v3598_v15 }
0x4b71   :  { %v3611_v61 = vor.u32 1.1754944e-38, %v3610_v62  ;;  %vm3609_vm11 = vcmp.eq.f32.partialorder %v3608_v0, 8.507059e+37 }
0x4b73   :  { %3637 = vperm.xlu1 %4370, %v4323_v51  }
0x4b75   :  { %v4682_v50 = vpop.eup %4681 }
0x4b76   :  { %v3600_v58 = vmul.f32 %v4682_v50, %v3598_v15  ;;  %vm3605_vm8 = vweird.f32 %v4682_v50 }
0x4b77   :  { %vm3606_vm10 = vmor %vm3604_vm9, %vm3605_vm8 }
0x4b78   :  { %v3601_v10 = vsub.f32 1.0, %v3600_v58 }
0x4b7a   :  { %v3602_v56 = vmul.f32 %v4682_v50, %v3601_v10 }
0x4b7b   :  { %4376 = vset.pattern.permute.xlu1 %v4877_v3 }
0x4b7c   :  { %v3603_v55 = vadd.f32 %v4682_v50, %v3602_v56 }
0x4b7e   :  { %v3607_v3 = vsel %vm3606_vm10, %v4682_v50, %v3603_v55  ;;  %v4719_v55 = vld [vmem:[%s6659_s28] sm:$0xff]  ;;  %vm4044_vm10 = vcmask 1046528  }
0x4b7f   :  { %v3612_v54 = vsel %vm3609_vm11, %v3611_v61, %v3607_v3  ;;  %v2983_v62 = vperm.slane %v4719_v55, 7 }
0x4b80   :  { %v3615_v13 = vmul.f32 %v3612_v54, %v6443_v12 }
0x4b83   :  { %2988 = vperm.xlu1 %4376, %v2983_v62  }
0x4bdd   :  { %v3618_v6 = vpop.permute.xlu1 %3617 }
0x4bde   :  { %v3620_v8 = vmul.f32 %v3618_v6, %v3612_v54 }
0x4be0   :  { %3622 = vrot.lane.b32.xlu2 %v3620_v8, %s4750_s24 }
0x4be5   :  { %v6453_v25 = vpop.permute.xlu1 %3637 }
0x4be8   :  { %3644 = vperm.xlu2 %4375, %v3641_v17  }
0x4bf5   :  { %v2989_v4 = vpop.permute.xlu1 %2988 }
0x4bf6   :  { %vm2997_vm3 = vcmp.eq.s32.totalorder %v4975_v29, %v2989_v4 }
0x4bf7   :  { %4296 = vmatmul.msk.f32.gmra.mxu3 %vm2997_vm3, %v4747_v31 }
0x4c3a   :  { %v3623_v2 = vpop.permute.xlu2 %3622 }
0x4c3b   :  { %v6446_v24 = vadd.f32 %v3623_v2, %v3615_v13 }
0x4c3d   :  { %4683 = vtanh.f32 %v6446_v24 }
0x4c42   :  { %v6451_v48 = vpop.permute.xlu2 %3644 }
0x4c43   :  { %v4684_v33 = vpop.eup %4683  ;;  %v3647_v57 = vmul.f32 %v6451_v48, %v6392_v39  ;;  %v3650_v27 = vmul.f32 %v6451_v48, %v6443_v12 }
0x4c44   :  { %3628 = vrot.lane.b32.xlu0 %v4684_v33, %s4748_s27 }
0x4c7a   :  { %v3052_v29 = vpop.f32.mrf.mxu3 }
0x4c7b   :  { %v3062_v31 = vmul.f32 5.656854, %v3052_v29 }
0x4c7d   :  { %4304 = vmatmul.msk.f32.gmra.mxu2 %vm236_vm1, %v3062_v31 }
0x4cb6   :  { %v3629_v7 = vpop.permute.xlu0 %3628 }
0x4cb7   :  { %v3631_v60 = vmul.f32 %v3629_v7, %v3612_v54  ;;  %v3649_v7 = vmul.f32 %v6453_v25, %v6446_v24 }
0x4cb9   :  { %v3640_v36 = vmul.f32 %v6453_v25, %v3631_v60  ;;  %v6514_v60 = vadd.f32 %v3650_v27, %v3649_v7 }
0x4cbb   :  { %v6458_v30 = vadd.f32 %v3647_v57, %v3640_v36  ;;  %v3942_v34 = vperm.slane %v3640_v36, 0  ;;  %v3858_v43 = vrot.slane %v3640_v36, 4  ;;  %v3855_v42 = vrot.slane %v3640_v36, 1 }
0x4cbc   :  { %v3859_v18 = vrot.slane %v3640_v36, 5  ;;  %v3856_v38 = vrot.slane %v3640_v36, 2  ;;  %v3860_v20 = vrot.slane %v3640_v36, 6  ;;  %v3857_v37 = vrot.slane %v3640_v36, 3 }
0x4cbd   :  { %3653 = vrot.lane.b32.xlu0 %v6458_v30, %s4750_s24  ;;  %v6464_v52 = vsel %vm4026_vm12, %v6398_v5, %v3942_v34  ;;  %v3946_v39 = vperm.slane %v3858_v43, 0  ;;  %v3943_v46 = vperm.slane %v3855_v42, 0  ;;  %v3861_v21 = vrot.slane %v3640_v36, 7 }
0x4cbe   :  { %v3947_v1 = vperm.slane %v3859_v18, 0  ;;  %v3944_v14 = vperm.slane %v3856_v38, 0  ;;  %v3948_v63 = vperm.slane %v3860_v20, 0  ;;  %v3945_v53 = vperm.slane %v3857_v37, 0 }
0x4cbf   :  { %v6468_v59 = vsel %vm4026_vm12, %v6402_v23, %v3946_v39  ;;  %v6472_v45 = vsel %vm4026_vm12, %v6406_v49, %v3943_v46  ;;  %v3949_v35 = vperm.slane %v3861_v21, 0 }
0x4cc0   :  { %v6476_v5 = vsel %vm4026_vm12, %v6410_v19, %v3947_v1  ;;  %v6480_v51 = vsel %vm4026_vm12, %v6414_v16, %v3944_v14  ;;  %v6484_v9 = vsel %vm4026_vm12, %v6418_v47, %v3948_v63  ;;  %v6488_v23 = vsel %vm4026_vm12, %v6422_v32, %v3945_v53  ;;  %v3130_v19 = vpop.f32.mrf.mxu2  ;;  %v6498_v16 = vld [vmem:[%s6640_s20] ss:$0 sm:$0xff] }
0x4cc1   :  { %v6492_v49 = vsel %vm4026_vm12, %v6426_v22, %v3949_v35  ;;  %v3131_v47 = vadd.f32 %v6498_v16, %v3130_v19  ;;  %v4326_v22 = vsel %vm3715_vm13, 1.0, %v4746_v28 }
0x4cc2   :  { %v3724_v33 = vsub.f32 1.0, %v4326_v22 }
0x4d2f   :  { %v3654_v41 = vpop.permute.xlu0 %3653 }
0x4d30   :  { %4324 = vmatmul.msk.f32.vlgmr.msra.gmra.mxu0 %vm236_vm1, %v3654_v41 }
0x4dad   :  { %v3674_v15 = vpop.f32.mrf.mxu0 }
0x4dae   :  { %v3677_v50 = vadd.f32 %v3674_v15, %v3131_v47 }
0x4db0   :  { %4685 = vtanh.f32 %v3677_v50  ;;  %v4325_v40 = vmul.f32 -1.442695, %v3677_v50 }
0x4db2   :  { %4687 = vpow2.f32 %v4325_v40 }
0x4db6   :  { %v4686_v32 = vpop.eup %4685 }
0x4db7   :  { %3700 = vrot.lane.b32.xlu2 %v4686_v32, %s4748_s27 }
0x4db8   :  { %v4688_v58 = vpop.eup %4687 }
0x4db9   :  { %v3681_v10 = vadd.f32 1.0, %v4688_v58 }
0x4dbb   :  { %4689 = vrcp.f32 %v3681_v10  ;;  %v3693_v54 = vand.u32 2147483648, %v3681_v10  ;;  %vm3687_vm15 = vweird.f32 %v3681_v10  ;;  %v3691_v8 = vand.u32 2147483647, %v3681_v10 }
0x4dbd   :  { %v3694_v44 = vor.u32 1.1754944e-38, %v3693_v54  ;;  %vm3692_vm2 = vcmp.eq.f32.partialorder %v3691_v8, 8.507059e+37 }
0x4dbf   :  { %3720 = vperm.xlu2 %4375, %v4326_v22  }
0x4dc1   :  { %v4690_v56 = vpop.eup %4689 }
0x4dc2   :  { %v3683_v0 = vmul.f32 %v4690_v56, %v3681_v10  ;;  %vm3688_vm14 = vweird.f32 %v4690_v56 }
0x4dc3   :  { %vm3689_vm0 = vmor %vm3687_vm15, %vm3688_vm14 }
0x4dc4   :  { %v3684_v3 = vsub.f32 1.0, %v3683_v0 }
0x4dc6   :  { %v3685_v61 = vmul.f32 %v4690_v56, %v3684_v3 }
0x4dc8   :  { %v3686_v6 = vadd.f32 %v4690_v56, %v3685_v61 }
0x4dca   :  { %v3690_v17 = vsel %vm3689_vm0, %v4690_v56, %v3686_v6 }
0x4dcb   :  { %v3695_v13 = vsel %vm3692_vm2, %v3694_v44, %v3690_v17 }
0x4dcc   :  { %v3698_v57 = vmul.f32 %v3695_v13, %v6514_v60 }
0x4e11   :  { %v3701_v11 = vpop.permute.xlu2 %3700 }
0x4e12   :  { %v3703_v2 = vmul.f32 %v3701_v11, %v3695_v13 }
0x4e14   :  { %3705 = vrot.lane.b32.xlu0 %v3703_v2, %s4750_s24 }
0x4e19   :  { %v6524_v25 = vpop.permute.xlu2 %3720 }
0x4e1c   :  { %3727 = vperm.xlu0 %4373, %v3724_v33  }
0x4e86   :  { %v3706_v36 = vpop.permute.xlu0 %3705 }
0x4e87   :  { %v6517_v34 = vadd.f32 %v3706_v36, %v3698_v57 }
0x4e89   :  { %4691 = vtanh.f32 %v6517_v34  ;;  %v3732_v33 = vmul.f32 %v6524_v25, %v6517_v34 }
0x4e8e   :  { %v6522_v12 = vpop.permute.xlu0 %3727 }
0x4e8f   :  { %v4692_v43 = vpop.eup %4691  ;;  %v3730_v42 = vmul.f32 %v6522_v12, %v6458_v30  ;;  %v3733_v2 = vmul.f32 %v6522_v12, %v6514_v60 }
0x4e90   :  { %3711 = vrot.lane.b32.xlu1 %v4692_v43, %s4748_s27 }
0x4e91   :  { %v3734_v4 = vadd.f32 %v3733_v2, %v3732_v33 }
0x4f02   :  { %v3712_v48 = vpop.permute.xlu1 %3711 }
0x4f03   :  { %v3714_v24 = vmul.f32 %v3712_v48, %v3695_v13 }
0x4f05   :  { %v3723_v18 = vmul.f32 %v6524_v25, %v3714_v24 }
0x4f07   :  { %v3731_v38 = vadd.f32 %v3730_v42, %v3723_v18  ;;  %v3958_v20 = vperm.slane %v3723_v18, 0  ;;  %v3866_v37 = vrot.slane %v3723_v18, 4  ;;  %v3863_v39 = vrot.slane %v3723_v18, 1 }
0x4f08   :  { %v3867_v46 = vrot.slane %v3723_v18, 5  ;;  %v3864_v21 = vrot.slane %v3723_v18, 2  ;;  %v3868_v1 = vrot.slane %v3723_v18, 6  ;;  %v3865_v14 = vrot.slane %v3723_v18, 3 }
0x4f09   :  { %3736 = vrot.lane.b32.xlu1 %v3731_v38, %s4750_s24  ;;  %v6532_v63 = vsel %vm4035_vm4, %v6464_v52, %v3958_v20  ;;  %v3962_v53 = vperm.slane %v3866_v37, 0  ;;  %v3959_v35 = vperm.slane %v3863_v39, 0  ;;  %v3869_v30 = vrot.slane %v3723_v18, 7 }
0x4f0a   :  { %v3963_v41 = vperm.slane %v3867_v46, 0  ;;  %v3960_v19 = vperm.slane %v3864_v21, 0  ;;  %v3964_v47 = vperm.slane %v3868_v1, 0  ;;  %v3961_v15 = vperm.slane %v3865_v14, 0 }
0x4f0b   :  { %v6536_v50 = vsel %vm4035_vm4, %v6468_v59, %v3962_v53  ;;  %v6540_v32 = vsel %vm4035_vm4, %v6472_v45, %v3959_v35  ;;  %v3965_v22 = vperm.slane %v3869_v30, 0 }
0x4f0c   :  { %v6544_v52 = vsel %vm4035_vm4, %v6476_v5, %v3963_v41  ;;  %v6548_v40 = vsel %vm4035_vm4, %v6480_v51, %v3960_v19  ;;  %v6552_v58 = vsel %vm4035_vm4, %v6484_v9, %v3964_v47  ;;  %v6556_v59 = vsel %vm4035_vm4, %v6488_v23, %v3961_v15  ;;  %v3133_v5 = vpop.f32.mrf.mxu2 }
0x4f0d   :  { %v6560_v45 = vsel %vm4035_vm4, %v6492_v49, %v3965_v22  ;;  %v3134_v56 = vadd.f32 %v6498_v16, %v3133_v5  ;;  %v4329_v9 = vsel %vm3798_vm5, 1.0, %v4746_v28  ;;  %v4054_v22 = vld [vmem:[%s6661_s6 + $0x8] sm:$0xff] }
0x4f7b   :  { %v3737_v10 = vpop.permute.xlu1 %3736 }
0x4f7c   :  { %4327 = vmatmul.msk.f32.vlgmr.msra.gmra.mxu1 %vm236_vm1, %v3737_v10 }
0x4ff9   :  { %v3757_v51 = vpop.f32.mrf.mxu1 }
0x4ffa   :  { %v3760_v55 = vadd.f32 %v3757_v51, %v3134_v56 }
0x4ffc   :  { %4693 = vtanh.f32 %v3760_v55  ;;  %v4328_v23 = vmul.f32 -1.442695, %v3760_v55 }
0x4ffe   :  { %4695 = vpow2.f32 %v4328_v23 }
0x5002   :  { %v4694_v62 = vpop.eup %4693 }
0x5003   :  { %3783 = vrot.lane.b32.xlu2 %v4694_v62, %s4748_s27 }
0x5004   :  { %v4696_v49 = vpop.eup %4695 }
0x5005   :  { %v3764_v0 = vadd.f32 1.0, %v4696_v49 }
0x5007   :  { %4697 = vrcp.f32 %v3764_v0  ;;  %v3776_v8 = vand.u32 2147483648, %v3764_v0  ;;  %vm3770_vm7 = vweird.f32 %v3764_v0  ;;  %v3774_v17 = vand.u32 2147483647, %v3764_v0 }
0x5009   :  { %v3777_v26 = vor.u32 1.1754944e-38, %v3776_v8  ;;  %vm3775_vm9 = vcmp.eq.f32.partialorder %v3774_v17, 8.507059e+37 }
0x500b   :  { %3803 = vperm.xlu2 %4375, %v4329_v9  }
0x500d   :  { %v4698_v3 = vpop.eup %4697 }
0x500e   :  { %v3766_v61 = vmul.f32 %v4698_v3, %v3764_v0  ;;  %vm3771_vm6 = vweird.f32 %v4698_v3 }
0x500f   :  { %vm3772_vm8 = vmor %vm3770_vm7, %vm3771_vm6 }
0x5010   :  { %v3767_v6 = vsub.f32 1.0, %v3766_v61 }
0x5012   :  { %v3768_v16 = vmul.f32 %v4698_v3, %v3767_v6 }
0x5014   :  { %v3769_v54 = vadd.f32 %v4698_v3, %v3768_v16 }
0x5016   :  { %v3773_v44 = vsel %vm3772_vm8, %v4698_v3, %v3769_v54 }
0x5017   :  { %v3778_v11 = vsel %vm3775_vm9, %v3777_v26, %v3773_v44 }
0x5018   :  { %v3781_v27 = vmul.f32 %v3778_v11, %v3734_v4 }
0x505d   :  { %v3784_v28 = vpop.permute.xlu2 %3783 }
0x505e   :  { %v3786_v13 = vmul.f32 %v3784_v28, %v3778_v11 }
0x5060   :  { %3788 = vrot.lane.b32.xlu0 %v3786_v13, %s4750_s24 }
0x5065   :  { %v3804_v31 = vpop.permute.xlu2 %3803 }
0x50d2   :  { %v3789_v7 = vpop.permute.xlu0 %3788 }
0x50d3   :  { %v3791_v57 = vadd.f32 %v3789_v7, %v3781_v27 }
0x50d5   :  { %4699 = vtanh.f32 %v3791_v57 }
0x50db   :  { %v4700_v36 = vpop.eup %4699 }
0x50dc   :  { %3794 = vrot.lane.b32.xlu1 %v4700_v36, %s4748_s27 }
0x514e   :  { %v3795_v43 = vpop.permute.xlu1 %3794 }
0x514f   :  { %v3797_v29 = vmul.f32 %v3795_v43, %v3778_v11 }
0x5151   :  { %v3806_v48 = vmul.f32 %v3804_v31, %v3797_v29 }
0x5153   :  { %v3974_v24 = vperm.slane %v3806_v48, 0  ;;  %v3874_v42 = vrot.slane %v3806_v48, 4  ;;  %v3871_v18 = vrot.slane %v3806_v48, 1  ;;  %v3875_v25 = vrot.slane %v3806_v48, 5 }
0x5154   :  { %v3872_v37 = vrot.slane %v3806_v48, 2  ;;  %v3876_v39 = vrot.slane %v3806_v48, 6  ;;  %v3877_v30 = vrot.slane %v3806_v48, 7 }
0x5155   :  { %v4045_v60 = vsel %vm4044_vm10, %v6532_v63, %v3974_v24  ;;  %v3978_v34 = vperm.slane %v3874_v42, 0  ;;  %v3975_v12 = vperm.slane %v3871_v18, 0  ;;  %v3979_v46 = vperm.slane %v3875_v25, 0 }
0x5156   :  { %4065 = vrot.lane.b32.xlu0 %v4045_v60, %s4750_s24  ;;  %v3976_v21 = vperm.slane %v3872_v37, 0  ;;  %v3980_v1 = vperm.slane %v3876_v39, 0  ;;  %v3873_v63 = vrot.slane %v3806_v48, 3  ;;  %v3981_v19 = vperm.slane %v3877_v30, 0 }
0x5157   :  { %v4049_v38 = vsel %vm4044_vm10, %v6536_v50, %v3978_v34  ;;  %v4046_v20 = vsel %vm4044_vm10, %v6540_v32, %v3975_v12  ;;  %v4050_v14 = vsel %vm4044_vm10, %v6544_v52, %v3979_v46  ;;  %v4056_v50 = vld [vmem:[%s6661_s6 + $0x18] sm:$0xff]  ;;  %v4055_v32 = vld [vmem:[%s6661_s6 + $0x10] sm:$0xff]  ;;  %v4053_v52 = vld [vmem:[%s6661_s6] sm:$0xff] }
0x5158   :  { %4073 = vrot.lane.b32.xlu1 %v4049_v38, %s4750_s24  ;;  %4067 = vrot.lane.b32.xlu2 %v4046_v20, %s4750_s24  ;;  %v4047_v53 = vsel %vm4044_vm10, %v6548_v40, %v3976_v21  ;;  %v4051_v35 = vsel %vm4044_vm10, %v6552_v58, %v3980_v1  ;;  %v3977_v41 = vperm.slane %v3873_v63, 0  ;;  %v4052_v15 = vsel %vm4044_vm10, %v6560_v45, %v3981_v19 }
0x5159   :  { %4109 = vmatpush.msrb.mxu0 %v4056_v50  ;;  %4338 = vmatpush.msrb.mxu1 %v4056_v50 }
0x515a   :  { %v4048_v47 = vsel %vm4044_vm10, %v6556_v59, %v3977_v41 }
0x515b   :  { %4110 = vmatpush.msrb.mxu0 %v4055_v32  ;;  %4339 = vmatpush.msrb.mxu1 %v4055_v32 }
0x515d   :  { %4111 = vmatpush.msrb.mxu0 %v4054_v22  ;;  %4340 = vmatpush.msrb.mxu1 %v4054_v22 }
0x515e   :  { %4075 = vrot.lane.b32.xlu0 %v4050_v14, %s4750_s24 }
0x515f   :  { %4112 = vmatpush.msrb.mxu0 %v4053_v52  ;;  %4341 = vmatpush.msrb.mxu1 %v4053_v52 }
0x5160   :  { %4069 = vrot.lane.b32.xlu1 %v4047_v53, %s4750_s24  ;;  %4077 = vrot.lane.b32.xlu2 %v4051_v35, %s4750_s24 }
0x5166   :  { %4071 = vrot.lane.b32.xlu0 %v4048_v47, %s4750_s24 }
0x5168   :  { %4079 = vrot.lane.b32.xlu1 %v4052_v15, %s4750_s24  ;;  %s4752_s24 = smov [#allocation2]  }
0x5169   :  { %s4150_s29 = sshll.u32 %s4752_s24, 4  ;;  %s4151_s29 = int_to_ptr.vmem [resolvable:$true] %s4150_s29 }
0x51b2   :  { %v4068_v59 = vpop.permute.xlu2 %4067 }
0x51ba   :  { %v4078_v5 = vpop.permute.xlu2 %4077 }
0x51c8   :  { %v4066_v40 = vpop.permute.xlu0 %4065 }
0x51c9   :  { %4330 = vmatmul.msk.f32.vlgmr.msrb.gmra.mxu0 %vm236_vm1, %v4066_v40 }
0x51ca   :  { %v4074_v58 = vpop.permute.xlu1 %4073 }
0x51cb   :  { %4334 = vmatmul.msk.f32.vlgmr.msrb.gmra.mxu1 %vm236_vm1, %v4074_v58 }
0x51d0   :  { %v4076_v45 = vpop.permute.xlu0 %4075 }
0x51d1   :  { %4331 = vmatmul.msk.f32.gmra.mxu0 %vm236_vm1, %v4068_v59 }
0x51d2   :  { %v4070_v10 = vpop.permute.xlu1 %4069 }
0x51d3   :  { %4335 = vmatmul.msk.f32.gmra.mxu1 %vm236_vm1, %v4076_v45 }
0x51d8   :  { %v4072_v56 = vpop.permute.xlu0 %4071 }
0x51d9   :  { %4332 = vmatmul.msk.f32.gmra.mxu0 %vm236_vm1, %v4070_v10 }
0x51da   :  { %v4080_v51 = vpop.permute.xlu1 %4079 }
0x51db   :  { %4336 = vmatmul.msk.f32.gmra.mxu1 %vm236_vm1, %v4078_v5 }
0x51e1   :  { %4333 = vmatmul.msk.f32.gmra.mxu0 %vm236_vm1, %v4072_v56 }
0x51e3   :  { %4337 = vmatmul.msk.f32.gmra.mxu1 %vm236_vm1, %v4080_v51 }
0x5246   :  { %v4114_v55 = vpop.f32.mrf.mxu0 }
0x5247   :  { %4138 = vst [vmem:[#allocation2] sm:$0xff] %v4114_v55 }
0x5248   :  { %v4126_v62 = vpop.f32.mrf.mxu1 }
0x5249   :  { %4142 = vst [vmem:[#allocation2 + $0x20] sm:$0xff] %v4126_v62 }
0x524e   :  { %v4117_v9 = vpop.f32.mrf.mxu0 }
0x524f   :  { %4139 = vst [vmem:[#allocation2 + $0x8] sm:$0xff] %v4117_v9 }
0x5250   :  { %v4129_v23 = vpop.f32.mrf.mxu1 }
0x5251   :  { %4143 = vst [vmem:[#allocation2 + $0x28] sm:$0xff] %v4129_v23 }
0x5256   :  { %v4120_v49 = vpop.f32.mrf.mxu0 }
0x5257   :  { %4140 = vst [vmem:[#allocation2 + $0x10] sm:$0xff] %v4120_v49 }
0x5258   :  { %v4132_v0 = vpop.f32.mrf.mxu1 }
0x5259   :  { %4144 = vst [vmem:[#allocation2 + $0x30] sm:$0xff] %v4132_v0 }
0x525e   :  { %v4123_v3 = vpop.f32.mrf.mxu0 }
0x525f   :  { %4141 = vst [vmem:[#allocation2 + $0x18] sm:$0xff] %v4123_v3 }
0x5260   :  { %v4135_v61 = vpop.f32.mrf.mxu1 }
0x5261   :  { %4145 = vst [vmem:[#allocation2 + $0x38] sm:$0xff] %v4135_v61 }
0x5262   :  { %4158 = dma.vmem_to_hbm [thread:$0]  %s4151_s29, 1024, %s4153_s10, [#allocation3], %s4753_s30, %s4753_s30, %s4754_s11  }
0x5263   :  { %4744 = dma.done.wait [#allocation3], 1024  }
0x5264   :  { %4745 = vsyncadd [#allocation3], 4294966272 }
0x5265   :  { %4163 = vsyncpa [#allocation3], 1 }

</bundles_post_ra>
